<compile_context>
chip_gen: v7x
topology: tpu7x:2x2x1
jax: 0.10.0
libtpu: 0.0.40
codegen_flags: <defaults>
</compile_context>

<pallas_src>
import jax
import jax.numpy as jnp
from jax import lax
from jax.experimental import pallas as pl
from jax.experimental.pallas import tpu as pltpu


def _round_up(x, m):
    return (x + m - 1) // m * m


# ---------------------------------------------------------------------------
# Fused DenseBlock kernel: one batch element per grid step, all layers inside.
# ---------------------------------------------------------------------------
def _dense_block_kernel(x_ref, scale_ref, shift_ref, w_ref, out_ref, feat_ref):
    # x_ref:     (1, H, W, Cp)       input image, channels zero-padded to Cp (lane multiple)
    # scale_ref: (L, Cp) f32         folded BN scale per layer (zero beyond that layer's Cin)
    # shift_ref: (L, Cp) f32         folded BN shift per layer (zero beyond that layer's Cin)
    # w_ref:     (L, 9*Cp, Cp)       packed im2col conv weights; rows zero beyond the layer's
    #                                Cin, columns nonzero only in the layer's output slot
    # out_ref:   (1, H, W, Cp)       lane-dense feature slab (wrapper slices the channels)
    # feat_ref:  (H+2, W+2, Cp) f32  VMEM-resident concatenated raw features, zero halo
    L = w_ref.shape[0]
    H, W, Cp = out_ref.shape[1], out_ref.shape[2], out_ref.shape[3]

    # ---- init feature buffer for this batch element (zero halo + zero channel tail) ----
    feat_ref[...] = jnp.zeros_like(feat_ref)
    feat_ref[1:H + 1, 1:W + 1, :] = x_ref[0].astype(feat_ref.dtype)

    # Interior mask, hoisted out of the layer loop.  The conv must see ZERO padding of the
    # post-BN/ReLU activation (PyTorch Conv2d(padding=1) semantics) and ReLU(shift) at the
    # halo can be nonzero, so the halo is re-zeroed each layer (a few vregs of VPU selects,
    # cheaper than sublane-offset interior writes).
    rows = lax.broadcasted_iota(jnp.int32, (H + 2, W + 2, Cp), 0)
    cols = lax.broadcasted_iota(jnp.int32, (H + 2, W + 2, Cp), 1)
    interior = (rows >= 1) & (rows <= H) & (cols >= 1) & (cols <= W)

    for i in range(L):  # static, fully unrolled layer loop (all layers share shapes)
        # BN(eval) + ReLU in f32; unwritten/padded channels have scale=shift=0 -> act = 0.
        act = jnp.maximum(feat_ref[...] * scale_ref[i] + shift_ref[i], 0.0)
        act = jnp.where(interior, act, 0.0).astype(w_ref.dtype)

        # im2col: one lane-aligned (H*W, 9*Cp) patch matrix, a single MXU matmul (K = 9*Cp).
        taps = [act[dy:dy + H, dx:dx + W, :] for dy in range(3) for dx in range(3)]
        patch = jnp.concatenate(taps, axis=-1).reshape(H * W, 9 * Cp)
        y = jnp.dot(patch, w_ref[i], preferred_element_type=jnp.float32)

        # Weight columns outside this layer's output slot are exactly zero, so a plain
        # full-lane-width accumulate places the layer output at its channel offset
        # (the dense "concat") without any masked / lane-offset stores.
        feat_ref[1:H + 1, 1:W + 1, :] = (feat_ref[1:H + 1, 1:W + 1, :]
                                         + y.reshape(H, W, Cp))

    # Lane-dense output store of the whole feature slab; wrapper slices the channel range.
    out_ref[...] = feat_ref[1:H + 1, 1:W + 1, :].reshape(1, H, W, Cp).astype(out_ref.dtype)


# ---------------------------------------------------------------------------
# Wrapper: parameter packing (lane padding + offset placement) + pallas_call.
# ---------------------------------------------------------------------------
def dense_block_pallas(x_nchw, params, concat_input=False, matmul_dtype=jnp.bfloat16):
    N, Cin, H, W = x_nchw.shape
    L = len(params)
    G = params[0]["w"].shape[-1]
    C_total = Cin + L * G
    Cp = _round_up(C_total, 128)            # lane-pad the whole dense feature space

    # Pack per-layer BN params and conv weights into lane-padded, offset-placed slabs.
    scale_p = jnp.zeros((L, Cp), jnp.float32)
    shift_p = jnp.zeros((L, Cp), jnp.float32)
    w_p = jnp.zeros((L, 9 * Cp, Cp), jnp.float32)
    for i, p in enumerate(params):
        cin_i = Cin + i * G                 # layer-i input channels
        off = cin_i                         # layer-i output slot starts where its input ends
        scale_p = scale_p.at[i, :cin_i].set(p["scale"].astype(jnp.float32))
        shift_p = shift_p.at[i, :cin_i].set(p["shift"].astype(jnp.float32))
        w = p["w"].astype(jnp.float32)      # (3, 3, cin_i, G) HWIO
        for dy in range(3):
            for dx in range(3):
                tap = dy * 3 + dx
                w_p = w_p.at[i, tap * Cp:tap * Cp + cin_i, off:off + G].set(w[dy, dx])
    w_p = w_p.astype(matmul_dtype)

    # NCHW (PyTorch) -> NHWC; zero-pad channels to the lane-padded width (done once on the
    # small input, not on the growing feature map).
    x_nhwc = jnp.transpose(x_nchw, (0, 2, 3, 1))
    x_pad = jnp.pad(x_nhwc, ((0, 0), (0, 0), (0, 0), (0, Cp - Cin)))

    flops = 2 * N * H * W * sum(9 * (Cin + i * G) * G for i in range(L))
    bytes_accessed = (x_pad.size * x_pad.dtype.itemsize
                      + w_p.size * w_p.dtype.itemsize
                      + (scale_p.size + shift_p.size) * 4
                      + N * H * W * Cp * x_nchw.dtype.itemsize)

    out_full = pl.pallas_call(
        _dense_block_kernel,
        out_shape=jax.ShapeDtypeStruct((N, H, W, Cp), x_nchw.dtype),
        grid=(N,),
        in_specs=[
            pl.BlockSpec((1, H, W, Cp), lambda n: (n, 0, 0, 0)),
            pl.BlockSpec((L, Cp), lambda n: (0, 0)),
            pl.BlockSpec((L, Cp), lambda n: (0, 0)),
            pl.BlockSpec((L, 9 * Cp, Cp), lambda n: (0, 0, 0)),
        ],
        out_specs=pl.BlockSpec((1, H, W, Cp), lambda n: (n, 0, 0, 0)),
        scratch_shapes=[pltpu.VMEM((H + 2, W + 2, Cp), jnp.float32)],
        compiler_params=pltpu.CompilerParams(dimension_semantics=("parallel",)),
        cost_estimate=pl.CostEstimate(flops=flops, transcendentals=0,
                                      bytes_accessed=bytes_accessed),
    )(x_pad, scale_p, shift_p, w_p)

    # Channel layout of the slab: [input (Cin), out_0 .. out_{L-1} (L*G), zero pad].
    c_lo = 0 if concat_input else Cin
    out = out_full[..., c_lo:C_total]
    return jnp.transpose(out, (0, 3, 1, 2))   # back to NCHW


# ---------------------------------------------------------------------------
# Pure-JAX reference (true f32 module semantics, for correctness checking only).
# ---------------------------------------------------------------------------
def dense_block_reference(x_nchw, params, concat_input=False):
    feat = jnp.transpose(x_nchw, (0, 2, 3, 1))
    outs = [feat] if concat_input else []
    for p in params:
        a = jnp.maximum(feat * p["scale"] + p["shift"], 0.0)
        y = lax.conv_general_dilated(
            a, p["w"], window_strides=(1, 1), padding="SAME",
            dimension_numbers=("NHWC", "HWIO", "NHWC"))
        outs.append(y)
        feat = jnp.concatenate([feat, y], axis=-1)
    return jnp.transpose(jnp.concatenate(outs, axis=-1), (0, 3, 1, 2))


# ---------------------------------------------------------------------------
# Deterministic parameter construction (synthetic, no checkpoint load).
# ---------------------------------------------------------------------------
def make_dense_block_params(key, in_channels, growth_rate, num_layers, eps=1e-5):
    params = []
    for i in range(num_layers):
        cin = in_channels + i * growth_rate
        k_g, k_b, k_w, key = jax.random.split(key, 4)
        gamma = jax.random.uniform(k_g, (cin,), jnp.float32, 0.5, 1.5)
        beta = 0.1 * jax.random.normal(k_b, (cin,), jnp.float32)
        running_mean = jnp.zeros((cin,), jnp.float32)
        running_var = jnp.ones((cin,), jnp.float32)
        w = 0.1 * jax.random.normal(k_w, (3, 3, cin, growth_rate), jnp.float32)  # HWIO
        scale = gamma / jnp.sqrt(running_var + eps)
        shift = beta - running_mean * scale
        params.append({"scale": scale, "shift": shift, "w": w})
    return params


if __name__ == "__main__":
    # DenseBlock(in_channels=4, growth_rate=4, num_layers=3, concat_input=False)
    N, Cin, H, W = 2, 4, 16, 16
    growth_rate, num_layers = 4, 3
    concat_input = False

    key = jax.random.PRNGKey(0)
    k_x, k_p = jax.random.split(key)
    x = jax.random.normal(k_x, (N, Cin, H, W), jnp.float32)       # NCHW input
    params = make_dense_block_params(k_p, Cin, growth_rate, num_layers)

    # Optimized path: bf16 matmul operands, f32 MXU accumulation.
    out = jax.block_until_ready(
        dense_block_pallas(x, params, concat_input=concat_input,
                           matmul_dtype=jnp.bfloat16))

    expected_channels = growth_rate * num_layers + (Cin if concat_input else 0)
    assert out.shape == (N, expected_channels, H, W), out.shape

    ref = jax.block_until_ready(dense_block_reference(x, params, concat_input))

    # Tight check of packing / im2col / concat placement with f32 matmul operands.
    out_f32 = jax.block_until_ready(
        dense_block_pallas(x, params, concat_input=concat_input,
                           matmul_dtype=jnp.float32))
    assert jnp.allclose(out_f32, ref, rtol=2e-3, atol=2e-3), \
        float(jnp.max(jnp.abs(out_f32 - ref)))

    # bf16-operand path: looser tolerance for operand rounding (accumulation stays f32).
    assert jnp.allclose(out, ref, rtol=5e-2, atol=5e-2), \
        float(jnp.max(jnp.abs(out - ref)))

    print("KERNEL_OK")
</pallas_src>

<mosaic_0001>
module attributes {stable_mosaic.version = 11 : i64} {
  func.func @_dense_block_kernel(%arg0: i32, %arg1: memref<1x16x16x128xf32, #tpu.memory_space<vmem>>, %arg2: memref<3x128xf32, #tpu.memory_space<vmem>>, %arg3: memref<3x128xf32, #tpu.memory_space<vmem>>, %arg4: memref<3x1152x128xbf16, #tpu.memory_space<vmem>>, %arg5: memref<1x16x16x128xf32, #tpu.memory_space<vmem>>, %arg6: memref<18x18x128xf32, #tpu.memory_space<vmem>>) attributes {dimension_semantics = [#tpu.dimension_semantics<parallel>], iteration_bounds = array<i64: 2>, scalar_prefetch = 0 : i64, scratch_operands = 1 : i64, tpu.core_type = #tpu.core_type<tc>, window_params = [{transform_indices = @transform_0, window_bounds = array<i64: 1, 16, 16, 128>}, {pipeline_mode = #tpu.pipeline_mode<synchronous>, transform_indices = @transform_1, window_bounds = array<i64: 3, 128>}, {pipeline_mode = #tpu.pipeline_mode<synchronous>, transform_indices = @transform_2, window_bounds = array<i64: 3, 128>}, {pipeline_mode = #tpu.pipeline_mode<synchronous>, transform_indices = @transform_3, window_bounds = array<i64: 3, 1152, 128>}, {transform_indices = @transform_4, window_bounds = array<i64: 1, 16, 16, 128>}]} {
    %cst = arith.constant 0.000000e+00 : f32
    %0 = vector.broadcast %cst : f32 to vector<18x18x128xf32>
    %c0 = arith.constant 0 : index
    %c0_0 = arith.constant 0 : index
    %c0_1 = arith.constant 0 : index
    %1 = vector.load %arg6[%c0, %c0_0, %c0_1] : memref<18x18x128xf32, #tpu.memory_space<vmem>>, vector<18x18x128xf32>
    tpu.vector_store %arg6[%c0, %c0_0, %c0_1], %0 {strides = array<i32>} : memref<18x18x128xf32, #tpu.memory_space<vmem>>, vector<18x18x128xf32>,
    %c0_2 = arith.constant 0 : index
    %c0_3 = arith.constant 0 : index
    %c0_4 = arith.constant 0 : index
    %c0_5 = arith.constant 0 : index
    %2 = vector.load %arg1[%c0_2, %c0_3, %c0_4, %c0_5] : memref<1x16x16x128xf32, #tpu.memory_space<vmem>>, vector<1x16x16x128xf32>
    %3 = vector.shape_cast %2 : vector<1x16x16x128xf32> to vector<16x16x128xf32>
    %c1 = arith.constant 1 : index
    %c1_6 = arith.constant 1 : index
    %c0_7 = arith.constant 0 : index
    %4 = vector.load %arg6[%c1, %c1_6, %c0_7] : memref<18x18x128xf32, #tpu.memory_space<vmem>>, vector<16x16x128xf32>
    tpu.vector_store %arg6[%c1, %c1_6, %c0_7], %3 {strides = array<i32>} : memref<18x18x128xf32, #tpu.memory_space<vmem>>, vector<16x16x128xf32>,
    %5 = tpu.iota {dimensions = array<i32: 0>} : vector<18x18x128xi32>
    %6 = tpu.iota {dimensions = array<i32: 1>} : vector<18x18x128xi32>
    %c1_i32 = arith.constant 1 : i32
    %7 = vector.broadcast %c1_i32 : i32 to vector<18x18x128xi32>
    %8 = arith.cmpi sge, %5, %7 : vector<18x18x128xi32>
    %c16_i32 = arith.constant 16 : i32
    %9 = vector.broadcast %c16_i32 : i32 to vector<18x18x128xi32>
    %10 = arith.cmpi sle, %5, %9 : vector<18x18x128xi32>
    %11 = arith.andi %8, %10 : vector<18x18x128xi1>
    %c1_i32_8 = arith.constant 1 : i32
    %12 = vector.broadcast %c1_i32_8 : i32 to vector<18x18x128xi32>
    %13 = arith.cmpi sge, %6, %12 : vector<18x18x128xi32>
    %14 = arith.andi %11, %13 : vector<18x18x128xi1>
    %c16_i32_9 = arith.constant 16 : i32
    %15 = vector.broadcast %c16_i32_9 : i32 to vector<18x18x128xi32>
    %16 = arith.cmpi sle, %6, %15 : vector<18x18x128xi32>
    %17 = arith.andi %14, %16 : vector<18x18x128xi1>
    %c0_10 = arith.constant 0 : index
    %c0_11 = arith.constant 0 : index
    %c0_12 = arith.constant 0 : index
    %18 = vector.load %arg6[%c0_10, %c0_11, %c0_12] : memref<18x18x128xf32, #tpu.memory_space<vmem>>, vector<18x18x128xf32>
    %c0_13 = arith.constant 0 : index
    %c0_14 = arith.constant 0 : index
    %19 = vector.load %arg2[%c0_13, %c0_14] : memref<3x128xf32, #tpu.memory_space<vmem>>, vector<1x128xf32>
    %20 = vector.shape_cast %19 : vector<1x128xf32> to vector<128xf32>
    %21 = vector.shape_cast %20 : vector<128xf32> to vector<1x1x128xf32>
    %22 = vector.broadcast %21 : vector<1x1x128xf32> to vector<18x18x128xf32>
    %23 = arith.mulf %18, %22 : vector<18x18x128xf32>
    %c0_15 = arith.constant 0 : index
    %c0_16 = arith.constant 0 : index
    %24 = vector.load %arg3[%c0_15, %c0_16] : memref<3x128xf32, #tpu.memory_space<vmem>>, vector<1x128xf32>
    %25 = vector.shape_cast %24 : vector<1x128xf32> to vector<128xf32>
    %26 = vector.shape_cast %25 : vector<128xf32> to vector<1x1x128xf32>
    %27 = vector.broadcast %26 : vector<1x1x128xf32> to vector<18x18x128xf32>
    %28 = arith.addf %23, %27 : vector<18x18x128xf32>
    %cst_17 = arith.constant 0.000000e+00 : f32
    %29 = vector.broadcast %cst_17 : f32 to vector<18x18x128xf32>
    %30 = arith.maximumf %28, %29 : vector<18x18x128xf32>
    %cst_18 = arith.constant 0.000000e+00 : f32
    %31 = vector.broadcast %cst_18 : f32 to vector<18x18x128xf32>
    %32 = arith.select %17, %30, %31 : vector<18x18x128xi1>, vector<18x18x128xf32>
    %33 = arith.truncf %32 : vector<18x18x128xf32> to vector<18x18x128xbf16>
    %34 = vector.extract_strided_slice %33 {offsets = [0, 0, 0], sizes = [16, 16, 128], strides = [1, 1, 1]} : vector<18x18x128xbf16> to vector<16x16x128xbf16>
    %35 = vector.extract_strided_slice %33 {offsets = [0, 1, 0], sizes = [16, 16, 128], strides = [1, 1, 1]} : vector<18x18x128xbf16> to vector<16x16x128xbf16>
    %36 = vector.extract_strided_slice %33 {offsets = [0, 2, 0], sizes = [16, 16, 128], strides = [1, 1, 1]} : vector<18x18x128xbf16> to vector<16x16x128xbf16>
    %37 = vector.extract_strided_slice %33 {offsets = [1, 0, 0], sizes = [16, 16, 128], strides = [1, 1, 1]} : vector<18x18x128xbf16> to vector<16x16x128xbf16>
    %38 = vector.extract_strided_slice %33 {offsets = [1, 1, 0], sizes = [16, 16, 128], strides = [1, 1, 1]} : vector<18x18x128xbf16> to vector<16x16x128xbf16>
    %39 = vector.extract_strided_slice %33 {offsets = [1, 2, 0], sizes = [16, 16, 128], strides = [1, 1, 1]} : vector<18x18x128xbf16> to vector<16x16x128xbf16>
    %40 = vector.extract_strided_slice %33 {offsets = [2, 0, 0], sizes = [16, 16, 128], strides = [1, 1, 1]} : vector<18x18x128xbf16> to vector<16x16x128xbf16>
    %41 = vector.extract_strided_slice %33 {offsets = [2, 1, 0], sizes = [16, 16, 128], strides = [1, 1, 1]} : vector<18x18x128xbf16> to vector<16x16x128xbf16>
    %42 = vector.extract_strided_slice %33 {offsets = [2, 2, 0], sizes = [16, 16, 128], strides = [1, 1, 1]} : vector<18x18x128xbf16> to vector<16x16x128xbf16>
    %43 = tpu.concatenate %34, %35, %36, %37, %38, %39, %40, %41, %42 in 2 : vector<16x16x128xbf16>, vector<16x16x128xbf16>, vector<16x16x128xbf16>, vector<16x16x128xbf16>, vector<16x16x128xbf16>, vector<16x16x128xbf16>, vector<16x16x128xbf16>, vector<16x16x128xbf16>, vector<16x16x128xbf16> -> vector<16x16x1152xbf16>
    %44 = vector.shape_cast %43 : vector<16x16x1152xbf16> to vector<256x1152xbf16>
    %c0_19 = arith.constant 0 : index
    %c0_20 = arith.constant 0 : index
    %c0_21 = arith.constant 0 : index
    %45 = vector.load %arg4[%c0_19, %c0_20, %c0_21] : memref<3x1152x128xbf16, #tpu.memory_space<vmem>>, vector<1x1152x128xbf16>
    %46 = vector.shape_cast %45 : vector<1x1152x128xbf16> to vector<1152x128xbf16>
    %cst_22 = arith.constant dense<0.000000e+00> : vector<256x128xf32>
    %47 = tpu.matmul %44, %46, %cst_22 {dimension_numbers = #tpu.dot_dimension_numbers<[1], [0], [0], [1], [0, 0, 1, 1], [], []>} : vector<256x1152xbf16>, vector<1152x128xbf16>, vector<256x128xf32> -> vector<256x128xf32>
    %c1_23 = arith.constant 1 : index
    %c1_24 = arith.constant 1 : index
    %c0_25 = arith.constant 0 : index
    %48 = vector.load %arg6[%c1_23, %c1_24, %c0_25] : memref<18x18x128xf32, #tpu.memory_space<vmem>>, vector<16x16x128xf32>
    %49 = vector.shape_cast %47 : vector<256x128xf32> to vector<16x16x128xf32>
    %50 = arith.addf %48, %49 : vector<16x16x128xf32>
    %c1_26 = arith.constant 1 : index
    %c1_27 = arith.constant 1 : index
    %c0_28 = arith.constant 0 : index
    %51 = vector.load %arg6[%c1_26, %c1_27, %c0_28] : memref<18x18x128xf32, #tpu.memory_space<vmem>>, vector<16x16x128xf32>
    tpu.vector_store %arg6[%c1_26, %c1_27, %c0_28], %50 {strides = array<i32>} : memref<18x18x128xf32, #tpu.memory_space<vmem>>, vector<16x16x128xf32>,
    %c0_29 = arith.constant 0 : index
    %c0_30 = arith.constant 0 : index
    %c0_31 = arith.constant 0 : index
    %52 = vector.load %arg6[%c0_29, %c0_30, %c0_31] : memref<18x18x128xf32, #tpu.memory_space<vmem>>, vector<18x18x128xf32>
    %c1_32 = arith.constant 1 : index
    %c0_33 = arith.constant 0 : index
    %53 = vector.load %arg2[%c1_32, %c0_33] : memref<3x128xf32, #tpu.memory_space<vmem>>, vector<1x128xf32>
    %54 = vector.shape_cast %53 : vector<1x128xf32> to vector<128xf32>
    %55 = vector.shape_cast %54 : vector<128xf32> to vector<1x1x128xf32>
    %56 = vector.broadcast %55 : vector<1x1x128xf32> to vector<18x18x128xf32>
    %57 = arith.mulf %52, %56 : vector<18x18x128xf32>
    %c1_34 = arith.constant 1 : index
    %c0_35 = arith.constant 0 : index
    %58 = vector.load %arg3[%c1_34, %c0_35] : memref<3x128xf32, #tpu.memory_space<vmem>>, vector<1x128xf32>
    %59 = vector.shape_cast %58 : vector<1x128xf32> to vector<128xf32>
    %60 = vector.shape_cast %59 : vector<128xf32> to vector<1x1x128xf32>
    %61 = vector.broadcast %60 : vector<1x1x128xf32> to vector<18x18x128xf32>
    %62 = arith.addf %57, %61 : vector<18x18x128xf32>
    %cst_36 = arith.constant 0.000000e+00 : f32
    %63 = vector.broadcast %cst_36 : f32 to vector<18x18x128xf32>
    %64 = arith.maximumf %62, %63 : vector<18x18x128xf32>
    %cst_37 = arith.constant 0.000000e+00 : f32
    %65 = vector.broadcast %cst_37 : f32 to vector<18x18x128xf32>
    %66 = arith.select %17, %64, %65 : vector<18x18x128xi1>, vector<18x18x128xf32>
    %67 = arith.truncf %66 : vector<18x18x128xf32> to vector<18x18x128xbf16>
    %68 = vector.extract_strided_slice %67 {offsets = [0, 0, 0], sizes = [16, 16, 128], strides = [1, 1, 1]} : vector<18x18x128xbf16> to vector<16x16x128xbf16>
    %69 = vector.extract_strided_slice %67 {offsets = [0, 1, 0], sizes = [16, 16, 128], strides = [1, 1, 1]} : vector<18x18x128xbf16> to vector<16x16x128xbf16>
    %70 = vector.extract_strided_slice %67 {offsets = [0, 2, 0], sizes = [16, 16, 128], strides = [1, 1, 1]} : vector<18x18x128xbf16> to vector<16x16x128xbf16>
    %71 = vector.extract_strided_slice %67 {offsets = [1, 0, 0], sizes = [16, 16, 128], strides = [1, 1, 1]} : vector<18x18x128xbf16> to vector<16x16x128xbf16>
    %72 = vector.extract_strided_slice %67 {offsets = [1, 1, 0], sizes = [16, 16, 128], strides = [1, 1, 1]} : vector<18x18x128xbf16> to vector<16x16x128xbf16>
    %73 = vector.extract_strided_slice %67 {offsets = [1, 2, 0], sizes = [16, 16, 128], strides = [1, 1, 1]} : vector<18x18x128xbf16> to vector<16x16x128xbf16>
    %74 = vector.extract_strided_slice %67 {offsets = [2, 0, 0], sizes = [16, 16, 128], strides = [1, 1, 1]} : vector<18x18x128xbf16> to vector<16x16x128xbf16>
    %75 = vector.extract_strided_slice %67 {offsets = [2, 1, 0], sizes = [16, 16, 128], strides = [1, 1, 1]} : vector<18x18x128xbf16> to vector<16x16x128xbf16>
    %76 = vector.extract_strided_slice %67 {offsets = [2, 2, 0], sizes = [16, 16, 128], strides = [1, 1, 1]} : vector<18x18x128xbf16> to vector<16x16x128xbf16>
    %77 = tpu.concatenate %68, %69, %70, %71, %72, %73, %74, %75, %76 in 2 : vector<16x16x128xbf16>, vector<16x16x128xbf16>, vector<16x16x128xbf16>, vector<16x16x128xbf16>, vector<16x16x128xbf16>, vector<16x16x128xbf16>, vector<16x16x128xbf16>, vector<16x16x128xbf16>, vector<16x16x128xbf16> -> vector<16x16x1152xbf16>
    %78 = vector.shape_cast %77 : vector<16x16x1152xbf16> to vector<256x1152xbf16>
    %c1_38 = arith.constant 1 : index
    %c0_39 = arith.constant 0 : index
    %c0_40 = arith.constant 0 : index
    %79 = vector.load %arg4[%c1_38, %c0_39, %c0_40] : memref<3x1152x128xbf16, #tpu.memory_space<vmem>>, vector<1x1152x128xbf16>
    %80 = vector.shape_cast %79 : vector<1x1152x128xbf16> to vector<1152x128xbf16>
    %cst_41 = arith.constant dense<0.000000e+00> : vector<256x128xf32>
    %81 = tpu.matmul %78, %80, %cst_41 {dimension_numbers = #tpu.dot_dimension_numbers<[1], [0], [0], [1], [0, 0, 1, 1], [], []>} : vector<256x1152xbf16>, vector<1152x128xbf16>, vector<256x128xf32> -> vector<256x128xf32>
    %c1_42 = arith.constant 1 : index
    %c1_43 = arith.constant 1 : index
    %c0_44 = arith.constant 0 : index
    %82 = vector.load %arg6[%c1_42, %c1_43, %c0_44] : memref<18x18x128xf32, #tpu.memory_space<vmem>>, vector<16x16x128xf32>
    %83 = vector.shape_cast %81 : vector<256x128xf32> to vector<16x16x128xf32>
    %84 = arith.addf %82, %83 : vector<16x16x128xf32>
    %c1_45 = arith.constant 1 : index
    %c1_46 = arith.constant 1 : index
    %c0_47 = arith.constant 0 : index
    %85 = vector.load %arg6[%c1_45, %c1_46, %c0_47] : memref<18x18x128xf32, #tpu.memory_space<vmem>>, vector<16x16x128xf32>
    tpu.vector_store %arg6[%c1_45, %c1_46, %c0_47], %84 {strides = array<i32>} : memref<18x18x128xf32, #tpu.memory_space<vmem>>, vector<16x16x128xf32>,
    %c0_48 = arith.constant 0 : index
    %c0_49 = arith.constant 0 : index
    %c0_50 = arith.constant 0 : index
    %86 = vector.load %arg6[%c0_48, %c0_49, %c0_50] : memref<18x18x128xf32, #tpu.memory_space<vmem>>, vector<18x18x128xf32>
    %c2 = arith.constant 2 : index
    %c0_51 = arith.constant 0 : index
    %87 = vector.load %arg2[%c2, %c0_51] : memref<3x128xf32, #tpu.memory_space<vmem>>, vector<1x128xf32>
    %88 = vector.shape_cast %87 : vector<1x128xf32> to vector<128xf32>
    %89 = vector.shape_cast %88 : vector<128xf32> to vector<1x1x128xf32>
    %90 = vector.broadcast %89 : vector<1x1x128xf32> to vector<18x18x128xf32>
    %91 = arith.mulf %86, %90 : vector<18x18x128xf32>
    %c2_52 = arith.constant 2 : index
    %c0_53 = arith.constant 0 : index
    %92 = vector.load %arg3[%c2_52, %c0_53] : memref<3x128xf32, #tpu.memory_space<vmem>>, vector<1x128xf32>
    %93 = vector.shape_cast %92 : vector<1x128xf32> to vector<128xf32>
    %94 = vector.shape_cast %93 : vector<128xf32> to vector<1x1x128xf32>
    %95 = vector.broadcast %94 : vector<1x1x128xf32> to vector<18x18x128xf32>
    %96 = arith.addf %91, %95 : vector<18x18x128xf32>
    %cst_54 = arith.constant 0.000000e+00 : f32
    %97 = vector.broadcast %cst_54 : f32 to vector<18x18x128xf32>
    %98 = arith.maximumf %96, %97 : vector<18x18x128xf32>
    %cst_55 = arith.constant 0.000000e+00 : f32
    %99 = vector.broadcast %cst_55 : f32 to vector<18x18x128xf32>
    %100 = arith.select %17, %98, %99 : vector<18x18x128xi1>, vector<18x18x128xf32>
    %101 = arith.truncf %100 : vector<18x18x128xf32> to vector<18x18x128xbf16>
    %102 = vector.extract_strided_slice %101 {offsets = [0, 0, 0], sizes = [16, 16, 128], strides = [1, 1, 1]} : vector<18x18x128xbf16> to vector<16x16x128xbf16>
    %103 = vector.extract_strided_slice %101 {offsets = [0, 1, 0], sizes = [16, 16, 128], strides = [1, 1, 1]} : vector<18x18x128xbf16> to vector<16x16x128xbf16>
    %104 = vector.extract_strided_slice %101 {offsets = [0, 2, 0], sizes = [16, 16, 128], strides = [1, 1, 1]} : vector<18x18x128xbf16> to vector<16x16x128xbf16>
    %105 = vector.extract_strided_slice %101 {offsets = [1, 0, 0], sizes = [16, 16, 128], strides = [1, 1, 1]} : vector<18x18x128xbf16> to vector<16x16x128xbf16>
    %106 = vector.extract_strided_slice %101 {offsets = [1, 1, 0], sizes = [16, 16, 128], strides = [1, 1, 1]} : vector<18x18x128xbf16> to vector<16x16x128xbf16>
    %107 = vector.extract_strided_slice %101 {offsets = [1, 2, 0], sizes = [16, 16, 128], strides = [1, 1, 1]} : vector<18x18x128xbf16> to vector<16x16x128xbf16>
    %108 = vector.extract_strided_slice %101 {offsets = [2, 0, 0], sizes = [16, 16, 128], strides = [1, 1, 1]} : vector<18x18x128xbf16> to vector<16x16x128xbf16>
    %109 = vector.extract_strided_slice %101 {offsets = [2, 1, 0], sizes = [16, 16, 128], strides = [1, 1, 1]} : vector<18x18x128xbf16> to vector<16x16x128xbf16>
    %110 = vector.extract_strided_slice %101 {offsets = [2, 2, 0], sizes = [16, 16, 128], strides = [1, 1, 1]} : vector<18x18x128xbf16> to vector<16x16x128xbf16>
    %111 = tpu.concatenate %102, %103, %104, %105, %106, %107, %108, %109, %110 in 2 : vector<16x16x128xbf16>, vector<16x16x128xbf16>, vector<16x16x128xbf16>, vector<16x16x128xbf16>, vector<16x16x128xbf16>, vector<16x16x128xbf16>, vector<16x16x128xbf16>, vector<16x16x128xbf16>, vector<16x16x128xbf16> -> vector<16x16x1152xbf16>
    %112 = vector.shape_cast %111 : vector<16x16x1152xbf16> to vector<256x1152xbf16>
    %c2_56 = arith.constant 2 : index
    %c0_57 = arith.constant 0 : index
    %c0_58 = arith.constant 0 : index
    %113 = vector.load %arg4[%c2_56, %c0_57, %c0_58] : memref<3x1152x128xbf16, #tpu.memory_space<vmem>>, vector<1x1152x128xbf16>
    %114 = vector.shape_cast %113 : vector<1x1152x128xbf16> to vector<1152x128xbf16>
    %cst_59 = arith.constant dense<0.000000e+00> : vector<256x128xf32>
    %115 = tpu.matmul %112, %114, %cst_59 {dimension_numbers = #tpu.dot_dimension_numbers<[1], [0], [0], [1], [0, 0, 1, 1], [], []>} : vector<256x1152xbf16>, vector<1152x128xbf16>, vector<256x128xf32> -> vector<256x128xf32>
    %c1_60 = arith.constant 1 : index
    %c1_61 = arith.constant 1 : index
    %c0_62 = arith.constant 0 : index
    %116 = vector.load %arg6[%c1_60, %c1_61, %c0_62] : memref<18x18x128xf32, #tpu.memory_space<vmem>>, vector<16x16x128xf32>
    %117 = vector.shape_cast %115 : vector<256x128xf32> to vector<16x16x128xf32>
    %118 = arith.addf %116, %117 : vector<16x16x128xf32>
    %c1_63 = arith.constant 1 : index
    %c1_64 = arith.constant 1 : index
    %c0_65 = arith.constant 0 : index
    %119 = vector.load %arg6[%c1_63, %c1_64, %c0_65] : memref<18x18x128xf32, #tpu.memory_space<vmem>>, vector<16x16x128xf32>
    tpu.vector_store %arg6[%c1_63, %c1_64, %c0_65], %118 {strides = array<i32>} : memref<18x18x128xf32, #tpu.memory_space<vmem>>, vector<16x16x128xf32>,
    %c1_66 = arith.constant 1 : index
    %c1_67 = arith.constant 1 : index
    %c0_68 = arith.constant 0 : index
    %120 = vector.load %arg6[%c1_66, %c1_67, %c0_68] : memref<18x18x128xf32, #tpu.memory_space<vmem>>, vector<16x16x128xf32>
    %121 = vector.shape_cast %120 : vector<16x16x128xf32> to vector<1x16x16x128xf32>
    %c0_69 = arith.constant 0 : index
    %c0_70 = arith.constant 0 : index
    %c0_71 = arith.constant 0 : index
    %c0_72 = arith.constant 0 : index
    %122 = vector.load %arg5[%c0_69, %c0_70, %c0_71, %c0_72] : memref<1x16x16x128xf32, #tpu.memory_space<vmem>>, vector<1x16x16x128xf32>
    tpu.vector_store %arg5[%c0_69, %c0_70, %c0_71, %c0_72], %121 {strides = array<i32>} : memref<1x16x16x128xf32, #tpu.memory_space<vmem>>, vector<1x16x16x128xf32>,
    return
  }
  func.func @transform_0(%arg0: i32) -> (i32, i32, i32, i32) {
    %c0_i32 = arith.constant 0 : i32
    %c0_i32_0 = arith.constant 0 : i32
    %c0_i32_1 = arith.constant 0 : i32
    %c0_i32_2 = arith.constant 0 : i32
    return %arg0, %c0_i32, %c0_i32_0, %c0_i32_1 : i32, i32, i32, i32
  }
  func.func @transform_1(%arg0: i32) -> (i32, i32) {
    %c0_i32 = arith.constant 0 : i32
    %c0_i32_0 = arith.constant 0 : i32
    %c0_i32_1 = arith.constant 0 : i32
    return %c0_i32, %c0_i32_0 : i32, i32
  }
  func.func @transform_2(%arg0: i32) -> (i32, i32) {
    %c0_i32 = arith.constant 0 : i32
    %c0_i32_0 = arith.constant 0 : i32
    %c0_i32_1 = arith.constant 0 : i32
    return %c0_i32, %c0_i32_0 : i32, i32
  }
  func.func @transform_3(%arg0: i32) -> (i32, i32, i32) {
    %c0_i32 = arith.constant 0 : i32
    %c0_i32_0 = arith.constant 0 : i32
    %c0_i32_1 = arith.constant 0 : i32
    %c0_i32_2 = arith.constant 0 : i32
    return %c0_i32, %c0_i32_0, %c0_i32_1 : i32, i32, i32
  }
  func.func @transform_4(%arg0: i32) -> (i32, i32, i32, i32) {
    %c0_i32 = arith.constant 0 : i32
    %c0_i32_0 = arith.constant 0 : i32
    %c0_i32_1 = arith.constant 0 : i32
    %c0_i32_2 = arith.constant 0 : i32
    return %arg0, %c0_i32, %c0_i32_0, %c0_i32_1 : i32, i32, i32, i32
  }
}

</mosaic_0001>

<bundles_post_ra>
// kernel: tpu_custom_call.1
= control target key start
LH: loop header
LB: loop body
LE: loop exit
PB: predicated region body
PF: predicated region fallthrough
CT: control target
= control target key end

     0   :  { %s12824_s0 = inlined_call_operand.hbm [shape: f32[2,16,16,128], index: 0, kind: input, shape index: {}]   ;;  %s12825_s1 = inlined_call_operand.hbm [shape: f32[3,128], index: 1, kind: input, shape index: {}]   ;;  %s12826_s2 = inlined_call_operand.vmem [shape: f32[3,128], index: 2, kind: input, shape index: {}]   ;;  %s12827_s3 = inlined_call_operand.hbm [shape: bf16[3,1152,128], index: 3, kind: input, shape index: {}]   ;;  %s12828_s4 = inlined_call_operand.hbm [shape: f32[2,16,16,128], index: 4, kind: output, shape index: {}]  }
   0x1   :  { %12913 = sst [smem:[#allocation38_spill]] %s12825_s1 }
   0x2   :  { %9 = vsyncpa [#allocation4], 0 }
   0x3   :  { %11 = vsyncpa [#allocation4 + $0x1], 0 }
   0x4   :  { %12 = vsyncpa [#allocation7], 0 }
   0x5   :  { %13 = vsyncpa [#allocation5], 0 }
   0x6   :  { %15 = vsyncpa [#allocation5 + $0x1], 0  ;;  %s10079_s15 = smov 0   ;;  %s10081_s16 = smov 0  }
   0x7   :  { %s10083_s17 = smov 0   ;;  %s10085_s18 = smov 0  }
   0x8 LB: > { %s10100_s19 = sadd.s32 4294967295, %s10038_s18   ;;  %s6964_s20 = sadd.s32 4294967294, %s10038_s18   ;;  %s10038_s18 = sphi %s10085_s18, %s13034_s18   ;;  %s10034_s17 = sphi %s10083_s17, %s13033_s17   ;;  %s10030_s16 = sphi %s10081_s16, %s13032_s16   ;;  %s10026_s15 = sphi %s10079_s15, %s13031_s15  }
   0x9   : > { %s10104_s21 = sadd.s32 1, %s10038_s18   ;;  %s28_s22 = sadd.s32 1, %s10034_s17 }
   0xa   : > { %s25_s23 = ssub.s32 %s10038_s18, %s10104_s21  ;;  %p35_p0 = scmp.ne.s32.totalorder %s10034_s17, %s10030_s16 }
   0xb   : > { %p26_p1 = scmp.eq.s32.totalorder %s25_s23, 0  ;;  %p36_p2 = scmp.eq.s32.totalorder %s10038_s18, 0 }
   0xc   : > { %p41_p3 = scmp.ne.s32.totalorder %s10030_s16, %s10026_s15  ;;  %p12829_p4 = scmp.eq.s32.totalorder %s10100_s19, 0 }
   0xd   : > { %s10116_s24 = scalar_select %p26_p1, %s10034_s17, %s28_s22  }
   0xe   : > { %p10118_p5 = por %p36_p2, %p35_p0  ;;  %p10124_p6 = por %p12829_p4, %p41_p3 }
   0xf   : > { %p128_p7 = scmp.eq.s32.totalorder %s10100_s19, 1  ;;  %p134_p8 = scmp.eq.s32.totalorder %s6964_s20, 1 }
  0x10   : > { %s12915_s26 = scalar_select %p10124_p6, 1, 0 }
  0x11   : > { %p6965_p9 = scmp.ge.s32.totalorder %s10038_s18, 1  ;;  %p141_p10 = scmp.lt.s32.totalorder %s10038_s18, 3 }
  0x12   : > { %p10131_p11 = por %p128_p7, %p35_p0  ;;  %p10135_p12 = por %p134_p8, %p41_p3 }
  0x13   : > { %p10139_p13 = pnand %p6965_p9, %p141_p10  ;;  %s10040_s30 = smov [#allocation6]  }
  0x14   : > { %s12916_s27 = scalar_select %p10131_p11, 1, 0 }
  0x15   : > { %s12917_s28 = scalar_select %p10135_p12, 1, 0 }
  0x16   : > { %s12918_s29 = scalar_select %p10139_p13, 1, 0 }
  0x17   : > { %p9592_p2 = pneg %p10139_p13  ;;  %s154_s5 = sshll.u32 %s10040_s30, 4  ;;  %s155_s5 = int_to_ptr.vmem [resolvable:$true] %s154_s5 }
  0x18   : > { %p9609_p4 = scmp.lt.s32.totalorder %s10038_s18, 2  ;;  %p12919_p0 = scmp.eq.s32.totalorder %s10100_s19, 0 }
  0x19   : > { %s10041_s8 = smov [#allocation8]   ;;  %s12922_s1 = sld [smem:[#allocation38_spill]] }
  0x1a   : > { %p10149_p7 = pnand %p9592_p2, %p12919_p0  ;;  %p10155_p3 = pnand %p9609_p4, %p10118_p5 }
  0x1b   : > { %s167_s9 = sshll.u32 %s10041_s8, 4  ;;  %s10159_s9 = int_to_ptr.vmem [resolvable:$true] %s167_s9 }
  0x1c   : > { %s12921_s7 = scalar_select %p10155_p3, 1, 0 }
  0x1d   : > { %p9884_p9 = pneg %p10149_p7 }
  0x1f   : > { %s9882_s12 = scalar_lea.hbm %s12922_s1, 64 }
  0x20   : > { %p9883_p8 = scmp.ne.s32.totalorder %s12922_s1, %s9882_s12  ;;  %p9889_p10 = scmp.lt.u32.totalorder %s9882_s12, %s12922_s1 }
  0x22   : > { %p9885_p4 = pnand %p9884_p9, %p9883_p8 }
  0x24   : > { %p9886_p5 = pneg %p9885_p4 }
  0x26   : > { %p9891_p2 = pnand %p9889_p10, %p9886_p5 }
  0x28   : > { %9894 = shalt.err (!%p9891_p2)
}
  0x29   : > { %s9895_s23 = scalar_lea.vmem %s155_s5, 64  ;;  %p9903_p11 = scmp.lt.s32.totalorder %s155_s5, %s155_s5 }
  0x2a   : > { %p9896_p0 = scmp.ne.s32.totalorder %s155_s5, %s9895_s23  ;;  %p9904_p6 = scmp.lt.s32.totalorder %s9895_s23, %s9895_s23 }
  0x2c   : > { %p9898_p1 = pnand %p9896_p0, %p9884_p9  ;;  %p9905_p13 = por %p9904_p6, %p9903_p11 }
  0x2e   : > { %p9899_p12 = pneg %p9898_p1 }
  0x30   : > { %p9906_p3 = pnand %p9905_p13, %p9899_p12 }
  0x32   : > { %9909 = shalt.err (!%p9906_p3)
}
  0x33   : > { %9595 = dma.hbm_to_vmem [thread:$0]  (!%p10149_p7), %s12922_s1, 64, %s155_s5, [#allocation7]  }
  0x34   : > { %s181_s8 = sand.u32 1, %s10034_s17   ;;  %s9910_s12 = scalar_lea.hbm %s12827_s3, 27648 }
  0x35   : > { %p9911_p1 = scmp.ne.s32.totalorder %s12827_s3, %s9910_s12  ;;  %p9917_p12 = scmp.lt.u32.totalorder %s9910_s12, %s12827_s3 }
  0x37   : > { %p9913_p6 = pnand %p9911_p1, %p9884_p9 }
  0x39   : > { %p9914_p11 = pneg %p9913_p6 }
  0x3b   : > { %p9919_p13 = pnand %p9917_p12, %p9914_p11 }
  0x3d   : > { %9922 = shalt.err (!%p9919_p13)
}
  0x3e   : > { %s9923_s5 = scalar_lea.vmem %s10159_s9, 27648  ;;  %p9931_p5 = scmp.lt.s32.totalorder %s10159_s9, %s10159_s9 }
  0x3f   : > { %p9924_p3 = scmp.ne.s32.totalorder %s10159_s9, %s9923_s5  ;;  %p9932_p10 = scmp.lt.s32.totalorder %s9923_s5, %s9923_s5 }
  0x41   : > { %p9926_p8 = pnand %p9924_p3, %p9884_p9  ;;  %p9933_p2 = por %p9932_p10, %p9931_p5 }
  0x43   : > { %p9927_p4 = pneg %p9926_p8 }
  0x45   : > { %p9934_p0 = pnand %p9933_p2, %p9927_p4 }
  0x47   : > { %9937 = shalt.err (!%p9934_p0)
}
  0x48   : > { %s10042_s23 = smov 64   ;;  %s10043_s25 = smov 4  }
  0x49   : > { %9598 = dma.hbm_to_vmem [thread:$0]  (!%p10149_p7), %s12827_s3, 27648, %s10159_s9, [#allocation7], %s10042_s23, %s10042_s23, %s10043_s25  }
  0x4a   : > { %s6969_s11 = sshll.u32 %s181_s8, 8  ;;  %s7618_s12 = sshll.u32 %s10038_s18, 12 }
  0x4b   : > { %s10213_s20 = scalar_lea.hbm %s12824_s0, %s7618_s12  ;;  %s185_s22 = scalar_lea.vmem [#allocation3], %s6969_s11 }
  0x4c   : > { %s192_s5 = sshll.u32 %s185_s22, 4  ;;  %s10217_s6 = scalar_lea.sflag [#allocation4], %s181_s8  ;;  %s10215_s5 = int_to_ptr.vmem [resolvable:$true] %s192_s5 }
  0x4d   : > { %s9938_s1 = scalar_lea.hbm %s10213_s20, 4096  ;;  %p12923_p7 = scmp.ne.s32.totalorder %s12921_s7, 0 }
  0x4e   : > { %p9939_p9 = scmp.ne.s32.totalorder %s10213_s20, %s9938_s1  ;;  %s9943_s25 = scalar_lea.hbm %s12824_s0, 8192 }
  0x4f   : > { %p9940_p1 = pneg %p12923_p7  ;;  %p9944_p12 = scmp.lt.u32.totalorder %s10213_s20, %s12824_s0 }
  0x50   : > { %p9945_p13 = scmp.lt.u32.totalorder %s9943_s25, %s9938_s1  ;;  %p9947_p8 = scmp.lt.u32.totalorder %s9938_s1, %s10213_s20 }
  0x51   : > { %p9941_p6 = pnand %p9940_p1, %p9939_p9 }
  0x52   : > { %p9946_p3 = por %p9945_p13, %p9944_p12 }
  0x53   : > { %p9942_p11 = pneg %p9941_p6 }
  0x54   : > { %p9948_p4 = por %p9947_p8, %p9946_p3 }
  0x56   : > { %p9949_p5 = pnand %p9948_p4, %p9942_p11 }
  0x58   : > { %9952 = shalt.err (!%p9949_p5)
}
  0x59   : > { %s9953_s8 = scalar_lea.vmem %s10215_s5, 4096  ;;  %s10044_s11 = smov [#allocation3]  }
  0x5a   : > { %p9954_p10 = scmp.ne.s32.totalorder %s10215_s5, %s9953_s8  ;;  %s9958_s12 = sshll.u32 %s10044_s11, 4  ;;  %s9959_s12 = int_to_ptr.vmem [resolvable:$false] %s9958_s12 }
  0x5b   : > { %s9960_s13 = scalar_lea.vmem %s9959_s12, 8192  ;;  %p9961_p9 = scmp.lt.s32.totalorder %s10215_s5, %s9959_s12 }
  0x5c   : > { %p9956_p2 = pnand %p9954_p10, %p9940_p1  ;;  %p9962_p6 = scmp.lt.s32.totalorder %s9960_s13, %s9953_s8 }
  0x5e   : > { %p9957_p0 = pneg %p9956_p2  ;;  %p9963_p12 = por %p9962_p6, %p9961_p9 }
  0x60   : > { %p9964_p13 = pnand %p9963_p12, %p9957_p0 }
  0x62   : > { %9967 = shalt.err (!%p9964_p13)
}
  0x63   : > { %s10045_s1 = smov 128   ;;  %s10046_s14 = smov 8  }
  0x64   : > { %9602 = dma.hbm_to_vmem [thread:$0]  (!%p12923_p7), %s10213_s20, 4096, %s10215_s5, %s10217_s6, %s10045_s1, %s10045_s1, %s10046_s14  }
  0x65   : > { %p12924_p1 = scmp.ne.s32.totalorder %s12918_s29, 0 }
  0x67   : > { %204 = sbr.rel (%p12924_p1) target bundleno = 1552 (0x610), region = 36 }
  0x6e   : > { %s10248_s22 = sand.u32 1, %s10030_s16   ;;  %p12925_p11 = scmp.ne.s32.totalorder %s12915_s26, 0 }
  0x6f   : > { %s6973_s9 = sshll.u32 %s10248_s22, 8  ;;  %s207_s23 = scalar_lea.sflag [#allocation4], %s10248_s22 }
  0x70   : > { %s10254_s25 = scalar_lea.vmem [#allocation3], %s6973_s9 }
  0x71   : > { %10013 = dma.done.wait (%p12925_p11), %s207_s23, 4096  }
  0x72   : > { %10015 = vsyncadd (%p12925_p11), %s207_s23, 4294963200  ;;  %p12926_p7 = scmp.eq.s32.totalorder %s10100_s19, 0 }
  0x74   : > { %10017 = dma.done.wait (%p12926_p7), [#allocation7], 27712   ;;  %p12927_p3 = pmov %p12926_p7 }
  0x75   : > { %v10047_v0 = vmov 0.0   ;;  %v10048_v1 = vmov 0   ;;  %v9657_v3 = vld [vmem:[#allocation8 + $0x40] sm:$0xff]   ;;  %v9659_v5 = vld [vmem:[#allocation8 + $0x48] sm:$0xff]   ;;  %v9661_v7 = vld [vmem:[#allocation8 + $0x50] sm:$0xff]   ;;  %v363_v16 = vlaneseq  ;;  %vm10050_vm3 = vmmov 1  }
  0x76   : > { %10019 = vsyncadd (%p12927_p3), [#allocation7], 4294939584  ;;  %247 = vst [vmem:[#allocation2 + $0x18] sm:$0xff] %v10047_v0  ;;  %v10264_v2 = vrot.slane %v10048_v1, 1  ;;  %v9658_v4 = vld [vmem:[#allocation8] sm:$0xff]   ;;  %9180 = vmatprep.subr.bf16.mxu1 %v9657_v3  ;;  %7620 = vmatprep.subr.bf16.mxu0 %v9657_v3  ;;  %v9660_v6 = vld [vmem:[#allocation8 + $0x8] sm:$0xff]  }
  0x77   : > { %248 = vst [vmem:[#allocation2 + $0x20] sm:$0xff] %v10047_v0  ;;  %249 = vst [vmem:[#allocation2 + $0x28] sm:$0x3] %v10047_v0  ;;  %9188 = vmatpush3.bf16.msra.mxu1 %v9658_v4  ;;  %7621 = vmatpush3.bf16.msra.mxu0 %v9658_v4  ;;  %v9662_v8 = vld [vmem:[#allocation8 + $0x10] sm:$0xff]   ;;  %v9663_v9 = vld [vmem:[#allocation8 + $0x58] sm:$0xff]   ;;  %v10271_v21 = vshrl.u32 %v363_v16, 7 }
  0x78   : > { %250 = vst [vmem:[#allocation2 + $0x30] sm:$0xff] %v10047_v0  ;;  %251 = vst [vmem:[#allocation2 + $0x38] sm:$0xff] %v10047_v0  ;;  %1653 = vmatprep.mubr.bf16.mxu0 %v10264_v2  ;;  %9181 = vmatprep.subr.bf16.mxu1 %v9659_v5  ;;  %v9664_v10 = vld [vmem:[#allocation8 + $0x18] sm:$0xff]   ;;  %v9665_v11 = vld [vmem:[#allocation8 + $0x60] sm:$0xff]   ;;  %vm701_vm2 = vsmask.f32 7424 }
  0x79   : > { %252 = vst [vmem:[#allocation2 + $0x40] sm:$0x3] %v10047_v0  ;;  %253 = vst [vmem:[#allocation2 + $0x48] sm:$0xff] %v10047_v0  ;;  %7622 = vmatprep.subr.bf16.mxu0 %v9659_v5  ;;  %v9666_v12 = vld [vmem:[#allocation8 + $0x20] sm:$0xff]   ;;  %v9667_v13 = vld [vmem:[#allocation8 + $0x68] sm:$0xff]   ;;  %v10285_v30 = vadd.s32 16, %v10271_v21 }
  0x7a   : > { %254 = vst [vmem:[#allocation2 + $0x50] sm:$0xff] %v10047_v0  ;;  %255 = vst [vmem:[#allocation2 + $0x58] sm:$0x3] %v10047_v0  ;;  %v304_v14 = vld [vmem:[%s10254_s25 + $0x30] sm:$0xff]  ;;  %v305_v15 = vld [vmem:[%s10254_s25 + $0x38] sm:$0xff]  ;;  %vm367_vm0 = vcmp.ge.s32.totalorder %v10271_v21, 1 }
  0x7b   : > { %256 = vst [vmem:[#allocation2 + $0x60] sm:$0xff] %v10047_v0  ;;  %257 = vst [vmem:[#allocation2 + $0x68] sm:$0xff] %v10047_v0  ;;  %9189 = vmatpush3.bf16.msra.mxu1 %v9660_v6  ;;  %7623 = vmatpush3.bf16.msra.mxu0 %v9660_v6  ;;  %v9668_v17 = vld [vmem:[#allocation8 + $0x28] sm:$0xff]   ;;  %v306_v18 = vld [vmem:[%s10254_s25 + $0x40] sm:$0xff]  ;;  %vm378_vm1 = vcmp.le.s32.totalorder %v10285_v30, 16  ;;  %vm942_vm5 = vcmask 1046528  }
  0x7c   : > { %258 = vst [vmem:[#allocation2 + $0x70] sm:$0x3] %v10047_v0  ;;  %259 = vst [vmem:[#allocation2 + $0x78] sm:$0xff] %v10047_v0  ;;  %9182 = vmatprep.subr.bf16.mxu1 %v9661_v7  ;;  %7624 = vmatprep.subr.bf16.mxu0 %v9661_v7  ;;  %v307_v19 = vld [vmem:[%s10254_s25 + $0x48] sm:$0xff]  ;;  %v9669_v20 = vld [vmem:[#allocation8 + $0x70] sm:$0xff]   ;;  %s12711_s23 = scalar_lea.vmem [#allocation9], %s6973_s9 }
  0x7d   : > { %260 = vst [vmem:[#allocation2 + $0x80] sm:$0xff] %v10047_v0  ;;  %261 = vst [vmem:[#allocation2 + $0x88] sm:$0x3] %v10047_v0  ;;  %v9670_v22 = vld [vmem:[#allocation8 + $0x30] sm:$0xff]   ;;  %v10273_v23 = vld [vmem:[#allocation6] ss:$0 sm:$0xff] }
  0x7e   : > { %262 = vst [vmem:[#allocation2 + $0x90] sm:$0xff] %v10047_v0  ;;  %263 = vst [vmem:[#allocation2 + $0x98] sm:$0xff] %v10047_v0  ;;  %v9671_v24 = vld [vmem:[#allocation8 + $0x78] sm:$0xff]   ;;  %v10278_v25 = vld [vmem:[%s12826_s2] ss:$0 sm:$0xff]  ;;  %s7619_s9 = sshll.u32 %s10100_s19, 12 }
  0x7f   : > { %264 = vst [vmem:[#allocation2 + $0xa0] sm:$0x3] %v10047_v0  ;;  %265 = vst [vmem:[#allocation2 + $0xa8] sm:$0xff] %v10047_v0  ;;  %9190 = vmatpush3.bf16.msra.mxu1 %v9662_v8  ;;  %7625 = vmatpush3.bf16.msra.mxu0 %v9662_v8  ;;  %v308_v26 = vld [vmem:[%s10254_s25 + $0x50] sm:$0xff]  ;;  %v309_v27 = vld [vmem:[%s10254_s25 + $0x58] sm:$0xff]  ;;  %s12775_s29 = scalar_lea.hbm %s12828_s4, %s7619_s9  ;;  %s6859_s7 = scalar_lea.sflag [#allocation5], %s10248_s22 }
  0x80   : > { %266 = vst [vmem:[#allocation2 + $0xb0] sm:$0xff] %v10047_v0  ;;  %267 = vst [vmem:[#allocation2 + $0xb8] sm:$0x3] %v10047_v0  ;;  %9183 = vmatprep.subr.bf16.mxu1 %v9663_v9  ;;  %7626 = vmatprep.subr.bf16.mxu0 %v9663_v9  ;;  %v310_v28 = vld [vmem:[%s10254_s25 + $0x60] sm:$0xff]  ;;  %v311_v29 = vld [vmem:[%s10254_s25 + $0x68] sm:$0xff]  ;;  %p13028_p4 = scmp.ne.s32.totalorder %s12916_s27, 0 }
  0x81   : > { %268 = vst [vmem:[#allocation2 + $0xc0] sm:$0xff] %v10047_v0  ;;  %269 = vst [vmem:[#allocation2 + $0xc8] sm:$0xff] %v10047_v0  ;;  %v9672_v37 = vld [vmem:[#allocation8 + $0x38] sm:$0xff]   ;;  %v312_v38 = vld [vmem:[%s10254_s25 + $0x70] sm:$0xff]  ;;  %s10051_s5 = smov [#allocation9]  }
  0x82   : > { %270 = vst [vmem:[#allocation2 + $0xd0] sm:$0x3] %v10047_v0  ;;  %271 = vst [vmem:[#allocation2 + $0xd8] sm:$0xff] %v10047_v0  ;;  %v313_v39 = vld [vmem:[%s10254_s25 + $0x78] sm:$0xff]  ;;  %v9673_v46 = vld [vmem:[#allocation8 + $0xc0] sm:$0xff]   ;;  %s9972_s6 = sshll.u32 %s10051_s5, 4  ;;  %s9973_s6 = int_to_ptr.vmem [resolvable:$false] %s9972_s6 }
  0x83   : > { %272 = vst [vmem:[#allocation2 + $0xe0] sm:$0xff] %v10047_v0  ;;  %273 = vst [vmem:[#allocation2 + $0xe8] sm:$0x3] %v10047_v0  ;;  %9191 = vmatpush3.bf16.msra.mxu1 %v9664_v10  ;;  %7627 = vmatpush3.bf16.msra.mxu0 %v9664_v10  ;;  %v314_v3 = vld [vmem:[%s10254_s25 + $0x80] sm:$0xff]  ;;  %v315_v4 = vld [vmem:[%s10254_s25 + $0x88] sm:$0xff]  ;;  %s9974_s30 = scalar_lea.vmem %s9973_s6, 8192 }
  0x84   : > { %274 = vst [vmem:[#allocation2 + $0xf0] sm:$0xff] %v10047_v0  ;;  %275 = vst [vmem:[#allocation2 + $0xf8] sm:$0xff] %v10047_v0  ;;  %9184 = vmatprep.subr.bf16.mxu1 %v9665_v11  ;;  %7628 = vmatprep.subr.bf16.mxu0 %v9665_v11  ;;  %v316_v9 = vld [vmem:[%s10254_s25 + $0x90] sm:$0xff]  ;;  %v317_v10 = vld [vmem:[%s10254_s25 + $0x98] sm:$0xff] }
  0x85   : > { %276 = vst [vmem:[#allocation2 + $0x100] sm:$0x3] %v10047_v0  ;;  %277 = vst [vmem:[#allocation2 + $0x108] sm:$0xff] %v10047_v0 }
  0x86   : > { %278 = vst [vmem:[#allocation2 + $0x110] sm:$0xff] %v10047_v0  ;;  %279 = vst [vmem:[#allocation2 + $0x118] sm:$0x3] %v10047_v0 }
  0x87   : > { %280 = vst [vmem:[#allocation2 + $0x120] sm:$0xff] %v10047_v0  ;;  %281 = vst [vmem:[#allocation2 + $0x128] sm:$0xff] %v10047_v0  ;;  %9192 = vmatpush3.bf16.msra.mxu1 %v9666_v12  ;;  %7629 = vmatpush3.bf16.msra.mxu0 %v9666_v12 }
  0x88   : > { %282 = vst [vmem:[#allocation2 + $0x130] sm:$0x3] %v10047_v0  ;;  %283 = vst [vmem:[#allocation2 + $0x138] sm:$0xff] %v10047_v0  ;;  %9185 = vmatprep.subr.bf16.mxu1 %v9667_v13  ;;  %7630 = vmatprep.subr.bf16.mxu0 %v9667_v13 }
  0x89   : > { %284 = vst [vmem:[#allocation2 + $0x140] sm:$0xff] %v10047_v0  ;;  %285 = vst [vmem:[#allocation2 + $0x148] sm:$0x3] %v10047_v0 }
  0x8a   : > { %286 = vst [vmem:[#allocation2 + $0x150] sm:$0xff] %v10047_v0  ;;  %287 = vst [vmem:[#allocation2 + $0x158] sm:$0xff] %v10047_v0 }
  0x8b   : > { %288 = vst [vmem:[#allocation2 + $0x160] sm:$0x3] %v10047_v0  ;;  %289 = vst [vmem:[#allocation2 + $0x168] sm:$0xff] %v10047_v0  ;;  %9193 = vmatpush3.bf16.msra.mxu1 %v9668_v17  ;;  %7631 = vmatpush3.bf16.msra.mxu0 %v9668_v17 }
  0x8c   : > { %290 = vst [vmem:[#allocation2 + $0x170] sm:$0xff] %v10047_v0  ;;  %291 = vst [vmem:[#allocation2 + $0x178] sm:$0x3] %v10047_v0  ;;  %9186 = vmatprep.subr.bf16.mxu1 %v9669_v20  ;;  %7632 = vmatprep.subr.bf16.mxu0 %v9669_v20 }
  0x8d   : > { %292 = vst [vmem:[#allocation2 + $0x180] sm:$0xff] %v10047_v0  ;;  %293 = vst [vmem:[#allocation2 + $0x188] sm:$0xff] %v10047_v0 }
  0x8e   : > { %294 = vst [vmem:[#allocation2 + $0x190] sm:$0x3] %v10047_v0  ;;  %12928 = vst [vmem:[#allocation13_spill] sm:$0xff] %v10264_v2 }
  0x8f   : > { %337 = vst [vmem:[#allocation2 + $0x61] sm:$0xff] %v304_v14  ;;  %338 = vst [vmem:[#allocation2 + $0x69] sm:$0xff] %v305_v15  ;;  %9194 = vmatpush3.bf16.msra.mxu1 %v9670_v22  ;;  %7633 = vmatpush3.bf16.msra.mxu0 %v9670_v22  ;;  %v12834_v15 = vmov 0.0|0.0  }
  0x90   : > { %12929 = vst [vmem:[#allocation14_spill] sm:$0xff] %v10271_v21  ;;  %339 = vst [vmem:[#allocation2 + $0x79] sm:$0xff] %v306_v18  ;;  %9187 = vmatprep.subr.bf16.mxu1 %v9671_v24  ;;  %7634 = vmatprep.subr.bf16.mxu0 %v9671_v24 }
  0x91   : > { %340 = vst [vmem:[#allocation2 + $0x81] sm:$0xff] %v307_v19  ;;  %341 = vst [vmem:[#allocation2 + $0x91] sm:$0xff] %v308_v26 }
  0x92   : > { %342 = vst [vmem:[#allocation2 + $0x99] sm:$0xff] %v309_v27  ;;  %343 = vst [vmem:[#allocation2 + $0xa9] sm:$0xff] %v310_v28 }
  0x93   : > { %12930 = vst [vmem:[#allocation15_spill] sm:$0xff] %v10285_v30  ;;  %344 = vst [vmem:[#allocation2 + $0xb1] sm:$0xff] %v311_v29  ;;  %9195 = vmatpush3.bf16.msra.mxu1 %v9672_v37  ;;  %7635 = vmatpush3.bf16.msra.mxu0 %v9672_v37 }
  0x94   : > { %345 = vst [vmem:[#allocation2 + $0xc1] sm:$0xff] %v312_v38  ;;  %346 = vst [vmem:[#allocation2 + $0xc9] sm:$0xff] %v313_v39  ;;  %7732 = vmatprep.subr.bf16.mxu1 %v9673_v46 }
  0x95   : > { %347 = vst [vmem:[#allocation2 + $0xd9] sm:$0xff] %v314_v3  ;;  %348 = vst [vmem:[#allocation2 + $0xe1] sm:$0xff] %v315_v4 }
  0x96   : > { %v397_v31 = vld [vmem:[#allocation2 + $0x60] sm:$0xff]  ;;  %v398_v32 = vld [vmem:[#allocation2 + $0x68] sm:$0xff]  ;;  %v399_v33 = vld [vmem:[#allocation2 + $0x70] sm:$0x3]  ;;  %349 = vst [vmem:[#allocation2 + $0xf1] sm:$0xff] %v316_v9  ;;  %1654 = vmatmul.mubr.bf16.vlgmr.msra.gmra.mrb[0].mxu0 %v12834_v15 }
  0x97   : > { %v456_v34 = vmul.f32 %v10273_v23, %v397_v31  ;;  %v457_v35 = vmul.f32 %v10273_v23, %v398_v32  ;;  %v458_v36 = vmul.f32 %v10273_v23, %v399_v33  ;;  %v400_v43 = vld [vmem:[#allocation2 + $0x78] sm:$0xff]  ;;  %350 = vst [vmem:[#allocation2 + $0xf9] sm:$0xff] %v317_v10  ;;  %vm10359_vm4 = vmpackc.low %vm10050_vm3, %vm367_vm0  ;;  %v320_v9 = vld [vmem:[%s10254_s25 + $0xb0] sm:$0xff] }
  0x98   : > { %v401_v44 = vld [vmem:[#allocation2 + $0x80] sm:$0xff]  ;;  %v402_v45 = vld [vmem:[#allocation2 + $0x88] sm:$0x3]  ;;  %v459_v47 = vmul.f32 %v10273_v23, %v400_v43  ;;  %v403_v56 = vld [vmem:[#allocation2 + $0x90] sm:$0xff]  ;;  %353 = vst [vmem:[#allocation2 + $0x121] sm:$0xff] %v320_v9 }
  0x99   : > { %v515_v40 = vadd.f32 %v10278_v25, %v456_v34  ;;  %v516_v41 = vadd.f32 %v10278_v25, %v457_v35  ;;  %v517_v42 = vadd.f32 %v10278_v25, %v458_v36  ;;  %v460_v48 = vmul.f32 %v10273_v23, %v401_v44  ;;  %v404_v57 = vld [vmem:[#allocation2 + $0x98] sm:$0xff]  ;;  %v405_v58 = vld [vmem:[#allocation2 + $0xa0] sm:$0x3]  ;;  %v406_v20 = vld [vmem:[#allocation2 + $0xa8] sm:$0xff] }
  0x9a   : > { %v461_v49 = vmul.f32 %v10273_v23, %v402_v45  ;;  %v10301_v53 = vadd.f32 %v10278_v25, %v459_v47  ;;  %v462_v61 = vmul.f32 %v10273_v23, %v403_v56  ;;  %v463_v6 = vmul.f32 %v10273_v23, %v404_v57  ;;  %v407_v22 = vld [vmem:[#allocation2 + $0xb0] sm:$0xff]  ;;  %v408_v29 = vld [vmem:[#allocation2 + $0xb8] sm:$0x3] }
  0x9b   : > { %v569_v50 = vmax.f32 %v515_v40, 0.0  ;;  %v570_v51 = vmax.f32 %v516_v41, 0.0  ;;  %v571_v52 = vmax.f32 %v517_v42, 0.0  ;;  %v10304_v54 = vadd.f32 %v10278_v25, %v460_v48  ;;  %v9674_v31 = vld [vmem:[#allocation8 + $0x80] sm:$0xff]   ;;  %v409_v41 = vld [vmem:[#allocation2 + $0xc0] sm:$0xff] }
  0x9c   : > { %v520_v55 = vadd.f32 %v10278_v25, %v461_v49  ;;  %v572_v0 = vmax.f32 %v10301_v53, 0.0  ;;  %v464_v7 = vmul.f32 %v10273_v23, %v405_v58  ;;  %v10323_v8 = vadd.f32 %v10278_v25, %v462_v61  ;;  %v318_v36 = vld [vmem:[%s10254_s25 + $0xa0] sm:$0xff]  ;;  %v319_v42 = vld [vmem:[%s10254_s25 + $0xa8] sm:$0xff] }
  0x9d   : > { %v623_v59 = vsel %vm367_vm0, %v569_v50, 0.0  ;;  %v625_v60 = vsel %vm378_vm1, %v571_v52, 0.0  ;;  %v573_v1 = vmax.f32 %v10304_v54, 0.0  ;;  %v10335_v16 = vpack.c.bf16 %v570_v51, %v569_v50  ;;  %351 = vst [vmem:[#allocation2 + $0x109] sm:$0xff] %v318_v36  ;;  %352 = vst [vmem:[#allocation2 + $0x111] sm:$0xff] %v319_v42  ;;  %v9675_v49 = vld [vmem:[#allocation8 + $0xc8] sm:$0xff]  }
  0x9e   : > { %v10312_v62 = vpack.c.bf16 %v570_v51, %v623_v59  ;;  %v10314_v63 = vpack.c.bf16 %v625_v60, %v625_v60  ;;  %v574_v5 = vmax.f32 %v520_v55, 0.0  ;;  %v626_v14 = vsel %vm367_vm0, %v572_v0, 0.0  ;;  %v9676_v55 = vld [vmem:[#allocation8 + $0x88] sm:$0xff]   ;;  %v410_v59 = vld [vmem:[#allocation2 + $0xc8] sm:$0xff]  ;;  %v411_v60 = vld [vmem:[#allocation2 + $0xd0] sm:$0x3] }
  0x9f   : > { %12932 = vst [vmem:[#allocation17_spill] sm:$0xff] %v10335_v16  ;;  %v10341_v18 = vpack.c.bf16 %v573_v1, %v626_v14  ;;  %v10344_v19 = vadd.f32 %v10278_v25, %v463_v6  ;;  %v523_v28 = vadd.f32 %v10278_v25, %v464_v7  ;;  %v575_v34 = vmax.f32 %v10323_v8, 0.0  ;;  %v412_v7 = vld [vmem:[#allocation2 + $0xd8] sm:$0xff]  ;;  %v321_v14 = vld [vmem:[%s10254_s25 + $0xb8] sm:$0xff] }
  0xa0   : > { %12931 = vst [vmem:[#allocation16_spill] sm:$0xff] %v10314_v63  ;;  %v751_v11 = vshrl.u32 %v10312_v62, 16  ;;  %v753_v12 = vshll.u32 %v10312_v62, 16  ;;  %v758_v13 = vshll.u32 %v10314_v63, 16  ;;  %v628_v17 = vsel %vm378_vm1, %v574_v5, 0.0  ;;  %v9677_v5 = vld [vmem:[#allocation8 + $0xd0] sm:$0xff]  }
  0xa1   : > { %12933 = vst [vmem:[#allocation18_spill] sm:$0xff] %v10341_v18  ;;  %v10346_v27 = vpack.c.bf16 %v628_v17, %v628_v17  ;;  %v763_v32 = vshrl.u32 %v10341_v18, 16  ;;  %v765_v33 = vshll.u32 %v10341_v18, 16  ;;  %v576_v35 = vmax.f32 %v10344_v19, 0.0  ;;  %v9685_v17 = vld [vmem:[#allocation8 + $0x140] sm:$0xff]   ;;  %354 = vst [vmem:[#allocation2 + $0x129] sm:$0xff] %v321_v14 }
  0xa2   : > { %v755_v24 = vrot.slane %v753_v12, 1  ;;  %v760_v26 = vrot.slane %v758_v13, 1  ;;  %v577_v39 = vmax.f32 %v523_v28, 0.0  ;;  %v465_v40 = vmul.f32 %v10273_v23, %v406_v20  ;;  %7844 = vmatprep.subr.bf16.mxu0 %v9685_v17  ;;  %v414_v42 = vld [vmem:[#allocation2 + $0xe8] sm:$0x3]  ;;  %v9681_v14 = vld [vmem:[#allocation8 + $0xe0] sm:$0xff]  }
  0xa3   : > { %12934 = vst [vmem:[#allocation19_spill] sm:$0xff] %v10346_v27  ;;  %v770_v38 = vshll.u32 %v10346_v27, 16  ;;  %v767_v44 = vrot.slane %v765_v33, 1  ;;  %v629_v45 = vsel %vm367_vm0, %v575_v34, 0.0  ;;  %v466_v46 = vmul.f32 %v10273_v23, %v407_v22  ;;  %v9691_v19 = vld [vmem:[#allocation8 + $0x150] sm:$0xff]  }
  0xa4   : > { %v756_v37 = vor.u32 %v755_v24, %v751_v11  ;;  %v631_v50 = vsel %vm378_vm1, %v577_v39, 0.0  ;;  %v10375_v51 = vpack.c.bf16 %v576_v35, %v629_v45  ;;  %v467_v57 = vmul.f32 %v10273_v23, %v408_v29 }
  0xa5   : > { %v772_v48 = vrot.slane %v770_v38, 1  ;;  %v768_v52 = vor.u32 %v767_v44, %v763_v32  ;;  %v10378_v56 = vpack.c.bf16 %v631_v50, %v631_v50  ;;  %v10382_v58 = vadd.f32 %v10278_v25, %v465_v40  ;;  %v9678_v32 = vld [vmem:[#allocation8 + $0x90] sm:$0xff]   ;;  %v9679_v40 = vld [vmem:[#allocation8 + $0xd8] sm:$0xff]   ;;  %v9686_v44 = vld [vmem:[#allocation8 + $0x100] sm:$0xff]  }
  0xa6   : > { %v10369_v47 = vsel %vm701_vm2, %v756_v37, %v760_v26  ;;  %12938 = vst [vmem:[#allocation21_spill] sm:$0xff] %v10375_v51  ;;  %v775_v61 = vshrl.u32 %v10375_v51, 16  ;;  %v777_v3 = vshll.u32 %v10375_v51, 16  ;;  %v10390_v4 = vadd.f32 %v10278_v25, %v466_v46  ;;  %7845 = vmatpush3.bf16.msra.mxu0 %v9686_v44  ;;  %v9687_v50 = vld [vmem:[#allocation8 + $0x148] sm:$0xff]  }
  0xa7   : > { %12937 = vst [vmem:[#allocation20_spill] sm:$0xff] %v10369_v47  ;;  %1685 = vmatprep.mubr.bf16.mxu1 %v10369_v47  ;;  %12939 = vst [vmem:[#allocation22_spill] sm:$0xff] %v10378_v56  ;;  %v468_v6 = vmul.f32 %v10273_v23, %v409_v41  ;;  %v10395_v10 = vsel %vm701_vm2, %v768_v52, %v772_v48  ;;  %v782_v11 = vshll.u32 %v10378_v56, 16  ;;  %v578_v13 = vmax.f32 %v10382_v58, 0.0  ;;  %v413_v41 = vld [vmem:[#allocation2 + $0xe0] sm:$0xff]  ;;  %v322_v52 = vld [vmem:[%s10254_s25 + $0xc0] sm:$0xff] }
  0xa8   : > { %7062 = vmatmul.mubr.msk.bf16.vlgmr.msra.gmra.mrb[0].mxu1 %vm10359_vm4, %v10335_v16  ;;  %12940 = vst [vmem:[#allocation23_spill] sm:$0xff] %v10395_v10  ;;  %v526_v12 = vadd.f32 %v10278_v25, %v467_v57  ;;  %v779_v20 = vrot.slane %v777_v3, 1  ;;  %v579_v22 = vmax.f32 %v10390_v4, 0.0  ;;  %v469_v24 = vmul.f32 %v10273_v23, %v410_v59  ;;  %355 = vst [vmem:[#allocation2 + $0x139] sm:$0xff] %v322_v52 }
  0xa9   : > { %7733 = vmatpush3.bf16.msra.mxu1 %v9674_v31  ;;  %1693 = vmatprep.mubr.bf16.mxu1 %v10395_v10  ;;  %v470_v26 = vmul.f32 %v10273_v23, %v411_v60  ;;  %v784_v28 = vrot.slane %v782_v11, 1  ;;  %v632_v31 = vsel %vm367_vm0, %v578_v13, 0.0  ;;  %v10410_v33 = vadd.f32 %v10278_v25, %v468_v6  ;;  %v9688_v6 = vld [vmem:[#allocation8 + $0x108] sm:$0xff]  }
  0xaa   : > { %7734 = vmatprep.subr.bf16.mxu1 %v9675_v49  ;;  %v580_v29 = vmax.f32 %v526_v12, 0.0  ;;  %v10416_v36 = vpack.c.bf16 %v573_v1, %v572_v0  ;;  %v780_v37 = vor.u32 %v779_v20, %v775_v61  ;;  %v10420_v38 = vpack.c.bf16 %v579_v22, %v632_v31  ;;  %v9680_v61 = vld [vmem:[#allocation8 + $0x98] sm:$0xff]   ;;  %7846 = vmatprep.subr.bf16.mxu0 %v9687_v50 }
  0xab   : > { %v10423_v39 = vadd.f32 %v10278_v25, %v469_v24  ;;  %v529_v54 = vadd.f32 %v10278_v25, %v470_v26  ;;  %v581_v0 = vmax.f32 %v10410_v33, 0.0  ;;  %v471_v1 = vmul.f32 %v10273_v23, %v412_v7  ;;  %v415_v12 = vld [vmem:[#allocation2 + $0xf0] sm:$0xff]  ;;  %v416_v26 = vld [vmem:[#allocation2 + $0xf8] sm:$0xff]  ;;  %7847 = vmatpush3.bf16.msra.mxu0 %v9688_v6 }
  0xac   : > { %12941 = vst [vmem:[#allocation24_spill] sm:$0xff] %v10416_v36  ;;  %v634_v53 = vsel %vm378_vm1, %v580_v29, 0.0  ;;  %v10431_v45 = vsel %vm701_vm2, %v780_v37, %v784_v28  ;;  %v787_v48 = vshrl.u32 %v10420_v38, 16  ;;  %v789_v49 = vshll.u32 %v10420_v38, 16  ;;  %v417_v28 = vld [vmem:[#allocation2 + $0x100] sm:$0x3]  ;;  %7848 = vmatprep.subr.bf16.mxu0 %v9691_v19 }
  0xad   : > { %7735 = vmatpush3.bf16.msra.mxu1 %v9676_v55  ;;  %12942 = vst [vmem:[#allocation25_spill] sm:$0xff] %v10431_v45  ;;  %v10433_v46 = vpack.c.bf16 %v634_v53, %v634_v53  ;;  %v323_v55 = vld [vmem:[%s10254_s25 + $0xc8] sm:$0xff]  ;;  %v582_v57 = vmax.f32 %v10423_v39, 0.0  ;;  %v583_v59 = vmax.f32 %v529_v54, 0.0  ;;  %v635_v60 = vsel %vm367_vm0, %v581_v0, 0.0 }
  0xae   : > { %7736 = vmatprep.subr.bf16.mxu1 %v9677_v5  ;;  %v472_v3 = vmul.f32 %v10273_v23, %v413_v41  ;;  %356 = vst [vmem:[#allocation2 + $0x141] sm:$0xff] %v323_v55  ;;  %v791_v5 = vrot.slane %v789_v49, 1  ;;  %v473_v9 = vmul.f32 %v10273_v23, %v414_v42  ;;  %v10451_v11 = vadd.f32 %v10278_v25, %v471_v1  ;;  %v299_v42 = vld [vmem:[%s10254_s25 + $0x8] sm:$0xff]  ;;  %v418_v49 = vld [vmem:[#allocation2 + $0x108] sm:$0xff] }
  0xaf   : > { %v794_v7 = vshll.u32 %v10433_v46, 16  ;;  %v637_v17 = vsel %vm378_vm1, %v583_v59, 0.0  ;;  %v10458_v20 = vpack.c.bf16 %v582_v57, %v635_v60  ;;  %v10472_v44 = vpack.c.bf16 %v576_v35, %v575_v34  ;;  %332 = vst [vmem:[#allocation2 + $0x21] sm:$0xff] %v299_v42 }
  0xb0   : > { %7065 = vmatmul.mubr.msk.bf16.gmra.mrb[4].mxu1 %vm10359_vm4, %v10416_v36  ;;  %v10461_v24 = vadd.f32 %v10278_v25, %v472_v3  ;;  %v792_v29 = vor.u32 %v791_v5, %v787_v48  ;;  %v10463_v37 = vpack.c.bf16 %v637_v17, %v637_v17  ;;  %v532_v41 = vadd.f32 %v10278_v25, %v473_v9  ;;  %v9682_v48 = vld [vmem:[#allocation8 + $0xa0] sm:$0xff]   ;;  %v9692_v17 = vld [vmem:[#allocation8 + $0x110] sm:$0xff]  }
  0xb1   : > { %1701 = vmatprep.mubr.bf16.mxu1 %v10431_v45  ;;  %7737 = vmatpush3.bf16.msra.mxu1 %v9678_v32  ;;  %v796_v31 = vrot.slane %v794_v7, 1  ;;  %v298_v32 = vld [vmem:[%s10254_s25] sm:$0xff]  ;;  %12943 = vst [vmem:[#allocation26_spill] sm:$0xff] %v10472_v44  ;;  %v801_v53 = vshll.u32 %v10458_v20, 16  ;;  %v12841_v54 = vmax.f32 %v10451_v11, 0.0  ;;  %v474_v8 = vmul.f32 %v10273_v23, %v415_v12  ;;  %v9683_v7 = vld [vmem:[#allocation8 + $0xe8] sm:$0xff]  }
  0xb2   : > { %7738 = vmatprep.subr.bf16.mxu1 %v9679_v40  ;;  %v12840_v1 = vmax.f32 %v10461_v24, 0.0  ;;  %331 = vst [vmem:[#allocation2 + $0x19] sm:$0xff] %v298_v32  ;;  %v799_v40 = vshrl.u32 %v10458_v20, 16  ;;  %v806_v50 = vshll.u32 %v10463_v37, 16  ;;  %v586_v52 = vmax.f32 %v532_v41, 0.0  ;;  %7849 = vmatpush3.bf16.msra.mxu0 %v9692_v17 }
  0xb3   : > { %v803_v34 = vrot.slane %v801_v53, 1  ;;  %v638_v35 = vsel %vm367_vm0, %v12841_v54, 0.0  ;;  %v475_v55 = vmul.f32 %v10273_v23, %v416_v26  ;;  %v10486_v59 = vsel %vm701_vm2, %v792_v29, %v796_v31  ;;  %v420_v5 = vld [vmem:[#allocation2 + $0x118] sm:$0x3]  ;;  %v9684_v29 = vld [vmem:[#allocation8 + $0xa8] sm:$0xff]   ;;  %v9693_v53 = vld [vmem:[#allocation8 + $0x158] sm:$0xff]  }
  0xb4   : > { %12944 = vst [vmem:[#allocation27_spill] sm:$0xff] %v10486_v59  ;;  %v640_v60 = vsel %vm378_vm1, %v586_v52, 0.0  ;;  %v10492_v3 = vpack.c.bf16 %v12840_v1, %v638_v35  ;;  %v476_v6 = vmul.f32 %v10273_v23, %v417_v28  ;;  %v10496_v9 = vadd.f32 %v10278_v25, %v474_v8  ;;  %v324_v52 = vld [vmem:[%s10254_s25 + $0xd0] sm:$0xff]  ;;  %v325_v8 = vld [vmem:[%s10254_s25 + $0xd8] sm:$0xff]  ;;  %7850 = vmatprep.subr.bf16.mxu0 %v9693_v53 }
  0xb5   : > { %7739 = vmatpush3.bf16.msra.mxu1 %v9680_v61  ;;  %v419_v61 = vld [vmem:[#allocation2 + $0x110] sm:$0xff]  ;;  %v10499_v12 = vadd.f32 %v10278_v25, %v475_v55  ;;  %v10504_v26 = vpack.c.bf16 %v640_v60, %v640_v60  ;;  %v477_v28 = vmul.f32 %v10273_v23, %v418_v49  ;;  %v804_v31 = vor.u32 %v803_v34, %v799_v40  ;;  %v421_v60 = vld [vmem:[#allocation2 + $0x120] sm:$0xff] }
  0xb6   : > { %7740 = vmatprep.subr.bf16.mxu1 %v9681_v14  ;;  %v535_v14 = vadd.f32 %v10278_v25, %v476_v6  ;;  %v808_v41 = vrot.slane %v806_v50, 1  ;;  %v12837_v32 = vmax.f32 %v10496_v9, 0.0  ;;  %v813_v19 = vshll.u32 %v10492_v3, 16  ;;  %v422_v6 = vld [vmem:[#allocation2 + $0x128] sm:$0xff]  ;;  %357 = vst [vmem:[#allocation2 + $0x151] sm:$0xff] %v324_v52  ;;  %358 = vst [vmem:[#allocation2 + $0x159] sm:$0xff] %v325_v8 }
  0xb7   : > { %v12836_v42 = vmax.f32 %v10499_v12, 0.0  ;;  %v478_v55 = vmul.f32 %v10273_v23, %v419_v61  ;;  %v479_v49 = vmul.f32 %v10273_v23, %v420_v5  ;;  %v9689_v40 = vld [vmem:[#allocation8 + $0xf0] sm:$0xff]   ;;  %v811_v50 = vshrl.u32 %v10492_v3, 16  ;;  %v423_v5 = vld [vmem:[#allocation2 + $0x130] sm:$0x3] }
  0xb8   : > { %7068 = vmatmul.mubr.msk.bf16.gmra.mrb[8].mxu1 %vm10359_vm4, %v10472_v44  ;;  %v589_v35 = vmax.f32 %v535_v14, 0.0  ;;  %v641_v34 = vsel %vm367_vm0, %v12837_v32, 0.0  ;;  %v10528_v61 = vadd.f32 %v10278_v25, %v477_v28  ;;  %v818_v17 = vshll.u32 %v10504_v26, 16  ;;  %v300_v14 = vld [vmem:[%s10254_s25 + $0x10] sm:$0xff]  ;;  %v301_v52 = vld [vmem:[%s10254_s25 + $0x18] sm:$0xff] }
  0xb9   : > { %1709 = vmatprep.mubr.bf16.mxu1 %v10486_v59  ;;  %7741 = vmatpush3.bf16.msra.mxu1 %v9682_v48  ;;  %v10520_v48 = vpack.c.bf16 %v579_v22, %v578_v13  ;;  %v10535_v4 = vpack.c.bf16 %v12836_v42, %v641_v34  ;;  %v10538_v13 = vadd.f32 %v10278_v25, %v478_v55  ;;  %v9694_v22 = vld [vmem:[#allocation8 + $0x118] sm:$0xff]   ;;  %v815_v55 = vrot.slane %v813_v19, 1  ;;  %v424_v19 = vld [vmem:[#allocation2 + $0x138] sm:$0xff]  ;;  %v390_v54 = vld [vmem:[#allocation2 + $0x28] sm:$0x3] }
  0xba   : > { %7742 = vmatprep.subr.bf16.mxu1 %v9683_v7  ;;  %v9690_v7 = vld [vmem:[#allocation8 + $0xb0] sm:$0xff]   ;;  %v643_v58 = vsel %vm378_vm1, %v589_v35, 0.0  ;;  %v538_v8 = vadd.f32 %v10278_v25, %v479_v49  ;;  %v12839_v53 = vmax.f32 %v10528_v61, 0.0  ;;  %v480_v15 = vmul.f32 %v10273_v23, %v421_v60  ;;  %333 = vst [vmem:[#allocation2 + $0x31] sm:$0xff] %v300_v14  ;;  %334 = vst [vmem:[#allocation2 + $0x39] sm:$0xff] %v301_v52  ;;  %v9695_v35 = vld [vmem:[#allocation8 + $0x160] sm:$0xff]  }
  0xbb   : > { %12945 = vst [vmem:[#allocation28_spill] sm:$0xff] %v10520_v48  ;;  %v10542_v28 = vpack.c.bf16 %v643_v58, %v643_v58  ;;  %v10548_v34 = vsel %vm701_vm2, %v804_v31, %v808_v41  ;;  %v825_v42 = vshll.u32 %v10535_v4, 16  ;;  %v12838_v32 = vmax.f32 %v10538_v13, 0.0  ;;  %7851 = vmatpush3.bf16.msra.mxu0 %v9694_v22  ;;  %v9696_v58 = vld [vmem:[#allocation8 + $0x120] sm:$0xff]   ;;  %v9697_v60 = vld [vmem:[#allocation8 + $0xf8] sm:$0xff]   ;;  %v425_v14 = vld [vmem:[#allocation2 + $0x140] sm:$0xff] }
  0xbc   : > { %12946 = vst [vmem:[#allocation29_spill] sm:$0xff] %v10548_v34  ;;  %v592_v49 = vmax.f32 %v538_v8, 0.0  ;;  %v644_v31 = vsel %vm367_vm0, %v12839_v53, 0.0  ;;  %v481_v41 = vmul.f32 %v10273_v23, %v422_v6  ;;  %7852 = vmatprep.subr.bf16.mxu0 %v9695_v35  ;;  %v820_v33 = vrot.slane %v818_v17, 1  ;;  %v426_v52 = vld [vmem:[#allocation2 + $0x148] sm:$0x3] }
  0xbd   : > { %7743 = vmatpush3.bf16.msra.mxu1 %v9684_v29  ;;  %v10556_v29 = vpack.c.bf16 %v582_v57, %v581_v0  ;;  %v823_v39 = vshrl.u32 %v10535_v4, 16  ;;  %v10569_v0 = vpack.c.bf16 %v12838_v32, %v644_v31  ;;  %v482_v57 = vmul.f32 %v10273_v23, %v423_v5  ;;  %v9698_v8 = vld [vmem:[#allocation8 + $0xb8] sm:$0xff]  }
  0xbe   : > { %7744 = vmatprep.subr.bf16.mxu1 %v9689_v40  ;;  %v830_v6 = vshll.u32 %v10542_v28, 16  ;;  %v646_v40 = vsel %vm378_vm1, %v592_v49, 0.0  ;;  %v10577_v22 = vadd.f32 %v10278_v25, %v480_v15  ;;  %v10580_v17 = vadd.f32 %v10278_v25, %v481_v41  ;;  %v327_v41 = vld [vmem:[%s10254_s25 + $0xe8] sm:$0xff] }
  0xbf   : > { %12947 = vst [vmem:[#allocation30_spill] sm:$0xff] %v10556_v29  ;;  %v816_v35 = vor.u32 %v815_v55, %v811_v50  ;;  %v827_v31 = vrot.slane %v825_v42, 1  ;;  %v10582_v5 = vpack.c.bf16 %v646_v40, %v646_v40  ;;  %v837_v32 = vshll.u32 %v10569_v0, 16  ;;  %7853 = vmatpush3.bf16.msra.mxu0 %v9696_v58  ;;  %v388_v40 = vld [vmem:[#allocation2 + $0x18] sm:$0xff]  ;;  %v389_v58 = vld [vmem:[#allocation2 + $0x20] sm:$0xff]  ;;  %360 = vst [vmem:[#allocation2 + $0x171] sm:$0xff] %v327_v41 }
  0xc0   : > { %7071 = vmatmul.mubr.msk.bf16.gmra.mrb[12].mxu1 %vm10359_vm4, %v10520_v48  ;;  %v541_v49 = vadd.f32 %v10278_v25, %v482_v57  ;;  %v12846_v15 = vmax.f32 %v10577_v22, 0.0  ;;  %v483_v53 = vmul.f32 %v10273_v23, %v424_v19  ;;  %v484_v55 = vmul.f32 %v10273_v23, %v425_v14  ;;  %v9699_v19 = vld [vmem:[#allocation8 + $0x168] sm:$0xff]  }
  0xc1   : > { %1717 = vmatprep.mubr.bf16.mxu1 %v10548_v34  ;;  %7745 = vmatpush3.bf16.msra.mxu1 %v9690_v7  ;;  %v835_v7 = vshrl.u32 %v10569_v0, 16  ;;  %v839_v50 = vrot.slane %v837_v32, 1  ;;  %v842_v42 = vshll.u32 %v10582_v5, 16  ;;  %v485_v1 = vmul.f32 %v10273_v23, %v426_v52  ;;  %v326_v32 = vld [vmem:[%s10254_s25 + $0xe0] sm:$0xff]  ;;  %v9700_v52 = vld [vmem:[#allocation8 + $0x128] sm:$0xff]  }
  0xc2   : > { %7746 = vmatprep.subr.bf16.mxu1 %v9697_v60  ;;  %v595_v60 = vmax.f32 %v541_v49, 0.0  ;;  %v647_v57 = vsel %vm367_vm0, %v12846_v15, 0.0  ;;  %v10600_v2 = vsel %vm701_vm2, %v816_v35, %v820_v33  ;;  %v12949_v14 = vmax.f32 %v10580_v17, 0.0  ;;  %359 = vst [vmem:[#allocation2 + $0x169] sm:$0xff] %v326_v32  ;;  %7854 = vmatprep.subr.bf16.mxu0 %v9699_v19  ;;  %v302_v33 = vld [vmem:[%s10254_s25 + $0x20] sm:$0xff]  ;;  %v303_v35 = vld [vmem:[%s10254_s25 + $0x28] sm:$0xff] }
  0xc3   : > { %12948 = vst [vmem:[#allocation31_spill] sm:$0xff] %v10600_v2  ;;  %v10607_v48 = vadd.f32 %v10278_v25, %v483_v53  ;;  %v832_v15 = vrot.slane %v830_v6, 1  ;;  %v544_v34 = vadd.f32 %v10278_v25, %v485_v1  ;;  %v447_v44 = vmul.f32 %v10273_v23, %v388_v40  ;;  %v427_v6 = vld [vmem:[#allocation2 + $0x150] sm:$0xff]  ;;  %7855 = vmatpush3.bf16.msra.mxu0 %v9700_v52  ;;  %v9702_v1 = vld [vmem:[#allocation8 + $0x130] sm:$0xff]  }
  0xc4   : > { %v10604_v49 = vpack.c.bf16 %v12949_v14, %v647_v57  ;;  %v828_v53 = vor.u32 %v827_v31, %v823_v39  ;;  %v840_v57 = vor.u32 %v839_v50, %v835_v7  ;;  %v844_v32 = vrot.slane %v842_v42, 1  ;;  %335 = vst [vmem:[#allocation2 + $0x49] sm:$0xff] %v302_v33  ;;  %336 = vst [vmem:[#allocation2 + $0x51] sm:$0xff] %v303_v35  ;;  %v9703_v31 = vld [vmem:[#allocation8 + $0x178] sm:$0xff]   ;;  %v428_v33 = vld [vmem:[#allocation2 + $0x158] sm:$0xff] }
  0xc5   : > { %7747 = vmatpush3.bf16.msra.mxu1 %v9698_v8  ;;  %v10610_v8 = vadd.f32 %v10278_v25, %v484_v55  ;;  %v9701_v55 = vld [vmem:[#allocation8 + $0x170] sm:$0xff]   ;;  %v649_v40 = vsel %vm378_vm1, %v595_v60, 0.0  ;;  %v12855_v19 = vmax.f32 %v10607_v48, 0.0  ;;  %v598_v14 = vmax.f32 %v544_v34, 0.0 }
  0xc6   : > { %v849_v41 = vshll.u32 %v10604_v49, 16  ;;  %v448_v39 = vmul.f32 %v10273_v23, %v389_v58  ;;  %v847_v7 = vshrl.u32 %v10604_v49, 16  ;;  %v449_v42 = vmul.f32 %v10273_v23, %v390_v54  ;;  %7856 = vmatprep.subr.bf16.mxu0 %v9701_v55 }
  0xc7   : > { %v506_v52 = vadd.f32 %v10278_v25, %v447_v44  ;;  %v650_v60 = vsel %vm367_vm0, %v12855_v19, 0.0  ;;  %v12950_v58 = vmax.f32 %v10451_v11, 0.0  ;;  %v12953_v54 = vmax.f32 %v10496_v9, 0.0  ;;  %7857 = vmatpush3.bf16.msra.mxu0 %v9702_v1  ;;  %v9704_v19 = vld [vmem:[#allocation8 + $0x138] sm:$0xff]  }
  0xc8   : > { %7074 = vmatmul.mubr.msk.bf16.gmra.mrb[16].mxu1 %vm10359_vm4, %v10556_v29  ;;  %v851_v35 = vrot.slane %v849_v41, 1  ;;  %v507_v34 = vadd.f32 %v10278_v25, %v448_v39  ;;  %v12951_v29 = vmax.f32 %v10461_v24, 0.0  ;;  %v12954_v44 = vmax.f32 %v10499_v12, 0.0  ;;  %v429_v24 = vld [vmem:[#allocation2 + $0x160] sm:$0x3]  ;;  %7858 = vmatprep.subr.bf16.mxu0 %v9703_v31 }
  0xc9   : > { %1725 = vmatprep.mubr.bf16.mxu1 %v10600_v2  ;;  %v10646_v41 = vpack.c.bf16 %v649_v40, %v649_v40  ;;  %v652_v55 = vsel %vm378_vm1, %v598_v14, 0.0  ;;  %v508_v39 = vadd.f32 %v10278_v25, %v449_v42  ;;  %v560_v11 = vmax.f32 %v506_v52, 0.0  ;;  %v431_v16 = vld [vmem:[#allocation2 + $0x170] sm:$0xff] }
  0xca   : > { %v10638_v2 = vpack.c.bf16 %v12951_v29, %v12950_v58  ;;  %v10644_v50 = vpack.c.bf16 %v12954_v44, %v12953_v54  ;;  %v561_v59 = vmax.f32 %v507_v34, 0.0  ;;  %v486_v29 = vmul.f32 %v10273_v23, %v427_v6  ;;  %v391_v34 = vld [vmem:[#allocation2 + $0x30] sm:$0xff] }
  0xcb   : > { %v10653_v9 = vsel %vm701_vm2, %v828_v53, %v832_v15  ;;  %v10656_v12 = vsel %vm701_vm2, %v840_v57, %v844_v32  ;;  %v12958_v40 = vmax.f32 %v10528_v61, 0.0  ;;  %v12959_v14 = vmax.f32 %v10538_v13, 0.0  ;;  %v9705_v58 = vld [vmem:[#allocation8 + $0x1c0] sm:$0xff]   ;;  %v393_v57 = vld [vmem:[#allocation2 + $0x40] sm:$0x3]  ;;  %7859 = vmatpush3.bf16.msra.mxu0 %v9704_v19 }
  0xcc   : > { %12952 = vst [vmem:[#allocation32_spill] sm:$0xff] %v10638_v2  ;;  %12955 = vst [vmem:[#allocation33_spill] sm:$0xff] %v10644_v50  ;;  %v12960_v42 = vmax.f32 %v10610_v8, 0.0  ;;  %v10668_v6 = vor.u32 %v851_v35, %v847_v7  ;;  %v562_v31 = vmax.f32 %v508_v39, 0.0  ;;  %v614_v15 = vsel %vm367_vm0, %v560_v11, 0.0  ;;  %v392_v35 = vld [vmem:[#allocation2 + $0x38] sm:$0xff]  ;;  %7956 = vmatprep.subr.bf16.mxu1 %v9705_v58 }
  0xcd   : > { %12956 = vst [vmem:[#allocation34_spill] sm:$0xff] %v10653_v9  ;;  %12957 = vst [vmem:[#allocation35_spill] sm:$0xff] %v10656_v12  ;;  %v10662_v1 = vpack.c.bf16 %v12959_v14, %v12958_v40  ;;  %v487_v53 = vmul.f32 %v10273_v23, %v428_v33  ;;  %v854_v61 = vshll.u32 %v10646_v41, 16  ;;  %v10677_v13 = vpack.c.bf16 %v652_v55, %v652_v55 }
  0xce   : > { %v10666_v52 = vpack.c.bf16 %v12960_v42, %v650_v60  ;;  %v10679_v32 = vpack.c.bf16 %v561_v59, %v614_v15  ;;  %v488_v7 = vmul.f32 %v10273_v23, %v429_v24  ;;  %v616_v33 = vsel %vm378_vm1, %v562_v31, 0.0 }
  0xcf   : > { %v10686_v60 = vadd.f32 %v10278_v25, %v486_v29  ;;  %v10689_v54 = vadd.f32 %v10278_v25, %v487_v53  ;;  %v450_v44 = vmul.f32 %v10273_v23, %v391_v34  ;;  %v10693_v39 = vpack.c.bf16 %v616_v33, %v616_v33  ;;  %v430_v53 = vld [vmem:[#allocation2 + $0x168] sm:$0xff] }
  0xd0   : > { %7077 = vmatmul.mubr.msk.bf16.gmra.mrb[20].mxu1 %vm10359_vm4, %v10638_v2  ;;  %v861_v55 = vshll.u32 %v10666_v52, 16  ;;  %v715_v19 = vshrl.u32 %v10679_v32, 16  ;;  %v717_v24 = vshll.u32 %v10679_v32, 16  ;;  %v547_v40 = vadd.f32 %v10278_v25, %v488_v7 }
  0xd1   : > { %1733 = vmatprep.mubr.bf16.mxu1 %v10653_v9  ;;  %v12870_v14 = vmax.f32 %v10686_v60, 0.0  ;;  %v451_v42 = vmul.f32 %v10273_v23, %v392_v35  ;;  %v866_v31 = vshll.u32 %v10677_v13, 16  ;;  %v722_v58 = vshll.u32 %v10693_v39, 16  ;;  %v432_v9 = vld [vmem:[#allocation2 + $0x178] sm:$0x3] }
  0xd2   : > { %v719_v34 = vrot.slane %v717_v24, 1  ;;  %v452_v15 = vmul.f32 %v10273_v23, %v393_v57  ;;  %v10704_v33 = vpack.c.bf16 %v561_v59, %v560_v11  ;;  %v601_v2 = vmax.f32 %v547_v40, 0.0 }
  0xd3   : > { %v653_v7 = vsel %vm367_vm0, %v12870_v14, 0.0  ;;  %v509_v29 = vadd.f32 %v10278_v25, %v450_v44  ;;  %v724_v36 = vrot.slane %v722_v58, 1  ;;  %v12962_v24 = vmax.f32 %v10689_v54, 0.0 }
  0xd4   : > { %12961 = vst [vmem:[#allocation36_spill] sm:$0xff] %v10704_v33  ;;  %v720_v35 = vor.u32 %v719_v34, %v715_v19  ;;  %v510_v57 = vadd.f32 %v10278_v25, %v451_v42  ;;  %v856_v59 = vrot.slane %v854_v61, 1  ;;  %v511_v11 = vadd.f32 %v10278_v25, %v452_v15  ;;  %v394_v15 = vld [vmem:[#allocation2 + $0x48] sm:$0xff] }
  0xd5   : > { %v10713_v45 = vpack.c.bf16 %v12962_v24, %v653_v7  ;;  %v563_v40 = vmax.f32 %v509_v29, 0.0  ;;  %v489_v10 = vmul.f32 %v10273_v23, %v430_v53  ;;  %v859_v44 = vshrl.u32 %v10666_v52, 16  ;;  %v9873_v29 = vld [vmem:[#allocation6] ss:$0 sm:$0xff]  ;;  %v9874_v7 = vld [vmem:[%s12826_s2] ss:$0 sm:$0xff] }
  0xd6   : > { %v10723_v19 = vsel %vm701_vm2, %v720_v35, %v724_v36  ;;  %v655_v34 = vsel %vm378_vm1, %v601_v2, 0.0  ;;  %v564_v25 = vmax.f32 %v510_v57, 0.0  ;;  %v565_v23 = vmax.f32 %v511_v11, 0.0  ;;  %v396_v11 = vld [vmem:[#allocation2 + $0x58] sm:$0x3] }
  0xd7   : > { %v873_v42 = vshll.u32 %v10713_v45, 16  ;;  %1661 = vmatprep.mubr.bf16.mxu0 %v10723_v19  ;;  %v617_v61 = vsel %vm367_vm0, %v563_v40, 0.0  ;;  %v490_v58 = vmul.f32 %v9873_v29, %v431_v16  ;;  %v863_v53 = vrot.slane %v861_v55, 1 }
  0xd8   : > { %7080 = vmatmul.mubr.msk.bf16.gmra.mrb[24].mxu1 %vm10359_vm4, %v10644_v50  ;;  %v868_v36 = vrot.slane %v866_v31, 1  ;;  %7053 = vmatmul.mubr.msk.bf16.gmra.mrb[4].mxu0 %vm10359_vm4, %v10704_v33  ;;  %v491_v2 = vmul.f32 %v9873_v29, %v432_v9  ;;  %v10738_v35 = vadd.f32 %v9874_v7, %v489_v10  ;;  %v10740_v24 = vpack.c.bf16 %v655_v34, %v655_v34  ;;  %v395_v31 = vld [vmem:[#allocation2 + $0x50] sm:$0xff] }
  0xd9   : > { %1741 = vmatprep.mubr.bf16.mxu1 %v10656_v12  ;;  %v619_v57 = vsel %vm378_vm1, %v565_v23, 0.0  ;;  %v10744_v16 = vpack.c.bf16 %v564_v25, %v617_v61  ;;  %v10746_v55 = vadd.f32 %v9874_v7, %v490_v58  ;;  %v871_v14 = vshrl.u32 %v10713_v45, 16 }
  0xda   : > { %v875_v9 = vrot.slane %v873_v42, 1  ;;  %v10749_v50 = vpack.c.bf16 %v619_v57, %v619_v57  ;;  %v550_v12 = vadd.f32 %v9874_v7, %v491_v2  ;;  %v12882_v47 = vmax.f32 %v10738_v35, 0.0 }
  0xdb   : > { %v727_v10 = vshrl.u32 %v10744_v16, 16  ;;  %v729_v34 = vshll.u32 %v10744_v16, 16  ;;  %v10757_v61 = vsel %vm701_vm2, %v10668_v6, %v856_v59  ;;  %v453_v56 = vmul.f32 %v9873_v29, %v394_v15 }
  0xdc   : > { %v734_v58 = vshll.u32 %v10749_v50, 16  ;;  %v604_v33 = vmax.f32 %v550_v12, 0.0  ;;  %v656_v2 = vsel %vm367_vm0, %v12882_v47, 0.0  ;;  %v454_v57 = vmul.f32 %v9873_v29, %v395_v31 }
  0xdd   : > { %v731_v42 = vrot.slane %v729_v34, 1  ;;  %v864_v23 = vor.u32 %v863_v53, %v859_v44  ;;  %v878_v51 = vshll.u32 %v10740_v24, 16  ;;  %v455_v59 = vmul.f32 %v9873_v29, %v396_v11 }
  0xde   : > { %v736_v6 = vrot.slane %v734_v58, 1  ;;  %v10769_v15 = vpack.c.bf16 %v564_v25, %v563_v40  ;;  %v512_v34 = vadd.f32 %v9874_v7, %v453_v56  ;;  %v513_v27 = vadd.f32 %v9874_v7, %v454_v57 }
  0xdf   : > { %v732_v12 = vor.u32 %v731_v42, %v727_v10  ;;  %v12963_v18 = vmax.f32 %v10746_v55, 0.0  ;;  %v514_v31 = vadd.f32 %v9874_v7, %v455_v59  ;;  %v658_v44 = vsel %vm378_vm1, %v604_v33, 0.0 }
  0xe0   : > { %7083 = vmatmul.mubr.msk.bf16.gmra.mrb[28].mxu1 %vm10359_vm4, %v10662_v1  ;;  %v566_v53 = vmax.f32 %v512_v34, 0.0  ;;  %v567_v29 = vmax.f32 %v513_v27, 0.0  ;;  %v12964_v11 = vmax.f32 %v10577_v22, 0.0  ;;  %v12965_v40 = vmax.f32 %v10580_v17, 0.0 }
  0xe1   : > { %1749 = vmatprep.mubr.bf16.mxu1 %v10757_v61  ;;  %v10773_v47 = vpack.c.bf16 %v12963_v18, %v656_v2  ;;  %v10776_v63 = vsel %vm701_vm2, %v732_v12, %v736_v6  ;;  %v568_v56 = vmax.f32 %v514_v31, 0.0  ;;  %v10788_v18 = vsel %vm701_vm2, %v864_v23, %v868_v36  ;;  %v328_v12 = vld [vmem:[%s10254_s25 + $0xf0] sm:$0xff] }
  0xe2   : > { %v10784_v25 = vpack.c.bf16 %v12965_v40, %v12964_v11  ;;  %1669 = vmatprep.mubr.bf16.mxu0 %v10776_v63  ;;  %v876_v7 = vor.u32 %v875_v9, %v871_v14  ;;  %v880_v10 = vrot.slane %v878_v51, 1  ;;  %v620_v27 = vsel %vm367_vm0, %v566_v53, 0.0  ;;  %361 = vst [vmem:[#allocation2 + $0x181] sm:$0xff] %v328_v12 }
  0xe3   : > { %7056 = vmatmul.mubr.msk.bf16.gmra.mrb[8].mxu0 %vm10359_vm4, %v10769_v15  ;;  %v10795_v22 = vpack.c.bf16 %v658_v44, %v658_v44  ;;  %v885_v17 = vshll.u32 %v10773_v47, 16  ;;  %v622_v33 = vsel %vm378_vm1, %v568_v56, 0.0  ;;  %v10800_v58 = vpack.c.bf16 %v567_v29, %v620_v27  ;;  %v329_v44 = vld [vmem:[%s10254_s25 + $0xf8] sm:$0xff]  ;;  %s6872_s25 = sshll.u32 %s12711_s23, 4  ;;  %s12777_s25 = int_to_ptr.vmem [resolvable:$true] %s6872_s25 }
  0xe4   : > { %v10802_v36 = vpack.c.bf16 %v622_v33, %v622_v33  ;;  %v946_v9 = vrot.slane %v10679_v32, 1  ;;  %v947_v23 = vrot.slane %v10693_v39, 1  ;;  %v12966_v42 = vmax.f32 %v10607_v48, 0.0  ;;  %362 = vst [vmem:[#allocation2 + $0x189] sm:$0xff] %v329_v44  ;;  %s9968_s20 = scalar_lea.vmem %s12777_s25, 4096  ;;  %p9975_p2 = scmp.lt.s32.totalorder %s12777_s25, %s9973_s6 }
  0xe5   : > { %v739_v51 = vshrl.u32 %v10800_v58, 16  ;;  %v741_v14 = vshll.u32 %v10800_v58, 16  ;;  %v12967_v2 = vmax.f32 %v10610_v8, 0.0  ;;  %v10819_v6 = vsel %vm701_vm2, %v876_v7, %v880_v10  ;;  %p9969_p8 = scmp.ne.s32.totalorder %s12777_s25, %s9968_s20  ;;  %p9976_p0 = scmp.lt.s32.totalorder %s9974_s30, %s9968_s20 }
  0xe6   : > { %v746_v59 = vshll.u32 %v10802_v36, 16  ;;  %v883_v34 = vshrl.u32 %v10773_v47, 16  ;;  %v887_v32 = vrot.slane %v885_v17, 1  ;;  %v890_v39 = vshll.u32 %v10795_v22, 16 }
  0xe7   : > { %v10816_v57 = vpack.c.bf16 %v12967_v2, %v12966_v42  ;;  %v743_v31 = vrot.slane %v741_v14, 1  ;;  %v949_v8 = vrot.slane %v10744_v16, 1  ;;  %v964_v11 = vrot.slane %v10420_v38, 1  ;;  %p9970_p5 = pnand %p9969_p8, %p13028_p4  ;;  %p9977_p9 = por %p9976_p0, %p9975_p2 }
  0xe8   : > { %7086 = vmatmul.mubr.msk.bf16.gmra.mrb[32].mxu1 %vm10359_vm4, %v10784_v25  ;;  %v748_v48 = vrot.slane %v746_v59, 1  ;;  %v965_v40 = vrot.slane %v10433_v46, 1  ;;  %v10829_v7 = vpack.c.bf16 %v567_v29, %v566_v53  ;;  %v10832_v10 = vsel %vm942_vm5, %v946_v9, %v947_v23 }
  0xe9   : > { %1757 = vmatprep.mubr.bf16.mxu1 %v10788_v18  ;;  %v744_v56 = vor.u32 %v743_v31, %v739_v51  ;;  %v967_v27 = vrot.slane %v10458_v20, 1  ;;  %v968_v33 = vrot.slane %v10463_v37, 1  ;;  %v970_v16 = vrot.slane %v10492_v3, 1  ;;  %p9971_p10 = pneg %p9970_p5 }
  0xea   : > { %v10836_v17 = vsel %vm942_vm5, %v964_v11, %v965_v40  ;;  %v971_v38 = vrot.slane %v10504_v26, 1  ;;  %v973_v53 = vrot.slane %v10535_v4, 1  ;;  %v974_v29 = vrot.slane %v10542_v28, 1 }
  0xeb   : > { %v10842_v46 = vsel %vm701_vm2, %v744_v56, %v748_v48  ;;  %v976_v51 = vrot.slane %v10569_v0, 1  ;;  %v10849_v20 = vsel %vm942_vm5, %v967_v27, %v968_v33  ;;  %v977_v3 = vrot.slane %v10582_v5, 1  ;;  %v12975_v56 = vld [vmem:[#allocation18_spill] sm:$0xff]  ;;  %v12976_v27 = vld [vmem:[#allocation19_spill] sm:$0xff]  ;;  %v12977_v33 = vld [vmem:[#allocation21_spill] sm:$0xff]  ;;  %p9978_p6 = pnand %p9977_p9, %p9971_p10 }
  0xec   : > { %1677 = vmatprep.mubr.bf16.mxu0 %v10842_v46  ;;  %v10852_v37 = vsel %vm942_vm5, %v970_v16, %v971_v38  ;;  %v979_v26 = vrot.slane %v10604_v49, 1  ;;  %v10863_v4 = vsel %vm942_vm5, %v973_v53, %v974_v29  ;;  %v980_v28 = vrot.slane %v10646_v41, 1  ;;  %v12978_v16 = vld [vmem:[#allocation22_spill] sm:$0xff]  ;;  %v9706_v38 = vld [vmem:[#allocation8 + $0x180] sm:$0xff]  }
  0xed   : > { %7059 = vmatmul.mubr.msk.bf16.gmra.mrb[12].mxu0 %vm10359_vm4, %v10829_v7  ;;  %v982_v0 = vrot.slane %v10666_v52, 1  ;;  %v983_v14 = vrot.slane %v10677_v13, 1  ;;  %v892_v5 = vrot.slane %v890_v39, 1  ;;  %v10871_v49 = vsel %vm942_vm5, %v976_v51, %v977_v3  ;;  %v9707_v53 = vld [vmem:[#allocation8 + $0x1c8] sm:$0xff]   ;;  %v9709_v3 = vld [vmem:[#allocation8 + $0x1d0] sm:$0xff]  }
  0xee   : > { %1975 = vmatprep.mubr.bf16.mxu0 %v10832_v10  ;;  %v985_v9 = vrot.slane %v10713_v45, 1  ;;  %v986_v23 = vrot.slane %v10740_v24, 1  ;;  %v888_v42 = vor.u32 %v887_v32, %v883_v34  ;;  %v950_v2 = vrot.slane %v10749_v50, 1  ;;  %v9708_v29 = vld [vmem:[#allocation8 + $0x188] sm:$0xff]  }
  0xef   : > { %v10877_v41 = vsel %vm942_vm5, %v979_v26, %v980_v28  ;;  %v10880_v52 = vsel %vm942_vm5, %v982_v0, %v983_v14  ;;  %v12968_v59 = vmax.f32 %v10686_v60, 0.0  ;;  %v12969_v12 = vmax.f32 %v10689_v54, 0.0  ;;  %v9710_v26 = vld [vmem:[#allocation8 + $0x190] sm:$0xff]   ;;  %v9711_v28 = vld [vmem:[#allocation8 + $0x1d8] sm:$0xff]  }
  0xf0   : > { %7089 = vmatmul.mubr.msk.bf16.gmra.mrb[36].mxu1 %vm10359_vm4, %v10816_v57  ;;  %v10883_v13 = vsel %vm942_vm5, %v985_v9, %v986_v23  ;;  %v10892_v45 = vsel %vm701_vm2, %v888_v42, %v892_v5  ;;  %v10895_v50 = vsel %vm942_vm5, %v949_v8, %v950_v2  ;;  %v988_v24 = vrot.slane %v10773_v47, 1  ;;  %v12974_v8 = vld [vmem:[#allocation16_spill] sm:$0xff]  ;;  %v9713_v9 = vld [vmem:[#allocation8 + $0x1e0] sm:$0xff]   ;;  %v9715_v42 = vld [vmem:[#allocation8 + $0x1e8] sm:$0xff]  }
  0xf1   : > { %1765 = vmatprep.mubr.bf16.mxu1 %v10819_v6  ;;  %v10889_v39 = vpack.c.bf16 %v12969_v12, %v12968_v59  ;;  %v989_v34 = vrot.slane %v10795_v22, 1  ;;  %v952_v54 = vrot.slane %v10800_v58, 1  ;;  %v953_v32 = vrot.slane %v10802_v36, 1  ;;  %v12980_v14 = vld [vmem:[#allocation20_spill] sm:$0xff]  ;;  %v9714_v23 = vld [vmem:[#allocation8 + $0x1a0] sm:$0xff]   ;;  %v9716_v59 = vld [vmem:[#allocation8 + $0x1a8] sm:$0xff]  }
  0xf2   : > { %v12970_v47 = vmax.f32 %v10738_v35, 0.0  ;;  %v12971_v22 = vmax.f32 %v10746_v55, 0.0  ;;  %v12972_v44 = vmov 0.0|0.0   ;;  %v956_v11 = vrot.slane %v12974_v8, 1  ;;  %v9712_v5 = vld [vmem:[#allocation8 + $0x198] sm:$0xff]   ;;  %v12982_v12 = vld [vmem:[#allocation17_spill] sm:$0xff] }
  0xf3   : > { %v10904_v60 = vsel %vm942_vm5, %v988_v24, %v989_v34  ;;  %v10917_v48 = vrot.slane %v12972_v44, 1  ;;  %v10922_v40 = vsel %vm942_vm5, %v952_v54, %v953_v32  ;;  %v958_v58 = vrot.slane %v12975_v56, 1  ;;  %v9717_v24 = vld [vmem:[#allocation8 + $0x1f0] sm:$0xff]   ;;  %v9719_v54 = vld [vmem:[#allocation8 + $0x1f8] sm:$0xff]   ;;  %v12983_v32 = vld [vmem:[#allocation25_spill] sm:$0xff] }
  0xf4   : > { %v10914_v31 = vpack.c.bf16 %v12971_v22, %v12970_v47  ;;  %v959_v36 = vrot.slane %v12976_v27, 1  ;;  %v961_v35 = vrot.slane %v12977_v33, 1  ;;  %v962_v55 = vrot.slane %v12978_v16, 1  ;;  %v9718_v34 = vld [vmem:[#allocation8 + $0x1b0] sm:$0xff]   ;;  %v9720_v47 = vld [vmem:[#allocation8 + $0x1b8] sm:$0xff]   ;;  %v12986_v8 = vld [vmem:[#allocation26_spill] sm:$0xff] }
  0xf5   : > { %1976 = vmatmul.mubr.bf16.vlgmr.msra.gmra.mrb[16].mxu0 %v10723_v19  ;;  %12973 = vst [vmem:[#allocation37_spill] sm:$0xff] %v10917_v48  ;;  %v955_v19 = vrot.slane %v10312_v62, 1  ;;  %v12979_v62 = vld [vmem:[#allocation36_spill] sm:$0xff]  ;;  %v12989_v27 = vld [vmem:[#allocation31_spill] sm:$0xff]  ;;  %v12991_v33 = vld [vmem:[#allocation34_spill] sm:$0xff] }
  0xf6   : > { %1983 = vmatprep.mubr.bf16.mxu0 %v10895_v50  ;;  %v10946_v0 = vsel %vm942_vm5, %v958_v58, %v959_v36  ;;  %v10955_v2 = vsel %vm942_vm5, %v961_v35, %v962_v55  ;;  %v12984_v22 = vld [vmem:[#allocation24_spill] sm:$0xff]  ;;  %v9721_v58 = vld [vmem:[#allocation8 + $0x200] sm:$0xff]   ;;  %v12990_v36 = vld [vmem:[#allocation30_spill] sm:$0xff] }
  0xf7   : > { %v10937_v51 = vsel %vm942_vm5, %v955_v19, %v956_v11  ;;  %v12985_v19 = vld [vmem:[#allocation27_spill] sm:$0xff]  ;;  %v12987_v11 = vld [vmem:[#allocation29_spill] sm:$0xff]  ;;  %v12988_v56 = vld [vmem:[#allocation28_spill] sm:$0xff]  ;;  %9036 = vmatprep.subr.bf16.mxu0 %v9721_v58 }
  0xf8   : > { %7092 = vmatmul.mubr.msk.bf16.gmra.mrb[40].mxu1 %vm10359_vm4, %v10889_v39  ;;  %9037 = vmatpush3.bf16.msra.mxu0 %v9721_v58  ;;  %v12992_v35 = vld [vmem:[#allocation32_spill] sm:$0xff]  ;;  %v9722_v16 = vld [vmem:[#allocation8 + $0x208] sm:$0xff]   ;;  %v12993_v55 = vld [vmem:[#allocation35_spill] sm:$0xff] }
  0xf9   : > { %1773 = vmatprep.mubr.bf16.mxu1 %v10892_v45  ;;  %9038 = vmatprep.subr.bf16.mxu0 %v9722_v16 }
  0xfc   : > { %9039 = vmatpush3.bf16.msra.mxu0 %v9722_v16 }
  0xfd   : > { %1984 = vmatmul.mubr.bf16.gmra.mrb[20].mxu0 %v10776_v63 }
  0xfe   : > { %1991 = vmatprep.mubr.bf16.mxu0 %v10922_v40 }
 0x100   : > { %7095 = vmatmul.mubr.msk.bf16.gmra.mrb[44].mxu1 %vm10359_vm4, %v10914_v31 }
 0x101   : > { %7098 = vmatprep.mubr.msk.bf16.mxu1 %vm10359_vm4, %v12979_v62  ;;  %v12994_v62 = vld [vmem:[#allocation33_spill] sm:$0xff] }
 0x105   : > { %1992 = vmatmul.mubr.bf16.gmra.mrb[24].mxu0 %v10842_v46 }
 0x106   : > { %1999 = vmatprep.mubr.bf16.mxu0 %v10937_v51 }
 0x108   : > { %1815 = vmatmul.mubr.bf16.vlgmr.msra.gmra.mrb[48].mxu1 %v10917_v48 }
 0x109   : > { %7957 = vmatpush3.bf16.msra.mxu1 %v9706_v38  ;;  %7101 = vmatprep.mubr.msk.bf16.mxu1 %vm10359_vm4, %v10769_v15  ;;  %v433_v38 = vld [vmem:[#allocation2 + $0x180] sm:$0xff] }
 0x10a   : > { %7958 = vmatprep.subr.bf16.mxu1 %v9707_v53  ;;  %v435_v53 = vld [vmem:[#allocation2 + $0x190] sm:$0x3] }
 0x10d   : > { %7959 = vmatpush3.bf16.msra.mxu1 %v9708_v29  ;;  %2000 = vmatmul.mubr.bf16.gmra.mrb[28].mxu0 %v12980_v14  ;;  %v434_v29 = vld [vmem:[#allocation2 + $0x188] sm:$0xff] }
 0x10e   : > { %7960 = vmatprep.subr.bf16.mxu1 %v9709_v3  ;;  %2007 = vmatprep.mubr.bf16.mxu0 %v10946_v0  ;;  %v9875_v3 = vld [vmem:[#allocation6] ss:$0 sm:$0xff] }
 0x110   : > { %1823 = vmatmul.mubr.bf16.gmra.mrb[52].mxu1 %v10832_v10  ;;  %v12981_v10 = vld [vmem:[#allocation23_spill] sm:$0xff] }
 0x111   : > { %7104 = vmatprep.mubr.msk.bf16.mxu1 %vm10359_vm4, %v10829_v7  ;;  %7961 = vmatpush3.bf16.msra.mxu1 %v9710_v26  ;;  %v492_v26 = vmul.f32 %v9875_v3, %v433_v38 }
 0x112   : > { %7962 = vmatprep.subr.bf16.mxu1 %v9711_v28  ;;  %v494_v28 = vmul.f32 %v9875_v3, %v435_v53 }
 0x115   : > { %7963 = vmatpush3.bf16.msra.mxu1 %v9712_v5  ;;  %2008 = vmatmul.mubr.bf16.gmra.mrb[32].mxu0 %v12981_v10  ;;  %v493_v5 = vmul.f32 %v9875_v3, %v434_v29 }
 0x116   : > { %7964 = vmatprep.subr.bf16.mxu1 %v9713_v9  ;;  %2015 = vmatprep.mubr.bf16.mxu0 %v10955_v2  ;;  %v9876_v9 = vld [vmem:[%s12826_s2] ss:$0 sm:$0xff] }
 0x118   : > { %1831 = vmatmul.mubr.bf16.gmra.mrb[56].mxu1 %v10895_v50 }
 0x119   : > { %7107 = vmatprep.mubr.msk.bf16.mxu1 %vm10359_vm4, %v12982_v12  ;;  %7965 = vmatpush3.bf16.msra.mxu1 %v9714_v23  ;;  %v551_v23 = vadd.f32 %v9876_v9, %v492_v26 }
 0x11a   : > { %7966 = vmatprep.subr.bf16.mxu1 %v9715_v42  ;;  %v553_v42 = vadd.f32 %v9876_v9, %v494_v28 }
 0x11d   : > { %7967 = vmatpush3.bf16.msra.mxu1 %v9716_v59  ;;  %2016 = vmatmul.mubr.bf16.gmra.mrb[36].mxu0 %v12983_v32  ;;  %v552_v59 = vadd.f32 %v9876_v9, %v493_v5 }
 0x11e   : > { %7968 = vmatprep.subr.bf16.mxu1 %v9717_v24  ;;  %2023 = vmatprep.mubr.bf16.mxu0 %v10836_v17  ;;  %v605_v24 = vmax.f32 %v551_v23, 0.0 }
 0x120   : > { %1839 = vmatmul.mubr.bf16.gmra.mrb[60].mxu1 %v10922_v40  ;;  %v659_v58 = vsel %vm367_vm0, %v605_v24, 0.0 }
 0x121   : > { %7110 = vmatprep.mubr.msk.bf16.mxu1 %vm10359_vm4, %v12984_v22  ;;  %7969 = vmatpush3.bf16.msra.mxu1 %v9718_v34  ;;  %v607_v34 = vmax.f32 %v553_v42, 0.0 }
 0x122   : > { %7970 = vmatprep.subr.bf16.mxu1 %v9719_v54  ;;  %v9723_v54 = vld [vmem:[#allocation8 + $0x210] sm:$0xff]  }
 0x123   : > { %9040 = vmatprep.subr.bf16.mxu0 %v9723_v54  ;;  %v661_v16 = vsel %vm378_vm1, %v607_v34, 0.0  ;;  %v9724_v34 = vld [vmem:[#allocation8 + $0x218] sm:$0xff]  }
 0x124   : > { %9041 = vmatpush3.bf16.msra.mxu0 %v9723_v54  ;;  %v698_v53 = vpack.c.bf16 %v661_v16, %v661_v16 }
 0x125   : > { %7971 = vmatpush3.bf16.msra.mxu1 %v9720_v47  ;;  %2024 = vmatmul.mubr.bf16.gmra.mrb[40].mxu0 %v12985_v19  ;;  %v606_v47 = vmax.f32 %v552_v59, 0.0 }
 0x126   : > { %2031 = vmatprep.mubr.bf16.mxu0 %v10849_v20  ;;  %v1023_v26 = vrot.slane %v698_v53, 1  ;;  %v1015_v9 = vshll.u32 %v698_v53, 16  ;;  %9042 = vmatprep.subr.bf16.mxu0 %v9724_v34 }
 0x127   : > { %v697_v38 = vpack.c.bf16 %v606_v47, %v659_v58 }
 0x128   : > { %1847 = vmatmul.mubr.bf16.gmra.mrb[64].mxu1 %v10937_v51  ;;  %v1017_v59 = vrot.slane %v1015_v9, 1  ;;  %9043 = vmatpush3.bf16.msra.mxu0 %v9724_v34 }
 0x129   : > { %7113 = vmatprep.mubr.msk.bf16.mxu1 %vm10359_vm4, %v12986_v8  ;;  %v1010_v29 = vshll.u32 %v697_v38, 16  ;;  %v1022_v3 = vrot.slane %v697_v38, 1  ;;  %v1008_v28 = vshrl.u32 %v697_v38, 16  ;;  %v11042_v38 = vpack.c.bf16 %v606_v47, %v605_v24 }
 0x12b   : > { %v1012_v5 = vrot.slane %v1010_v29, 1  ;;  %v11025_v23 = vsel %vm942_vm5, %v1022_v3, %v1023_v26 }
 0x12d   : > { %2032 = vmatmul.mubr.bf16.gmra.mrb[44].mxu0 %v12987_v11  ;;  %v1013_v42 = vor.u32 %v1012_v5, %v1008_v28  ;;  %v9725_v28 = vld [vmem:[#allocation8 + $0x280] sm:$0xff]  }
 0x12e   : > { %2039 = vmatprep.mubr.bf16.mxu0 %v10852_v37  ;;  %8092 = vmatprep.subr.bf16.mxu1 %v9725_v28  ;;  %v9727_v5 = vld [vmem:[#allocation8 + $0x220] sm:$0xff]  }
 0x12f   : > { %v11034_v54 = vsel %vm701_vm2, %v1013_v42, %v1017_v59  ;;  %9044 = vmatprep.subr.bf16.mxu0 %v9727_v5 }
 0x130   : > { %1855 = vmatmul.mubr.bf16.gmra.mrb[68].mxu1 %v10946_v0  ;;  %9045 = vmatpush3.bf16.msra.mxu0 %v9727_v5  ;;  %v9728_v5 = vld [vmem:[#allocation8 + $0x288] sm:$0xff]  }
 0x131   : > { %7116 = vmatprep.mubr.msk.bf16.mxu1 %vm10359_vm4, %v12988_v56 }
 0x135   : > { %2040 = vmatmul.mubr.bf16.gmra.mrb[48].mxu0 %v12989_v27 }
 0x136   : > { %2047 = vmatprep.mubr.bf16.mxu0 %v10863_v4 }
 0x138   : > { %1863 = vmatmul.mubr.bf16.gmra.mrb[72].mxu1 %v10955_v2 }
 0x139   : > { %7119 = vmatprep.mubr.msk.bf16.mxu1 %vm10359_vm4, %v12990_v36 }
 0x13d   : > { %2048 = vmatmul.mubr.bf16.gmra.mrb[52].mxu0 %v12991_v33 }
 0x13e   : > { %2055 = vmatprep.mubr.bf16.mxu0 %v10871_v49 }
 0x140   : > { %1871 = vmatmul.mubr.bf16.gmra.mrb[76].mxu1 %v10836_v17 }
 0x141   : > { %7122 = vmatprep.mubr.msk.bf16.mxu1 %vm10359_vm4, %v12992_v35 }
 0x145   : > { %2056 = vmatmul.mubr.bf16.gmra.mrb[56].mxu0 %v12993_v55 }
 0x146   : > { %2063 = vmatprep.mubr.bf16.mxu0 %v10877_v41 }
 0x148   : > { %1879 = vmatmul.mubr.bf16.gmra.mrb[80].mxu1 %v10849_v20 }
 0x149   : > { %7125 = vmatprep.mubr.msk.bf16.mxu1 %vm10359_vm4, %v12994_v62 }
 0x14d   : > { %2064 = vmatmul.mubr.bf16.gmra.mrb[60].mxu0 %v10757_v61 }
 0x14e   : > { %2071 = vmatprep.mubr.bf16.mxu0 %v10880_v52 }
 0x150   : > { %1887 = vmatmul.mubr.bf16.gmra.mrb[84].mxu1 %v10852_v37 }
 0x151   : > { %7128 = vmatprep.mubr.msk.bf16.mxu1 %vm10359_vm4, %v10662_v1 }
 0x155   : > { %2072 = vmatmul.mubr.bf16.gmra.mrb[64].mxu0 %v10788_v18 }
 0x156   : > { %2079 = vmatprep.mubr.bf16.mxu0 %v10883_v13 }
 0x158   : > { %1895 = vmatmul.mubr.bf16.gmra.mrb[88].mxu1 %v10863_v4 }
 0x159   : > { %7131 = vmatprep.mubr.msk.bf16.mxu1 %vm10359_vm4, %v10784_v25 }
 0x15d   : > { %2080 = vmatmul.mubr.bf16.gmra.mrb[68].mxu0 %v10819_v6 }
 0x15e   : > { %2087 = vmatprep.mubr.bf16.mxu0 %v10904_v60 }
 0x160   : > { %1903 = vmatmul.mubr.bf16.gmra.mrb[92].mxu1 %v10871_v49 }
 0x161   : > { %7134 = vmatprep.mubr.msk.bf16.mxu1 %vm10359_vm4, %v10816_v57 }
 0x165   : > { %2088 = vmatmul.mubr.bf16.gmra.mrb[72].mxu0 %v10892_v45 }
 0x166   : > { %2095 = vmatprep.mubr.bf16.mxu0 %v11025_v23 }
 0x168   : > { %1911 = vmatmul.mubr.bf16.gmra.mrb[96].mxu1 %v10877_v41 }
 0x169   : > { %7137 = vmatprep.mubr.msk.bf16.mxu1 %vm10359_vm4, %v10889_v39  ;;  %v7636_v58 = vpop.f32.mrb[0].mxu0 }
 0x16a   : > { %v7637_v16 = vpop.f32.mrb[1].mxu0 }
 0x16b   : > { %v11044_v53 = vadd.f32 %v7637_v16, %v7636_v58  ;;  %v7639_v29 = vpop.f32.mrb[2].mxu0 }
 0x16c   : > { %v7640_v3 = vpop.f32.mrb[3].mxu0 }
 0x16d   : > { %2096 = vmatmul.mubr.bf16.gmra.mrb[76].mxu0 %v11034_v54  ;;  %v11046_v26 = vadd.f32 %v7640_v3, %v7639_v29  ;;  %v9726_v3 = vld [vmem:[#allocation8 + $0x240] sm:$0xff]  }
 0x16e   : > { %9052 = vmatprep.mubr.bf16.mxu0 %v10895_v50 }
 0x170   : > { %1919 = vmatmul.mubr.bf16.gmra.mrb[100].mxu1 %v10880_v52 }
 0x171   : > { %7140 = vmatprep.mubr.msk.bf16.mxu1 %vm10359_vm4, %v10914_v31 }
 0x178   : > { %1927 = vmatmul.mubr.bf16.gmra.mrb[104].mxu1 %v10883_v13 }
 0x179   : > { %7143 = vmatprep.mubr.msk.bf16.mxu1 %vm10359_vm4, %v11042_v38 }
 0x17b   : > { %v7660_v50 = vpop.f32.mrb[0].mxu1 }
 0x17c   : > { %v7661_v9 = vpop.f32.mrb[1].mxu1 }
 0x17d   : > { %v11052_v24 = vadd.f32 %v7661_v9, %v7660_v50  ;;  %v7663_v47 = vpop.f32.mrb[2].mxu1  ;;  %v9729_v50 = vld [vmem:[#allocation8 + $0x248] sm:$0xff]  }
 0x17e   : > { %v7664_v42 = vpop.f32.mrb[3].mxu1  ;;  %v9730_v9 = vld [vmem:[#allocation8 + $0x228] sm:$0xff]  }
 0x17f   : > { %v11054_v59 = vadd.f32 %v7664_v42, %v7663_v47  ;;  %9046 = vmatprep.subr.bf16.mxu0 %v9730_v9 }
 0x180   : > { %1935 = vmatmul.mubr.bf16.gmra.mrb[108].mxu1 %v10904_v60  ;;  %9047 = vmatpush3.bf16.msra.mxu0 %v9730_v9 }
 0x181   : > { %2136 = vmatprep.mubr.bf16.mxu1 %v10776_v63 }
 0x183   : > { %v7666_v34 = vpop.f32.mrb[4].mxu1 }
 0x184   : > { %v7667_v58 = vpop.f32.mrb[5].mxu1 }
 0x185   : > { %v11058_v16 = vadd.f32 %v7667_v58, %v7666_v34  ;;  %v7669_v29 = vpop.f32.mrb[6].mxu1 }
 0x186   : > { %v7670_v28 = vpop.f32.mrb[7].mxu1 }
 0x187   : > { %v11060_v30 = vadd.f32 %v7670_v28, %v7669_v29 }
 0x188   : > { %7146 = vmatmul.mubr.msk.bf16.vlgmr.msra.gmra.mrb[112].mxu1 %vm10359_vm4, %v10769_v15 }
 0x189   : > { %2144 = vmatprep.mubr.bf16.mxu1 %v10842_v46  ;;  %8093 = vmatpush3.bf16.msra.mxu1 %v9726_v3 }
 0x18a   : > { %8094 = vmatprep.subr.bf16.mxu1 %v9728_v5 }
 0x18b   : > { %v7672_v63 = vpop.f32.mrb[8].mxu1 }
 0x18c   : > { %v7673_v47 = vpop.f32.mrb[9].mxu1 }
 0x18d   : > { %v11066_v42 = vadd.f32 %v7673_v47, %v7672_v63  ;;  %v7675_v34 = vpop.f32.mrb[10].mxu1  ;;  %8095 = vmatpush3.bf16.msra.mxu1 %v9729_v50  ;;  %v9731_v63 = vld [vmem:[#allocation8 + $0x290] sm:$0xff]  }
 0x18e   : > { %v7676_v58 = vpop.f32.mrb[11].mxu1  ;;  %8096 = vmatprep.subr.bf16.mxu1 %v9731_v63  ;;  %v9732_v50 = vld [vmem:[#allocation8 + $0x250] sm:$0xff]  }
 0x18f   : > { %v11068_v29 = vadd.f32 %v7676_v58, %v7675_v34 }
 0x190   : > { %7149 = vmatmul.mubr.msk.bf16.gmra.mrb[116].mxu1 %vm10359_vm4, %v10829_v7  ;;  %v9733_v7 = vld [vmem:[#allocation8 + $0x230] sm:$0xff]  }
 0x191   : > { %2152 = vmatprep.mubr.bf16.mxu1 %v12980_v14  ;;  %8097 = vmatpush3.bf16.msra.mxu1 %v9732_v50 }
 0x192   : > { %9048 = vmatprep.subr.bf16.mxu0 %v9733_v7 }
 0x193   : > { %v7678_v15 = vpop.f32.mrb[12].mxu1  ;;  %9049 = vmatpush3.bf16.msra.mxu0 %v9733_v7  ;;  %v9734_v7 = vld [vmem:[#allocation8 + $0x298] sm:$0xff]  }
 0x194   : > { %v7679_v46 = vpop.f32.mrb[13].mxu1  ;;  %8098 = vmatprep.subr.bf16.mxu1 %v9734_v7 }
 0x195   : > { %v11074_v3 = vadd.f32 %v7679_v46, %v7678_v15  ;;  %v7681_v28 = vpop.f32.mrb[14].mxu1 }
 0x196   : > { %v7682_v5 = vpop.f32.mrb[15].mxu1 }
 0x197   : > { %v11076_v9 = vadd.f32 %v7682_v5, %v7681_v28 }
 0x198   : > { %7152 = vmatmul.mubr.msk.bf16.gmra.mrb[120].mxu1 %vm10359_vm4, %v12982_v12 }
 0x199   : > { %2160 = vmatprep.mubr.bf16.mxu1 %v12981_v10 }
 0x19b   : > { %v7684_v47 = vpop.f32.mrb[16].mxu1 }
 0x19c   : > { %v7685_v14 = vpop.f32.mrb[17].mxu1 }
 0x19d   : > { %v11082_v34 = vadd.f32 %v7685_v14, %v7684_v47  ;;  %v7687_v58 = vpop.f32.mrb[18].mxu1  ;;  %v9735_v47 = vld [vmem:[#allocation8 + $0x258] sm:$0xff]  }
 0x19e   : > { %v7688_v15 = vpop.f32.mrb[19].mxu1  ;;  %8099 = vmatpush3.bf16.msra.mxu1 %v9735_v47 }
 0x19f   : > { %v11084_v46 = vadd.f32 %v7688_v15, %v7687_v58 }
 0x1a0   : > { %7155 = vmatmul.mubr.msk.bf16.gmra.mrb[124].mxu1 %vm10359_vm4, %v12984_v22  ;;  %v9736_v22 = vld [vmem:[#allocation8 + $0x238] sm:$0xff]  }
 0x1a1   : > { %2168 = vmatprep.mubr.bf16.mxu1 %v12983_v32  ;;  %9050 = vmatprep.subr.bf16.mxu0 %v9736_v22 }
 0x1a2   : > { %9051 = vmatpush3.bf16.msra.mxu0 %v9736_v22 }
 0x1a3   : > { %v7690_v10 = vpop.f32.mrb[20].mxu1 }
 0x1a4   : > { %v7691_v12 = vpop.f32.mrb[21].mxu1 }
 0x1a5   : > { %v11090_v28 = vadd.f32 %v7691_v12, %v7690_v10  ;;  %v7693_v5 = vpop.f32.mrb[22].mxu1  ;;  %9053 = vmatmul.mubr.bf16.vlgmr.msra.gmra.mrb[80].mxu0 %v10922_v40  ;;  %v9737_v40 = vld [vmem:[#allocation8 + $0x2a0] sm:$0xff]  }
 0x1a6   : > { %v7694_v63 = vpop.f32.mrb[23].mxu1  ;;  %9056 = vmatprep.mubr.bf16.mxu0 %v10937_v51  ;;  %8100 = vmatprep.subr.bf16.mxu1 %v9737_v40  ;;  %v9741_v40 = vld [vmem:[#allocation8 + $0x308] sm:$0xff]  }
 0x1a7   : > { %v11092_v50 = vadd.f32 %v7694_v63, %v7693_v5 }
 0x1a8   : > { %7158 = vmatmul.mubr.msk.bf16.gmra.mrb[128].mxu1 %vm10359_vm4, %v12986_v8 }
 0x1a9   : > { %2176 = vmatprep.mubr.bf16.mxu1 %v12985_v19 }
 0x1ab   : > { %v7696_v14 = vpop.f32.mrb[24].mxu1  ;;  %v7642_v10 = vpop.f32.mrb[4].mxu0 }
 0x1ac   : > { %v7697_v32 = vpop.f32.mrb[25].mxu1  ;;  %v7643_v5 = vpop.f32.mrb[5].mxu0 }
 0x1ad   : > { %v11098_v58 = vadd.f32 %v7697_v32, %v7696_v14  ;;  %v7699_v15 = vpop.f32.mrb[26].mxu1  ;;  %v11102_v21 = vadd.f32 %v7643_v5, %v7642_v10  ;;  %v7645_v8 = vpop.f32.mrb[6].mxu0  ;;  %9057 = vmatmul.mubr.bf16.gmra.mrb[84].mxu0 %v10946_v0  ;;  %v9740_v0 = vld [vmem:[#allocation8 + $0x2c0] sm:$0xff]  }
 0x1ae   : > { %v7700_v12 = vpop.f32.mrb[27].mxu1  ;;  %v7646_v19 = vpop.f32.mrb[7].mxu0  ;;  %9060 = vmatprep.mubr.bf16.mxu0 %v10955_v2 }
 0x1af   : > { %v11100_v63 = vadd.f32 %v7700_v12, %v7699_v15  ;;  %v11110_v7 = vadd.f32 %v7646_v19, %v7645_v8  ;;  %v9739_v12 = vld [vmem:[#allocation8 + $0x300] sm:$0xff]  }
 0x1b0   : > { %7161 = vmatmul.mubr.msk.bf16.gmra.mrb[132].mxu1 %vm10359_vm4, %v12988_v56  ;;  %v9738_v56 = vld [vmem:[#allocation8 + $0x260] sm:$0xff]   ;;  %8204 = vmatprep.subr.bf16.mxu0 %v9739_v12 }
 0x1b1   : > { %2184 = vmatprep.mubr.bf16.mxu1 %v12987_v11  ;;  %8101 = vmatpush3.bf16.msra.mxu1 %v9738_v56  ;;  %v9742_v56 = vld [vmem:[#allocation8 + $0x2c8] sm:$0xff]  }
 0x1b2   : > { %8205 = vmatpush3.bf16.msra.mxu0 %v9740_v0 }
 0x1b3   : > { %v7702_v47 = vpop.f32.mrb[28].mxu1  ;;  %8206 = vmatprep.subr.bf16.mxu0 %v9741_v40  ;;  %v9745_v40 = vld [vmem:[#allocation8 + $0x310] sm:$0xff]  }
 0x1b4   : > { %v7703_v22 = vpop.f32.mrb[29].mxu1 }
 0x1b5   : > { %v11112_v14 = vadd.f32 %v7703_v22, %v7702_v47  ;;  %v7705_v32 = vpop.f32.mrb[30].mxu1  ;;  %9061 = vmatmul.mubr.bf16.gmra.mrb[88].mxu0 %v10836_v17 }
 0x1b6   : > { %v7706_v15 = vpop.f32.mrb[31].mxu1  ;;  %v7648_v51 = vpop.f32.mrb[8].mxu0  ;;  %9064 = vmatprep.mubr.bf16.mxu0 %v10849_v20  ;;  %8207 = vmatpush3.bf16.msra.mxu0 %v9742_v56  ;;  %v9746_v56 = vld [vmem:[#allocation8 + $0x2d0] sm:$0xff]  }
 0x1b7   : > { %v11114_v10 = vadd.f32 %v7706_v15, %v7705_v32  ;;  %v7649_v11 = vpop.f32.mrb[9].mxu0  ;;  %8208 = vmatprep.subr.bf16.mxu0 %v9745_v40 }
 0x1b8   : > { %7164 = vmatmul.mubr.msk.bf16.gmra.mrb[136].mxu1 %vm10359_vm4, %v12990_v36  ;;  %v11122_v5 = vadd.f32 %v7649_v11, %v7648_v51  ;;  %v7651_v8 = vpop.f32.mrb[10].mxu0 }
 0x1b9   : > { %2192 = vmatprep.mubr.bf16.mxu1 %v12989_v27  ;;  %v7652_v47 = vpop.f32.mrb[11].mxu0 }
 0x1ba   : > { %v11124_v32 = vadd.f32 %v7652_v47, %v7651_v8  ;;  %8209 = vmatpush3.bf16.msra.mxu0 %v9746_v56 }
 0x1bb   : > { %v7708_v19 = vpop.f32.mrb[32].mxu1 }
 0x1bc   : > { %v7709_v22 = vpop.f32.mrb[33].mxu1 }
 0x1bd   : > { %v11126_v36 = vadd.f32 %v7709_v22, %v7708_v19  ;;  %v7711_v2 = vpop.f32.mrb[34].mxu1  ;;  %9065 = vmatmul.mubr.bf16.gmra.mrb[92].mxu0 %v10852_v37 }
 0x1be   : > { %v7712_v27 = vpop.f32.mrb[35].mxu1  ;;  %9068 = vmatprep.mubr.bf16.mxu0 %v10863_v4 }
 0x1bf   : > { %v11128_v15 = vadd.f32 %v7712_v27, %v7711_v2  ;;  %v9744_v27 = vld [vmem:[#allocation8 + $0x268] sm:$0xff]  }
 0x1c0   : > { %7167 = vmatmul.mubr.msk.bf16.gmra.mrb[140].mxu1 %vm10359_vm4, %v12992_v35  ;;  %v7654_v11 = vpop.f32.mrb[12].mxu0 }
 0x1c1   : > { %2200 = vmatprep.mubr.bf16.mxu1 %v12991_v33  ;;  %v7655_v8 = vpop.f32.mrb[13].mxu0  ;;  %v9743_v33 = vld [vmem:[#allocation8 + $0x2a8] sm:$0xff]  }
 0x1c2   : > { %v11138_v0 = vadd.f32 %v7655_v8, %v7654_v11  ;;  %v7657_v17 = vpop.f32.mrb[14].mxu0  ;;  %8102 = vmatprep.subr.bf16.mxu1 %v9743_v33  ;;  %v9747_v33 = vld [vmem:[#allocation8 + $0x318] sm:$0xff]  }
 0x1c3   : > { %v7714_v51 = vpop.f32.mrb[36].mxu1  ;;  %v7658_v35 = vpop.f32.mrb[15].mxu0  ;;  %8103 = vmatpush3.bf16.msra.mxu1 %v9744_v27  ;;  %8210 = vmatprep.subr.bf16.mxu0 %v9747_v33  ;;  %v9751_v33 = vld [vmem:[#allocation8 + $0x320] sm:$0xff]  }
 0x1c4   : > { %v7715_v12 = vpop.f32.mrb[37].mxu1  ;;  %v11142_v20 = vadd.f32 %v7658_v35, %v7657_v17 }
 0x1c5   : > { %v11136_v19 = vadd.f32 %v7715_v12, %v7714_v51  ;;  %v7717_v47 = vpop.f32.mrb[38].mxu1  ;;  %9069 = vmatmul.mubr.bf16.gmra.mrb[96].mxu0 %v10871_v49 }
 0x1c6   : > { %v7718_v22 = vpop.f32.mrb[39].mxu1  ;;  %9072 = vmatprep.mubr.bf16.mxu0 %v10877_v41 }
 0x1c7   : > { %v11140_v2 = vadd.f32 %v7718_v22, %v7717_v47 }
 0x1c8   : > { %7170 = vmatmul.mubr.msk.bf16.gmra.mrb[144].mxu1 %vm10359_vm4, %v12994_v62  ;;  %v7860_v11 = vpop.f32.mrb[16].mxu0 }
 0x1c9   : > { %2208 = vmatprep.mubr.bf16.mxu1 %v12993_v55  ;;  %v7861_v8 = vpop.f32.mrb[17].mxu0 }
 0x1ca   : > { %v7862_v17 = vadd.f32 %v7861_v8, %v7860_v11  ;;  %v7863_v22 = vpop.f32.mrb[18].mxu0 }
 0x1cb   : > { %v7720_v51 = vpop.f32.mrb[40].mxu1  ;;  %v7864_v4 = vpop.f32.mrb[19].mxu0 }
 0x1cc   : > { %v7721_v12 = vpop.f32.mrb[41].mxu1  ;;  %v7865_v55 = vadd.f32 %v7864_v4, %v7863_v22  ;;  %v9749_v4 = vld [vmem:[#allocation8 + $0x2b0] sm:$0xff]  }
 0x1cd   : > { %v11150_v47 = vadd.f32 %v7721_v12, %v7720_v51  ;;  %v7723_v37 = vpop.f32.mrb[42].mxu1  ;;  %v9748_v51 = vld [vmem:[#allocation8 + $0x2d8] sm:$0xff]   ;;  %9073 = vmatmul.mubr.bf16.gmra.mrb[100].mxu0 %v10880_v52  ;;  %8104 = vmatprep.subr.bf16.mxu1 %v9749_v4 }
 0x1ce   : > { %v7724_v62 = vpop.f32.mrb[43].mxu1  ;;  %8211 = vmatpush3.bf16.msra.mxu0 %v9748_v51  ;;  %9076 = vmatprep.mubr.bf16.mxu0 %v10883_v13  ;;  %v9752_v51 = vld [vmem:[#allocation8 + $0x2e0] sm:$0xff]  }
 0x1cf   : > { %v11152_v35 = vadd.f32 %v7724_v62, %v7723_v37  ;;  %8212 = vmatprep.subr.bf16.mxu0 %v9751_v33 }
 0x1d0   : > { %7173 = vmatmul.mubr.msk.bf16.gmra.mrb[148].mxu1 %vm10359_vm4, %v10662_v1  ;;  %v7866_v40 = vpop.f32.mrb[20].mxu0 }
 0x1d1   : > { %2216 = vmatprep.mubr.bf16.mxu1 %v10757_v61  ;;  %v7867_v56 = vpop.f32.mrb[21].mxu0  ;;  %v9750_v61 = vld [vmem:[#allocation8 + $0x270] sm:$0xff]  }
 0x1d2   : > { %v7868_v37 = vadd.f32 %v7867_v56, %v7866_v40  ;;  %v7869_v49 = vpop.f32.mrb[22].mxu0  ;;  %8105 = vmatpush3.bf16.msra.mxu1 %v9750_v61  ;;  %8213 = vmatpush3.bf16.msra.mxu0 %v9752_v51 }
 0x1d3   : > { %v7726_v27 = vpop.f32.mrb[44].mxu1  ;;  %v7870_v62 = vpop.f32.mrb[23].mxu0 }
 0x1d4   : > { %v7727_v11 = vpop.f32.mrb[45].mxu1  ;;  %v7871_v41 = vadd.f32 %v7870_v62, %v7869_v49 }
 0x1d5   : > { %v11160_v12 = vadd.f32 %v7727_v11, %v7726_v27  ;;  %v7729_v8 = vpop.f32.mrb[46].mxu1  ;;  %9077 = vmatmul.mubr.bf16.gmra.mrb[104].mxu0 %v10904_v60 }
 0x1d6   : > { %v7730_v22 = vpop.f32.mrb[47].mxu1  ;;  %9080 = vmatprep.mubr.bf16.mxu0 %v11025_v23 }
 0x1d7   : > { %v11162_v1 = vadd.f32 %v7730_v22, %v7729_v8 }
 0x1d8   : > { %7176 = vmatmul.mubr.msk.bf16.gmra.mrb[152].mxu1 %vm10359_vm4, %v10784_v25  ;;  %v7872_v40 = vpop.f32.mrb[24].mxu0 }
 0x1d9   : > { %2224 = vmatprep.mubr.bf16.mxu1 %v10788_v18  ;;  %v7873_v56 = vpop.f32.mrb[25].mxu0 }
 0x1da   : > { %v7874_v49 = vadd.f32 %v7873_v56, %v7872_v40  ;;  %v7875_v22 = vpop.f32.mrb[26].mxu0 }
 0x1db   : > { %v7748_v27 = vpop.f32.mrb[48].mxu1  ;;  %v7876_v62 = vpop.f32.mrb[27].mxu0 }
 0x1dc   : > { %v7749_v11 = vpop.f32.mrb[49].mxu1  ;;  %v7877_v4 = vadd.f32 %v7876_v62, %v7875_v22  ;;  %v9753_v22 = vld [vmem:[#allocation8 + $0x328] sm:$0xff]  }
 0x1dd   : > { %v7750_v8 = vadd.f32 %v7749_v11, %v7748_v27  ;;  %v7751_v52 = vpop.f32.mrb[50].mxu1  ;;  %8214 = vmatprep.subr.bf16.mxu0 %v9753_v22  ;;  %9081 = vmatmul.mubr.bf16.gmra.mrb[108].mxu0 %v10917_v48  ;;  %v9758_v22 = vld [vmem:[#allocation8 + $0x2f0] sm:$0xff]  }
 0x1de   : > { %v7752_v25 = vpop.f32.mrb[51].mxu1 }
 0x1df   : > { %v1817_v13 = vadd.f32 %v7750_v8, %v11044_v53  ;;  %v7753_v18 = vadd.f32 %v7752_v25, %v7751_v52 }
 0x1e0   : > { %7179 = vmatmul.mubr.msk.bf16.gmra.mrb[156].mxu1 %vm10359_vm4, %v10816_v57  ;;  %v7878_v53 = vpop.f32.mrb[28].mxu0  ;;  %v9754_v57 = vld [vmem:[#allocation8 + $0x2e8] sm:$0xff]  }
 0x1e1   : > { %v1820_v61 = vadd.f32 %v7753_v18, %v11046_v26  ;;  %v11177_v33 = vadd.f32 %v7862_v17, %v1817_v13  ;;  %2232 = vmatprep.mubr.bf16.mxu1 %v10819_v6  ;;  %v7879_v11 = vpop.f32.mrb[29].mxu0  ;;  %8215 = vmatpush3.bf16.msra.mxu0 %v9754_v57 }
 0x1e2   : > { %v7880_v8 = vadd.f32 %v7879_v11, %v7878_v53  ;;  %v7881_v52 = vpop.f32.mrb[30].mxu0 }
 0x1e3   : > { %v11180_v27 = vadd.f32 %v7865_v55, %v1820_v61  ;;  %v7754_v40 = vpop.f32.mrb[52].mxu1  ;;  %v7882_v23 = vpop.f32.mrb[31].mxu0  ;;  %v9755_v61 = vld [vmem:[#allocation8 + $0x2b8] sm:$0xff]  }
 0x1e4   : > { %v7755_v51 = vpop.f32.mrb[53].mxu1  ;;  %v7883_v62 = vadd.f32 %v7882_v23, %v7881_v52  ;;  %8106 = vmatprep.subr.bf16.mxu1 %v9755_v61 }
 0x1e5   : > { %v7756_v56 = vadd.f32 %v7755_v51, %v7754_v40  ;;  %v7757_v60 = vpop.f32.mrb[54].mxu1  ;;  %v9757_v51 = vld [vmem:[#allocation8 + $0x330] sm:$0xff]  }
 0x1e6   : > { %v7758_v25 = vpop.f32.mrb[55].mxu1  ;;  %8216 = vmatprep.subr.bf16.mxu0 %v9757_v51 }
 0x1e7   : > { %v1825_v26 = vadd.f32 %v7756_v56, %v11102_v21  ;;  %v7759_v17 = vadd.f32 %v7758_v25, %v7757_v60  ;;  %8217 = vmatpush3.bf16.msra.mxu0 %v9758_v22  ;;  %v9759_v25 = vld [vmem:[#allocation8 + $0x338] sm:$0xff]  }
 0x1e8   : > { %7182 = vmatmul.mubr.msk.bf16.gmra.mrb[160].mxu1 %vm10359_vm4, %v10889_v39  ;;  %v7884_v21 = vpop.f32.mrb[32].mxu0  ;;  %v9756_v39 = vld [vmem:[#allocation8 + $0x278] sm:$0xff]   ;;  %8218 = vmatprep.subr.bf16.mxu0 %v9759_v25 }
 0x1e9   : > { %v1828_v6 = vadd.f32 %v7759_v17, %v11110_v7  ;;  %v11188_v55 = vadd.f32 %v7868_v37, %v1825_v26  ;;  %2240 = vmatprep.mubr.bf16.mxu1 %v10892_v45  ;;  %v7885_v53 = vpop.f32.mrb[33].mxu0  ;;  %8107 = vmatpush3.bf16.msra.mxu1 %v9756_v39  ;;  %v9760_v17 = vld [vmem:[#allocation8 + $0x2f8] sm:$0xff]   ;;  %v12995_v39 = vld [vmem:[#allocation13_spill] sm:$0xff] }
 0x1ea   : > { %v7886_v60 = vadd.f32 %v7885_v53, %v7884_v21  ;;  %v7887_v52 = vpop.f32.mrb[34].mxu0 }
 0x1eb   : > { %v11191_v13 = vadd.f32 %v7871_v41, %v1828_v6  ;;  %v7760_v18 = vpop.f32.mrb[56].mxu1  ;;  %v7888_v37 = vpop.f32.mrb[35].mxu0  ;;  %8219 = vmatpush3.bf16.msra.mxu0 %v9760_v17 }
 0x1ec   : > { %v7761_v40 = vpop.f32.mrb[57].mxu1  ;;  %v7889_v57 = vadd.f32 %v7888_v37, %v7887_v52 }
 0x1ed   : > { %v7762_v11 = vadd.f32 %v7761_v40, %v7760_v18  ;;  %v7763_v56 = vpop.f32.mrb[58].mxu1 }
 0x1ee   : > { %v7764_v7 = vpop.f32.mrb[59].mxu1 }
 0x1ef   : > { %v1833_v45 = vadd.f32 %v7762_v11, %v11122_v5  ;;  %v7765_v41 = vadd.f32 %v7764_v7, %v7763_v56 }
 0x1f0   : > { %7185 = vmatmul.mubr.msk.bf16.gmra.mrb[164].mxu1 %vm10359_vm4, %v10914_v31  ;;  %v7890_v18 = vpop.f32.mrb[36].mxu0 }
 0x1f1   : > { %v1836_v23 = vadd.f32 %v7765_v41, %v11124_v32  ;;  %v11198_v26 = vadd.f32 %v7874_v49, %v1833_v45  ;;  %2248 = vmatprep.mubr.bf16.mxu1 %v11034_v54  ;;  %v7891_v61 = vpop.f32.mrb[37].mxu0  ;;  %v9761_v45 = vld [vmem:[#allocation8 + $0x380] sm:$0xff]  }
 0x1f2   : > { %v7892_v51 = vadd.f32 %v7891_v61, %v7890_v18  ;;  %v7893_v31 = vpop.f32.mrb[38].mxu0  ;;  %8316 = vmatprep.subr.bf16.mxu1 %v9761_v45  ;;  %v9763_v18 = vld [vmem:[#allocation8 + $0x400] sm:$0xff]  }
 0x1f3   : > { %v11201_v6 = vadd.f32 %v7877_v4, %v1836_v23  ;;  %v7766_v5 = vpop.f32.mrb[60].mxu1  ;;  %v7894_v56 = vpop.f32.mrb[39].mxu0  ;;  %8428 = vmatprep.subr.bf16.mxu0 %v9763_v18 }
 0x1f4   : > { %v7767_v21 = vpop.f32.mrb[61].mxu1  ;;  %v7895_v52 = vadd.f32 %v7894_v56, %v7893_v31 }
 0x1f5   : > { %v7768_v40 = vadd.f32 %v7767_v21, %v7766_v5  ;;  %v7769_v53 = vpop.f32.mrb[62].mxu1 }
 0x1f6   : > { %v7770_v11 = vpop.f32.mrb[63].mxu1 }
 0x1f7   : > { %v1841_v32 = vadd.f32 %v7768_v40, %v11138_v0  ;;  %v7771_v49 = vadd.f32 %v7770_v11, %v7769_v53 }
 0x1f8   : > { %7188 = vmatmul.mubr.msk.bf16.gmra.mrb[168].mxu1 %vm10359_vm4, %v11042_v38  ;;  %v7896_v37 = vpop.f32.mrb[40].mxu0 }
 0x1f9   : > { %v1844_v54 = vadd.f32 %v7771_v49, %v11142_v20  ;;  %v11208_v4 = vadd.f32 %v7880_v8, %v1841_v32  ;;  %2256 = vmatprep.mubr.bf16.mxu1 %v12995_v39  ;;  %v7897_v25 = vpop.f32.mrb[41].mxu0 }
 0x1fa   : > { %v7898_v17 = vadd.f32 %v7897_v25, %v7896_v37  ;;  %v7899_v5 = vpop.f32.mrb[42].mxu0  ;;  %v9762_v37 = vld [vmem:[#allocation8 + $0x340] sm:$0xff]  }
 0x1fb   : > { %v11211_v22 = vadd.f32 %v7883_v62, %v1844_v54  ;;  %v7772_v7 = vpop.f32.mrb[64].mxu1  ;;  %v7900_v21 = vpop.f32.mrb[43].mxu0 }
 0x1fc   : > { %v7773_v41 = vpop.f32.mrb[65].mxu1  ;;  %v7901_v61 = vadd.f32 %v7900_v21, %v7899_v5 }
 0x1fd   : > { %v7774_v0 = vadd.f32 %v7773_v41, %v7772_v7  ;;  %v7775_v23 = vpop.f32.mrb[66].mxu1 }
 0x1fe   : > { %v7776_v38 = vpop.f32.mrb[67].mxu1 }
 0x1ff   : > { %v1849_v20 = vadd.f32 %v7774_v0, %v11052_v24  ;;  %v7777_v8 = vadd.f32 %v7776_v38, %v7775_v23  ;;  %v9765_v38 = vld [vmem:[#allocation8 + $0x388] sm:$0xff]  }
 0x200   : > { %2257 = vmatmul.mubr.bf16.gmra.mrb[172].mxu1 %v12972_v44  ;;  %v7902_v11 = vpop.f32.mrb[44].mxu0 }
 0x201   : > { %v1852_v62 = vadd.f32 %v7777_v8, %v11054_v59  ;;  %v11216_v40 = vadd.f32 %v7886_v60, %v1849_v20  ;;  %3789 = vmatprep.mubr.bf16.mxu1 %v12995_v39  ;;  %v7903_v32 = vpop.f32.mrb[45].mxu0 }
 0x202   : > { %v7904_v24 = vadd.f32 %v7903_v32, %v7902_v11  ;;  %v7905_v7 = vpop.f32.mrb[46].mxu0  ;;  %v9766_v11 = vld [vmem:[#allocation8 + $0x348] sm:$0xff]  }
 0x203   : > { %v11219_v53 = vadd.f32 %v7889_v57, %v1852_v62  ;;  %v7778_v31 = vpop.f32.mrb[68].mxu1  ;;  %v7906_v41 = vpop.f32.mrb[47].mxu0 }
 0x204   : > { %v7779_v56 = vpop.f32.mrb[69].mxu1  ;;  %v7907_v60 = vadd.f32 %v7906_v41, %v7905_v7 }
 0x205   : > { %v7780_v49 = vadd.f32 %v7779_v56, %v7778_v31  ;;  %v7781_v54 = vpop.f32.mrb[70].mxu1 }
 0x206   : > { %v7782_v45 = vpop.f32.mrb[71].mxu1 }
 0x207   : > { %v1857_v25 = vadd.f32 %v7780_v49, %v11058_v16  ;;  %v7783_v59 = vadd.f32 %v7782_v45, %v7781_v54 }
 0x208   : > { %3790 = vmatmul.mubr.bf16.vlgmr.msra.gmra.mrb[176].mxu1 %v12972_v44  ;;  %v7908_v18 = vpop.f32.mrb[48].mxu0 }
 0x209   : > { %v1860_v57 = vadd.f32 %v7783_v59, %v11060_v30  ;;  %v11224_v0 = vadd.f32 %v7892_v51, %v1857_v25  ;;  %8317 = vmatpush3.bf16.msra.mxu1 %v9762_v37  ;;  %v7909_v20 = vpop.f32.mrb[49].mxu0 }
 0x20a   : > { %v7910_v31 = vadd.f32 %v7909_v20, %v7908_v18  ;;  %v7911_v16 = vpop.f32.mrb[50].mxu0  ;;  %8318 = vmatprep.subr.bf16.mxu1 %v9765_v38 }
 0x20b   : > { %v11226_v23 = vadd.f32 %v7895_v52, %v1860_v57  ;;  %v7784_v5 = vpop.f32.mrb[72].mxu1  ;;  %v7912_v32 = vpop.f32.mrb[51].mxu0 }
 0x20c   : > { %v7785_v21 = vpop.f32.mrb[73].mxu1  ;;  %v7913_v49 = vadd.f32 %v7912_v32, %v7911_v16 }
 0x20d   : > { %v7786_v8 = vadd.f32 %v7785_v21, %v7784_v5  ;;  %v7787_v62 = vpop.f32.mrb[74].mxu1  ;;  %8319 = vmatpush3.bf16.msra.mxu1 %v9766_v11  ;;  %v9769_v11 = vld [vmem:[#allocation8 + $0x390] sm:$0xff]  }
 0x20e   : > { %v7788_v56 = vpop.f32.mrb[75].mxu1  ;;  %8320 = vmatprep.subr.bf16.mxu1 %v9769_v11 }
 0x20f   : > { %v1865_v30 = vadd.f32 %v7786_v8, %v11066_v42  ;;  %v7789_v51 = vadd.f32 %v7788_v56, %v7787_v62 }
 0x210   : > { %v7914_v45 = vpop.f32.mrb[52].mxu0 }
 0x211   : > { %v1868_v52 = vadd.f32 %v7789_v51, %v11068_v29  ;;  %v11230_v54 = vadd.f32 %v7898_v17, %v1865_v30  ;;  %v7915_v25 = vpop.f32.mrb[53].mxu0 }
 0x212   : > { %v7916_v5 = vadd.f32 %v7915_v25, %v7914_v45  ;;  %v7917_v18 = vpop.f32.mrb[54].mxu0  ;;  %v9770_v45 = vld [vmem:[#allocation8 + $0x350] sm:$0xff]  }
 0x213   : > { %v11232_v7 = vadd.f32 %v7901_v61, %v1868_v52  ;;  %v7790_v37 = vpop.f32.mrb[76].mxu1  ;;  %v7918_v21 = vpop.f32.mrb[55].mxu0  ;;  %8321 = vmatpush3.bf16.msra.mxu1 %v9770_v45  ;;  %v9773_v45 = vld [vmem:[#allocation8 + $0x398] sm:$0xff]  }
 0x214   : > { %v7791_v41 = vpop.f32.mrb[77].mxu1  ;;  %v7919_v8 = vadd.f32 %v7918_v21, %v7917_v18  ;;  %8322 = vmatprep.subr.bf16.mxu1 %v9773_v45 }
 0x215   : > { %v7792_v59 = vadd.f32 %v7791_v41, %v7790_v37  ;;  %v7793_v57 = vpop.f32.mrb[78].mxu1 }
 0x216   : > { %v7794_v38 = vpop.f32.mrb[79].mxu1 }
 0x217   : > { %v1873_v42 = vadd.f32 %v7792_v59, %v11074_v3  ;;  %v7795_v20 = vadd.f32 %v7794_v38, %v7793_v57 }
 0x218   : > { %v7920_v16 = vpop.f32.mrb[56].mxu0 }
 0x219   : > { %v1876_v29 = vadd.f32 %v7795_v20, %v11076_v9  ;;  %v11236_v17 = vadd.f32 %v7904_v24, %v1873_v42  ;;  %v7921_v32 = vpop.f32.mrb[57].mxu0 }
 0x21a   : > { %v7922_v52 = vadd.f32 %v7921_v32, %v7920_v16  ;;  %v7923_v37 = vpop.f32.mrb[58].mxu0 }
 0x21b   : > { %v11238_v61 = vadd.f32 %v7907_v60, %v1876_v29  ;;  %v7796_v62 = vpop.f32.mrb[80].mxu1  ;;  %v7924_v41 = vpop.f32.mrb[59].mxu0 }
 0x21c   : > { %v7797_v56 = vpop.f32.mrb[81].mxu1  ;;  %v7925_v24 = vadd.f32 %v7924_v41, %v7923_v37 }
 0x21d   : > { %v7798_v30 = vadd.f32 %v7797_v56, %v7796_v62  ;;  %v7799_v51 = vpop.f32.mrb[82].mxu1 }
 0x21e   : > { %v7800_v3 = vpop.f32.mrb[83].mxu1 }
 0x21f   : > { %v1881_v25 = vadd.f32 %v7798_v30, %v11082_v34  ;;  %v7801_v9 = vadd.f32 %v7800_v3, %v7799_v51 }
 0x220   : > { %v7926_v38 = vpop.f32.mrb[60].mxu0 }
 0x221   : > { %v1884_v60 = vadd.f32 %v7801_v9, %v11084_v46  ;;  %v11242_v59 = vadd.f32 %v7910_v31, %v1881_v25  ;;  %v7927_v42 = vpop.f32.mrb[61].mxu0 }
 0x222   : > { %v7928_v62 = vadd.f32 %v7927_v42, %v7926_v38  ;;  %v7929_v16 = vpop.f32.mrb[62].mxu0  ;;  %v9774_v38 = vld [vmem:[#allocation8 + $0x358] sm:$0xff]  }
 0x223   : > { %v11244_v57 = vadd.f32 %v7913_v49, %v1884_v60  ;;  %v7802_v18 = vpop.f32.mrb[84].mxu1  ;;  %v7930_v56 = vpop.f32.mrb[63].mxu0  ;;  %8323 = vmatpush3.bf16.msra.mxu1 %v9774_v38  ;;  %v9777_v38 = vld [vmem:[#allocation8 + $0x3a0] sm:$0xff]  }
 0x224   : > { %v7803_v21 = vpop.f32.mrb[85].mxu1  ;;  %v7931_v30 = vadd.f32 %v7930_v56, %v7929_v16  ;;  %8324 = vmatprep.subr.bf16.mxu1 %v9777_v38 }
 0x225   : > { %v7804_v20 = vadd.f32 %v7803_v21, %v7802_v18  ;;  %v7805_v29 = vpop.f32.mrb[86].mxu1 }
 0x226   : > { %v7806_v11 = vpop.f32.mrb[87].mxu1 }
 0x227   : > { %v1889_v34 = vadd.f32 %v7804_v20, %v11090_v28  ;;  %v7807_v32 = vadd.f32 %v7806_v11, %v7805_v29 }
 0x228   : > { %v7932_v37 = vpop.f32.mrb[64].mxu0 }
 0x229   : > { %v1892_v46 = vadd.f32 %v7807_v32, %v11092_v50  ;;  %v11248_v31 = vadd.f32 %v7916_v5, %v1889_v34  ;;  %v7933_v41 = vpop.f32.mrb[65].mxu0 }
 0x22a   : > { %v7934_v60 = vadd.f32 %v7933_v41, %v7932_v37  ;;  %v7935_v18 = vpop.f32.mrb[66].mxu0 }
 0x22b   : > { %v11250_v49 = vadd.f32 %v7919_v8, %v1892_v46  ;;  %v7808_v51 = vpop.f32.mrb[88].mxu1  ;;  %v7936_v21 = vpop.f32.mrb[67].mxu0 }
 0x22c   : > { %v7809_v3 = vpop.f32.mrb[89].mxu1  ;;  %v7937_v5 = vadd.f32 %v7936_v21, %v7935_v18 }
 0x22d   : > { %v7810_v25 = vadd.f32 %v7809_v3, %v7808_v51  ;;  %v7811_v9 = vpop.f32.mrb[90].mxu1 }
 0x22e   : > { %v7812_v28 = vpop.f32.mrb[91].mxu1 }
 0x22f   : > { %v1897_v42 = vadd.f32 %v7810_v25, %v11098_v58  ;;  %v7813_v50 = vadd.f32 %v7812_v28, %v7811_v9 }
 0x230   : > { %v7938_v11 = vpop.f32.mrb[68].mxu0 }
 0x231   : > { %v1900_v8 = vadd.f32 %v7813_v50, %v11100_v63  ;;  %v11254_v20 = vadd.f32 %v7922_v52, %v1897_v42  ;;  %v7939_v34 = vpop.f32.mrb[69].mxu0 }
 0x232   : > { %v7940_v51 = vadd.f32 %v7939_v34, %v7938_v11  ;;  %v7941_v37 = vpop.f32.mrb[70].mxu0  ;;  %v9778_v11 = vld [vmem:[#allocation8 + $0x360] sm:$0xff]  }
 0x233   : > { %v11256_v29 = vadd.f32 %v7925_v24, %v1900_v8  ;;  %v7814_v16 = vpop.f32.mrb[92].mxu1  ;;  %v7942_v3 = vpop.f32.mrb[71].mxu0  ;;  %8325 = vmatpush3.bf16.msra.mxu1 %v9778_v11 }
 0x234   : > { %v7815_v56 = vpop.f32.mrb[93].mxu1  ;;  %v7943_v25 = vadd.f32 %v7942_v3, %v7941_v37 }
 0x235   : > { %v7816_v32 = vadd.f32 %v7815_v56, %v7814_v16  ;;  %v7817_v46 = vpop.f32.mrb[94].mxu1 }
 0x236   : > { %v7818_v45 = vpop.f32.mrb[95].mxu1 }
 0x237   : > { %v1905_v58 = vadd.f32 %v7816_v32, %v11112_v14  ;;  %v7819_v41 = vadd.f32 %v7818_v45, %v7817_v46 }
 0x238   : > { %v7944_v18 = vpop.f32.mrb[72].mxu0 }
 0x239   : > { %v1908_v63 = vadd.f32 %v7819_v41, %v11114_v10  ;;  %v11260_v52 = vadd.f32 %v7928_v62, %v1905_v58  ;;  %v7945_v21 = vpop.f32.mrb[73].mxu0 }
 0x23a   : > { %v7946_v8 = vadd.f32 %v7945_v21, %v7944_v18  ;;  %v7947_v16 = vpop.f32.mrb[74].mxu0 }
 0x23b   : > { %v11262_v24 = vadd.f32 %v7931_v30, %v1908_v63  ;;  %v7820_v9 = vpop.f32.mrb[96].mxu1  ;;  %v7948_v56 = vpop.f32.mrb[75].mxu0 }
 0x23c   : > { %v7821_v28 = vpop.f32.mrb[97].mxu1  ;;  %v7949_v62 = vadd.f32 %v7948_v56, %v7947_v16  ;;  %v9781_v16 = vld [vmem:[#allocation8 + $0x3a8] sm:$0xff]  }
 0x23d   : > { %v7822_v42 = vadd.f32 %v7821_v28, %v7820_v9  ;;  %v7823_v50 = vpop.f32.mrb[98].mxu1  ;;  %8326 = vmatprep.subr.bf16.mxu1 %v9781_v16 }
 0x23e   : > { %v7824_v14 = vpop.f32.mrb[99].mxu1 }
 0x23f   : > { %v1913_v34 = vadd.f32 %v7822_v42, %v11126_v36  ;;  %v7825_v10 = vadd.f32 %v7824_v14, %v7823_v50 }
 0x240   : > { %v7950_v45 = vpop.f32.mrb[76].mxu0 }
 0x241   : > { %v1916_v30 = vadd.f32 %v7825_v10, %v11128_v15  ;;  %v11266_v32 = vadd.f32 %v7934_v60, %v1913_v34  ;;  %v7951_v58 = vpop.f32.mrb[77].mxu0  ;;  %v9782_v34 = vld [vmem:[#allocation8 + $0x368] sm:$0xff]  }
 0x242   : > { %v7952_v9 = vadd.f32 %v7951_v58, %v7950_v45  ;;  %v7953_v18 = vpop.f32.mrb[78].mxu0  ;;  %8327 = vmatpush3.bf16.msra.mxu1 %v9782_v34 }
 0x243   : > { %v11268_v46 = vadd.f32 %v7937_v5, %v1916_v30  ;;  %v7826_v37 = vpop.f32.mrb[100].mxu1  ;;  %v7954_v28 = vpop.f32.mrb[79].mxu0 }
 0x244   : > { %v7827_v3 = vpop.f32.mrb[101].mxu1  ;;  %v7955_v42 = vadd.f32 %v7954_v28, %v7953_v18 }
 0x245   : > { %v7828_v41 = vadd.f32 %v7827_v3, %v7826_v37  ;;  %v7829_v63 = vpop.f32.mrb[102].mxu1 }
 0x246   : > { %v7830_v38 = vpop.f32.mrb[103].mxu1 }
 0x247   : > { %v1921_v36 = vadd.f32 %v7828_v41, %v11136_v19  ;;  %v7831_v21 = vadd.f32 %v7830_v38, %v7829_v63 }
 0x249   : > { %v1924_v15 = vadd.f32 %v7831_v21, %v11140_v2  ;;  %v11272_v60 = vadd.f32 %v7940_v51, %v1921_v36 }
 0x24b   : > { %v11274_v5 = vadd.f32 %v7943_v25, %v1924_v15  ;;  %v7832_v50 = vpop.f32.mrb[104].mxu1  ;;  %v9786_v15 = vld [vmem:[#allocation8 + $0x370] sm:$0xff]  }
 0x24c   : > { %v7833_v11 = vpop.f32.mrb[105].mxu1 }
 0x24d   : > { %v7834_v14 = vadd.f32 %v7833_v11, %v7832_v50  ;;  %v7835_v56 = vpop.f32.mrb[106].mxu1  ;;  %v2426_v50 = vld [vmem:[#allocation2 + $0x19] sm:$0xff] }
 0x24e   : > { %v7836_v10 = vpop.f32.mrb[107].mxu1 }
 0x24f   : > { %v1929_v30 = vadd.f32 %v7834_v14, %v11150_v47  ;;  %v7837_v37 = vadd.f32 %v7836_v10, %v7835_v56 }
 0x251   : > { %v1932_v19 = vadd.f32 %v7837_v37, %v11152_v35  ;;  %v11278_v45 = vadd.f32 %v7946_v8, %v1929_v30  ;;  %v9785_v35 = vld [vmem:[#allocation8 + $0x3b0] sm:$0xff]   ;;  %v2428_v37 = vld [vmem:[#allocation2 + $0x31] sm:$0xff] }
 0x252   : > { %8328 = vmatprep.subr.bf16.mxu1 %v9785_v35 }
 0x253   : > { %v11280_v2 = vadd.f32 %v7949_v62, %v1932_v19  ;;  %v7838_v51 = vpop.f32.mrb[108].mxu1  ;;  %8329 = vmatpush3.bf16.msra.mxu1 %v9786_v15 }
 0x254   : > { %v7839_v25 = vpop.f32.mrb[109].mxu1 }
 0x255   : > { %v7840_v3 = vadd.f32 %v7839_v25, %v7838_v51  ;;  %v7841_v58 = vpop.f32.mrb[110].mxu1  ;;  %v9789_v51 = vld [vmem:[#allocation8 + $0x3b8] sm:$0xff]  }
 0x256   : > { %v7842_v41 = vpop.f32.mrb[111].mxu1  ;;  %8330 = vmatprep.subr.bf16.mxu1 %v9789_v51 }
 0x257   : > { %v1937_v63 = vadd.f32 %v7840_v3, %v11160_v12  ;;  %v7843_v18 = vadd.f32 %v7842_v41, %v7841_v58  ;;  %v2427_v12 = vld [vmem:[#allocation2 + $0x21] sm:$0xff]  ;;  %v2429_v58 = vld [vmem:[#allocation2 + $0x39] sm:$0xff]  ;;  %v11291_v41 = vld [vmem:[#allocation6 + $0x1] ss:$0 sm:$0xff] }
 0x259   : > { %v1940_v38 = vadd.f32 %v7843_v18, %v11162_v1  ;;  %v11284_v28 = vadd.f32 %v7952_v9, %v1937_v63 }
 0x25b   : > { %v11286_v47 = vadd.f32 %v7955_v42, %v1940_v38  ;;  %v7972_v36 = vpop.f32.mrb[112].mxu1  ;;  %v11297_v38 = vld [vmem:[%s12826_s2 + $0x1] ss:$0 sm:$0xff] }
 0x25c   : > { %v7973_v8 = vpop.f32.mrb[113].mxu1 }
 0x25d   : > { %v7974_v21 = vadd.f32 %v7973_v8, %v7972_v36  ;;  %v7975_v62 = vpop.f32.mrb[114].mxu1 }
 0x25e   : > { %v7976_v16 = vpop.f32.mrb[115].mxu1 }
 0x25f   : > { %v2139_v11 = vadd.f32 %v7974_v21, %v11177_v33  ;;  %v7977_v14 = vadd.f32 %v7976_v16, %v7975_v62  ;;  %v9790_v33 = vld [vmem:[#allocation8 + $0x378] sm:$0xff]  }
 0x260   : > { %8331 = vmatpush3.bf16.msra.mxu1 %v9790_v33 }
 0x261   : > { %v9206_v56 = vadd.f32 %v2426_v50, %v2139_v11  ;;  %v2142_v1 = vadd.f32 %v7977_v14, %v11180_v27  ;;  %v2430_v14 = vld [vmem:[#allocation2 + $0x49] sm:$0xff] }
 0x263   : > { %9207 = vst [vmem:[#allocation2 + $0x19] sm:$0xff] %v9206_v56  ;;  %v9226_v9 = vadd.f32 %v2427_v12, %v2142_v1  ;;  %v7978_v42 = vpop.f32.mrb[116].mxu1 }
 0x264   : > { %v7979_v34 = vpop.f32.mrb[117].mxu1 }
 0x265   : > { %9227 = vst [vmem:[#allocation2 + $0x21] sm:$0xff] %v9226_v9  ;;  %v7980_v10 = vadd.f32 %v7979_v34, %v7978_v42  ;;  %v7981_v30 = vpop.f32.mrb[118].mxu1  ;;  %v2431_v34 = vld [vmem:[#allocation2 + $0x51] sm:$0xff] }
 0x266   : > { %v7982_v19 = vpop.f32.mrb[119].mxu1 }
 0x267   : > { %v2147_v25 = vadd.f32 %v7980_v10, %v11188_v55  ;;  %v7983_v3 = vadd.f32 %v7982_v19, %v7981_v30 }
 0x269   : > { %v9196_v63 = vadd.f32 %v2428_v37, %v2147_v25  ;;  %v2150_v27 = vadd.f32 %v7983_v3, %v11191_v13 }
 0x26a   : > { %v2525_v18 = vld [vmem:[#allocation2 + $0x18] sm:$0xff] }
 0x26b   : > { %9197 = vst [vmem:[#allocation2 + $0x31] sm:$0xff] %v9196_v63  ;;  %v9216_v36 = vadd.f32 %v2429_v58, %v2150_v27  ;;  %v7984_v35 = vpop.f32.mrb[120].mxu1  ;;  %v2584_v55 = vmul.f32 %v11291_v41, %v2525_v18  ;;  %v9764_v18 = vld [vmem:[#allocation8 + $0x3c0] sm:$0xff]  }
 0x26c   : > { %v7985_v8 = vpop.f32.mrb[121].mxu1  ;;  %v2526_v21 = vld [vmem:[#allocation2 + $0x20] sm:$0xff]  ;;  %v2527_v62 = vld [vmem:[#allocation2 + $0x28] sm:$0x3] }
 0x26d   : > { %9217 = vst [vmem:[#allocation2 + $0x39] sm:$0xff] %v9216_v36  ;;  %v7986_v15 = vadd.f32 %v7985_v8, %v7984_v35  ;;  %v7987_v50 = vpop.f32.mrb[122].mxu1  ;;  %v2585_v13 = vmul.f32 %v11291_v41, %v2526_v21  ;;  %v2643_v16 = vadd.f32 %v11297_v38, %v2584_v55  ;;  %v2586_v11 = vmul.f32 %v11291_v41, %v2527_v62  ;;  %v9767_v62 = vld [vmem:[#allocation8 + $0x408] sm:$0xff]  }
 0x26e   : > { %v7988_v12 = vpop.f32.mrb[123].mxu1 }
 0x26f   : > { %v2155_v56 = vadd.f32 %v7986_v15, %v11198_v26  ;;  %v7989_v1 = vadd.f32 %v7988_v12, %v7987_v50  ;;  %v2644_v9 = vadd.f32 %v11297_v38, %v2585_v13  ;;  %v2697_v42 = vmax.f32 %v2643_v16, 0.0 }
 0x270   : > { %v2645_v10 = vadd.f32 %v11297_v38, %v2586_v11 }
 0x271   : > { %v9246_v30 = vadd.f32 %v2430_v14, %v2155_v56  ;;  %v2158_v37 = vadd.f32 %v7989_v1, %v11201_v6  ;;  %v2698_v19 = vmax.f32 %v2644_v9, 0.0  ;;  %v2751_v25 = vsel %vm367_vm0, %v2697_v42, 0.0  ;;  %v2432_v14 = vld [vmem:[#allocation2 + $0x61] sm:$0xff] }
 0x272   : > { %v2699_v3 = vmax.f32 %v2645_v10, 0.0  ;;  %v2528_v33 = vld [vmem:[#allocation2 + $0x30] sm:$0xff] }
 0x273   : > { %9247 = vst [vmem:[#allocation2 + $0x49] sm:$0xff] %v9246_v30  ;;  %v9266_v58 = vadd.f32 %v2431_v34, %v2158_v37  ;;  %v7990_v63 = vpop.f32.mrb[124].mxu1  ;;  %v2804_v26 = vpack.c.bf16 %v2698_v19, %v2751_v25  ;;  %v7264_v27 = vpack.c.bf16 %v2698_v19, %v2697_v42  ;;  %v2587_v36 = vmul.f32 %v11291_v41, %v2528_v33  ;;  %v9768_v19 = vld [vmem:[#allocation8 + $0x3c8] sm:$0xff]   ;;  %v2433_v25 = vld [vmem:[#allocation2 + $0x69] sm:$0xff] }
 0x274   : > { %v7991_v35 = vpop.f32.mrb[125].mxu1  ;;  %v2753_v8 = vsel %vm378_vm1, %v2699_v3, 0.0  ;;  %v2529_v21 = vld [vmem:[#allocation2 + $0x38] sm:$0xff]  ;;  %v2530_v6 = vld [vmem:[#allocation2 + $0x40] sm:$0x3] }
 0x275   : > { %9267 = vst [vmem:[#allocation2 + $0x51] sm:$0xff] %v9266_v58  ;;  %v7992_v15 = vadd.f32 %v7991_v35, %v7990_v63  ;;  %v7993_v50 = vpop.f32.mrb[126].mxu1  ;;  %7310 = vmatprep.mubr.msk.bf16.mxu0 %vm10359_vm4, %v7264_v27  ;;  %v2805_v13 = vpack.c.bf16 %v2753_v8, %v2753_v8  ;;  %v2851_v16 = vshrl.u32 %v2804_v26, 16  ;;  %v2853_v11 = vshll.u32 %v2804_v26, 16  ;;  %v9771_v35 = vld [vmem:[#allocation8 + $0x410] sm:$0xff]  }
 0x276   : > { %v7994_v12 = vpop.f32.mrb[127].mxu1  ;;  %3951 = vmatmul.mubr.bf16.vlgmr.msra.gmra.mrb[112].mxu0 %v10917_v48  ;;  %v2588_v56 = vmul.f32 %v11291_v41, %v2529_v21  ;;  %v2646_v1 = vadd.f32 %v11297_v38, %v2587_v36  ;;  %v3081_v9 = vrot.slane %v2804_v26, 1  ;;  %v2589_v42 = vmul.f32 %v11291_v41, %v2530_v6 }
 0x277   : > { %v2163_v34 = vadd.f32 %v7992_v15, %v11208_v4  ;;  %v7995_v10 = vadd.f32 %v7994_v12, %v7993_v50  ;;  %8429 = vmatpush3.bf16.msra.mxu0 %v9764_v18  ;;  %v2855_v30 = vrot.slane %v2853_v11, 1  ;;  %v2858_v37 = vshll.u32 %v2805_v13, 16 }
 0x278   : > { %v2647_v3 = vadd.f32 %v11297_v38, %v2588_v56  ;;  %v2700_v33 = vmax.f32 %v2646_v1, 0.0  ;;  %v3082_v58 = vrot.slane %v2805_v13, 1  ;;  %v2648_v63 = vadd.f32 %v11297_v38, %v2589_v42  ;;  %8430 = vmatprep.subr.bf16.mxu0 %v9767_v62 }
 0x279   : > { %v9236_v36 = vadd.f32 %v2432_v14, %v2163_v34  ;;  %v2166_v26 = vadd.f32 %v7995_v10, %v11211_v22  ;;  %v2856_v8 = vor.u32 %v2855_v30, %v2851_v16  ;;  %v2860_v21 = vrot.slane %v2858_v37, 1  ;;  %v9772_v34 = vld [vmem:[#allocation8 + $0x3d0] sm:$0xff]  }
 0x27a   : > { %v2701_v4 = vmax.f32 %v2647_v3, 0.0  ;;  %v2754_v18 = vsel %vm367_vm0, %v2700_v33, 0.0  ;;  %v2702_v6 = vmax.f32 %v2648_v63, 0.0  ;;  %v2531_v15 = vld [vmem:[#allocation2 + $0x48] sm:$0xff]  ;;  %v11332_v12 = vsel %vm942_vm5, %v3081_v9, %v3082_v58  ;;  %v2434_v3 = vld [vmem:[#allocation2 + $0x79] sm:$0xff] }
 0x27b   : > { %9237 = vst [vmem:[#allocation2 + $0x61] sm:$0xff] %v9236_v36  ;;  %v9256_v50 = vadd.f32 %v2433_v25, %v2166_v26  ;;  %v7996_v11 = vpop.f32.mrb[128].mxu1  ;;  %v11325_v13 = vsel %vm701_vm2, %v2856_v8, %v2860_v21  ;;  %v2590_v62 = vmul.f32 %v11291_v41, %v2531_v15  ;;  %8431 = vmatpush3.bf16.msra.mxu0 %v9768_v19  ;;  %v9775_v9 = vld [vmem:[#allocation8 + $0x418] sm:$0xff]  }
 0x27c   : > { %v7997_v14 = vpop.f32.mrb[129].mxu1  ;;  %3797 = vmatprep.mubr.bf16.mxu1 %v11325_v13  ;;  %v2806_v22 = vpack.c.bf16 %v2701_v4, %v2754_v18  ;;  %v11329_v16 = vpack.c.bf16 %v2701_v4, %v2700_v33  ;;  %v2756_v56 = vsel %vm378_vm1, %v2702_v6, 0.0  ;;  %v2532_v1 = vld [vmem:[#allocation2 + $0x50] sm:$0xff]  ;;  %v2533_v42 = vld [vmem:[#allocation2 + $0x58] sm:$0x3]  ;;  %8432 = vmatprep.subr.bf16.mxu0 %v9771_v35  ;;  %v2435_v4 = vld [vmem:[#allocation2 + $0x81] sm:$0xff] }
 0x27d   : > { %9257 = vst [vmem:[#allocation2 + $0x69] sm:$0xff] %v9256_v50  ;;  %v7998_v10 = vadd.f32 %v7997_v14, %v7996_v11  ;;  %v7999_v30 = vpop.f32.mrb[130].mxu1  ;;  %7265 = vmatmul.mubr.msk.bf16.gmra.mrb[180].mxu1 %vm10359_vm4, %v7264_v27  ;;  %v2807_v37 = vpack.c.bf16 %v2756_v56, %v2756_v56  ;;  %v2591_v19 = vmul.f32 %v11291_v41, %v2532_v1  ;;  %v9776_v11 = vld [vmem:[#allocation8 + $0x3d8] sm:$0xff]  }
 0x27e   : > { %v2649_v25 = vadd.f32 %v11297_v38, %v2590_v62  ;;  %7313 = vmatprep.mubr.msk.bf16.mxu0 %vm10359_vm4, %v11329_v16  ;;  %v8000_v33 = vpop.f32.mrb[131].mxu1  ;;  %v2863_v58 = vshrl.u32 %v2806_v22, 16  ;;  %v2865_v63 = vshll.u32 %v2806_v22, 16  ;;  %v3084_v35 = vrot.slane %v2806_v22, 1 }
 0x27f   : > { %v2592_v36 = vmul.f32 %v11291_v41, %v2533_v42  ;;  %v2171_v26 = vadd.f32 %v7998_v10, %v11216_v40  ;;  %v8001_v27 = vadd.f32 %v8000_v33, %v7999_v30  ;;  %3959 = vmatmul.mubr.bf16.gmra.mrb[116].mxu0 %v11332_v12  ;;  %v2870_v8 = vshll.u32 %v2807_v37, 16  ;;  %v9779_v30 = vld [vmem:[#allocation8 + $0x420] sm:$0xff]  }
 0x280   : > { %v2650_v21 = vadd.f32 %v11297_v38, %v2591_v19  ;;  %v2867_v18 = vrot.slane %v2865_v63, 1  ;;  %v2703_v6 = vmax.f32 %v2649_v25, 0.0  ;;  %v3085_v15 = vrot.slane %v2807_v37, 1  ;;  %8433 = vmatpush3.bf16.msra.mxu0 %v9772_v34 }
 0x281   : > { %v2651_v50 = vadd.f32 %v11297_v38, %v2592_v36  ;;  %v9286_v62 = vadd.f32 %v2434_v3, %v2171_v26  ;;  %v2174_v14 = vadd.f32 %v8001_v27, %v11219_v53  ;;  %v2872_v22 = vrot.slane %v2870_v8, 1  ;;  %8434 = vmatprep.subr.bf16.mxu0 %v9775_v9  ;;  %v9780_v26 = vld [vmem:[#allocation8 + $0x3e0] sm:$0xff]  }
 0x282   : > { %v2704_v56 = vmax.f32 %v2650_v21, 0.0  ;;  %v2868_v40 = vor.u32 %v2867_v18, %v2863_v58  ;;  %v2757_v1 = vsel %vm367_vm0, %v2703_v6, 0.0  ;;  %v2534_v10 = vld [vmem:[#allocation2 + $0x60] sm:$0xff]  ;;  %v11358_v9 = vsel %vm942_vm5, %v3084_v35, %v3085_v15 }
 0x283   : > { %v2705_v42 = vmax.f32 %v2651_v50, 0.0  ;;  %9287 = vst [vmem:[#allocation2 + $0x79] sm:$0xff] %v9286_v62  ;;  %v9306_v19 = vadd.f32 %v2435_v4, %v2174_v14  ;;  %v8002_v37 = vpop.f32.mrb[132].mxu1  ;;  %v2593_v34 = vmul.f32 %v11291_v41, %v2534_v10  ;;  %v9783_v18 = vld [vmem:[#allocation8 + $0x428] sm:$0xff]  }
 0x284   : > { %v2808_v25 = vpack.c.bf16 %v2704_v56, %v2757_v1  ;;  %v11351_v33 = vpack.c.bf16 %v2704_v56, %v2703_v6  ;;  %v8003_v3 = vpop.f32.mrb[133].mxu1  ;;  %v11355_v53 = vsel %vm701_vm2, %v2868_v40, %v2872_v22  ;;  %v2535_v63 = vld [vmem:[#allocation2 + $0x68] sm:$0xff]  ;;  %v2536_v36 = vld [vmem:[#allocation2 + $0x70] sm:$0x3]  ;;  %8435 = vmatpush3.bf16.msra.mxu0 %v9776_v11 }
 0x285   : > { %v2759_v58 = vsel %vm378_vm1, %v2705_v42, 0.0  ;;  %9307 = vst [vmem:[#allocation2 + $0x81] sm:$0xff] %v9306_v19  ;;  %v8004_v27 = vadd.f32 %v8003_v3, %v8002_v37  ;;  %3805 = vmatprep.mubr.bf16.mxu1 %v11355_v53  ;;  %v8005_v8 = vpop.f32.mrb[134].mxu1  ;;  %v2436_v6 = vld [vmem:[#allocation2 + $0x91] sm:$0xff]  ;;  %v2594_v50 = vmul.f32 %v11291_v41, %v2535_v63  ;;  %v2652_v11 = vadd.f32 %v11297_v38, %v2593_v34  ;;  %v2437_v42 = vld [vmem:[#allocation2 + $0x99] sm:$0xff] }
 0x286   : > { %7316 = vmatprep.mubr.msk.bf16.mxu0 %vm10359_vm4, %v11351_v33  ;;  %v2809_v21 = vpack.c.bf16 %v2759_v58, %v2759_v58  ;;  %v2875_v4 = vshrl.u32 %v2808_v25, 16  ;;  %v2877_v35 = vshll.u32 %v2808_v25, 16  ;;  %7268 = vmatmul.mubr.msk.bf16.gmra.mrb[184].mxu1 %vm10359_vm4, %v11329_v16  ;;  %v8006_v15 = vpop.f32.mrb[135].mxu1  ;;  %v3087_v62 = vrot.slane %v2808_v25, 1  ;;  %v9784_v34 = vld [vmem:[#allocation8 + $0x3e8] sm:$0xff]  }
 0x287   : > { %v2595_v14 = vmul.f32 %v11291_v41, %v2536_v36  ;;  %8436 = vmatprep.subr.bf16.mxu0 %v9779_v30  ;;  %v2179_v22 = vadd.f32 %v8004_v27, %v11224_v0  ;;  %v8007_v56 = vadd.f32 %v8006_v15, %v8005_v8  ;;  %3967 = vmatmul.mubr.bf16.gmra.mrb[120].mxu0 %v11358_v9  ;;  %v2706_v19 = vmax.f32 %v2652_v11, 0.0  ;;  %v9787_v0 = vld [vmem:[#allocation8 + $0x430] sm:$0xff]  }
 0x288   : > { %v2879_v40 = vrot.slane %v2877_v35, 1  ;;  %v2882_v1 = vshll.u32 %v2809_v21, 16  ;;  %v2653_v10 = vadd.f32 %v11297_v38, %v2594_v50  ;;  %v3088_v37 = vrot.slane %v2809_v21, 1  ;;  %8437 = vmatpush3.bf16.msra.mxu0 %v9780_v26 }
 0x289   : > { %v2654_v3 = vadd.f32 %v11297_v38, %v2595_v14  ;;  %v9276_v25 = vadd.f32 %v2436_v6, %v2179_v22  ;;  %v2182_v58 = vadd.f32 %v8007_v56, %v11226_v23  ;;  %8438 = vmatprep.subr.bf16.mxu0 %v9783_v18  ;;  %v2760_v27 = vsel %vm367_vm0, %v2706_v19, 0.0  ;;  %v9788_v56 = vld [vmem:[#allocation8 + $0x3f0] sm:$0xff]  }
 0x28a   : > { %v2880_v30 = vor.u32 %v2879_v40, %v2875_v4  ;;  %v2884_v63 = vrot.slane %v2882_v1, 1  ;;  %v2707_v36 = vmax.f32 %v2653_v10, 0.0  ;;  %v2537_v35 = vld [vmem:[#allocation2 + $0x78] sm:$0xff]  ;;  %v11387_v18 = vsel %vm942_vm5, %v3087_v62, %v3088_v37 }
 0x28b   : > { %v2708_v8 = vmax.f32 %v2654_v3, 0.0  ;;  %9277 = vst [vmem:[#allocation2 + $0x91] sm:$0xff] %v9276_v25  ;;  %v9296_v15 = vadd.f32 %v2437_v42, %v2182_v58  ;;  %v8008_v21 = vpop.f32.mrb[136].mxu1  ;;  %v2596_v26 = vmul.f32 %v11291_v41, %v2537_v35  ;;  %v2438_v25 = vld [vmem:[#allocation2 + $0xa9] sm:$0xff] }
 0x28c   : > { %v11380_v50 = vsel %vm701_vm2, %v2880_v30, %v2884_v63  ;;  %v8009_v6 = vpop.f32.mrb[137].mxu1  ;;  %v2810_v23 = vpack.c.bf16 %v2707_v36, %v2760_v27  ;;  %v11384_v4 = vpack.c.bf16 %v2707_v36, %v2706_v19  ;;  %v2538_v14 = vld [vmem:[#allocation2 + $0x80] sm:$0xff]  ;;  %v2539_v22 = vld [vmem:[#allocation2 + $0x88] sm:$0x3]  ;;  %8439 = vmatpush3.bf16.msra.mxu0 %v9784_v34  ;;  %v9791_v19 = vld [vmem:[#allocation8 + $0x438] sm:$0xff]  }
 0x28d   : > { %3813 = vmatprep.mubr.bf16.mxu1 %v11380_v50  ;;  %v2762_v11 = vsel %vm378_vm1, %v2708_v8, 0.0  ;;  %9297 = vst [vmem:[#allocation2 + $0x99] sm:$0xff] %v9296_v15  ;;  %v8010_v40 = vadd.f32 %v8009_v6, %v8008_v21  ;;  %v8011_v1 = vpop.f32.mrb[138].mxu1  ;;  %v2597_v10 = vmul.f32 %v11291_v41, %v2538_v14  ;;  %v2655_v3 = vadd.f32 %v11297_v38, %v2596_v26  ;;  %v2439_v8 = vld [vmem:[#allocation2 + $0xb1] sm:$0xff] }
 0x28e   : > { %v2811_v42 = vpack.c.bf16 %v2762_v11, %v2762_v11  ;;  %8440 = vmatprep.subr.bf16.mxu0 %v9787_v0  ;;  %7271 = vmatmul.mubr.msk.bf16.gmra.mrb[188].mxu1 %vm10359_vm4, %v11351_v33  ;;  %v8012_v62 = vpop.f32.mrb[139].mxu1  ;;  %v2887_v37 = vshrl.u32 %v2810_v23, 16  ;;  %v2889_v34 = vshll.u32 %v2810_v23, 16  ;;  %v3090_v58 = vrot.slane %v2810_v23, 1  ;;  %v9792_v6 = vld [vmem:[#allocation8 + $0x3f8] sm:$0xff]  }
 0x28f   : > { %7319 = vmatprep.mubr.msk.bf16.mxu0 %vm10359_vm4, %v11384_v4  ;;  %v2598_v30 = vmul.f32 %v11291_v41, %v2539_v22  ;;  %v2187_v63 = vadd.f32 %v8010_v40, %v11230_v54  ;;  %v8013_v36 = vadd.f32 %v8012_v62, %v8011_v1  ;;  %v2656_v27 = vadd.f32 %v11297_v38, %v2597_v10 }
 0x290   : > { %3975 = vmatmul.mubr.bf16.gmra.mrb[124].mxu0 %v11387_v18  ;;  %v2894_v0 = vshll.u32 %v2811_v42, 16  ;;  %v2891_v35 = vrot.slane %v2889_v34, 1  ;;  %v2709_v15 = vmax.f32 %v2655_v3, 0.0  ;;  %v3091_v21 = vrot.slane %v2811_v42, 1 }
 0x291   : > { %v2657_v26 = vadd.f32 %v11297_v38, %v2598_v30  ;;  %8441 = vmatpush3.bf16.msra.mxu0 %v9788_v56  ;;  %v9326_v11 = vadd.f32 %v2438_v25, %v2187_v63  ;;  %v2190_v23 = vadd.f32 %v8013_v36, %v11232_v7  ;;  %v2710_v22 = vmax.f32 %v2656_v27, 0.0 }
 0x292   : > { %v2896_v14 = vrot.slane %v2894_v0, 1  ;;  %8442 = vmatprep.subr.bf16.mxu0 %v9791_v19  ;;  %v2892_v54 = vor.u32 %v2891_v35, %v2887_v37  ;;  %v2763_v40 = vsel %vm367_vm0, %v2709_v15, 0.0  ;;  %v2540_v10 = vld [vmem:[#allocation2 + $0x90] sm:$0xff]  ;;  %v11414_v19 = vsel %vm942_vm5, %v3090_v58, %v3091_v21  ;;  %v2440_v58 = vld [vmem:[#allocation2 + $0xc1] sm:$0xff] }
 0x293   : > { %v2711_v1 = vmax.f32 %v2657_v26, 0.0  ;;  %9327 = vst [vmem:[#allocation2 + $0xa9] sm:$0xff] %v9326_v11  ;;  %v9346_v62 = vadd.f32 %v2439_v8, %v2190_v23  ;;  %v8014_v3 = vpop.f32.mrb[140].mxu1  ;;  %v2812_v42 = vpack.c.bf16 %v2710_v22, %v2763_v40  ;;  %v11407_v34 = vpack.c.bf16 %v2710_v22, %v2709_v15  ;;  %v2441_v40 = vld [vmem:[#allocation2 + $0xc9] sm:$0xff] }
 0x294   : > { %v2599_v56 = vmul.f32 %v11291_v41, %v2540_v10  ;;  %v8015_v25 = vpop.f32.mrb[141].mxu1  ;;  %v11411_v7 = vsel %vm701_vm2, %v2892_v54, %v2896_v14  ;;  %v2541_v30 = vld [vmem:[#allocation2 + $0x98] sm:$0xff]  ;;  %v2542_v63 = vld [vmem:[#allocation2 + $0xa0] sm:$0x3] }
 0x295   : > { %v2765_v37 = vsel %vm378_vm1, %v2711_v1, 0.0  ;;  %8443 = vmatpush3.bf16.msra.mxu0 %v9792_v6  ;;  %9347 = vst [vmem:[#allocation2 + $0xb1] sm:$0xff] %v9346_v62  ;;  %v8016_v36 = vadd.f32 %v8015_v25, %v8014_v3  ;;  %3821 = vmatprep.mubr.bf16.mxu1 %v11411_v7  ;;  %v8017_v0 = vpop.f32.mrb[142].mxu1  ;;  %v2899_v8 = vshrl.u32 %v2812_v42, 16  ;;  %v2901_v35 = vshll.u32 %v2812_v42, 16 }
 0x296   : > { %7322 = vmatprep.mubr.msk.bf16.mxu0 %vm10359_vm4, %v11407_v34  ;;  %v2813_v27 = vpack.c.bf16 %v2765_v37, %v2765_v37  ;;  %7274 = vmatmul.mubr.msk.bf16.gmra.mrb[192].mxu1 %vm10359_vm4, %v11384_v4  ;;  %v8018_v15 = vpop.f32.mrb[143].mxu1  ;;  %v2600_v21 = vmul.f32 %v11291_v41, %v2541_v30  ;;  %v2658_v26 = vadd.f32 %v11297_v38, %v2599_v56  ;;  %v3093_v6 = vrot.slane %v2812_v42, 1 }
 0x297   : > { %v2601_v11 = vmul.f32 %v11291_v41, %v2542_v63  ;;  %v2195_v23 = vadd.f32 %v8016_v36, %v11236_v17  ;;  %v8019_v14 = vadd.f32 %v8018_v15, %v8017_v0  ;;  %v2903_v22 = vrot.slane %v2901_v35, 1 }
 0x298   : > { %3983 = vmatmul.mubr.bf16.gmra.mrb[128].mxu0 %v11414_v19  ;;  %v2906_v54 = vshll.u32 %v2813_v27, 16  ;;  %v2659_v1 = vadd.f32 %v11297_v38, %v2600_v21  ;;  %v2712_v10 = vmax.f32 %v2658_v26, 0.0  ;;  %v3094_v62 = vrot.slane %v2813_v27, 1 }
 0x299   : > { %v2660_v3 = vadd.f32 %v11297_v38, %v2601_v11  ;;  %v9316_v25 = vadd.f32 %v2440_v58, %v2195_v23  ;;  %v2198_v56 = vadd.f32 %v8019_v14, %v11238_v61  ;;  %v2904_v42 = vor.u32 %v2903_v22, %v2899_v8 }
 0x29a   : > { %v2908_v37 = vrot.slane %v2906_v54, 1  ;;  %v2713_v30 = vmax.f32 %v2659_v1, 0.0  ;;  %v2766_v17 = vsel %vm367_vm0, %v2712_v10, 0.0  ;;  %v2543_v36 = vld [vmem:[#allocation2 + $0xa8] sm:$0xff]  ;;  %v11443_v58 = vsel %vm942_vm5, %v3093_v6, %v3094_v62 }
 0x29b   : > { %v2714_v63 = vmax.f32 %v2660_v3, 0.0  ;;  %9317 = vst [vmem:[#allocation2 + $0xc1] sm:$0xff] %v9316_v25  ;;  %v9336_v0 = vadd.f32 %v2441_v40, %v2198_v56  ;;  %v8020_v35 = vpop.f32.mrb[144].mxu1  ;;  %v2602_v27 = vmul.f32 %v11291_v41, %v2543_v36  ;;  %v2442_v3 = vld [vmem:[#allocation2 + $0xd9] sm:$0xff] }
 0x29c   : > { %v11436_v15 = vsel %vm701_vm2, %v2904_v42, %v2908_v37  ;;  %v8021_v21 = vpop.f32.mrb[145].mxu1  ;;  %v2814_v61 = vpack.c.bf16 %v2713_v30, %v2766_v17  ;;  %v11440_v8 = vpack.c.bf16 %v2713_v30, %v2712_v10  ;;  %v2544_v11 = vld [vmem:[#allocation2 + $0xb0] sm:$0xff]  ;;  %v2545_v23 = vld [vmem:[#allocation2 + $0xb8] sm:$0x3] }
 0x29d   : > { %3829 = vmatprep.mubr.bf16.mxu1 %v11436_v15  ;;  %v2768_v26 = vsel %vm378_vm1, %v2714_v63, 0.0  ;;  %9337 = vst [vmem:[#allocation2 + $0xc9] sm:$0xff] %v9336_v0  ;;  %v8022_v14 = vadd.f32 %v8021_v21, %v8020_v35  ;;  %v8023_v22 = vpop.f32.mrb[146].mxu1  ;;  %v2603_v40 = vmul.f32 %v11291_v41, %v2544_v11  ;;  %v2661_v1 = vadd.f32 %v11297_v38, %v2602_v27  ;;  %v2443_v63 = vld [vmem:[#allocation2 + $0xe1] sm:$0xff] }
 0x29e   : > { %v2815_v54 = vpack.c.bf16 %v2768_v26, %v2768_v26  ;;  %7277 = vmatmul.mubr.msk.bf16.gmra.mrb[196].mxu1 %vm10359_vm4, %v11407_v34  ;;  %7325 = vmatprep.mubr.msk.bf16.mxu0 %vm10359_vm4, %v11440_v8  ;;  %v8024_v6 = vpop.f32.mrb[147].mxu1  ;;  %v2911_v10 = vshrl.u32 %v2814_v61, 16  ;;  %v2913_v62 = vshll.u32 %v2814_v61, 16  ;;  %v3096_v25 = vrot.slane %v2814_v61, 1 }
 0x29f   : > { %v2604_v56 = vmul.f32 %v11291_v41, %v2545_v23  ;;  %v2203_v42 = vadd.f32 %v8022_v14, %v11242_v59  ;;  %v8025_v37 = vadd.f32 %v8024_v6, %v8023_v22  ;;  %v2662_v17 = vadd.f32 %v11297_v38, %v2603_v40 }
 0x2a0   : > { %3991 = vmatmul.mubr.bf16.gmra.mrb[132].mxu0 %v11443_v58  ;;  %v2918_v30 = vshll.u32 %v2815_v54, 16  ;;  %v2915_v36 = vrot.slane %v2913_v62, 1  ;;  %v2715_v0 = vmax.f32 %v2661_v1, 0.0  ;;  %v3097_v35 = vrot.slane %v2815_v54, 1 }
 0x2a1   : > { %v2663_v27 = vadd.f32 %v11297_v38, %v2604_v56  ;;  %v9366_v21 = vadd.f32 %v2442_v3, %v2203_v42  ;;  %v2206_v26 = vadd.f32 %v8025_v37, %v11244_v57  ;;  %v2716_v11 = vmax.f32 %v2662_v17, 0.0 }
 0x2a2   : > { %v2920_v61 = vrot.slane %v2918_v30, 1  ;;  %v2916_v23 = vor.u32 %v2915_v36, %v2911_v10  ;;  %v2769_v59 = vsel %vm367_vm0, %v2715_v0, 0.0  ;;  %v2546_v22 = vld [vmem:[#allocation2 + $0xc0] sm:$0xff]  ;;  %v11470_v57 = vsel %vm942_vm5, %v3096_v25, %v3097_v35 }
 0x2a3   : > { %v2717_v14 = vmax.f32 %v2663_v27, 0.0  ;;  %9367 = vst [vmem:[#allocation2 + $0xd9] sm:$0xff] %v9366_v21  ;;  %v9386_v6 = vadd.f32 %v2443_v63, %v2206_v26  ;;  %v8026_v40 = vpop.f32.mrb[148].mxu1  ;;  %v2816_v48 = vpack.c.bf16 %v2716_v11, %v2769_v59  ;;  %v11463_v62 = vpack.c.bf16 %v2716_v11, %v2715_v0  ;;  %v2444_v0 = vld [vmem:[#allocation2 + $0xf1] sm:$0xff] }
 0x2a4   : > { %v2605_v54 = vmul.f32 %v11291_v41, %v2546_v22  ;;  %v8027_v1 = vpop.f32.mrb[149].mxu1  ;;  %v11467_v3 = vsel %vm701_vm2, %v2916_v23, %v2920_v61  ;;  %v2547_v56 = vld [vmem:[#allocation2 + $0xc8] sm:$0xff]  ;;  %v2548_v42 = vld [vmem:[#allocation2 + $0xd0] sm:$0x3]  ;;  %v11484_v61 = vld [vmem:[#allocation8 + $0x440] sm:$0xff]  }
 0x2a5   : > { %12998 = vst [vmem:[#allocation16_spill] sm:$0xff] %v11463_v62  ;;  %v2771_v10 = vsel %vm378_vm1, %v2717_v14, 0.0  ;;  %9387 = vst [vmem:[#allocation2 + $0xe1] sm:$0xff] %v9386_v6  ;;  %v8028_v37 = vadd.f32 %v8027_v1, %v8026_v40  ;;  %3837 = vmatprep.mubr.bf16.mxu1 %v11467_v3  ;;  %v8029_v30 = vpop.f32.mrb[150].mxu1  ;;  %7328 = vmatprep.mubr.msk.bf16.mxu0 %vm10359_vm4, %v11463_v62  ;;  %v2923_v63 = vshrl.u32 %v2816_v48, 16  ;;  %v2925_v36 = vshll.u32 %v2816_v48, 16 }
 0x2a6   : > { %v2817_v17 = vpack.c.bf16 %v2771_v10, %v2771_v10  ;;  %7280 = vmatmul.mubr.msk.bf16.gmra.mrb[200].mxu1 %vm10359_vm4, %v11440_v8  ;;  %v8030_v25 = vpop.f32.mrb[151].mxu1  ;;  %v2606_v35 = vmul.f32 %v11291_v41, %v2547_v56  ;;  %v2664_v27 = vadd.f32 %v11297_v38, %v2605_v54  ;;  %v3099_v21 = vrot.slane %v2816_v48, 1  ;;  %v2445_v22 = vld [vmem:[#allocation2 + $0xf9] sm:$0xff]  ;;  %9084 = vmatprep.subr.bf16.mxu0 %v11484_v61 }
 0x2a7   : > { %v2607_v26 = vmul.f32 %v11291_v41, %v2548_v42  ;;  %v2211_v11 = vadd.f32 %v8028_v37, %v11248_v31  ;;  %v8031_v23 = vadd.f32 %v8030_v25, %v8029_v30  ;;  %v2927_v59 = vrot.slane %v2925_v36, 1 }
 0x2a8   : > { %3999 = vmatmul.mubr.bf16.gmra.mrb[136].mxu0 %v11470_v57  ;;  %v2930_v14 = vshll.u32 %v2817_v17, 16  ;;  %v2665_v6 = vadd.f32 %v11297_v38, %v2606_v35  ;;  %v2718_v40 = vmax.f32 %v2664_v27, 0.0  ;;  %v3100_v1 = vrot.slane %v2817_v17, 1 }
 0x2a9   : > { %v2666_v10 = vadd.f32 %v11297_v38, %v2607_v26  ;;  %v9356_v48 = vadd.f32 %v2444_v0, %v2211_v11  ;;  %v2214_v54 = vadd.f32 %v8031_v23, %v11250_v49  ;;  %v2928_v56 = vor.u32 %v2927_v59, %v2923_v63 }
 0x2aa   : > { %v2932_v42 = vrot.slane %v2930_v14, 1  ;;  %v2719_v31 = vmax.f32 %v2665_v6, 0.0  ;;  %v2772_v37 = vsel %vm367_vm0, %v2718_v40, 0.0  ;;  %v2549_v36 = vld [vmem:[#allocation2 + $0xd8] sm:$0xff]  ;;  %v11502_v0 = vsel %vm942_vm5, %v3099_v21, %v3100_v1 }
 0x2ab   : > { %v2720_v30 = vmax.f32 %v2666_v10, 0.0  ;;  %9357 = vst [vmem:[#allocation2 + $0xf1] sm:$0xff] %v9356_v48  ;;  %v9376_v25 = vadd.f32 %v2445_v22, %v2214_v54  ;;  %v8032_v35 = vpop.f32.mrb[152].mxu1  ;;  %v2608_v27 = vmul.f32 %v11291_v41, %v2549_v36  ;;  %v2446_v54 = vld [vmem:[#allocation2 + $0x109] sm:$0xff] }
 0x2ac   : > { %v11495_v17 = vsel %vm701_vm2, %v2928_v56, %v2932_v42  ;;  %v8033_v26 = vpop.f32.mrb[153].mxu1  ;;  %v2818_v49 = vpack.c.bf16 %v2719_v31, %v2772_v37  ;;  %v11499_v63 = vpack.c.bf16 %v2719_v31, %v2718_v40  ;;  %v2550_v23 = vld [vmem:[#allocation2 + $0xe0] sm:$0xff]  ;;  %v2551_v59 = vld [vmem:[#allocation2 + $0xe8] sm:$0x3] }
 0x2ad   : > { %3845 = vmatprep.mubr.bf16.mxu1 %v11495_v17  ;;  %v2774_v11 = vsel %vm378_vm1, %v2720_v30, 0.0  ;;  %9377 = vst [vmem:[#allocation2 + $0xf9] sm:$0xff] %v9376_v25  ;;  %v8034_v14 = vadd.f32 %v8033_v26, %v8032_v35  ;;  %v8035_v22 = vpop.f32.mrb[154].mxu1  ;;  %v2609_v10 = vmul.f32 %v11291_v41, %v2550_v23  ;;  %v2667_v48 = vadd.f32 %v11297_v38, %v2608_v27  ;;  %v2447_v25 = vld [vmem:[#allocation2 + $0x111] sm:$0xff] }
 0x2ae   : > { %v2819_v6 = vpack.c.bf16 %v2774_v11, %v2774_v11  ;;  %7283 = vmatmul.mubr.msk.bf16.gmra.mrb[204].mxu1 %vm10359_vm4, %v11463_v62  ;;  %7331 = vmatprep.mubr.msk.bf16.mxu0 %vm10359_vm4, %v11499_v63  ;;  %v8036_v21 = vpop.f32.mrb[155].mxu1  ;;  %v2935_v40 = vshrl.u32 %v2818_v49, 16  ;;  %v2937_v1 = vshll.u32 %v2818_v49, 16  ;;  %v3102_v56 = vrot.slane %v2818_v49, 1 }
 0x2af   : > { %v2610_v42 = vmul.f32 %v11291_v41, %v2551_v59  ;;  %v2219_v31 = vadd.f32 %v8034_v14, %v11254_v20  ;;  %v8037_v37 = vadd.f32 %v8036_v21, %v8035_v22  ;;  %v2668_v36 = vadd.f32 %v11297_v38, %v2609_v10 }
 0x2b0   : > { %4007 = vmatmul.mubr.bf16.gmra.mrb[140].mxu0 %v11502_v0  ;;  %v2942_v30 = vshll.u32 %v2819_v6, 16  ;;  %v2939_v35 = vrot.slane %v2937_v1, 1  ;;  %v2721_v27 = vmax.f32 %v2667_v48, 0.0  ;;  %v3103_v26 = vrot.slane %v2819_v6, 1 }
 0x2b1   : > { %v2669_v11 = vadd.f32 %v11297_v38, %v2610_v42  ;;  %v9406_v23 = vadd.f32 %v2446_v54, %v2219_v31  ;;  %v2222_v44 = vadd.f32 %v8037_v37, %v11256_v29  ;;  %v2722_v39 = vmax.f32 %v2668_v36, 0.0 }
 0x2b2   : > { %v2944_v49 = vrot.slane %v2942_v30, 1  ;;  %v2940_v59 = vor.u32 %v2939_v35, %v2935_v40  ;;  %v2775_v20 = vsel %vm367_vm0, %v2721_v27, 0.0  ;;  %v2552_v22 = vld [vmem:[#allocation2 + $0xf0] sm:$0xff]  ;;  %v11529_v29 = vsel %vm942_vm5, %v3102_v56, %v3103_v26 }
 0x2b3   : > { %v2723_v14 = vmax.f32 %v2669_v11, 0.0  ;;  %9407 = vst [vmem:[#allocation2 + $0x109] sm:$0xff] %v9406_v23  ;;  %v9426_v21 = vadd.f32 %v2447_v25, %v2222_v44  ;;  %v8038_v10 = vpop.f32.mrb[156].mxu1  ;;  %v2820_v62 = vpack.c.bf16 %v2722_v39, %v2775_v20  ;;  %v11522_v1 = vpack.c.bf16 %v2722_v39, %v2721_v27  ;;  %v2448_v25 = vld [vmem:[#allocation2 + $0x121] sm:$0xff] }
 0x2b4   : > { %v2611_v6 = vmul.f32 %v11291_v41, %v2552_v22  ;;  %v8039_v48 = vpop.f32.mrb[157].mxu1  ;;  %v11526_v54 = vsel %vm701_vm2, %v2940_v59, %v2944_v49  ;;  %v2553_v42 = vld [vmem:[#allocation2 + $0xf8] sm:$0xff]  ;;  %v2554_v31 = vld [vmem:[#allocation2 + $0x100] sm:$0x3] }
 0x2b5   : > { %12999 = vst [vmem:[#allocation18_spill] sm:$0xff] %v11522_v1  ;;  %v2777_v40 = vsel %vm378_vm1, %v2723_v14, 0.0  ;;  %9427 = vst [vmem:[#allocation2 + $0x111] sm:$0xff] %v9426_v21  ;;  %v8040_v44 = vadd.f32 %v8039_v48, %v8038_v10  ;;  %3853 = vmatprep.mubr.bf16.mxu1 %v11526_v54  ;;  %v8041_v39 = vpop.f32.mrb[158].mxu1  ;;  %7334 = vmatprep.mubr.msk.bf16.mxu0 %vm10359_vm4, %v11522_v1  ;;  %v2947_v30 = vshrl.u32 %v2820_v62, 16  ;;  %v2949_v36 = vshll.u32 %v2820_v62, 16 }
 0x2b6   : > { %v2821_v37 = vpack.c.bf16 %v2777_v40, %v2777_v40  ;;  %7286 = vmatmul.mubr.msk.bf16.gmra.mrb[208].mxu1 %vm10359_vm4, %v11499_v63  ;;  %v8042_v56 = vpop.f32.mrb[159].mxu1  ;;  %v2612_v35 = vmul.f32 %v11291_v41, %v2553_v42  ;;  %v2670_v27 = vadd.f32 %v11297_v38, %v2611_v6  ;;  %v3105_v26 = vrot.slane %v2820_v62, 1  ;;  %v2449_v14 = vld [vmem:[#allocation2 + $0x129] sm:$0xff] }
 0x2b7   : > { %v2613_v11 = vmul.f32 %v11291_v41, %v2554_v31  ;;  %v2227_v23 = vadd.f32 %v8040_v44, %v11260_v52  ;;  %v8043_v49 = vadd.f32 %v8042_v56, %v8041_v39  ;;  %v2951_v59 = vrot.slane %v2949_v36, 1 }
 0x2b8   : > { %4015 = vmatmul.mubr.bf16.gmra.mrb[144].mxu0 %v11529_v29  ;;  %v2954_v20 = vshll.u32 %v2821_v37, 16  ;;  %v2671_v22 = vadd.f32 %v11297_v38, %v2612_v35  ;;  %v2724_v21 = vmax.f32 %v2670_v27, 0.0  ;;  %v3106_v10 = vrot.slane %v2821_v37, 1 }
 0x2b9   : > { %v2672_v48 = vadd.f32 %v11297_v38, %v2613_v11  ;;  %v9396_v40 = vadd.f32 %v2448_v25, %v2227_v23  ;;  %v2230_v6 = vadd.f32 %v8043_v49, %v11262_v24  ;;  %v2952_v62 = vor.u32 %v2951_v59, %v2947_v30 }
 0x2ba   : > { %v2956_v42 = vrot.slane %v2954_v20, 1  ;;  %v2725_v31 = vmax.f32 %v2671_v22, 0.0  ;;  %v2778_v52 = vsel %vm367_vm0, %v2724_v21, 0.0  ;;  %v2555_v39 = vld [vmem:[#allocation2 + $0x108] sm:$0xff]  ;;  %v11558_v25 = vsel %vm942_vm5, %v3105_v26, %v3106_v10 }
 0x2bb   : > { %v2726_v44 = vmax.f32 %v2672_v48, 0.0  ;;  %9397 = vst [vmem:[#allocation2 + $0x121] sm:$0xff] %v9396_v40  ;;  %v9416_v36 = vadd.f32 %v2449_v14, %v2230_v6  ;;  %v8044_v56 = vpop.f32.mrb[160].mxu1  ;;  %v2614_v37 = vmul.f32 %v11291_v41, %v2555_v39  ;;  %v2450_v40 = vld [vmem:[#allocation2 + $0x139] sm:$0xff]  ;;  %v2451_v39 = vld [vmem:[#allocation2 + $0x141] sm:$0xff] }
 0x2bc   : > { %v11551_v35 = vsel %vm701_vm2, %v2952_v62, %v2956_v42  ;;  %v8045_v27 = vpop.f32.mrb[161].mxu1  ;;  %v2822_v24 = vpack.c.bf16 %v2725_v31, %v2778_v52  ;;  %v11555_v30 = vpack.c.bf16 %v2725_v31, %v2724_v21  ;;  %v2556_v23 = vld [vmem:[#allocation2 + $0x110] sm:$0xff]  ;;  %v2557_v49 = vld [vmem:[#allocation2 + $0x118] sm:$0x3] }
 0x2bd   : > { %3861 = vmatprep.mubr.bf16.mxu1 %v11551_v35  ;;  %v2780_v11 = vsel %vm378_vm1, %v2726_v44, 0.0  ;;  %9417 = vst [vmem:[#allocation2 + $0x129] sm:$0xff] %v9416_v36  ;;  %v8046_v59 = vadd.f32 %v8045_v27, %v8044_v56  ;;  %v8047_v20 = vpop.f32.mrb[162].mxu1  ;;  %v2615_v22 = vmul.f32 %v11291_v41, %v2556_v23  ;;  %v2673_v48 = vadd.f32 %v11297_v38, %v2614_v37 }
 0x2be   : > { %13000 = vst [vmem:[#allocation19_spill] sm:$0xff] %v11555_v30  ;;  %v2823_v14 = vpack.c.bf16 %v2780_v11, %v2780_v11  ;;  %7289 = vmatmul.mubr.msk.bf16.gmra.mrb[212].mxu1 %vm10359_vm4, %v11522_v1  ;;  %7337 = vmatprep.mubr.msk.bf16.mxu0 %vm10359_vm4, %v11555_v30  ;;  %v8048_v26 = vpop.f32.mrb[163].mxu1  ;;  %v2959_v21 = vshrl.u32 %v2822_v24, 16  ;;  %v2961_v10 = vshll.u32 %v2822_v24, 16  ;;  %v3108_v6 = vrot.slane %v2822_v24, 1 }
 0x2bf   : > { %v2616_v62 = vmul.f32 %v11291_v41, %v2557_v49  ;;  %v2235_v42 = vadd.f32 %v8046_v59, %v11266_v32  ;;  %v8049_v31 = vadd.f32 %v8048_v26, %v8047_v20  ;;  %v2674_v44 = vadd.f32 %v11297_v38, %v2615_v22 }
 0x2c0   : > { %4023 = vmatmul.mubr.bf16.gmra.mrb[148].mxu0 %v11558_v25  ;;  %v2966_v52 = vshll.u32 %v2823_v14, 16  ;;  %v2963_v36 = vrot.slane %v2961_v10, 1  ;;  %v2727_v56 = vmax.f32 %v2673_v48, 0.0  ;;  %v3109_v37 = vrot.slane %v2823_v14, 1  ;;  %v11580_v14 = vld [vmem:[#allocation6 + $0x1] ss:$0 sm:$0xff] }
 0x2c1   : > { %v2675_v27 = vadd.f32 %v11297_v38, %v2616_v62  ;;  %v9446_v11 = vadd.f32 %v2450_v40, %v2235_v42  ;;  %v2238_v23 = vadd.f32 %v8049_v31, %v11268_v46  ;;  %v2728_v1 = vmax.f32 %v2674_v44, 0.0 }
 0x2c2   : > { %v2968_v24 = vrot.slane %v2966_v52, 1  ;;  %v2964_v41 = vor.u32 %v2963_v36, %v2959_v21  ;;  %v2781_v32 = vsel %vm367_vm0, %v2727_v56, 0.0  ;;  %v2558_v59 = vld [vmem:[#allocation2 + $0x120] sm:$0xff]  ;;  %v11587_v40 = vsel %vm942_vm5, %v3108_v6, %v3109_v37  ;;  %v2452_v36 = vld [vmem:[#allocation2 + $0x151] sm:$0xff] }
 0x2c3   : > { %v2729_v49 = vmax.f32 %v2675_v27, 0.0  ;;  %9447 = vst [vmem:[#allocation2 + $0x139] sm:$0xff] %v9446_v11  ;;  %v9466_v20 = vadd.f32 %v2451_v39, %v2238_v23  ;;  %v8050_v22 = vpop.f32.mrb[164].mxu1  ;;  %v2824_v26 = vpack.c.bf16 %v2728_v1, %v2781_v32  ;;  %v11578_v10 = vpack.c.bf16 %v2728_v1, %v2727_v56  ;;  %v11602_v37 = vld [vmem:[%s12826_s2 + $0x1] ss:$0 sm:$0xff] }
 0x2c4   : > { %v2617_v38 = vmul.f32 %v11580_v14, %v2558_v59  ;;  %v8051_v48 = vpop.f32.mrb[165].mxu1  ;;  %v11584_v46 = vsel %vm701_vm2, %v2964_v41, %v2968_v24  ;;  %v2559_v62 = vld [vmem:[#allocation2 + $0x128] sm:$0xff]  ;;  %v2560_v42 = vld [vmem:[#allocation2 + $0x130] sm:$0x3]  ;;  %v2453_v59 = vld [vmem:[#allocation2 + $0x159] sm:$0xff] }
 0x2c5   : > { %13001 = vst [vmem:[#allocation21_spill] sm:$0xff] %v11578_v10  ;;  %v2783_v21 = vsel %vm378_vm1, %v2729_v49, 0.0  ;;  %9467 = vst [vmem:[#allocation2 + $0x141] sm:$0xff] %v9466_v20  ;;  %v8052_v31 = vadd.f32 %v8051_v48, %v8050_v22  ;;  %3869 = vmatprep.mubr.bf16.mxu1 %v11584_v46  ;;  %v8053_v1 = vpop.f32.mrb[166].mxu1  ;;  %7340 = vmatprep.mubr.msk.bf16.mxu0 %vm10359_vm4, %v11578_v10  ;;  %v2971_v44 = vshrl.u32 %v2824_v26, 16  ;;  %v2973_v39 = vshll.u32 %v2824_v26, 16 }
 0x2c6   : > { %v2825_v52 = vpack.c.bf16 %v2783_v21, %v2783_v21  ;;  %7292 = vmatmul.mubr.msk.bf16.gmra.mrb[216].mxu1 %vm10359_vm4, %v11555_v30  ;;  %v8054_v6 = vpop.f32.mrb[167].mxu1  ;;  %v2618_v56 = vmul.f32 %v11580_v14, %v2559_v62  ;;  %v2676_v27 = vadd.f32 %v11602_v37, %v2617_v38  ;;  %v3111_v11 = vrot.slane %v2824_v26, 1 }
 0x2c7   : > { %v2619_v23 = vmul.f32 %v11580_v14, %v2560_v42  ;;  %v2243_v24 = vadd.f32 %v8052_v31, %v11272_v60  ;;  %v8055_v41 = vadd.f32 %v8054_v6, %v8053_v1  ;;  %v2975_v32 = vrot.slane %v2973_v39, 1 }
 0x2c8   : > { %4031 = vmatmul.mubr.bf16.gmra.mrb[152].mxu0 %v11587_v40  ;;  %v2978_v49 = vshll.u32 %v2825_v52, 16  ;;  %v2677_v20 = vadd.f32 %v11602_v37, %v2618_v56  ;;  %v2730_v22 = vmax.f32 %v2676_v27, 0.0  ;;  %v3112_v48 = vrot.slane %v2825_v52, 1 }
 0x2c9   : > { %v2678_v21 = vadd.f32 %v11602_v37, %v2619_v23  ;;  %v9436_v62 = vadd.f32 %v2452_v36, %v2243_v24  ;;  %v2246_v38 = vadd.f32 %v8055_v41, %v11274_v5  ;;  %v2976_v26 = vor.u32 %v2975_v32, %v2971_v44 }
 0x2ca   : > { %v2980_v30 = vrot.slane %v2978_v49, 1  ;;  %v2731_v42 = vmax.f32 %v2677_v20, 0.0  ;;  %v2784_v60 = vsel %vm367_vm0, %v2730_v22, 0.0  ;;  %v2561_v1 = vld [vmem:[#allocation2 + $0x138] sm:$0xff]  ;;  %v11621_v36 = vsel %vm942_vm5, %v3111_v11, %v3112_v48 }
 0x2cb   : > { %v2732_v31 = vmax.f32 %v2678_v21, 0.0  ;;  %9437 = vst [vmem:[#allocation2 + $0x151] sm:$0xff] %v9436_v62  ;;  %v9456_v39 = vadd.f32 %v2453_v59, %v2246_v38  ;;  %v8056_v6 = vpop.f32.mrb[168].mxu1  ;;  %v2620_v52 = vmul.f32 %v11580_v14, %v2561_v1  ;;  %13002 = vst [vmem:[#allocation22_spill] sm:$0xff] %v11621_v36  ;;  %v2454_v21 = vld [vmem:[#allocation2 + $0x169] sm:$0xff]  ;;  %v2455_v1 = vld [vmem:[#allocation2 + $0x171] sm:$0xff] }
 0x2cc   : > { %v11614_v56 = vsel %vm701_vm2, %v2976_v26, %v2980_v30  ;;  %v8057_v27 = vpop.f32.mrb[169].mxu1  ;;  %v2826_v5 = vpack.c.bf16 %v2731_v42, %v2784_v60  ;;  %v11618_v44 = vpack.c.bf16 %v2731_v42, %v2730_v22  ;;  %v2562_v24 = vld [vmem:[#allocation2 + $0x140] sm:$0xff]  ;;  %v2563_v41 = vld [vmem:[#allocation2 + $0x148] sm:$0x3] }
 0x2cd   : > { %3877 = vmatprep.mubr.bf16.mxu1 %v11614_v56  ;;  %v2786_v23 = vsel %vm378_vm1, %v2732_v31, 0.0  ;;  %9457 = vst [vmem:[#allocation2 + $0x159] sm:$0xff] %v9456_v39  ;;  %v8058_v32 = vadd.f32 %v8057_v27, %v8056_v6  ;;  %v8059_v30 = vpop.f32.mrb[170].mxu1  ;;  %v2621_v59 = vmul.f32 %v11580_v14, %v2562_v24  ;;  %v2679_v20 = vadd.f32 %v11602_v37, %v2620_v52 }
 0x2ce   : > { %v2827_v49 = vpack.c.bf16 %v2786_v23, %v2786_v23  ;;  %7295 = vmatmul.mubr.msk.bf16.gmra.mrb[220].mxu1 %vm10359_vm4, %v11578_v10  ;;  %7343 = vmatprep.mubr.msk.bf16.mxu0 %vm10359_vm4, %v11618_v44  ;;  %v8060_v11 = vpop.f32.mrb[171].mxu1  ;;  %v2983_v22 = vshrl.u32 %v2826_v5, 16  ;;  %v2985_v48 = vshll.u32 %v2826_v5, 16  ;;  %v3114_v62 = vrot.slane %v2826_v5, 1 }
 0x2cf   : > { %v2622_v38 = vmul.f32 %v11580_v14, %v2563_v41  ;;  %v2251_v26 = vadd.f32 %v8058_v32, %v11278_v45  ;;  %v8061_v42 = vadd.f32 %v8060_v11, %v8059_v30  ;;  %v2680_v31 = vadd.f32 %v11602_v37, %v2621_v59 }
 0x2d0   : > { %4039 = vmatmul.mubr.bf16.gmra.mrb[156].mxu0 %v11621_v36  ;;  %v2990_v60 = vshll.u32 %v2827_v49, 16  ;;  %v2987_v39 = vrot.slane %v2985_v48, 1  ;;  %v2733_v6 = vmax.f32 %v2679_v20, 0.0  ;;  %v3115_v52 = vrot.slane %v2827_v49, 1 }
 0x2d1   : > { %v2681_v27 = vadd.f32 %v11602_v37, %v2622_v38  ;;  %v9486_v23 = vadd.f32 %v2454_v21, %v2251_v26  ;;  %v2254_v24 = vadd.f32 %v8061_v42, %v11280_v2  ;;  %v2734_v10 = vmax.f32 %v2680_v31, 0.0 }
 0x2d2   : > { %v2992_v5 = vrot.slane %v2990_v60, 1  ;;  %v2988_v41 = vor.u32 %v2987_v39, %v2983_v22  ;;  %v2787_v45 = vsel %vm367_vm0, %v2733_v6, 0.0  ;;  %v2564_v30 = vld [vmem:[#allocation2 + $0x150] sm:$0xff] }
 0x2d3   : > { %v2735_v32 = vmax.f32 %v2681_v27, 0.0  ;;  %9487 = vst [vmem:[#allocation2 + $0x169] sm:$0xff] %v9486_v23  ;;  %v9506_v11 = vadd.f32 %v2455_v1, %v2254_v24  ;;  %v8062_v59 = vpop.f32.mrb[172].mxu1  ;;  %v11641_v36 = vpack.c.bf16 %v2734_v10, %v2787_v45  ;;  %v11643_v20 = vpack.c.bf16 %v2734_v10, %v2733_v6  ;;  %v2456_v1 = vld [vmem:[#allocation2 + $0x181] sm:$0xff]  ;;  %v2457_v45 = vld [vmem:[#allocation2 + $0x189] sm:$0xff] }
 0x2d4   : > { %v2623_v49 = vmul.f32 %v11580_v14, %v2564_v30  ;;  %v8063_v21 = vpop.f32.mrb[173].mxu1  ;;  %v11647_v2 = vsel %vm701_vm2, %v2988_v41, %v2992_v5  ;;  %v2565_v48 = vld [vmem:[#allocation2 + $0x158] sm:$0xff]  ;;  %v2566_v38 = vld [vmem:[#allocation2 + $0x160] sm:$0x3]  ;;  %v11656_v10 = vsel %vm942_vm5, %v3114_v62, %v3115_v52 }
 0x2d5   : > { %13003 = vst [vmem:[#allocation36_spill] sm:$0xff] %v11643_v20  ;;  %v2789_v22 = vsel %vm378_vm1, %v2735_v32, 0.0  ;;  %9507 = vst [vmem:[#allocation2 + $0x171] sm:$0xff] %v9506_v11  ;;  %v8064_v26 = vadd.f32 %v8063_v21, %v8062_v59  ;;  %3885 = vmatprep.mubr.bf16.mxu1 %v11647_v2  ;;  %v8065_v42 = vpop.f32.mrb[174].mxu1  ;;  %7346 = vmatprep.mubr.msk.bf16.mxu0 %vm10359_vm4, %v11643_v20  ;;  %v2997_v31 = vshll.u32 %v11641_v36, 16  ;;  %v2995_v6 = vshrl.u32 %v11641_v36, 16 }
 0x2d6   : > { %v2829_v60 = vpack.c.bf16 %v2789_v22, %v2789_v22  ;;  %7298 = vmatmul.mubr.msk.bf16.gmra.mrb[224].mxu1 %vm10359_vm4, %v11618_v44  ;;  %v8066_v39 = vpop.f32.mrb[175].mxu1  ;;  %v2624_v27 = vmul.f32 %v11580_v14, %v2565_v48  ;;  %v2682_v23 = vadd.f32 %v11602_v37, %v2623_v49  ;;  %v2625_v24 = vmul.f32 %v11580_v14, %v2566_v38 }
 0x2d7   : > { %v2259_v62 = vadd.f32 %v8064_v26, %v11284_v28  ;;  %v8067_v52 = vadd.f32 %v8066_v39, %v8065_v42  ;;  %v2999_v5 = vrot.slane %v2997_v31, 1  ;;  %v3117_v11 = vrot.slane %v11641_v36, 1 }
 0x2d8   : > { %4047 = vmatmul.mubr.bf16.gmra.mrb[160].mxu0 %v11656_v10  ;;  %v3002_v41 = vshll.u32 %v2829_v60, 16  ;;  %v2683_v32 = vadd.f32 %v11602_v37, %v2624_v27  ;;  %v2736_v30 = vmax.f32 %v2682_v23, 0.0  ;;  %v2684_v59 = vadd.f32 %v11602_v37, %v2625_v24 }
 0x2d9   : > { %v9476_v21 = vadd.f32 %v2456_v1, %v2259_v62  ;;  %v2262_v49 = vadd.f32 %v8067_v52, %v11286_v47  ;;  %v3000_v22 = vor.u32 %v2999_v5, %v2995_v6  ;;  %v3118_v26 = vrot.slane %v2829_v60, 1 }
 0x2da   : > { %v3004_v48 = vrot.slane %v3002_v41, 1  ;;  %v2737_v38 = vmax.f32 %v2683_v32, 0.0  ;;  %v2790_v28 = vsel %vm367_vm0, %v2736_v30, 0.0  ;;  %v2738_v42 = vmax.f32 %v2684_v59, 0.0  ;;  %v2567_v31 = vld [vmem:[#allocation2 + $0x168] sm:$0xff] }
 0x2db   : > { %9477 = vst [vmem:[#allocation2 + $0x181] sm:$0xff] %v9476_v21  ;;  %v9496_v39 = vadd.f32 %v2457_v45, %v2262_v49  ;;  %v2626_v36 = vmul.f32 %v11580_v14, %v2567_v31  ;;  %v8108_v23 = vpop.f32.mrb[176].mxu1 }
 0x2dc   : > { %v11675_v27 = vsel %vm701_vm2, %v3000_v22, %v3004_v48  ;;  %v2830_v47 = vpack.c.bf16 %v2737_v38, %v2790_v28  ;;  %v11679_v1 = vpack.c.bf16 %v2737_v38, %v2736_v30  ;;  %v2792_v6 = vsel %vm378_vm1, %v2738_v42, 0.0  ;;  %v2568_v24 = vld [vmem:[#allocation2 + $0x170] sm:$0xff]  ;;  %v2569_v60 = vld [vmem:[#allocation2 + $0x178] sm:$0x3]  ;;  %v8109_v62 = vpop.f32.mrb[177].mxu1 }
 0x2dd   : > { %3893 = vmatprep.mubr.bf16.mxu1 %v11675_v27  ;;  %9497 = vst [vmem:[#allocation2 + $0x189] sm:$0xff] %v9496_v39  ;;  %v2831_v52 = vpack.c.bf16 %v2792_v6, %v2792_v6  ;;  %v2627_v5 = vmul.f32 %v11580_v14, %v2568_v24  ;;  %v2685_v41 = vadd.f32 %v11602_v37, %v2626_v36  ;;  %v8111_v32 = vpop.f32.mrb[178].mxu1 }
 0x2de   : > { %v2628_v45 = vmul.f32 %v11580_v14, %v2569_v60  ;;  %7301 = vmatmul.mubr.msk.bf16.gmra.mrb[228].mxu1 %vm10359_vm4, %v11643_v20  ;;  %7349 = vmatprep.mubr.msk.bf16.mxu0 %vm10359_vm4, %v11679_v1  ;;  %v11693_v30 = vsel %vm942_vm5, %v3117_v11, %v3118_v26  ;;  %v3009_v59 = vshll.u32 %v2830_v47, 16  ;;  %v11695_v21 = vadd.f32 %v8109_v62, %v8108_v23  ;;  %v8112_v49 = vpop.f32.mrb[179].mxu1 }
 0x2df   : > { %13004 = vst [vmem:[#allocation20_spill] sm:$0xff] %v11693_v30  ;;  %v3014_v22 = vshll.u32 %v2831_v52, 16  ;;  %v2686_v48 = vadd.f32 %v11602_v37, %v2627_v5  ;;  %v2739_v38 = vmax.f32 %v2685_v41, 0.0  ;;  %v3007_v28 = vshrl.u32 %v2830_v47, 16 }
 0x2e0   : > { %4055 = vmatmul.mubr.bf16.gmra.mrb[164].mxu0 %v11693_v30  ;;  %v3011_v42 = vrot.slane %v3009_v59, 1  ;;  %v2687_v31 = vadd.f32 %v11602_v37, %v2628_v45  ;;  %v11700_v39 = vadd.f32 %v8112_v49, %v8111_v32  ;;  %v3120_v23 = vrot.slane %v2830_v47, 1 }
 0x2e1   : > { %v3016_v36 = vrot.slane %v3014_v22, 1  ;;  %v2740_v6 = vmax.f32 %v2686_v48, 0.0  ;;  %v2793_v11 = vsel %vm367_vm0, %v2739_v38, 0.0  ;;  %v3121_v24 = vrot.slane %v2831_v52, 1 }
 0x2e2   : > { %v3012_v26 = vor.u32 %v3011_v42, %v3007_v28  ;;  %v2741_v60 = vmax.f32 %v2687_v31, 0.0  ;;  %v2570_v62 = vld [vmem:[#allocation2 + $0x180] sm:$0xff] }
 0x2e3   : > { %v2832_v20 = vpack.c.bf16 %v2740_v6, %v2793_v11  ;;  %v11704_v30 = vpack.c.bf16 %v2740_v6, %v2739_v38  ;;  %v2629_v5 = vmul.f32 %v11580_v14, %v2570_v62  ;;  %v11721_v49 = vsel %vm942_vm5, %v3120_v23, %v3121_v24 }
 0x2e4   : > { %v11708_v41 = vsel %vm701_vm2, %v3012_v26, %v3016_v36  ;;  %v2795_v45 = vsel %vm378_vm1, %v2741_v60, 0.0  ;;  %v2571_v32 = vld [vmem:[#allocation2 + $0x188] sm:$0xff] }
 0x2e5   : > { %3901 = vmatprep.mubr.bf16.mxu1 %v11708_v41  ;;  %7352 = vmatprep.mubr.msk.bf16.mxu0 %vm10359_vm4, %v11704_v30  ;;  %v2833_v47 = vpack.c.bf16 %v2795_v45, %v2795_v45  ;;  %v3021_v52 = vshll.u32 %v2832_v20, 16  ;;  %v2630_v59 = vmul.f32 %v11580_v14, %v2571_v32  ;;  %v2688_v22 = vadd.f32 %v11602_v37, %v2629_v5  ;;  %v9794_v45 = vld [vmem:[#allocation8 + $0x448] sm:$0xff]   ;;  %v9795_v32 = vld [vmem:[#allocation8 + $0x450] sm:$0xff]  }
 0x2e6   : > { %7304 = vmatmul.mubr.msk.bf16.gmra.mrb[232].mxu1 %vm10359_vm4, %v11679_v1  ;;  %v3019_v48 = vshrl.u32 %v2832_v20, 16  ;;  %v3123_v60 = vrot.slane %v2832_v20, 1 }
 0x2e7   : > { %v3023_v38 = vrot.slane %v3021_v52, 1  ;;  %v3026_v28 = vshll.u32 %v2833_v47, 16  ;;  %v2689_v42 = vadd.f32 %v11602_v37, %v2630_v59  ;;  %v2742_v31 = vmax.f32 %v2688_v22, 0.0  ;;  %v9815_v59 = vld [vmem:[#allocation8 + $0x4d8] sm:$0xff]  }
 0x2e8   : > { %4063 = vmatmul.mubr.bf16.gmra.mrb[168].mxu0 %v11721_v49  ;;  %v3124_v62 = vrot.slane %v2833_v47, 1  ;;  %v13009_v47 = vld [vmem:[#allocation21_spill] sm:$0xff]  ;;  %v9817_v22 = vld [vmem:[#allocation8 + $0x498] sm:$0xff]  }
 0x2e9   : > { %v3024_v36 = vor.u32 %v3023_v38, %v3019_v48  ;;  %v3028_v6 = vrot.slane %v3026_v28, 1  ;;  %v2743_v11 = vmax.f32 %v2689_v42, 0.0  ;;  %v2796_v26 = vsel %vm367_vm0, %v2742_v31, 0.0 }
 0x2ea   : > { %v11743_v20 = vsel %vm942_vm5, %v3123_v60, %v3124_v62 }
 0x2eb   : > { %v11729_v23 = vsel %vm701_vm2, %v3024_v36, %v3028_v6  ;;  %v11731_v24 = vpack.c.bf16 %v2743_v11, %v2796_v26  ;;  %v11733_v5 = vpack.c.bf16 %v2743_v11, %v2742_v31  ;;  %v13011_v6 = vld [vmem:[#allocation36_spill] sm:$0xff] }
 0x2ec   : > { %3909 = vmatprep.mubr.bf16.mxu1 %v11729_v23 }
 0x2ed   : > { %7355 = vmatprep.mubr.msk.bf16.mxu0 %vm10359_vm4, %v11733_v5 }
 0x2ee   : > { %7307 = vmatmul.mubr.msk.bf16.gmra.mrb[236].mxu1 %vm10359_vm4, %v11704_v30 }
 0x2ef   : > { %4111 = vmatprep.mubr.bf16.mxu1 %v11332_v12  ;;  %v9796_v12 = vld [vmem:[#allocation8 + $0x458] sm:$0xff]  }
 0x2f0   : > { %4071 = vmatmul.mubr.bf16.gmra.mrb[172].mxu0 %v11743_v20 }
 0x2f1   : > { %4272 = vmatprep.mubr.bf16.mxu0 %v11355_v53 }
 0x2f6   : > { %4112 = vmatmul.mubr.bf16.vlgmr.msra.gmra.mrb[240].mxu1 %v11325_v13  ;;  %v9797_v13 = vld [vmem:[#allocation8 + $0x460] sm:$0xff]  }
 0x2f7   : > { %4119 = vmatprep.mubr.bf16.mxu1 %v11358_v9 }
 0x2f8   : > { %7358 = vmatmul.mubr.msk.bf16.vlgmr.msra.gmra.mrb[176].mxu0 %vm10359_vm4, %v11329_v16  ;;  %v9798_v16 = vld [vmem:[#allocation8 + $0x468] sm:$0xff]  }
 0x2f9   : > { %4280 = vmatprep.mubr.bf16.mxu0 %v11380_v50  ;;  %9085 = vmatpush3.bf16.msra.mxu0 %v11484_v61  ;;  %v13007_v61 = vld [vmem:[#allocation19_spill] sm:$0xff] }
 0x2fa   : > { %9086 = vmatprep.subr.bf16.mxu0 %v9794_v45 }
 0x2fd   : > { %9087 = vmatpush3.bf16.msra.mxu0 %v9794_v45 }
 0x2fe   : > { %9088 = vmatprep.subr.bf16.mxu0 %v9795_v32  ;;  %4120 = vmatmul.mubr.bf16.gmra.mrb[244].mxu1 %v11355_v53  ;;  %v9800_v53 = vld [vmem:[#allocation8 + $0x478] sm:$0xff]  }
 0x2ff   : > { %4127 = vmatprep.mubr.bf16.mxu1 %v11387_v18 }
 0x300   : > { %7361 = vmatmul.mubr.msk.bf16.gmra.mrb[180].mxu0 %vm10359_vm4, %v11351_v33  ;;  %v9799_v33 = vld [vmem:[#allocation8 + $0x470] sm:$0xff]  }
 0x301   : > { %4288 = vmatprep.mubr.bf16.mxu0 %v11411_v7  ;;  %9089 = vmatpush3.bf16.msra.mxu0 %v9795_v32 }
 0x302   : > { %9090 = vmatprep.subr.bf16.mxu0 %v9796_v12 }
 0x305   : > { %9091 = vmatpush3.bf16.msra.mxu0 %v9796_v12 }
 0x306   : > { %9092 = vmatprep.subr.bf16.mxu0 %v9797_v13  ;;  %4128 = vmatmul.mubr.bf16.gmra.mrb[248].mxu1 %v11380_v50  ;;  %v9801_v50 = vld [vmem:[#allocation8 + $0x4c0] sm:$0xff]  }
 0x307   : > { %4135 = vmatprep.mubr.bf16.mxu1 %v11414_v19  ;;  %8564 = vmatprep.subr.bf16.mxu1 %v9801_v50 }
 0x308   : > { %7364 = vmatmul.mubr.msk.bf16.gmra.mrb[184].mxu0 %vm10359_vm4, %v11384_v4  ;;  %v9802_v4 = vld [vmem:[#allocation8 + $0x480] sm:$0xff]  }
 0x309   : > { %4296 = vmatprep.mubr.bf16.mxu0 %v11436_v15  ;;  %9093 = vmatpush3.bf16.msra.mxu0 %v9797_v13  ;;  %v3145_v13 = vshll.u32 %v11731_v24, 16 }
 0x30a   : > { %9094 = vmatprep.subr.bf16.mxu0 %v9798_v16  ;;  %8565 = vmatpush3.bf16.msra.mxu1 %v9802_v4  ;;  %v9822_v4 = vld [vmem:[#allocation8 + $0x4a0] sm:$0xff]  }
 0x30d   : > { %9095 = vmatpush3.bf16.msra.mxu0 %v9798_v16 }
 0x30e   : > { %9096 = vmatprep.subr.bf16.mxu0 %v9799_v33  ;;  %4136 = vmatmul.mubr.bf16.gmra.mrb[252].mxu1 %v11411_v7  ;;  %v9803_v7 = vld [vmem:[#allocation8 + $0x4c8] sm:$0xff]  }
 0x30f   : > { %4143 = vmatprep.mubr.bf16.mxu1 %v11443_v58  ;;  %8566 = vmatprep.subr.bf16.mxu1 %v9803_v7 }
 0x310   : > { %7367 = vmatmul.mubr.msk.bf16.gmra.mrb[188].mxu0 %vm10359_vm4, %v11407_v34  ;;  %v13005_v34 = vld [vmem:[#allocation16_spill] sm:$0xff] }
 0x311   : > { %4304 = vmatprep.mubr.bf16.mxu0 %v11467_v3  ;;  %9097 = vmatpush3.bf16.msra.mxu0 %v9799_v33 }
 0x312   : > { %9098 = vmatprep.subr.bf16.mxu0 %v9800_v53 }
 0x315   : > { %9099 = vmatpush3.bf16.msra.mxu0 %v9800_v53  ;;  %v9821_v53 = vld [vmem:[#allocation8 + $0x4e0] sm:$0xff]  }
 0x316   : > { %4144 = vmatmul.mubr.bf16.gmra.mrb[0].mxu1 %v11436_v15  ;;  %v9804_v15 = vld [vmem:[#allocation8 + $0x540] sm:$0xff]  }
 0x317   : > { %4151 = vmatprep.mubr.bf16.mxu1 %v11470_v57  ;;  %8676 = vmatprep.subr.bf16.mxu0 %v9804_v15  ;;  %v3147_v15 = vrot.slane %v3145_v13, 1 }
 0x318   : > { %7370 = vmatmul.mubr.msk.bf16.gmra.mrb[192].mxu0 %vm10359_vm4, %v11440_v8  ;;  %v9805_v8 = vld [vmem:[#allocation8 + $0x488] sm:$0xff]  }
 0x319   : > { %4312 = vmatprep.mubr.bf16.mxu0 %v11495_v17  ;;  %8567 = vmatpush3.bf16.msra.mxu1 %v9805_v8 }
 0x31e   : > { %4152 = vmatmul.mubr.bf16.gmra.mrb[4].mxu1 %v11467_v3  ;;  %v13006_v3 = vld [vmem:[#allocation18_spill] sm:$0xff] }
 0x31f   : > { %4159 = vmatprep.mubr.bf16.mxu1 %v11502_v0 }
 0x320   : > { %7373 = vmatmul.mubr.msk.bf16.gmra.mrb[196].mxu0 %vm10359_vm4, %v13005_v34 }
 0x321   : > { %4320 = vmatprep.mubr.bf16.mxu0 %v11526_v54 }
 0x326   : > { %4160 = vmatmul.mubr.bf16.gmra.mrb[8].mxu1 %v11495_v17  ;;  %v9809_v17 = vld [vmem:[#allocation8 + $0x4d0] sm:$0xff]  }
 0x327   : > { %4167 = vmatprep.mubr.bf16.mxu1 %v11529_v29  ;;  %8568 = vmatprep.subr.bf16.mxu1 %v9809_v17 }
 0x328   : > { %7376 = vmatmul.mubr.msk.bf16.gmra.mrb[200].mxu0 %vm10359_vm4, %v11499_v63  ;;  %v9811_v63 = vld [vmem:[#allocation8 + $0x490] sm:$0xff]  }
 0x329   : > { %4328 = vmatprep.mubr.bf16.mxu0 %v11551_v35  ;;  %8569 = vmatpush3.bf16.msra.mxu1 %v9811_v63  ;;  %v9826_v63 = vld [vmem:[#allocation8 + $0x4a8] sm:$0xff]  }
 0x32a   : > { %8570 = vmatprep.subr.bf16.mxu1 %v9815_v59 }
 0x32d   : > { %8571 = vmatpush3.bf16.msra.mxu1 %v9817_v22 }
 0x32e   : > { %4168 = vmatmul.mubr.bf16.gmra.mrb[12].mxu1 %v11526_v54  ;;  %v13008_v54 = vld [vmem:[#allocation22_spill] sm:$0xff]  ;;  %8572 = vmatprep.subr.bf16.mxu1 %v9821_v53 }
 0x32f   : > { %4175 = vmatprep.mubr.bf16.mxu1 %v11558_v25 }
 0x330   : > { %7379 = vmatmul.mubr.msk.bf16.gmra.mrb[204].mxu0 %vm10359_vm4, %v13006_v3 }
 0x331   : > { %4336 = vmatprep.mubr.bf16.mxu0 %v11584_v46  ;;  %8573 = vmatpush3.bf16.msra.mxu1 %v9822_v4 }
 0x336   : > { %4176 = vmatmul.mubr.bf16.gmra.mrb[16].mxu1 %v11551_v35  ;;  %v2572_v35 = vld [vmem:[#allocation2 + $0x190] sm:$0x3] }
 0x337   : > { %4183 = vmatprep.mubr.bf16.mxu1 %v11587_v40  ;;  %v2631_v52 = vmul.f32 %v11580_v14, %v2572_v35 }
 0x338   : > { %7382 = vmatmul.mubr.msk.bf16.gmra.mrb[208].mxu0 %vm10359_vm4, %v13007_v61  ;;  %v9825_v61 = vld [vmem:[#allocation8 + $0x4e8] sm:$0xff]  }
 0x339   : > { %4344 = vmatprep.mubr.bf16.mxu0 %v11614_v56  ;;  %8574 = vmatprep.subr.bf16.mxu1 %v9825_v61 }
 0x33a   : > { %8575 = vmatpush3.bf16.msra.mxu1 %v9826_v63 }
 0x33e   : > { %4184 = vmatmul.mubr.bf16.gmra.mrb[20].mxu1 %v11584_v46  ;;  %v2690_v46 = vadd.f32 %v11602_v37, %v2631_v52 }
 0x33f   : > { %4191 = vmatprep.mubr.bf16.mxu1 %v13008_v54 }
 0x340   : > { %7385 = vmatmul.mubr.msk.bf16.gmra.mrb[212].mxu0 %vm10359_vm4, %v13009_v47 }
 0x341   : > { %4352 = vmatprep.mubr.bf16.mxu0 %v11647_v2 }
 0x346   : > { %4192 = vmatmul.mubr.bf16.gmra.mrb[24].mxu1 %v11614_v56  ;;  %v2744_v56 = vmax.f32 %v2690_v46, 0.0 }
 0x347   : > { %4199 = vmatprep.mubr.bf16.mxu1 %v11656_v10 }
 0x348   : > { %7388 = vmatmul.mubr.msk.bf16.gmra.mrb[216].mxu0 %vm10359_vm4, %v11618_v44  ;;  %v13010_v44 = vld [vmem:[#allocation20_spill] sm:$0xff]  ;;  %v2798_v26 = vsel %vm378_vm1, %v2744_v56, 0.0 }
 0x349   : > { %4360 = vmatprep.mubr.bf16.mxu0 %v11675_v27  ;;  %v8220_v48 = vpop.f32.mrb[112].mxu0  ;;  %v11831_v12 = vpack.c.bf16 %v2798_v26, %v2798_v26 }
 0x34a   : > { %v8221_v38 = vpop.f32.mrb[113].mxu0 }
 0x34b   : > { %v8222_v28 = vadd.f32 %v8221_v38, %v8220_v48  ;;  %v8223_v42 = vpop.f32.mrb[114].mxu0  ;;  %v3150_v8 = vshll.u32 %v11831_v12, 16  ;;  %v3158_v13 = vrot.slane %v11831_v12, 1 }
 0x34c   : > { %v8224_v14 = vpop.f32.mrb[115].mxu0 }
 0x34d   : > { %v8225_v31 = vadd.f32 %v8224_v14, %v8223_v42  ;;  %v11818_v36 = vadd.f32 %v8222_v28, %v11695_v21  ;;  %v3152_v22 = vrot.slane %v3150_v8, 1  ;;  %v9827_v42 = vld [vmem:[#allocation8 + $0x4f0] sm:$0xff]  }
 0x34e   : > { %4200 = vmatmul.mubr.bf16.gmra.mrb[28].mxu1 %v11647_v2  ;;  %8576 = vmatprep.subr.bf16.mxu1 %v9827_v42 }
 0x34f   : > { %4207 = vmatprep.mubr.bf16.mxu1 %v13010_v44  ;;  %v11826_v37 = vadd.f32 %v8225_v31, %v11700_v39  ;;  %v9828_v31 = vld [vmem:[#allocation8 + $0x4b0] sm:$0xff]  }
 0x350   : > { %7391 = vmatmul.mubr.msk.bf16.gmra.mrb[220].mxu0 %vm10359_vm4, %v13011_v6  ;;  %v8114_v11 = vpop.f32.mrb[180].mxu1  ;;  %8577 = vmatpush3.bf16.msra.mxu1 %v9828_v31 }
 0x351   : > { %4368 = vmatprep.mubr.bf16.mxu0 %v11708_v41  ;;  %v8115_v60 = vpop.f32.mrb[181].mxu1 }
 0x352   : > { %v8116_v21 = vadd.f32 %v8115_v60, %v8114_v11  ;;  %v8226_v62 = vpop.f32.mrb[116].mxu0  ;;  %v8117_v45 = vpop.f32.mrb[182].mxu1 }
 0x353   : > { %v8227_v2 = vpop.f32.mrb[117].mxu0  ;;  %v8118_v32 = vpop.f32.mrb[183].mxu1 }
 0x354   : > { %v8228_v16 = vadd.f32 %v8227_v2, %v8226_v62  ;;  %v8119_v33 = vadd.f32 %v8118_v32, %v8117_v45  ;;  %v8229_v39 = vpop.f32.mrb[118].mxu0  ;;  %v9832_v45 = vld [vmem:[#allocation8 + $0x4b8] sm:$0xff]   ;;  %v3157_v32 = vrot.slane %v11731_v24, 1 }
 0x355   : > { %v8230_v50 = vpop.f32.mrb[119].mxu0 }
 0x356   : > { %v8231_v34 = vadd.f32 %v8230_v50, %v8229_v39  ;;  %4208 = vmatmul.mubr.bf16.gmra.mrb[32].mxu1 %v11675_v27  ;;  %v11835_v7 = vadd.f32 %v8228_v16, %v8116_v21  ;;  %v3143_v27 = vshrl.u32 %v11731_v24, 16  ;;  %v9831_v21 = vld [vmem:[#allocation8 + $0x4f8] sm:$0xff]   ;;  %v11860_v8 = vsel %vm942_vm5, %v3157_v32, %v3158_v13  ;;  %v13012_v24 = vld [vmem:[#allocation13_spill] sm:$0xff]  ;;  %v9807_v13 = vld [vmem:[#allocation8 + $0x548] sm:$0xff]  }
 0x357   : > { %4215 = vmatprep.mubr.bf16.mxu1 %v11721_v49  ;;  %8578 = vmatprep.subr.bf16.mxu1 %v9831_v21 }
 0x358   : > { %7394 = vmatmul.mubr.msk.bf16.gmra.mrb[224].mxu0 %vm10359_vm4, %v11679_v1  ;;  %v11843_v3 = vadd.f32 %v8231_v34, %v8119_v33  ;;  %v3148_v1 = vor.u32 %v3147_v15, %v3143_v27  ;;  %8579 = vmatpush3.bf16.msra.mxu1 %v9832_v45 }
 0x359   : > { %4376 = vmatprep.mubr.bf16.mxu0 %v11729_v23  ;;  %v8120_v17 = vpop.f32.mrb[184].mxu1 }
 0x35a   : > { %v8121_v47 = vpop.f32.mrb[185].mxu1  ;;  %v8232_v35 = vpop.f32.mrb[120].mxu0  ;;  %v3153_v26 = vsel %vm701_vm2, %v3148_v1, %v3152_v22 }
 0x35b   : > { %v8122_v52 = vadd.f32 %v8121_v47, %v8120_v17  ;;  %v8123_v46 = vpop.f32.mrb[186].mxu1  ;;  %v8233_v59 = vpop.f32.mrb[121].mxu0 }
 0x35c   : > { %v8234_v48 = vadd.f32 %v8233_v59, %v8232_v35  ;;  %v8124_v38 = vpop.f32.mrb[187].mxu1  ;;  %v8235_v28 = vpop.f32.mrb[122].mxu0 }
 0x35d   : > { %v8125_v14 = vadd.f32 %v8124_v38, %v8123_v46  ;;  %v8236_v56 = vpop.f32.mrb[123].mxu0 }
 0x35e   : > { %v8237_v6 = vadd.f32 %v8236_v56, %v8235_v28  ;;  %4216 = vmatmul.mubr.bf16.gmra.mrb[36].mxu1 %v11708_v41  ;;  %v11847_v11 = vadd.f32 %v8234_v48, %v8122_v52 }
 0x35f   : > { %4223 = vmatprep.mubr.bf16.mxu1 %v11743_v20 }
 0x360   : > { %7397 = vmatmul.mubr.msk.bf16.gmra.mrb[228].mxu0 %vm10359_vm4, %v11704_v30  ;;  %v11854_v60 = vadd.f32 %v8237_v6, %v8125_v14 }
 0x361   : > { %4384 = vmatprep.mubr.bf16.mxu0 %v3153_v26  ;;  %v8126_v62 = vpop.f32.mrb[188].mxu1 }
 0x362   : > { %v8127_v2 = vpop.f32.mrb[189].mxu1 }
 0x363   : > { %v8238_v41 = vpop.f32.mrb[124].mxu0  ;;  %v8128_v16 = vadd.f32 %v8127_v2, %v8126_v62  ;;  %v8129_v33 = vpop.f32.mrb[190].mxu1 }
 0x364   : > { %v8239_v39 = vpop.f32.mrb[125].mxu0  ;;  %v8130_v53 = vpop.f32.mrb[191].mxu1 }
 0x365   : > { %v8240_v30 = vadd.f32 %v8239_v39, %v8238_v41  ;;  %v8241_v50 = vpop.f32.mrb[126].mxu0  ;;  %v8131_v4 = vadd.f32 %v8130_v53, %v8129_v33  ;;  %v9810_v53 = vld [vmem:[#allocation8 + $0x550] sm:$0xff]  }
 0x366   : > { %v8242_v34 = vpop.f32.mrb[127].mxu0  ;;  %4224 = vmatmul.mubr.bf16.gmra.mrb[40].mxu1 %v11729_v23 }
 0x367   : > { %v8243_v15 = vadd.f32 %v8242_v34, %v8241_v50  ;;  %v11862_v61 = vadd.f32 %v8240_v30, %v8128_v16  ;;  %4231 = vmatprep.mubr.bf16.mxu1 %v11860_v8 }
 0x368   : > { %7400 = vmatmul.mubr.msk.bf16.gmra.mrb[232].mxu0 %vm10359_vm4, %v11733_v5  ;;  %v13013_v5 = vmov 0.0|0.0  }
 0x369   : > { %4392 = vmatprep.mubr.bf16.mxu0 %v13012_v24  ;;  %v11869_v12 = vadd.f32 %v8243_v15, %v8131_v4  ;;  %v8132_v17 = vpop.f32.mrb[192].mxu1 }
 0x36a   : > { %v8133_v27 = vpop.f32.mrb[193].mxu1 }
 0x36b   : > { %v8244_v63 = vpop.f32.mrb[128].mxu0  ;;  %v8134_v47 = vadd.f32 %v8133_v27, %v8132_v17  ;;  %v8135_v23 = vpop.f32.mrb[194].mxu1 }
 0x36c   : > { %v8245_v35 = vpop.f32.mrb[129].mxu0  ;;  %v8136_v46 = vpop.f32.mrb[195].mxu1 }
 0x36d   : > { %v8246_v52 = vadd.f32 %v8245_v35, %v8244_v63  ;;  %v8247_v59 = vpop.f32.mrb[130].mxu0  ;;  %v8137_v1 = vadd.f32 %v8136_v46, %v8135_v23  ;;  %v9812_v23 = vld [vmem:[#allocation8 + $0x510] sm:$0xff]  }
 0x36e   : > { %v8248_v22 = vpop.f32.mrb[131].mxu0  ;;  %4232 = vmatmul.mubr.bf16.gmra.mrb[44].mxu1 %v3153_v26  ;;  %v9806_v26 = vld [vmem:[#allocation8 + $0x500] sm:$0xff]  }
 0x36f   : > { %v8249_v48 = vadd.f32 %v8248_v22, %v8247_v59  ;;  %v11871_v38 = vadd.f32 %v8246_v52, %v8134_v47  ;;  %5925 = vmatprep.mubr.bf16.mxu1 %v13012_v24  ;;  %v9814_v59 = vld [vmem:[#allocation8 + $0x518] sm:$0xff]  }
 0x370   : > { %4393 = vmatmul.mubr.bf16.gmra.mrb[236].mxu0 %v13013_v5 }
 0x371   : > { %9100 = vmatprep.mubr.bf16.mxu0 %v11358_v9  ;;  %v11876_v28 = vadd.f32 %v8249_v48, %v8137_v1  ;;  %v8138_v42 = vpop.f32.mrb[196].mxu1  ;;  %v9808_v9 = vld [vmem:[#allocation8 + $0x508] sm:$0xff]   ;;  %v9816_v48 = vld [vmem:[#allocation8 + $0x560] sm:$0xff]  }
 0x372   : > { %v8139_v14 = vpop.f32.mrb[197].mxu1 }
 0x373   : > { %v8250_v56 = vpop.f32.mrb[132].mxu0  ;;  %v8140_v31 = vadd.f32 %v8139_v14, %v8138_v42  ;;  %v8141_v6 = vpop.f32.mrb[198].mxu1 }
 0x374   : > { %v8251_v21 = vpop.f32.mrb[133].mxu0  ;;  %v8142_v45 = vpop.f32.mrb[199].mxu1 }
 0x375   : > { %v8252_v62 = vadd.f32 %v8251_v21, %v8250_v56  ;;  %v8253_v2 = vpop.f32.mrb[134].mxu0  ;;  %v8143_v41 = vadd.f32 %v8142_v45, %v8141_v6 }
 0x376   : > { %v8254_v32 = vpop.f32.mrb[135].mxu0  ;;  %5926 = vmatmul.mubr.bf16.vlgmr.msra.gmra.mrb[48].mxu1 %v13013_v5 }
 0x377   : > { %v8255_v16 = vadd.f32 %v8254_v32, %v8253_v2  ;;  %v11879_v33 = vadd.f32 %v8252_v62, %v8140_v31  ;;  %v9818_v2 = vld [vmem:[#allocation8 + $0x520] sm:$0xff]  }
 0x378   : > { %9101 = vmatmul.mubr.bf16.vlgmr.msra.gmra.mrb[80].mxu0 %v11387_v18 }
 0x379   : > { %9104 = vmatprep.mubr.bf16.mxu0 %v11414_v19  ;;  %8677 = vmatpush3.bf16.msra.mxu0 %v9806_v26  ;;  %v11883_v39 = vadd.f32 %v8255_v16, %v8143_v41  ;;  %v8144_v30 = vpop.f32.mrb[200].mxu1  ;;  %v9813_v19 = vld [vmem:[#allocation8 + $0x558] sm:$0xff]  }
 0x37a   : > { %8678 = vmatprep.subr.bf16.mxu0 %v9807_v13  ;;  %v8145_v50 = vpop.f32.mrb[201].mxu1  ;;  %v9820_v13 = vld [vmem:[#allocation8 + $0x528] sm:$0xff]  }
 0x37b   : > { %v8256_v4 = vpop.f32.mrb[136].mxu0  ;;  %v8146_v34 = vadd.f32 %v8145_v50, %v8144_v30  ;;  %v8147_v15 = vpop.f32.mrb[202].mxu1  ;;  %v9823_v30 = vld [vmem:[#allocation8 + $0x570] sm:$0xff]  }
 0x37c   : > { %v8257_v17 = vpop.f32.mrb[137].mxu0  ;;  %v8148_v63 = vpop.f32.mrb[203].mxu1 }
 0x37d   : > { %v8258_v27 = vadd.f32 %v8257_v17, %v8256_v4  ;;  %v8259_v47 = vpop.f32.mrb[138].mxu0  ;;  %8679 = vmatpush3.bf16.msra.mxu0 %v9808_v9  ;;  %v8149_v18 = vadd.f32 %v8148_v63, %v8147_v15 }
 0x37e   : > { %v8260_v35 = vpop.f32.mrb[139].mxu0  ;;  %8680 = vmatprep.subr.bf16.mxu0 %v9810_v53 }
 0x37f   : > { %v8261_v52 = vadd.f32 %v8260_v35, %v8259_v47  ;;  %v11885_v46 = vadd.f32 %v8258_v27, %v8146_v34  ;;  %v9824_v47 = vld [vmem:[#allocation8 + $0x530] sm:$0xff]  }
 0x380   : > { %9105 = vmatmul.mubr.bf16.gmra.mrb[84].mxu0 %v11443_v58 }
 0x381   : > { %9108 = vmatprep.mubr.bf16.mxu0 %v11470_v57  ;;  %8681 = vmatpush3.bf16.msra.mxu0 %v9812_v23  ;;  %v11889_v1 = vadd.f32 %v8261_v52, %v8149_v18  ;;  %v8150_v22 = vpop.f32.mrb[204].mxu1  ;;  %v9819_v57 = vld [vmem:[#allocation8 + $0x568] sm:$0xff]   ;;  %v9830_v52 = vld [vmem:[#allocation8 + $0x538] sm:$0xff]  }
 0x382   : > { %8682 = vmatprep.subr.bf16.mxu0 %v9813_v19  ;;  %v8151_v42 = vpop.f32.mrb[205].mxu1 }
 0x383   : > { %v8262_v14 = vpop.f32.mrb[140].mxu0  ;;  %v8152_v56 = vadd.f32 %v8151_v42, %v8150_v22  ;;  %v8153_v31 = vpop.f32.mrb[206].mxu1  ;;  %v9833_v22 = vld [vmem:[#allocation8 + $0x640] sm:$0xff]  }
 0x384   : > { %v8263_v6 = vpop.f32.mrb[141].mxu0  ;;  %v8154_v62 = vpop.f32.mrb[207].mxu1 }
 0x385   : > { %v8264_v21 = vadd.f32 %v8263_v6, %v8262_v14  ;;  %v8265_v45 = vpop.f32.mrb[142].mxu0  ;;  %8683 = vmatpush3.bf16.msra.mxu0 %v9814_v59  ;;  %v8155_v58 = vadd.f32 %v8154_v62, %v8153_v31 }
 0x386   : > { %v8266_v26 = vpop.f32.mrb[143].mxu0  ;;  %8684 = vmatprep.subr.bf16.mxu0 %v9816_v48 }
 0x387   : > { %v8267_v41 = vadd.f32 %v8266_v26, %v8265_v45  ;;  %v11891_v32 = vadd.f32 %v8264_v21, %v8152_v56 }
 0x388   : > { %9109 = vmatmul.mubr.bf16.gmra.mrb[88].mxu0 %v11502_v0 }
 0x389   : > { %9112 = vmatprep.mubr.bf16.mxu0 %v11529_v29  ;;  %8685 = vmatpush3.bf16.msra.mxu0 %v9818_v2  ;;  %v11895_v16 = vadd.f32 %v8267_v41, %v8155_v58  ;;  %v8156_v9 = vpop.f32.mrb[208].mxu1  ;;  %v9829_v29 = vld [vmem:[#allocation8 + $0x578] sm:$0xff]  }
 0x38a   : > { %8686 = vmatprep.subr.bf16.mxu0 %v9819_v57  ;;  %v8157_v53 = vpop.f32.mrb[209].mxu1 }
 0x38b   : > { %v8268_v50 = vpop.f32.mrb[144].mxu0  ;;  %v8158_v4 = vadd.f32 %v8157_v53, %v8156_v9  ;;  %v8159_v34 = vpop.f32.mrb[210].mxu1 }
 0x38c   : > { %v8269_v15 = vpop.f32.mrb[145].mxu0  ;;  %v8160_v27 = vpop.f32.mrb[211].mxu1 }
 0x38d   : > { %v8270_v17 = vadd.f32 %v8269_v15, %v8268_v50  ;;  %v8271_v63 = vpop.f32.mrb[146].mxu0  ;;  %8687 = vmatpush3.bf16.msra.mxu0 %v9820_v13  ;;  %v8161_v0 = vadd.f32 %v8160_v27, %v8159_v34  ;;  %v9841_v27 = vld [vmem:[#allocation8 + $0x580] sm:$0xff]  }
 0x38e   : > { %v8272_v23 = vpop.f32.mrb[147].mxu0  ;;  %8688 = vmatprep.subr.bf16.mxu0 %v9823_v30 }
 0x38f   : > { %v11897_v18 = vadd.f32 %v8270_v17, %v8158_v4  ;;  %v8273_v35 = vadd.f32 %v8272_v23, %v8271_v63  ;;  %v9839_v17 = vld [vmem:[#allocation8 + $0x5c0] sm:$0xff]  }
 0x390   : > { %9113 = vmatmul.mubr.bf16.gmra.mrb[92].mxu0 %v11558_v25  ;;  %8788 = vmatprep.subr.bf16.mxu1 %v9839_v17 }
 0x391   : > { %v11900_v19 = vadd.f32 %v8273_v35, %v8161_v0  ;;  %9116 = vmatprep.mubr.bf16.mxu0 %v11587_v40  ;;  %8689 = vmatpush3.bf16.msra.mxu0 %v9824_v47  ;;  %v8162_v59 = vpop.f32.mrb[212].mxu1 }
 0x392   : > { %8690 = vmatprep.subr.bf16.mxu0 %v9829_v29  ;;  %v8163_v48 = vpop.f32.mrb[213].mxu1  ;;  %8789 = vmatpush3.bf16.msra.mxu1 %v9841_v27 }
 0x393   : > { %v8274_v42 = vpop.f32.mrb[148].mxu0  ;;  %v8164_v14 = vadd.f32 %v8163_v48, %v8162_v59  ;;  %v8165_v56 = vpop.f32.mrb[214].mxu1 }
 0x394   : > { %v8275_v31 = vpop.f32.mrb[149].mxu0  ;;  %v8166_v21 = vpop.f32.mrb[215].mxu1 }
 0x395   : > { %v8276_v6 = vadd.f32 %v8275_v31, %v8274_v42  ;;  %v8277_v62 = vpop.f32.mrb[150].mxu0  ;;  %8691 = vmatpush3.bf16.msra.mxu0 %v9830_v52  ;;  %v8167_v45 = vadd.f32 %v8166_v21, %v8165_v56 }
 0x396   : > { %v8278_v25 = vpop.f32.mrb[151].mxu0  ;;  %8900 = vmatprep.subr.bf16.mxu0 %v9833_v22 }
 0x397   : > { %v11903_v2 = vadd.f32 %v8276_v6, %v8164_v14  ;;  %v8279_v40 = vadd.f32 %v8278_v25, %v8277_v62 }
 0x398   : > { %9117 = vmatmul.mubr.bf16.gmra.mrb[96].mxu0 %v13008_v54 }
 0x399   : > { %v11906_v58 = vadd.f32 %v8279_v40, %v8167_v45  ;;  %9120 = vmatprep.mubr.bf16.mxu0 %v11656_v10  ;;  %v8168_v26 = vpop.f32.mrb[216].mxu1 }
 0x39a   : > { %v8169_v57 = vpop.f32.mrb[217].mxu1 }
 0x39b   : > { %v8280_v41 = vpop.f32.mrb[152].mxu0  ;;  %v8170_v13 = vadd.f32 %v8169_v57, %v8168_v26  ;;  %v8171_v9 = vpop.f32.mrb[218].mxu1 }
 0x39c   : > { %v8281_v30 = vpop.f32.mrb[153].mxu0  ;;  %v8172_v50 = vpop.f32.mrb[219].mxu1 }
 0x39d   : > { %v8282_v53 = vadd.f32 %v8281_v30, %v8280_v41  ;;  %v8283_v4 = vpop.f32.mrb[154].mxu0  ;;  %v8173_v34 = vadd.f32 %v8172_v50, %v8171_v9  ;;  %v9845_v50 = vld [vmem:[#allocation8 + $0x588] sm:$0xff]  }
 0x39e   : > { %v8284_v15 = vpop.f32.mrb[155].mxu0 }
 0x39f   : > { %v11909_v63 = vadd.f32 %v8282_v53, %v8170_v13  ;;  %v8285_v54 = vadd.f32 %v8284_v15, %v8283_v4  ;;  %v13014_v53 = vld [vmem:[#allocation37_spill] sm:$0xff] }
 0x3a0   : > { %9121 = vmatmul.mubr.bf16.gmra.mrb[100].mxu0 %v13010_v44 }
 0x3a1   : > { %v11912_v10 = vadd.f32 %v8285_v54, %v8173_v34  ;;  %9124 = vmatprep.mubr.bf16.mxu0 %v11721_v49  ;;  %v8174_v47 = vpop.f32.mrb[220].mxu1 }
 0x3a2   : > { %v8175_v0 = vpop.f32.mrb[221].mxu1 }
 0x3a3   : > { %v8286_v23 = vpop.f32.mrb[156].mxu0  ;;  %v8176_v29 = vadd.f32 %v8175_v0, %v8174_v47  ;;  %v8177_v35 = vpop.f32.mrb[222].mxu1 }
 0x3a4   : > { %v8287_v52 = vpop.f32.mrb[157].mxu0  ;;  %v8178_v22 = vpop.f32.mrb[223].mxu1 }
 0x3a5   : > { %v8288_v59 = vadd.f32 %v8287_v52, %v8286_v23  ;;  %v8289_v48 = vpop.f32.mrb[158].mxu0  ;;  %v8179_v42 = vadd.f32 %v8178_v22, %v8177_v35 }
 0x3a6   : > { %v8290_v14 = vpop.f32.mrb[159].mxu0 }
 0x3a7   : > { %v11915_v56 = vadd.f32 %v8288_v59, %v8176_v29  ;;  %v8291_v44 = vadd.f32 %v8290_v14, %v8289_v48 }
 0x3a8   : > { %9125 = vmatmul.mubr.bf16.gmra.mrb[104].mxu0 %v11743_v20  ;;  %v9843_v20 = vld [vmem:[#allocation8 + $0x5c8] sm:$0xff]  }
 0x3a9   : > { %v11918_v31 = vadd.f32 %v8291_v44, %v8179_v42  ;;  %9128 = vmatprep.mubr.bf16.mxu0 %v11860_v8  ;;  %v8180_v49 = vpop.f32.mrb[224].mxu1  ;;  %8790 = vmatprep.subr.bf16.mxu1 %v9843_v20 }
 0x3aa   : > { %v8181_v6 = vpop.f32.mrb[225].mxu1  ;;  %8791 = vmatpush3.bf16.msra.mxu1 %v9845_v50 }
 0x3ab   : > { %v8292_v21 = vpop.f32.mrb[160].mxu0  ;;  %v8182_v62 = vadd.f32 %v8181_v6, %v8180_v49  ;;  %v8183_v45 = vpop.f32.mrb[226].mxu1 }
 0x3ac   : > { %v8293_v25 = vpop.f32.mrb[161].mxu0  ;;  %v8184_v26 = vpop.f32.mrb[227].mxu1 }
 0x3ad   : > { %v8294_v40 = vadd.f32 %v8293_v25, %v8292_v21  ;;  %v8295_v57 = vpop.f32.mrb[162].mxu0  ;;  %v8185_v41 = vadd.f32 %v8184_v26, %v8183_v45 }
 0x3ae   : > { %v8296_v13 = vpop.f32.mrb[163].mxu0 }
 0x3af   : > { %v11921_v9 = vadd.f32 %v8294_v40, %v8182_v62  ;;  %v8297_v30 = vadd.f32 %v8296_v13, %v8295_v57  ;;  %v9849_v13 = vld [vmem:[#allocation8 + $0x590] sm:$0xff]  }
 0x3b0   : > { %9129 = vmatmul.mubr.bf16.gmra.mrb[108].mxu0 %v13014_v53 }
 0x3b1   : > { %v11924_v4 = vadd.f32 %v8297_v30, %v8185_v41  ;;  %v8186_v8 = vpop.f32.mrb[228].mxu1  ;;  %v9847_v41 = vld [vmem:[#allocation8 + $0x5d0] sm:$0xff]  }
 0x3b2   : > { %v8187_v34 = vpop.f32.mrb[229].mxu1  ;;  %8792 = vmatprep.subr.bf16.mxu1 %v9847_v41 }
 0x3b3   : > { %v8298_v15 = vpop.f32.mrb[164].mxu0  ;;  %v8188_v17 = vadd.f32 %v8187_v34, %v8186_v8  ;;  %v8189_v27 = vpop.f32.mrb[230].mxu1  ;;  %8793 = vmatpush3.bf16.msra.mxu1 %v9849_v13 }
 0x3b4   : > { %v8299_v54 = vpop.f32.mrb[165].mxu0  ;;  %v8190_v0 = vpop.f32.mrb[231].mxu1 }
 0x3b5   : > { %v8300_v47 = vadd.f32 %v8299_v54, %v8298_v15  ;;  %v8301_v23 = vpop.f32.mrb[166].mxu0  ;;  %v8191_v29 = vadd.f32 %v8190_v0, %v8189_v27 }
 0x3b6   : > { %v8302_v35 = vpop.f32.mrb[167].mxu0 }
 0x3b7   : > { %v11926_v52 = vadd.f32 %v8300_v47, %v8188_v17  ;;  %v8303_v59 = vadd.f32 %v8302_v35, %v8301_v23 }
 0x3b9   : > { %v11928_v22 = vadd.f32 %v8303_v59, %v8191_v29  ;;  %v8192_v48 = vpop.f32.mrb[232].mxu1 }
 0x3ba   : > { %v8193_v42 = vpop.f32.mrb[233].mxu1 }
 0x3bb   : > { %v8304_v14 = vpop.f32.mrb[168].mxu0  ;;  %v8194_v44 = vadd.f32 %v8193_v42, %v8192_v48  ;;  %v8195_v49 = vpop.f32.mrb[234].mxu1 }
 0x3bc   : > { %v8305_v6 = vpop.f32.mrb[169].mxu0  ;;  %v8196_v62 = vpop.f32.mrb[235].mxu1 }
 0x3bd   : > { %v8306_v21 = vadd.f32 %v8305_v6, %v8304_v14  ;;  %v8307_v45 = vpop.f32.mrb[170].mxu0  ;;  %v8197_v25 = vadd.f32 %v8196_v62, %v8195_v49 }
 0x3be   : > { %v8308_v40 = vpop.f32.mrb[171].mxu0 }
 0x3bf   : > { %v11930_v26 = vadd.f32 %v8306_v21, %v8194_v44  ;;  %v8309_v57 = vadd.f32 %v8308_v40, %v8307_v45 }
 0x3c1   : > { %v11932_v30 = vadd.f32 %v8309_v57, %v8197_v25  ;;  %v8198_v20 = vpop.f32.mrb[236].mxu1 }
 0x3c2   : > { %v8199_v50 = vpop.f32.mrb[237].mxu1 }
 0x3c3   : > { %v8310_v8 = vpop.f32.mrb[172].mxu0  ;;  %v8200_v34 = vadd.f32 %v8199_v50, %v8198_v20  ;;  %v8201_v15 = vpop.f32.mrb[238].mxu1  ;;  %v9208_v50 = vld [vmem:[#allocation2 + $0x19] sm:$0xff] }
 0x3c4   : > { %v8311_v17 = vpop.f32.mrb[173].mxu0  ;;  %v8202_v54 = vpop.f32.mrb[239].mxu1 }
 0x3c5   : > { %v8312_v27 = vadd.f32 %v8311_v17, %v8310_v8  ;;  %v8313_v47 = vpop.f32.mrb[174].mxu0  ;;  %v8203_v0 = vadd.f32 %v8202_v54, %v8201_v15  ;;  %v9851_v8 = vld [vmem:[#allocation8 + $0x5d8] sm:$0xff]   ;;  %v9228_v54 = vld [vmem:[#allocation2 + $0x21] sm:$0xff] }
 0x3c6   : > { %v8314_v23 = vpop.f32.mrb[175].mxu0  ;;  %8794 = vmatprep.subr.bf16.mxu1 %v9851_v8 }
 0x3c7   : > { %v11934_v29 = vadd.f32 %v8312_v27, %v8200_v34  ;;  %v8315_v35 = vadd.f32 %v8314_v23, %v8313_v47  ;;  %v9853_v34 = vld [vmem:[#allocation8 + $0x598] sm:$0xff]  }
 0x3c8   : > { %8795 = vmatpush3.bf16.msra.mxu1 %v9853_v34 }
 0x3c9   : > { %v11936_v59 = vadd.f32 %v8315_v35, %v8203_v0  ;;  %v8332_v48 = vpop.f32.mrb[240].mxu1 }
 0x3ca   : > { %v8333_v42 = vpop.f32.mrb[241].mxu1 }
 0x3cb   : > { %v8444_v14 = vpop.f32.mrb[176].mxu0  ;;  %v8334_v44 = vadd.f32 %v8333_v42, %v8332_v48  ;;  %v8335_v49 = vpop.f32.mrb[242].mxu1 }
 0x3cc   : > { %v8445_v6 = vpop.f32.mrb[177].mxu0  ;;  %v8336_v62 = vpop.f32.mrb[243].mxu1 }
 0x3cd   : > { %v8446_v21 = vadd.f32 %v8445_v6, %v8444_v14  ;;  %v8447_v45 = vpop.f32.mrb[178].mxu0  ;;  %v4114_v25 = vadd.f32 %v8334_v44, %v11818_v36  ;;  %v8337_v40 = vadd.f32 %v8336_v62, %v8335_v49 }
 0x3ce   : > { %v8448_v57 = vpop.f32.mrb[179].mxu0 }
 0x3cf   : > { %v8449_v41 = vadd.f32 %v8448_v57, %v8447_v45  ;;  %v4275_v13 = vadd.f32 %v8446_v21, %v4114_v25  ;;  %v4117_v20 = vadd.f32 %v8337_v40, %v11826_v37  ;;  %v9198_v25 = vld [vmem:[#allocation2 + $0x31] sm:$0xff] }
 0x3d0   : > { %v11942_v40 = vld [vmem:[#allocation6 + $0x2] ss:$0 sm:$0xff] }
 0x3d1   : > { %v9209_v15 = vadd.f32 %v9208_v50, %v4275_v13  ;;  %v4278_v17 = vadd.f32 %v8449_v41, %v4117_v20  ;;  %v8338_v27 = vpop.f32.mrb[244].mxu1  ;;  %v9218_v20 = vld [vmem:[#allocation2 + $0x39] sm:$0xff] }
 0x3d2   : > { %v8339_v47 = vpop.f32.mrb[245].mxu1 }
 0x3d3   : > { %v8450_v0 = vpop.f32.mrb[180].mxu0  ;;  %9210 = vst [vmem:[#allocation2 + $0x19] sm:$0xff] %v9209_v15  ;;  %v9229_v23 = vadd.f32 %v9228_v54, %v4278_v17  ;;  %v8340_v35 = vadd.f32 %v8339_v47, %v8338_v27  ;;  %v8341_v36 = vpop.f32.mrb[246].mxu1 }
 0x3d4   : > { %v8451_v48 = vpop.f32.mrb[181].mxu0  ;;  %v8342_v14 = vpop.f32.mrb[247].mxu1 }
 0x3d5   : > { %v8452_v42 = vadd.f32 %v8451_v48, %v8450_v0  ;;  %v8453_v44 = vpop.f32.mrb[182].mxu0  ;;  %9230 = vst [vmem:[#allocation2 + $0x21] sm:$0xff] %v9229_v23  ;;  %v4122_v37 = vadd.f32 %v8340_v35, %v11835_v7  ;;  %v8343_v49 = vadd.f32 %v8342_v14, %v8341_v36  ;;  %v11947_v7 = vld [vmem:[%s12826_s2 + $0x2] ss:$0 sm:$0xff] }
 0x3d6   : > { %v8454_v6 = vpop.f32.mrb[183].mxu0 }
 0x3d7   : > { %v8455_v21 = vadd.f32 %v8454_v6, %v8453_v44  ;;  %v4283_v62 = vadd.f32 %v8452_v42, %v4122_v37  ;;  %v4125_v45 = vadd.f32 %v8343_v49, %v11843_v3 }
 0x3d9   : > { %v9199_v57 = vadd.f32 %v9198_v25, %v4283_v62  ;;  %v4286_v41 = vadd.f32 %v8455_v21, %v4125_v45  ;;  %v8344_v13 = vpop.f32.mrb[248].mxu1 }
 0x3da   : > { %v8345_v50 = vpop.f32.mrb[249].mxu1  ;;  %v4661_v34 = vld [vmem:[#allocation2 + $0x18] sm:$0xff] }
 0x3db   : > { %v8456_v8 = vpop.f32.mrb[184].mxu0  ;;  %9200 = vst [vmem:[#allocation2 + $0x31] sm:$0xff] %v9199_v57  ;;  %v9219_v15 = vadd.f32 %v9218_v20, %v4286_v41  ;;  %v8346_v17 = vadd.f32 %v8345_v50, %v8344_v13  ;;  %v8347_v27 = vpop.f32.mrb[250].mxu1  ;;  %v4720_v54 = vmul.f32 %v11942_v40, %v4661_v34  ;;  %v9855_v57 = vld [vmem:[#allocation8 + $0x5e0] sm:$0xff]   ;;  %v9248_v41 = vld [vmem:[#allocation2 + $0x49] sm:$0xff] }
 0x3dc   : > { %v8457_v3 = vpop.f32.mrb[185].mxu0  ;;  %v8348_v0 = vpop.f32.mrb[251].mxu1  ;;  %v4662_v35 = vld [vmem:[#allocation2 + $0x20] sm:$0xff]  ;;  %v4663_v36 = vld [vmem:[#allocation2 + $0x28] sm:$0x3]  ;;  %8796 = vmatprep.subr.bf16.mxu1 %v9855_v57 }
 0x3dd   : > { %v8458_v47 = vadd.f32 %v8457_v3, %v8456_v8  ;;  %v8459_v23 = vpop.f32.mrb[186].mxu0  ;;  %9220 = vst [vmem:[#allocation2 + $0x39] sm:$0xff] %v9219_v15  ;;  %v4130_v48 = vadd.f32 %v8346_v17, %v11847_v11  ;;  %v8349_v42 = vadd.f32 %v8348_v0, %v8347_v27  ;;  %v4721_v44 = vmul.f32 %v11942_v40, %v4662_v35  ;;  %v9856_v11 = vld [vmem:[#allocation8 + $0x5a0] sm:$0xff]   ;;  %v9859_v17 = vld [vmem:[#allocation8 + $0x5e8] sm:$0xff]  }
 0x3de   : > { %v8460_v14 = vpop.f32.mrb[187].mxu0  ;;  %v4779_v37 = vadd.f32 %v11947_v7, %v4720_v54  ;;  %v4722_v6 = vmul.f32 %v11942_v40, %v4663_v36  ;;  %v9268_v27 = vld [vmem:[#allocation2 + $0x51] sm:$0xff]  ;;  %8797 = vmatpush3.bf16.msra.mxu1 %v9856_v11  ;;  %v9860_v0 = vld [vmem:[#allocation8 + $0x5a8] sm:$0xff]  }
 0x3df   : > { %v8461_v49 = vadd.f32 %v8460_v14, %v8459_v23  ;;  %v4291_v21 = vadd.f32 %v8458_v47, %v4130_v48  ;;  %v4133_v62 = vadd.f32 %v8349_v42, %v11854_v60  ;;  %v4780_v45 = vadd.f32 %v11947_v7, %v4721_v44  ;;  %v9834_v44 = vld [vmem:[#allocation8 + $0x600] sm:$0xff]   ;;  %8798 = vmatprep.subr.bf16.mxu1 %v9859_v17  ;;  %v9835_v57 = vld [vmem:[#allocation8 + $0x648] sm:$0xff]  }
 0x3e0   : > { %v4833_v25 = vmax.f32 %v4779_v37, 0.0  ;;  %v4781_v13 = vadd.f32 %v11947_v7, %v4722_v6 }
 0x3e1   : > { %v9249_v20 = vadd.f32 %v9248_v41, %v4291_v21  ;;  %v4294_v50 = vadd.f32 %v8461_v49, %v4133_v62  ;;  %v8350_v8 = vpop.f32.mrb[252].mxu1  ;;  %v4834_v34 = vmax.f32 %v4780_v45, 0.0 }
 0x3e2   : > { %v4887_v15 = vsel %vm367_vm0, %v4833_v25, 0.0  ;;  %v8351_v3 = vpop.f32.mrb[253].mxu1  ;;  %v4835_v54 = vmax.f32 %v4781_v13, 0.0  ;;  %v4664_v47 = vld [vmem:[#allocation2 + $0x30] sm:$0xff]  ;;  %8799 = vmatpush3.bf16.msra.mxu1 %v9860_v0 }
 0x3e3   : > { %v8462_v60 = vpop.f32.mrb[188].mxu0  ;;  %9250 = vst [vmem:[#allocation2 + $0x49] sm:$0xff] %v9249_v20  ;;  %v9269_v23 = vadd.f32 %v9268_v27, %v4294_v50  ;;  %v8352_v35 = vadd.f32 %v8351_v3, %v8350_v8  ;;  %v8353_v36 = vpop.f32.mrb[254].mxu1  ;;  %v4940_v42 = vpack.c.bf16 %v4834_v34, %v4887_v15  ;;  %v11959_v14 = vpack.c.bf16 %v4834_v34, %v4833_v25 }
 0x3e4   : > { %v8463_v48 = vpop.f32.mrb[189].mxu0  ;;  %v8354_v49 = vpop.f32.mrb[255].mxu1  ;;  %v4889_v21 = vsel %vm378_vm1, %v4835_v54, 0.0  ;;  %v4665_v62 = vld [vmem:[#allocation2 + $0x38] sm:$0xff]  ;;  %v4723_v45 = vmul.f32 %v11942_v40, %v4664_v47  ;;  %v4666_v17 = vld [vmem:[#allocation2 + $0x40] sm:$0x3] }
 0x3e5   : > { %v8464_v37 = vadd.f32 %v8463_v48, %v8462_v60  ;;  %v8465_v6 = vpop.f32.mrb[190].mxu0  ;;  %9270 = vst [vmem:[#allocation2 + $0x51] sm:$0xff] %v9269_v23  ;;  %v4138_v41 = vadd.f32 %v8352_v35, %v11862_v61  ;;  %v8355_v13 = vadd.f32 %v8354_v49, %v8353_v36  ;;  %7522 = vmatprep.mubr.msk.bf16.mxu0 %vm10359_vm4, %v11959_v14  ;;  %v4987_v20 = vshrl.u32 %v4940_v42, 16  ;;  %v9836_v54 = vld [vmem:[#allocation8 + $0x608] sm:$0xff]   ;;  %v9861_v47 = vld [vmem:[#allocation8 + $0x5f0] sm:$0xff]  }
 0x3e6   : > { %v8466_v11 = vpop.f32.mrb[191].mxu0  ;;  %v4941_v25 = vpack.c.bf16 %v4889_v21, %v4889_v21  ;;  %6087 = vmatmul.mubr.bf16.vlgmr.msra.gmra.mrb[240].mxu0 %v13014_v53  ;;  %v4989_v8 = vshll.u32 %v4940_v42, 16  ;;  %v4724_v34 = vmul.f32 %v11942_v40, %v4665_v62  ;;  %v4782_v15 = vadd.f32 %v11947_v7, %v4723_v45  ;;  %v9238_v23 = vld [vmem:[#allocation2 + $0x61] sm:$0xff]  ;;  %8800 = vmatprep.subr.bf16.mxu1 %v9861_v47 }
 0x3e7   : > { %v8467_v50 = vadd.f32 %v8466_v11, %v8465_v6  ;;  %v4299_v27 = vadd.f32 %v8464_v37, %v4138_v41  ;;  %v4141_v61 = vadd.f32 %v8355_v13, %v11869_v12  ;;  %8901 = vmatpush3.bf16.msra.mxu0 %v9834_v44  ;;  %v5217_v60 = vrot.slane %v4940_v42, 1  ;;  %v9837_v6 = vld [vmem:[#allocation8 + $0x650] sm:$0xff]   ;;  %v9863_v44 = vld [vmem:[#allocation8 + $0x5f8] sm:$0xff]  }
 0x3e8   : > { %v4994_v3 = vshll.u32 %v4941_v25, 16  ;;  %v4991_v35 = vrot.slane %v4989_v8, 1  ;;  %v4783_v36 = vadd.f32 %v11947_v7, %v4724_v34  ;;  %v4836_v48 = vmax.f32 %v4782_v15, 0.0  ;;  %8902 = vmatprep.subr.bf16.mxu0 %v9835_v57  ;;  %v9862_v21 = vld [vmem:[#allocation8 + $0x5b0] sm:$0xff]  }
 0x3e9   : > { %v5218_v49 = vrot.slane %v4941_v25, 1  ;;  %v9239_v62 = vadd.f32 %v9238_v23, %v4299_v27  ;;  %v4302_v45 = vadd.f32 %v8467_v50, %v4141_v61  ;;  %v8356_v0 = vpop.f32.mrb[0].mxu1  ;;  %v4725_v12 = vmul.f32 %v11942_v40, %v4666_v17  ;;  %v9258_v42 = vld [vmem:[#allocation2 + $0x69] sm:$0xff]  ;;  %8801 = vmatpush3.bf16.msra.mxu1 %v9862_v21 }
 0x3ea   : > { %v4996_v37 = vrot.slane %v4994_v3, 1  ;;  %v8357_v41 = vpop.f32.mrb[1].mxu1  ;;  %v4992_v11 = vor.u32 %v4991_v35, %v4987_v20  ;;  %v4837_v8 = vmax.f32 %v4783_v36, 0.0  ;;  %v4890_v34 = vsel %vm367_vm0, %v4836_v48, 0.0  ;;  %v4667_v25 = vld [vmem:[#allocation2 + $0x48] sm:$0xff]  ;;  %8802 = vmatprep.subr.bf16.mxu1 %v9863_v44 }
 0x3eb   : > { %v8468_v13 = vpop.f32.mrb[192].mxu0  ;;  %v11977_v57 = vsel %vm942_vm5, %v5217_v60, %v5218_v49  ;;  %9240 = vst [vmem:[#allocation2 + $0x61] sm:$0xff] %v9239_v62  ;;  %v9259_v50 = vadd.f32 %v9258_v42, %v4302_v45  ;;  %v8358_v15 = vadd.f32 %v8357_v41, %v8356_v0  ;;  %v8359_v27 = vpop.f32.mrb[2].mxu1  ;;  %v4784_v61 = vadd.f32 %v11947_v7, %v4725_v12  ;;  %v9864_v20 = vld [vmem:[#allocation8 + $0x5b8] sm:$0xff]   ;;  %v9838_v62 = vld [vmem:[#allocation8 + $0x610] sm:$0xff]  }
 0x3ec   : > { %v8469_v17 = vpop.f32.mrb[193].mxu0  ;;  %v4726_v3 = vmul.f32 %v11942_v40, %v4667_v25  ;;  %8903 = vmatpush3.bf16.msra.mxu0 %v9836_v54  ;;  %v8360_v23 = vpop.f32.mrb[3].mxu1  ;;  %v11982_v36 = vsel %vm701_vm2, %v4992_v11, %v4996_v37  ;;  %v11984_v60 = vpack.c.bf16 %v4837_v8, %v4890_v34  ;;  %v11986_v49 = vpack.c.bf16 %v4837_v8, %v4836_v48  ;;  %v4668_v21 = vld [vmem:[#allocation2 + $0x50] sm:$0xff]  ;;  %v9288_v34 = vld [vmem:[#allocation2 + $0x79] sm:$0xff] }
 0x3ed   : > { %v8470_v47 = vadd.f32 %v8469_v17, %v8468_v13  ;;  %v8471_v35 = vpop.f32.mrb[194].mxu0  ;;  %8904 = vmatprep.subr.bf16.mxu0 %v9837_v6  ;;  %9260 = vst [vmem:[#allocation2 + $0x69] sm:$0xff] %v9259_v50  ;;  %v4146_v45 = vadd.f32 %v8358_v15, %v11871_v38  ;;  %v8361_v0 = vadd.f32 %v8360_v23, %v8359_v27  ;;  %v4838_v12 = vmax.f32 %v4784_v61, 0.0  ;;  %v9840_v41 = vld [vmem:[#allocation8 + $0x658] sm:$0xff]   ;;  %v4669_v13 = vld [vmem:[#allocation2 + $0x58] sm:$0x3] }
 0x3ee   : > { %5933 = vmatprep.mubr.bf16.mxu1 %v11982_v36  ;;  %v8472_v54 = vpop.f32.mrb[195].mxu0  ;;  %v4727_v42 = vmul.f32 %v11942_v40, %v4668_v21  ;;  %7525 = vmatprep.mubr.msk.bf16.mxu0 %vm10359_vm4, %v11986_v49  ;;  %v4999_v38 = vshrl.u32 %v11984_v60, 16  ;;  %v5001_v48 = vshll.u32 %v11984_v60, 16  ;;  %v4785_v6 = vadd.f32 %v11947_v7, %v4726_v3  ;;  %v9842_v17 = vld [vmem:[#allocation8 + $0x618] sm:$0xff]   ;;  %v9308_v21 = vld [vmem:[#allocation2 + $0x81] sm:$0xff] }
 0x3ef   : > { %v8473_v37 = vadd.f32 %v8472_v54, %v8471_v35  ;;  %7477 = vmatmul.mubr.msk.bf16.gmra.mrb[52].mxu1 %vm10359_vm4, %v11959_v14  ;;  %v4307_v11 = vadd.f32 %v8470_v47, %v4146_v45  ;;  %v4149_v8 = vadd.f32 %v8361_v0, %v11876_v28  ;;  %6095 = vmatmul.mubr.bf16.gmra.mrb[244].mxu0 %v11977_v57  ;;  %v4892_v44 = vsel %vm378_vm1, %v4838_v12, 0.0  ;;  %v9844_v35 = vld [vmem:[#allocation8 + $0x660] sm:$0xff]  }
 0x3f0   : > { %v4786_v14 = vadd.f32 %v11947_v7, %v4727_v42  ;;  %8803 = vmatpush3.bf16.msra.mxu1 %v9864_v20  ;;  %v4943_v25 = vpack.c.bf16 %v4892_v44, %v4892_v44  ;;  %v5003_v50 = vrot.slane %v5001_v48, 1  ;;  %v4839_v15 = vmax.f32 %v4785_v6, 0.0  ;;  %8905 = vmatpush3.bf16.msra.mxu0 %v9838_v62 }
 0x3f1   : > { %v5220_v27 = vrot.slane %v11984_v60, 1  ;;  %v9289_v61 = vadd.f32 %v9288_v34, %v4307_v11  ;;  %v4310_v3 = vadd.f32 %v8473_v37, %v4149_v8  ;;  %v8362_v47 = vpop.f32.mrb[4].mxu1  ;;  %v4728_v23 = vmul.f32 %v11942_v40, %v4669_v13  ;;  %8906 = vmatprep.subr.bf16.mxu0 %v9840_v41 }
 0x3f2   : > { %v4840_v28 = vmax.f32 %v4786_v14, 0.0  ;;  %v8363_v45 = vpop.f32.mrb[5].mxu1  ;;  %v5004_v20 = vor.u32 %v5003_v50, %v4999_v38  ;;  %v5006_v54 = vshll.u32 %v4943_v25, 16  ;;  %v4893_v12 = vsel %vm367_vm0, %v4839_v15, 0.0  ;;  %v4670_v41 = vld [vmem:[#allocation2 + $0x60] sm:$0xff]  ;;  %v9846_v50 = vld [vmem:[#allocation8 + $0x620] sm:$0xff]  }
 0x3f3   : > { %v8474_v0 = vpop.f32.mrb[196].mxu0  ;;  %v5221_v42 = vrot.slane %v4943_v25, 1  ;;  %9290 = vst [vmem:[#allocation2 + $0x79] sm:$0xff] %v9289_v61  ;;  %v9309_v60 = vadd.f32 %v9308_v21, %v4310_v3  ;;  %v8364_v62 = vadd.f32 %v8363_v45, %v8362_v47  ;;  %v8365_v48 = vpop.f32.mrb[6].mxu1  ;;  %v4787_v38 = vadd.f32 %v11947_v7, %v4728_v23  ;;  %v9848_v23 = vld [vmem:[#allocation8 + $0x668] sm:$0xff]  }
 0x3f4   : > { %v8475_v37 = vpop.f32.mrb[197].mxu0  ;;  %v12009_v6 = vpack.c.bf16 %v4840_v28, %v4893_v12  ;;  %v12011_v11 = vpack.c.bf16 %v4840_v28, %v4839_v15  ;;  %v8366_v8 = vpop.f32.mrb[7].mxu1  ;;  %v5008_v14 = vrot.slane %v5006_v54, 1  ;;  %v4671_v34 = vld [vmem:[#allocation2 + $0x68] sm:$0xff]  ;;  %8907 = vmatpush3.bf16.msra.mxu0 %v9842_v17  ;;  %v4672_v28 = vld [vmem:[#allocation2 + $0x70] sm:$0x3] }
 0x3f5   : > { %v8476_v13 = vadd.f32 %v8475_v37, %v8474_v0  ;;  %v8477_v44 = vpop.f32.mrb[198].mxu0  ;;  %9310 = vst [vmem:[#allocation2 + $0x81] sm:$0xff] %v9309_v60  ;;  %v4154_v25 = vadd.f32 %v8364_v62, %v11879_v33  ;;  %v8367_v61 = vadd.f32 %v8366_v8, %v8365_v48  ;;  %v12019_v15 = vsel %vm942_vm5, %v5220_v27, %v5221_v42  ;;  %v9278_v42 = vld [vmem:[#allocation2 + $0x91] sm:$0xff]  ;;  %v9850_v62 = vld [vmem:[#allocation8 + $0x628] sm:$0xff]  }
 0x3f6   : > { %v8478_v3 = vpop.f32.mrb[199].mxu0  ;;  %7528 = vmatprep.mubr.msk.bf16.mxu0 %vm10359_vm4, %v12011_v11  ;;  %v5013_v47 = vshll.u32 %v12009_v6, 16  ;;  %8908 = vmatprep.subr.bf16.mxu0 %v9844_v35  ;;  %v12023_v17 = vsel %vm701_vm2, %v5004_v20, %v5008_v14  ;;  %v4841_v45 = vmax.f32 %v4787_v38, 0.0  ;;  %v4729_v33 = vmul.f32 %v11942_v40, %v4670_v41  ;;  %v9298_v14 = vld [vmem:[#allocation2 + $0x99] sm:$0xff] }
 0x3f7   : > { %v8479_v21 = vadd.f32 %v8478_v3, %v8477_v44  ;;  %v4315_v0 = vadd.f32 %v8476_v13, %v4154_v25  ;;  %v4157_v54 = vadd.f32 %v8367_v61, %v11883_v39  ;;  %5941 = vmatprep.mubr.bf16.mxu1 %v12023_v17  ;;  %6103 = vmatmul.mubr.bf16.gmra.mrb[248].mxu0 %v12019_v15  ;;  %v5011_v20 = vshrl.u32 %v12009_v6, 16  ;;  %v9852_v44 = vld [vmem:[#allocation8 + $0x670] sm:$0xff]  }
 0x3f8   : > { %v5015_v27 = vrot.slane %v5013_v47, 1  ;;  %v4730_v12 = vmul.f32 %v11942_v40, %v4671_v34  ;;  %7480 = vmatmul.mubr.msk.bf16.gmra.mrb[56].mxu1 %vm10359_vm4, %v11986_v49  ;;  %v4895_v35 = vsel %vm378_vm1, %v4841_v45, 0.0  ;;  %v4788_v60 = vadd.f32 %v11947_v7, %v4729_v33  ;;  %8909 = vmatpush3.bf16.msra.mxu0 %v9846_v50 }
 0x3f9   : > { %v4731_v39 = vmul.f32 %v11942_v40, %v4672_v28  ;;  %v9279_v48 = vadd.f32 %v9278_v42, %v4315_v0  ;;  %v4318_v37 = vadd.f32 %v8479_v21, %v4157_v54  ;;  %v8368_v41 = vpop.f32.mrb[8].mxu1  ;;  %v4945_v13 = vpack.c.bf16 %v4895_v35, %v4895_v35  ;;  %8910 = vmatprep.subr.bf16.mxu0 %v9848_v23 }
 0x3fa   : > { %v5223_v8 = vrot.slane %v12009_v6, 1  ;;  %v8369_v38 = vpop.f32.mrb[9].mxu1  ;;  %v5016_v25 = vor.u32 %v5015_v27, %v5011_v20  ;;  %v4789_v61 = vadd.f32 %v11947_v7, %v4730_v12  ;;  %v4842_v3 = vmax.f32 %v4788_v60, 0.0 }
 0x3fb   : > { %v8480_v34 = vpop.f32.mrb[200].mxu0  ;;  %v4790_v47 = vadd.f32 %v11947_v7, %v4731_v39  ;;  %9280 = vst [vmem:[#allocation2 + $0x91] sm:$0xff] %v9279_v48  ;;  %v9299_v50 = vadd.f32 %v9298_v14, %v4318_v37  ;;  %v8370_v28 = vadd.f32 %v8369_v38, %v8368_v41  ;;  %v8371_v45 = vpop.f32.mrb[10].mxu1  ;;  %v5018_v33 = vshll.u32 %v4945_v13, 16  ;;  %v4673_v37 = vld [vmem:[#allocation2 + $0x78] sm:$0xff] }
 0x3fc   : > { %v8481_v21 = vpop.f32.mrb[201].mxu0  ;;  %v5224_v0 = vrot.slane %v4945_v13, 1  ;;  %v8372_v6 = vpop.f32.mrb[11].mxu1  ;;  %v4843_v42 = vmax.f32 %v4789_v61, 0.0  ;;  %v4896_v35 = vsel %vm367_vm0, %v4842_v3, 0.0  ;;  %8911 = vmatpush3.bf16.msra.mxu0 %v9850_v62 }
 0x3fd   : > { %v8482_v54 = vadd.f32 %v8481_v21, %v8480_v34  ;;  %v8483_v23 = vpop.f32.mrb[202].mxu0  ;;  %v4844_v27 = vmax.f32 %v4790_v47, 0.0  ;;  %9300 = vst [vmem:[#allocation2 + $0x99] sm:$0xff] %v9299_v50  ;;  %v4162_v12 = vadd.f32 %v8370_v28, %v11885_v46  ;;  %v8373_v20 = vadd.f32 %v8372_v6, %v8371_v45  ;;  %8912 = vmatprep.subr.bf16.mxu0 %v9852_v44  ;;  %v9854_v34 = vld [vmem:[#allocation8 + $0x630] sm:$0xff]   ;;  %v9857_v28 = vld [vmem:[#allocation8 + $0x678] sm:$0xff]  }
 0x3fe   : > { %v5020_v60 = vrot.slane %v5018_v33, 1  ;;  %v8484_v39 = vpop.f32.mrb[203].mxu0  ;;  %v12045_v48 = vsel %vm942_vm5, %v5223_v8, %v5224_v0  ;;  %v4946_v13 = vpack.c.bf16 %v4843_v42, %v4896_v35  ;;  %v12047_v14 = vpack.c.bf16 %v4843_v42, %v4842_v3  ;;  %v4674_v50 = vld [vmem:[#allocation2 + $0x80] sm:$0xff]  ;;  %v4675_v8 = vld [vmem:[#allocation2 + $0x88] sm:$0x3] }
 0x3ff   : > { %v8485_v41 = vadd.f32 %v8484_v39, %v8483_v23  ;;  %v4898_v38 = vsel %vm378_vm1, %v4844_v27, 0.0  ;;  %v4323_v62 = vadd.f32 %v8482_v54, %v4162_v12  ;;  %v4165_v61 = vadd.f32 %v8373_v20, %v11889_v1  ;;  %v9328_v45 = vld [vmem:[#allocation2 + $0xa9] sm:$0xff]  ;;  %v9348_v23 = vld [vmem:[#allocation2 + $0xb1] sm:$0xff] }
 0x400   : > { %v12053_v46 = vsel %vm701_vm2, %v5016_v25, %v5020_v60  ;;  %v4947_v47 = vpack.c.bf16 %v4898_v38, %v4898_v38  ;;  %v5226_v44 = vrot.slane %v4946_v13, 1  ;;  %7531 = vmatprep.mubr.msk.bf16.mxu0 %vm10359_vm4, %v12047_v14  ;;  %v5023_v3 = vshrl.u32 %v4946_v13, 16  ;;  %8913 = vmatpush3.bf16.msra.mxu0 %v9854_v34 }
 0x401   : > { %5949 = vmatprep.mubr.bf16.mxu1 %v12053_v46  ;;  %v5025_v21 = vshll.u32 %v4946_v13, 16  ;;  %v4732_v33 = vmul.f32 %v11942_v40, %v4673_v37  ;;  %v9329_v1 = vadd.f32 %v9328_v45, %v4323_v62  ;;  %v4326_v0 = vadd.f32 %v8485_v41, %v4165_v61  ;;  %6111 = vmatmul.mubr.bf16.gmra.mrb[252].mxu0 %v12045_v48  ;;  %v8374_v25 = vpop.f32.mrb[12].mxu1  ;;  %v9858_v37 = vld [vmem:[#allocation8 + $0x638] sm:$0xff]   ;;  %v9865_v45 = vld [vmem:[#allocation8 + $0x680] sm:$0xff]  }
 0x402   : > { %7483 = vmatmul.mubr.msk.bf16.gmra.mrb[60].mxu1 %vm10359_vm4, %v12011_v11  ;;  %v5030_v54 = vshll.u32 %v4947_v47, 16  ;;  %v5227_v6 = vrot.slane %v4947_v47, 1  ;;  %v8375_v42 = vpop.f32.mrb[13].mxu1  ;;  %v4733_v12 = vmul.f32 %v11942_v40, %v4674_v50  ;;  %v4734_v60 = vmul.f32 %v11942_v40, %v4675_v8  ;;  %v4676_v39 = vld [vmem:[#allocation2 + $0x90] sm:$0xff]  ;;  %8914 = vmatprep.subr.bf16.mxu0 %v9857_v28 }
 0x403   : > { %v8486_v35 = vpop.f32.mrb[204].mxu0  ;;  %v5027_v27 = vrot.slane %v5025_v21, 1  ;;  %v4791_v20 = vadd.f32 %v11947_v7, %v4732_v33  ;;  %9330 = vst [vmem:[#allocation2 + $0xa9] sm:$0xff] %v9329_v1  ;;  %v9349_v41 = vadd.f32 %v9348_v23, %v4326_v0  ;;  %v8376_v13 = vadd.f32 %v8375_v42, %v8374_v25  ;;  %v8377_v38 = vpop.f32.mrb[14].mxu1 }
 0x404   : > { %v8487_v62 = vpop.f32.mrb[205].mxu0  ;;  %v5032_v61 = vrot.slane %v5030_v54, 1  ;;  %v12068_v47 = vsel %vm942_vm5, %v5226_v44, %v5227_v6  ;;  %v8378_v50 = vpop.f32.mrb[15].mxu1  ;;  %v4792_v8 = vadd.f32 %v11947_v7, %v4733_v12  ;;  %v4677_v34 = vld [vmem:[#allocation2 + $0x98] sm:$0xff]  ;;  %v4793_v54 = vadd.f32 %v11947_v7, %v4734_v60  ;;  %v4678_v6 = vld [vmem:[#allocation2 + $0xa0] sm:$0x3]  ;;  %8915 = vmatpush3.bf16.msra.mxu0 %v9858_v37 }
 0x405   : > { %v8488_v21 = vadd.f32 %v8487_v62, %v8486_v35  ;;  %v8489_v53 = vpop.f32.mrb[206].mxu0  ;;  %v5028_v33 = vor.u32 %v5027_v27, %v5023_v3  ;;  %v4845_v5 = vmax.f32 %v4791_v20, 0.0  ;;  %9350 = vst [vmem:[#allocation2 + $0xb1] sm:$0xff] %v9349_v41  ;;  %v4170_v1 = vadd.f32 %v8376_v13, %v11891_v32  ;;  %9132 = vmatprep.subr.bf16.mxu0 %v9865_v45  ;;  %v9318_v20 = vld [vmem:[#allocation2 + $0xc1] sm:$0xff] }
 0x406   : > { %v8379_v0 = vadd.f32 %v8378_v50, %v8377_v38  ;;  %v8490_v25 = vpop.f32.mrb[207].mxu0  ;;  %v4735_v44 = vmul.f32 %v11942_v40, %v4676_v39  ;;  %v4846_v42 = vmax.f32 %v4792_v8, 0.0  ;;  %v4847_v32 = vmax.f32 %v4793_v54, 0.0 }
 0x407   : > { %v12075_v28 = vsel %vm701_vm2, %v5028_v33, %v5032_v61  ;;  %v8491_v23 = vadd.f32 %v8490_v25, %v8489_v53  ;;  %v4899_v3 = vsel %vm367_vm0, %v4845_v5, 0.0  ;;  %v4331_v35 = vadd.f32 %v8488_v21, %v4170_v1  ;;  %v9338_v61 = vld [vmem:[#allocation2 + $0xc9] sm:$0xff] }
 0x408   : > { %v4173_v27 = vadd.f32 %v8379_v0, %v11895_v16  ;;  %5957 = vmatprep.mubr.bf16.mxu1 %v12075_v28  ;;  %v4736_v12 = vmul.f32 %v11942_v40, %v4677_v34  ;;  %v4948_v60 = vpack.c.bf16 %v4846_v42, %v4899_v3  ;;  %v12082_v39 = vpack.c.bf16 %v4846_v42, %v4845_v5 }
 0x409   : > { %v4794_v53 = vadd.f32 %v11947_v7, %v4735_v44  ;;  %v4737_v41 = vmul.f32 %v11942_v40, %v4678_v6  ;;  %v9319_v13 = vadd.f32 %v9318_v20, %v4331_v35  ;;  %v8380_v16 = vpop.f32.mrb[16].mxu1  ;;  %v4901_v37 = vsel %vm378_vm1, %v4847_v32, 0.0 }
 0x40a   : > { %v4334_v38 = vadd.f32 %v8491_v23, %v4173_v27  ;;  %7486 = vmatmul.mubr.msk.bf16.gmra.mrb[64].mxu1 %vm10359_vm4, %v12047_v14  ;;  %v4795_v62 = vadd.f32 %v11947_v7, %v4736_v12  ;;  %v5229_v45 = vrot.slane %v4948_v60, 1  ;;  %7534 = vmatprep.mubr.msk.bf16.mxu0 %vm10359_vm4, %v12082_v39  ;;  %v8381_v5 = vpop.f32.mrb[17].mxu1  ;;  %v4949_v50 = vpack.c.bf16 %v4901_v37, %v4901_v37 }
 0x40b   : > { %v8492_v21 = vpop.f32.mrb[208].mxu0  ;;  %v5035_v33 = vshrl.u32 %v4948_v60, 16  ;;  %v5037_v8 = vshll.u32 %v4948_v60, 16  ;;  %9320 = vst [vmem:[#allocation2 + $0xc1] sm:$0xff] %v9319_v13  ;;  %6119 = vmatmul.mubr.bf16.gmra.mrb[0].mxu0 %v12068_v47  ;;  %v8382_v1 = vadd.f32 %v8381_v5, %v8380_v16  ;;  %v8383_v0 = vpop.f32.mrb[18].mxu1  ;;  %v4848_v54 = vmax.f32 %v4794_v53, 0.0 }
 0x40c   : > { %v9339_v34 = vadd.f32 %v9338_v61, %v4334_v38  ;;  %v8493_v25 = vpop.f32.mrb[209].mxu0  ;;  %v4849_v44 = vmax.f32 %v4795_v62, 0.0  ;;  %v8384_v23 = vpop.f32.mrb[19].mxu1  ;;  %v5042_v35 = vshll.u32 %v4949_v50, 16  ;;  %v5230_v27 = vrot.slane %v4949_v50, 1  ;;  %v4679_v62 = vld [vmem:[#allocation2 + $0xa8] sm:$0xff] }
 0x40d   : > { %v8494_v6 = vadd.f32 %v8493_v25, %v8492_v21  ;;  %v8495_v42 = vpop.f32.mrb[210].mxu0  ;;  %v5039_v3 = vrot.slane %v5037_v8, 1  ;;  %v4178_v32 = vadd.f32 %v8382_v1, %v11897_v18  ;;  %v8385_v12 = vadd.f32 %v8384_v23, %v8383_v0  ;;  %v4680_v21 = vld [vmem:[#allocation2 + $0xb0] sm:$0xff]  ;;  %v4681_v50 = vld [vmem:[#allocation2 + $0xb8] sm:$0x3] }
 0x40e   : > { %9340 = vst [vmem:[#allocation2 + $0xc9] sm:$0xff] %v9339_v34  ;;  %v8496_v20 = vpop.f32.mrb[211].mxu0  ;;  %v4902_v60 = vsel %vm367_vm0, %v4848_v54, 0.0  ;;  %v12099_v13 = vpack.c.bf16 %v4849_v44, %v4848_v54  ;;  %v5044_v16 = vrot.slane %v5042_v35, 1  ;;  %v4796_v18 = vadd.f32 %v11947_v7, %v4737_v41  ;;  %v9368_v8 = vld [vmem:[#allocation2 + $0xd9] sm:$0xff]  ;;  %v9388_v41 = vld [vmem:[#allocation2 + $0xe1] sm:$0xff] }
 0x40f   : > { %v5040_v38 = vor.u32 %v5039_v3, %v5035_v33  ;;  %v8497_v53 = vadd.f32 %v8496_v20, %v8495_v42  ;;  %v4950_v37 = vpack.c.bf16 %v4849_v44, %v4902_v60  ;;  %v4339_v61 = vadd.f32 %v8494_v6, %v4178_v32 }
 0x410   : > { %v4181_v5 = vadd.f32 %v8385_v12, %v11900_v19  ;;  %7537 = vmatprep.mubr.msk.bf16.mxu0 %vm10359_vm4, %v12099_v13  ;;  %v12110_v1 = vsel %vm942_vm5, %v5229_v45, %v5230_v27  ;;  %v4850_v44 = vmax.f32 %v4796_v18, 0.0  ;;  %v4738_v6 = vmul.f32 %v11942_v40, %v4679_v62 }
 0x411   : > { %v12107_v34 = vsel %vm701_vm2, %v5040_v38, %v5044_v16  ;;  %v5232_v33 = vrot.slane %v4950_v37, 1  ;;  %v5049_v0 = vshll.u32 %v4950_v37, 16  ;;  %v9369_v25 = vadd.f32 %v9368_v8, %v4339_v61  ;;  %v8386_v54 = vpop.f32.mrb[20].mxu1 }
 0x412   : > { %5965 = vmatprep.mubr.bf16.mxu1 %v12107_v34  ;;  %v4342_v19 = vadd.f32 %v8497_v53, %v4181_v5  ;;  %v8387_v23 = vpop.f32.mrb[21].mxu1  ;;  %v5047_v3 = vshrl.u32 %v4950_v37, 16  ;;  %v4739_v45 = vmul.f32 %v11942_v40, %v4680_v21  ;;  %v4740_v27 = vmul.f32 %v11942_v40, %v4681_v50 }
 0x413   : > { %7489 = vmatmul.mubr.msk.bf16.gmra.mrb[68].mxu1 %vm10359_vm4, %v12082_v39  ;;  %v8498_v42 = vpop.f32.mrb[212].mxu0  ;;  %v5051_v35 = vrot.slane %v5049_v0, 1  ;;  %9370 = vst [vmem:[#allocation2 + $0xd9] sm:$0xff] %v9369_v25  ;;  %6127 = vmatmul.mubr.bf16.gmra.mrb[4].mxu0 %v12110_v1  ;;  %v8388_v12 = vadd.f32 %v8387_v23, %v8386_v54  ;;  %v8389_v20 = vpop.f32.mrb[22].mxu1  ;;  %v4904_v38 = vsel %vm378_vm1, %v4850_v44, 0.0  ;;  %v4797_v16 = vadd.f32 %v11947_v7, %v4738_v6  ;;  %v4682_v6 = vld [vmem:[#allocation2 + $0xc0] sm:$0xff] }
 0x414   : > { %v9389_v32 = vadd.f32 %v9388_v41, %v4342_v19  ;;  %v8499_v60 = vpop.f32.mrb[213].mxu0  ;;  %v8390_v62 = vpop.f32.mrb[23].mxu1  ;;  %v4951_v61 = vpack.c.bf16 %v4904_v38, %v4904_v38  ;;  %v4798_v18 = vadd.f32 %v11947_v7, %v4739_v45  ;;  %v4799_v25 = vadd.f32 %v11947_v7, %v4740_v27  ;;  %v9358_v45 = vld [vmem:[#allocation2 + $0xf1] sm:$0xff] }
 0x415   : > { %v8500_v53 = vadd.f32 %v8499_v60, %v8498_v42  ;;  %v8501_v37 = vpop.f32.mrb[214].mxu0  ;;  %v5052_v5 = vor.u32 %v5051_v35, %v5047_v3  ;;  %v4186_v21 = vadd.f32 %v8388_v12, %v11903_v2  ;;  %v8391_v50 = vadd.f32 %v8390_v62, %v8389_v20  ;;  %v4683_v27 = vld [vmem:[#allocation2 + $0xc8] sm:$0xff] }
 0x416   : > { %9390 = vst [vmem:[#allocation2 + $0xe1] sm:$0xff] %v9389_v32  ;;  %v8502_v8 = vpop.f32.mrb[215].mxu0  ;;  %v4851_v0 = vmax.f32 %v4797_v16, 0.0  ;;  %v5054_v19 = vshll.u32 %v4951_v61, 16  ;;  %v5233_v54 = vrot.slane %v4951_v61, 1  ;;  %v4852_v41 = vmax.f32 %v4798_v18, 0.0 }
 0x417   : > { %v8503_v44 = vadd.f32 %v8502_v8, %v8501_v37  ;;  %v4347_v23 = vadd.f32 %v8500_v53, %v4186_v21  ;;  %v4189_v42 = vadd.f32 %v8391_v50, %v11906_v58  ;;  %v4853_v35 = vmax.f32 %v4799_v25, 0.0  ;;  %v9378_v37 = vld [vmem:[#allocation2 + $0xf9] sm:$0xff] }
 0x418   : > { %v4905_v3 = vsel %vm367_vm0, %v4851_v0, 0.0  ;;  %v5056_v32 = vrot.slane %v5054_v19, 1  ;;  %v12129_v12 = vpack.c.bf16 %v4852_v41, %v4851_v0  ;;  %v12132_v20 = vsel %vm942_vm5, %v5232_v33, %v5233_v54 }
 0x419   : > { %v4952_v2 = vpack.c.bf16 %v4852_v41, %v4905_v3  ;;  %v9359_v60 = vadd.f32 %v9358_v45, %v4347_v23  ;;  %v4350_v38 = vadd.f32 %v8503_v44, %v4189_v42  ;;  %v8392_v16 = vpop.f32.mrb[24].mxu1  ;;  %v4907_v53 = vsel %vm378_vm1, %v4853_v35, 0.0 }
 0x41a   : > { %v4741_v58 = vmul.f32 %v11942_v40, %v4682_v6  ;;  %v12138_v62 = vsel %vm701_vm2, %v5052_v5, %v5056_v32  ;;  %7540 = vmatprep.mubr.msk.bf16.mxu0 %vm10359_vm4, %v12129_v12  ;;  %v8393_v33 = vpop.f32.mrb[25].mxu1  ;;  %v4953_v21 = vpack.c.bf16 %v4907_v53, %v4907_v53  ;;  %v4742_v54 = vmul.f32 %v11942_v40, %v4683_v27  ;;  %v4684_v27 = vld [vmem:[#allocation2 + $0xd0] sm:$0x3] }
 0x41b   : > { %v5235_v61 = vrot.slane %v4952_v2, 1  ;;  %v8504_v18 = vpop.f32.mrb[216].mxu0  ;;  %v5059_v50 = vshrl.u32 %v4952_v2, 16  ;;  %9360 = vst [vmem:[#allocation2 + $0xf1] sm:$0xff] %v9359_v60  ;;  %5973 = vmatprep.mubr.bf16.mxu1 %v12138_v62  ;;  %v9379_v8 = vadd.f32 %v9378_v37, %v4350_v38  ;;  %6135 = vmatmul.mubr.bf16.gmra.mrb[8].mxu0 %v12132_v20  ;;  %v8394_v0 = vadd.f32 %v8393_v33, %v8392_v16  ;;  %v8395_v25 = vpop.f32.mrb[26].mxu1  ;;  %v4685_v38 = vld [vmem:[#allocation2 + $0xd8] sm:$0xff] }
 0x41c   : > { %v8505_v5 = vpop.f32.mrb[217].mxu0  ;;  %v5061_v19 = vshll.u32 %v4952_v2, 16  ;;  %7492 = vmatmul.mubr.msk.bf16.gmra.mrb[72].mxu1 %vm10359_vm4, %v12099_v13  ;;  %v8396_v41 = vpop.f32.mrb[27].mxu1  ;;  %v5066_v23 = vshll.u32 %v4953_v21, 16  ;;  %v5236_v42 = vrot.slane %v4953_v21, 1  ;;  %v4800_v3 = vadd.f32 %v11947_v7, %v4741_v58 }
 0x41d   : > { %v8506_v44 = vadd.f32 %v8505_v5, %v8504_v18  ;;  %v8507_v6 = vpop.f32.mrb[218].mxu0  ;;  %9380 = vst [vmem:[#allocation2 + $0xf9] sm:$0xff] %v9379_v8  ;;  %v4194_v35 = vadd.f32 %v8394_v0, %v11909_v63  ;;  %v8397_v45 = vadd.f32 %v8396_v41, %v8395_v25  ;;  %v4801_v2 = vadd.f32 %v11947_v7, %v4742_v54  ;;  %v4686_v16 = vld [vmem:[#allocation2 + $0xe0] sm:$0xff]  ;;  %v9408_v63 = vld [vmem:[#allocation2 + $0x109] sm:$0xff] }
 0x41e   : > { %v5063_v32 = vrot.slane %v5061_v19, 1  ;;  %v8508_v60 = vpop.f32.mrb[219].mxu0  ;;  %v5068_v53 = vrot.slane %v5066_v23, 1  ;;  %v4854_v33 = vmax.f32 %v4800_v3, 0.0  ;;  %v12153_v18 = vsel %vm942_vm5, %v5235_v61, %v5236_v42 }
 0x41f   : > { %v8509_v37 = vadd.f32 %v8508_v60, %v8507_v6  ;;  %v4355_v21 = vadd.f32 %v8506_v44, %v4194_v35  ;;  %v4197_v58 = vadd.f32 %v8397_v45, %v11912_v10  ;;  %v4855_v5 = vmax.f32 %v4801_v2, 0.0 }
 0x420   : > { %v5064_v8 = vor.u32 %v5063_v32, %v5059_v50  ;;  %v4908_v0 = vsel %vm367_vm0, %v4854_v33, 0.0  ;;  %v4743_v25 = vmul.f32 %v11942_v40, %v4684_v27  ;;  %v4744_v19 = vmul.f32 %v11942_v40, %v4685_v38  ;;  %v9428_v50 = vld [vmem:[#allocation2 + $0x111] sm:$0xff]  ;;  %v4687_v32 = vld [vmem:[#allocation2 + $0xe8] sm:$0x3] }
 0x421   : > { %v4745_v54 = vmul.f32 %v11942_v40, %v4686_v16  ;;  %v9409_v41 = vadd.f32 %v9408_v63, %v4355_v21  ;;  %v4358_v61 = vadd.f32 %v8509_v37, %v4197_v58  ;;  %v12164_v44 = vpack.c.bf16 %v4855_v5, %v4908_v0  ;;  %v8398_v10 = vpop.f32.mrb[28].mxu1 }
 0x422   : > { %v12162_v6 = vsel %vm701_vm2, %v5064_v8, %v5068_v53  ;;  %v12167_v23 = vpack.c.bf16 %v4855_v5, %v4854_v33  ;;  %v8399_v42 = vpop.f32.mrb[29].mxu1  ;;  %v4802_v35 = vadd.f32 %v11947_v7, %v4743_v25  ;;  %v4803_v45 = vadd.f32 %v11947_v7, %v4744_v19  ;;  %v12183_v19 = vld [vmem:[#allocation6 + $0x2] ss:$0 sm:$0xff] }
 0x423   : > { %5981 = vmatprep.mubr.bf16.mxu1 %v12162_v6  ;;  %v8510_v3 = vpop.f32.mrb[220].mxu0  ;;  %v4804_v40 = vadd.f32 %v11947_v7, %v4745_v54  ;;  %9410 = vst [vmem:[#allocation2 + $0x109] sm:$0xff] %v9409_v41  ;;  %v9429_v60 = vadd.f32 %v9428_v50, %v4358_v61  ;;  %v5238_v2 = vrot.slane %v12164_v44, 1  ;;  %v8400_v27 = vadd.f32 %v8399_v42, %v8398_v10  ;;  %v8401_v38 = vpop.f32.mrb[30].mxu1  ;;  %v4688_v41 = vld [vmem:[#allocation2 + $0xf0] sm:$0xff] }
 0x424   : > { %v8511_v16 = vpop.f32.mrb[221].mxu0  ;;  %v5071_v53 = vshrl.u32 %v12164_v44, 16  ;;  %7495 = vmatmul.mubr.msk.bf16.gmra.mrb[76].mxu1 %vm10359_vm4, %v12129_v12  ;;  %7543 = vmatprep.mubr.msk.bf16.mxu0 %vm10359_vm4, %v12167_v23  ;;  %v8402_v7 = vpop.f32.mrb[31].mxu1  ;;  %v4856_v21 = vmax.f32 %v4802_v35, 0.0  ;;  %v5073_v58 = vshll.u32 %v12164_v44, 16  ;;  %v4857_v8 = vmax.f32 %v4803_v45, 0.0 }
 0x425   : > { %v8512_v37 = vadd.f32 %v8511_v16, %v8510_v3  ;;  %v8513_v33 = vpop.f32.mrb[222].mxu0  ;;  %9430 = vst [vmem:[#allocation2 + $0x111] sm:$0xff] %v9429_v60  ;;  %6143 = vmatmul.mubr.bf16.gmra.mrb[12].mxu0 %v12153_v18  ;;  %v4202_v5 = vadd.f32 %v8400_v27, %v11915_v56  ;;  %v8403_v63 = vadd.f32 %v8402_v7, %v8401_v38  ;;  %v4858_v25 = vmax.f32 %v4804_v40, 0.0  ;;  %v9398_v45 = vld [vmem:[#allocation2 + $0x121] sm:$0xff] }
 0x426   : > { %v8514_v0 = vpop.f32.mrb[223].mxu0  ;;  %v4746_v54 = vmul.f32 %v12183_v19, %v4687_v32  ;;  %v4910_v61 = vsel %vm378_vm1, %v4856_v21, 0.0  ;;  %v5075_v10 = vrot.slane %v5073_v58, 1  ;;  %v4911_v44 = vsel %vm367_vm0, %v4857_v8, 0.0  ;;  %v12198_v32 = vld [vmem:[%s12826_s2 + $0x2] ss:$0 sm:$0xff] }
 0x427   : > { %v8515_v50 = vadd.f32 %v8514_v0, %v8513_v33  ;;  %v4363_v42 = vadd.f32 %v8512_v37, %v4202_v5  ;;  %v4205_v3 = vadd.f32 %v8403_v63, %v11918_v31  ;;  %v4955_v56 = vpack.c.bf16 %v4910_v61, %v4910_v61  ;;  %v9418_v33 = vld [vmem:[#allocation2 + $0x129] sm:$0xff]  ;;  %v4689_v58 = vld [vmem:[#allocation2 + $0xf8] sm:$0xff] }
 0x428   : > { %v12191_v35 = vpack.c.bf16 %v4858_v25, %v4911_v44  ;;  %v5076_v40 = vor.u32 %v5075_v10, %v5071_v53  ;;  %v12193_v60 = vpack.c.bf16 %v4858_v25, %v4857_v8  ;;  %v4805_v27 = vadd.f32 %v12198_v32, %v4746_v54 }
 0x429   : > { %v4747_v38 = vmul.f32 %v12183_v19, %v4688_v41  ;;  %v9399_v16 = vadd.f32 %v9398_v45, %v4363_v42  ;;  %v5078_v37 = vshll.u32 %v4955_v56, 16  ;;  %v5239_v7 = vrot.slane %v4955_v56, 1  ;;  %v8404_v21 = vpop.f32.mrb[32].mxu1 }
 0x42a   : > { %v4366_v31 = vadd.f32 %v8515_v50, %v4205_v3  ;;  %v5241_v53 = vrot.slane %v12191_v35, 1  ;;  %7546 = vmatprep.mubr.msk.bf16.mxu0 %vm10359_vm4, %v12193_v60  ;;  %v8405_v8 = vpop.f32.mrb[33].mxu1  ;;  %v4859_v63 = vmax.f32 %v4805_v27, 0.0  ;;  %v5083_v0 = vshrl.u32 %v12191_v35, 16 }
 0x42b   : > { %v8516_v5 = vpop.f32.mrb[224].mxu0  ;;  %v5085_v25 = vshll.u32 %v12191_v35, 16  ;;  %9400 = vst [vmem:[#allocation2 + $0x121] sm:$0xff] %v9399_v16  ;;  %v5080_v54 = vrot.slane %v5078_v37, 1  ;;  %v12209_v61 = vsel %vm942_vm5, %v5238_v2, %v5239_v7  ;;  %v8406_v10 = vadd.f32 %v8405_v8, %v8404_v21  ;;  %v8407_v50 = vpop.f32.mrb[34].mxu1 }
 0x42c   : > { %v9419_v41 = vadd.f32 %v9418_v33, %v4366_v31  ;;  %v8517_v44 = vpop.f32.mrb[225].mxu0  ;;  %v8408_v3 = vpop.f32.mrb[35].mxu1  ;;  %v4913_v45 = vsel %vm378_vm1, %v4859_v63, 0.0  ;;  %v4748_v24 = vmul.f32 %v12183_v19, %v4689_v58  ;;  %v4690_v31 = vld [vmem:[#allocation2 + $0x100] sm:$0x3]  ;;  %v4691_v33 = vld [vmem:[#allocation2 + $0x108] sm:$0xff] }
 0x42d   : > { %v8518_v42 = vadd.f32 %v8517_v44, %v8516_v5  ;;  %v8519_v56 = vpop.f32.mrb[226].mxu0  ;;  %v5087_v27 = vrot.slane %v5085_v25, 1  ;;  %v12215_v35 = vsel %vm701_vm2, %v5076_v40, %v5080_v54  ;;  %6151 = vmatmul.mubr.bf16.gmra.mrb[16].mxu0 %v12209_v61  ;;  %v4210_v2 = vadd.f32 %v8406_v10, %v11921_v9  ;;  %v4692_v54 = vld [vmem:[#allocation2 + $0x110] sm:$0xff] }
 0x42e   : > { %9420 = vst [vmem:[#allocation2 + $0x129] sm:$0xff] %v9419_v41  ;;  %v8409_v16 = vadd.f32 %v8408_v3, %v8407_v50  ;;  %v4957_v37 = vpack.c.bf16 %v4913_v45, %v4913_v45  ;;  %v8520_v7 = vpop.f32.mrb[227].mxu0  ;;  %5989 = vmatprep.mubr.bf16.mxu1 %v12215_v35  ;;  %v4806_v5 = vadd.f32 %v12198_v32, %v4747_v38  ;;  %v9448_v41 = vld [vmem:[#allocation2 + $0x139] sm:$0xff] }
 0x42f   : > { %v5088_v21 = vor.u32 %v5087_v27, %v5083_v0  ;;  %v8521_v8 = vadd.f32 %v8520_v7, %v8519_v56  ;;  %v4807_v58 = vadd.f32 %v12198_v32, %v4748_v24  ;;  %7498 = vmatmul.mubr.msk.bf16.gmra.mrb[80].mxu1 %vm10359_vm4, %v12167_v23  ;;  %v4371_v40 = vadd.f32 %v8518_v42, %v4210_v2  ;;  %v9468_v42 = vld [vmem:[#allocation2 + $0x141] sm:$0xff] }
 0x430   : > { %v4213_v9 = vadd.f32 %v8409_v16, %v11924_v4  ;;  %v5090_v63 = vshll.u32 %v4957_v37, 16  ;;  %v5242_v25 = vrot.slane %v4957_v37, 1  ;;  %v4860_v10 = vmax.f32 %v4806_v5, 0.0 }
 0x431   : > { %v4861_v50 = vmax.f32 %v4807_v58, 0.0  ;;  %v4749_v0 = vmul.f32 %v12183_v19, %v4690_v31  ;;  %v4750_v44 = vmul.f32 %v12183_v19, %v4691_v33  ;;  %v9449_v38 = vadd.f32 %v9448_v41, %v4371_v40  ;;  %v8410_v45 = vpop.f32.mrb[36].mxu1 }
 0x432   : > { %v5092_v3 = vrot.slane %v5090_v63, 1  ;;  %v4374_v24 = vadd.f32 %v8521_v8, %v4213_v9  ;;  %v12229_v56 = vsel %vm942_vm5, %v5241_v53, %v5242_v25  ;;  %v4914_v4 = vsel %vm367_vm0, %v4860_v10, 0.0  ;;  %v8411_v2 = vpop.f32.mrb[37].mxu1 }
 0x433   : > { %13015 = vst [vmem:[#allocation23_spill] sm:$0xff] %v12229_v56  ;;  %v12233_v27 = vpack.c.bf16 %v4861_v50, %v4860_v10  ;;  %v8522_v16 = vpop.f32.mrb[228].mxu0  ;;  %v4808_v37 = vadd.f32 %v12198_v32, %v4749_v0  ;;  %v4751_v7 = vmul.f32 %v12183_v19, %v4692_v54  ;;  %9450 = vst [vmem:[#allocation2 + $0x139] sm:$0xff] %v9449_v38  ;;  %v8413_v5 = vpop.f32.mrb[38].mxu1 }
 0x434   : > { %v12238_v31 = vsel %vm701_vm2, %v5088_v21, %v5092_v3  ;;  %v9469_v33 = vadd.f32 %v9468_v42, %v4374_v24  ;;  %v4958_v53 = vpack.c.bf16 %v4861_v50, %v4914_v4  ;;  %v8412_v8 = vadd.f32 %v8411_v2, %v8410_v45  ;;  %v8523_v58 = vpop.f32.mrb[229].mxu0  ;;  %v8414_v9 = vpop.f32.mrb[39].mxu1  ;;  %v4693_v3 = vld [vmem:[#allocation2 + $0x118] sm:$0x3]  ;;  %v4694_v24 = vld [vmem:[#allocation2 + $0x120] sm:$0xff] }
 0x435   : > { %5997 = vmatprep.mubr.bf16.mxu1 %v12238_v31  ;;  %7549 = vmatprep.mubr.msk.bf16.mxu0 %vm10359_vm4, %v12233_v27  ;;  %v8524_v40 = vadd.f32 %v8523_v58, %v8522_v16  ;;  %v8525_v63 = vpop.f32.mrb[230].mxu0  ;;  %v4862_v25 = vmax.f32 %v4808_v37, 0.0  ;;  %v4809_v54 = vadd.f32 %v12198_v32, %v4750_v44  ;;  %v4810_v21 = vadd.f32 %v12198_v32, %v4751_v7  ;;  %v9438_v7 = vld [vmem:[#allocation2 + $0x151] sm:$0xff] }
 0x436   : > { %9470 = vst [vmem:[#allocation2 + $0x141] sm:$0xff] %v9469_v33  ;;  %v5244_v41 = vrot.slane %v4958_v53, 1  ;;  %6159 = vmatmul.mubr.bf16.gmra.mrb[20].mxu0 %v12229_v56  ;;  %v4218_v10 = vadd.f32 %v8412_v8, %v11926_v52  ;;  %v8415_v50 = vadd.f32 %v8414_v9, %v8413_v5  ;;  %v5095_v0 = vshrl.u32 %v4958_v53, 16  ;;  %v8526_v38 = vpop.f32.mrb[231].mxu0 }
 0x437   : > { %v4916_v45 = vsel %vm378_vm1, %v4862_v25, 0.0  ;;  %v5097_v42 = vshll.u32 %v4958_v53, 16  ;;  %v8527_v4 = vadd.f32 %v8526_v38, %v8525_v63  ;;  %v4863_v2 = vmax.f32 %v4809_v54, 0.0  ;;  %7501 = vmatmul.mubr.msk.bf16.gmra.mrb[84].mxu1 %vm10359_vm4, %v12193_v60 }
 0x438   : > { %v4379_v44 = vadd.f32 %v8524_v40, %v4218_v10  ;;  %v4221_v16 = vadd.f32 %v8415_v50, %v11928_v22  ;;  %v4959_v37 = vpack.c.bf16 %v4916_v45, %v4916_v45  ;;  %v4864_v52 = vmax.f32 %v4810_v21, 0.0  ;;  %v9458_v40 = vld [vmem:[#allocation2 + $0x159] sm:$0xff] }
 0x439   : > { %v5099_v33 = vrot.slane %v5097_v42, 1  ;;  %v4917_v8 = vsel %vm367_vm0, %v4863_v2, 0.0  ;;  %v4752_v5 = vmul.f32 %v12183_v19, %v4693_v3  ;;  %v4753_v53 = vmul.f32 %v12183_v19, %v4694_v24  ;;  %v8416_v54 = vpop.f32.mrb[40].mxu1 }
 0x43a   : > { %v9439_v58 = vadd.f32 %v9438_v7, %v4379_v44  ;;  %v5102_v9 = vshll.u32 %v4959_v37, 16  ;;  %v5245_v63 = vrot.slane %v4959_v37, 1  ;;  %v4382_v25 = vadd.f32 %v8527_v4, %v4221_v16  ;;  %v8417_v21 = vpop.f32.mrb[41].mxu1  ;;  %v4695_v4 = vld [vmem:[#allocation2 + $0x128] sm:$0xff] }
 0x43b   : > { %v5100_v38 = vor.u32 %v5099_v33, %v5095_v0  ;;  %v4960_v10 = vpack.c.bf16 %v4864_v52, %v4917_v8  ;;  %v12258_v22 = vpack.c.bf16 %v4864_v52, %v4863_v2  ;;  %v8528_v50 = vpop.f32.mrb[232].mxu0  ;;  %v4811_v45 = vadd.f32 %v12198_v32, %v4752_v5  ;;  %v8419_v44 = vpop.f32.mrb[42].mxu1 }
 0x43c   : > { %9440 = vst [vmem:[#allocation2 + $0x151] sm:$0xff] %v9439_v58  ;;  %v5104_v42 = vrot.slane %v5102_v9, 1  ;;  %v9459_v56 = vadd.f32 %v9458_v40, %v4382_v25  ;;  %v12262_v3 = vsel %vm942_vm5, %v5244_v41, %v5245_v63  ;;  %v8418_v24 = vadd.f32 %v8417_v21, %v8416_v54  ;;  %v8529_v37 = vpop.f32.mrb[233].mxu0  ;;  %v8420_v2 = vpop.f32.mrb[43].mxu1  ;;  %v4696_v63 = vld [vmem:[#allocation2 + $0x130] sm:$0x3] }
 0x43d   : > { %13016 = vst [vmem:[#allocation17_spill] sm:$0xff] %v12262_v3  ;;  %v5247_v16 = vrot.slane %v4960_v10, 1  ;;  %7552 = vmatprep.mubr.msk.bf16.mxu0 %vm10359_vm4, %v12258_v22  ;;  %v8530_v0 = vadd.f32 %v8529_v37, %v8528_v50  ;;  %v8531_v52 = vpop.f32.mrb[234].mxu0  ;;  %v4865_v7 = vmax.f32 %v4811_v45, 0.0  ;;  %v5107_v33 = vshrl.u32 %v4960_v10, 16  ;;  %v4697_v25 = vld [vmem:[#allocation2 + $0x138] sm:$0xff] }
 0x43e   : > { %v12268_v8 = vsel %vm701_vm2, %v5100_v38, %v5104_v42  ;;  %9460 = vst [vmem:[#allocation2 + $0x159] sm:$0xff] %v9459_v56  ;;  %6167 = vmatmul.mubr.bf16.gmra.mrb[24].mxu0 %v12262_v3  ;;  %v4226_v41 = vadd.f32 %v8418_v24, %v11930_v26  ;;  %v8421_v5 = vadd.f32 %v8420_v2, %v8419_v44  ;;  %v5109_v58 = vshll.u32 %v4960_v10, 16  ;;  %v8532_v9 = vpop.f32.mrb[235].mxu0  ;;  %v9488_v45 = vld [vmem:[#allocation2 + $0x169] sm:$0xff]  ;;  %v4698_v37 = vld [vmem:[#allocation2 + $0x140] sm:$0xff] }
 0x43f   : > { %6005 = vmatprep.mubr.bf16.mxu1 %v12268_v8  ;;  %v4919_v54 = vsel %vm378_vm1, %v4865_v7, 0.0  ;;  %v8533_v40 = vadd.f32 %v8532_v9, %v8531_v52  ;;  %v4754_v21 = vmul.f32 %v12183_v19, %v4695_v4  ;;  %v4812_v38 = vadd.f32 %v12198_v32, %v4753_v53 }
 0x440   : > { %7504 = vmatmul.mubr.msk.bf16.gmra.mrb[88].mxu1 %vm10359_vm4, %v12233_v27  ;;  %v4387_v26 = vadd.f32 %v8530_v0, %v4226_v41  ;;  %v4229_v56 = vadd.f32 %v8421_v5, %v11932_v30  ;;  %v4961_v10 = vpack.c.bf16 %v4919_v54, %v4919_v54  ;;  %v5111_v50 = vrot.slane %v5109_v58, 1 }
 0x441   : > { %v4813_v42 = vadd.f32 %v12198_v32, %v4754_v21  ;;  %v4866_v24 = vmax.f32 %v4812_v38, 0.0  ;;  %v4755_v44 = vmul.f32 %v12183_v19, %v4696_v63  ;;  %v4756_v4 = vmul.f32 %v12183_v19, %v4697_v25  ;;  %v8422_v9 = vpop.f32.mrb[44].mxu1  ;;  %v9508_v63 = vld [vmem:[#allocation2 + $0x171] sm:$0xff] }
 0x442   : > { %v9489_v2 = vadd.f32 %v9488_v45, %v4387_v26  ;;  %v5112_v53 = vor.u32 %v5111_v50, %v5107_v33  ;;  %v5114_v52 = vshll.u32 %v4961_v10, 16  ;;  %v5248_v7 = vrot.slane %v4961_v10, 1  ;;  %v8423_v41 = vpop.f32.mrb[45].mxu1 }
 0x443   : > { %v4390_v3 = vadd.f32 %v8533_v40, %v4229_v56  ;;  %v4867_v0 = vmax.f32 %v4813_v42, 0.0  ;;  %v4920_v30 = vsel %vm367_vm0, %v4866_v24, 0.0  ;;  %v8534_v5 = vpop.f32.mrb[236].mxu0  ;;  %v4814_v58 = vadd.f32 %v12198_v32, %v4755_v44  ;;  %v8425_v33 = vpop.f32.mrb[46].mxu1 }
 0x444   : > { %9490 = vst [vmem:[#allocation2 + $0x169] sm:$0xff] %v9489_v2  ;;  %v5116_v54 = vrot.slane %v5114_v52, 1  ;;  %v12288_v21 = vsel %vm942_vm5, %v5247_v16, %v5248_v7  ;;  %v8424_v25 = vadd.f32 %v8423_v41, %v8422_v9  ;;  %v8535_v38 = vpop.f32.mrb[237].mxu0  ;;  %v4757_v26 = vmul.f32 %v12183_v19, %v4698_v37  ;;  %v8426_v45 = vpop.f32.mrb[47].mxu1  ;;  %v4699_v9 = vld [vmem:[#allocation2 + $0x148] sm:$0x3] }
 0x445   : > { %13017 = vst [vmem:[#allocation25_spill] sm:$0xff] %v12288_v21  ;;  %v9509_v40 = vadd.f32 %v9508_v63, %v4390_v3  ;;  %v4962_v56 = vpack.c.bf16 %v4867_v0, %v4920_v30  ;;  %v12291_v10 = vpack.c.bf16 %v4867_v0, %v4866_v24  ;;  %v8536_v50 = vadd.f32 %v8535_v38, %v8534_v5  ;;  %v8537_v42 = vpop.f32.mrb[238].mxu0  ;;  %v4700_v30 = vld [vmem:[#allocation2 + $0x150] sm:$0xff]  ;;  %v4701_v38 = vld [vmem:[#allocation2 + $0x158] sm:$0xff] }
 0x446   : > { %v12294_v44 = vsel %vm701_vm2, %v5112_v53, %v5116_v54  ;;  %v4234_v2 = vadd.f32 %v8424_v25, %v11934_v29  ;;  %v8427_v52 = vadd.f32 %v8426_v45, %v8425_v33  ;;  %v4868_v16 = vmax.f32 %v4814_v58, 0.0  ;;  %v8538_v7 = vpop.f32.mrb[239].mxu0  ;;  %v9478_v58 = vld [vmem:[#allocation2 + $0x181] sm:$0xff]  ;;  %v9498_v45 = vld [vmem:[#allocation2 + $0x189] sm:$0xff] }
 0x447   : > { %13018 = vst [vmem:[#allocation24_spill] sm:$0xff] %v12291_v10  ;;  %6013 = vmatprep.mubr.bf16.mxu1 %v12294_v44  ;;  %9510 = vst [vmem:[#allocation2 + $0x171] sm:$0xff] %v9509_v40  ;;  %v5250_v37 = vrot.slane %v4962_v56, 1  ;;  %7555 = vmatprep.mubr.msk.bf16.mxu0 %vm10359_vm4, %v12291_v10  ;;  %v5119_v3 = vshrl.u32 %v4962_v56, 16  ;;  %v5121_v24 = vshll.u32 %v4962_v56, 16  ;;  %v8539_v0 = vadd.f32 %v8538_v7, %v8537_v42 }
 0x448   : > { %7507 = vmatmul.mubr.msk.bf16.gmra.mrb[92].mxu1 %vm10359_vm4, %v12258_v22  ;;  %6175 = vmatmul.mubr.bf16.gmra.mrb[28].mxu0 %v12288_v21  ;;  %v4395_v29 = vadd.f32 %v8536_v50, %v4234_v2  ;;  %v4237_v53 = vadd.f32 %v8427_v52, %v11936_v59  ;;  %v4922_v41 = vsel %vm378_vm1, %v4868_v16, 0.0  ;;  %v4815_v5 = vadd.f32 %v12198_v32, %v4756_v4  ;;  %v4702_v7 = vld [vmem:[#allocation2 + $0x160] sm:$0x3] }
 0x449   : > { %v4963_v54 = vpack.c.bf16 %v4922_v41, %v4922_v41  ;;  %v5123_v63 = vrot.slane %v5121_v24, 1  ;;  %v4816_v25 = vadd.f32 %v12198_v32, %v4757_v26  ;;  %v4758_v33 = vmul.f32 %v12183_v19, %v4699_v9  ;;  %v12312_v59 = vpop.f32.mrb[48].mxu1 }
 0x44a   : > { %v9479_v40 = vadd.f32 %v9478_v58, %v4395_v29  ;;  %v4398_v56 = vadd.f32 %v8539_v0, %v4237_v53  ;;  %v4869_v42 = vmax.f32 %v4815_v5, 0.0  ;;  %v4759_v50 = vmul.f32 %v12183_v19, %v4700_v30  ;;  %v12314_v41 = vpop.f32.mrb[49].mxu1 }
 0x44b   : > { %v5124_v2 = vor.u32 %v5123_v63, %v5119_v3  ;;  %v5126_v52 = vshll.u32 %v4963_v54, 16  ;;  %v5251_v16 = vrot.slane %v4963_v54, 1  ;;  %v4870_v4 = vmax.f32 %v4816_v25, 0.0  ;;  %v12320_v29 = vpop.f32.mrb[50].mxu1 }
 0x44c   : > { %9480 = vst [vmem:[#allocation2 + $0x181] sm:$0xff] %v9479_v40  ;;  %v9499_v26 = vadd.f32 %v9498_v45, %v4398_v56  ;;  %v4923_v9 = vsel %vm367_vm0, %v4869_v42, 0.0  ;;  %v4817_v24 = vadd.f32 %v12198_v32, %v4758_v33  ;;  %v4760_v0 = vmul.f32 %v12183_v19, %v4701_v38  ;;  %v12327_v58 = vpop.f32.mrb[51].mxu1  ;;  %v4703_v38 = vld [vmem:[#allocation2 + $0x168] sm:$0xff] }
 0x44d   : > { %v5128_v30 = vrot.slane %v5126_v52, 1  ;;  %v4964_v53 = vpack.c.bf16 %v4870_v4, %v4923_v9  ;;  %v12322_v3 = vpack.c.bf16 %v4870_v4, %v4869_v42  ;;  %v12325_v5 = vsel %vm942_vm5, %v5250_v37, %v5251_v16 }
 0x44e   : > { %13019 = vst [vmem:[#allocation27_spill] sm:$0xff] %v12325_v5  ;;  %9500 = vst [vmem:[#allocation2 + $0x189] sm:$0xff] %v9499_v26  ;;  %v4871_v54 = vmax.f32 %v4817_v24, 0.0  ;;  %v4818_v63 = vadd.f32 %v12198_v32, %v4759_v50  ;;  %v4819_v25 = vadd.f32 %v12198_v32, %v4760_v0  ;;  %v4761_v33 = vmul.f32 %v12183_v19, %v4702_v7  ;;  %v4704_v40 = vld [vmem:[#allocation2 + $0x170] sm:$0xff]  ;;  %v4705_v52 = vld [vmem:[#allocation2 + $0x178] sm:$0x3] }
 0x44f   : > { %v12333_v56 = vsel %vm701_vm2, %v5124_v2, %v5128_v30  ;;  %v5253_v45 = vrot.slane %v4964_v53, 1  ;;  %7558 = vmatprep.mubr.msk.bf16.mxu0 %vm10359_vm4, %v12322_v3  ;;  %v5131_v37 = vshrl.u32 %v4964_v53, 16  ;;  %v5133_v42 = vshll.u32 %v4964_v53, 16 }
 0x450   : > { %6021 = vmatprep.mubr.bf16.mxu1 %v12333_v56  ;;  %6183 = vmatmul.mubr.bf16.gmra.mrb[32].mxu0 %v12325_v5  ;;  %v4925_v50 = vsel %vm378_vm1, %v4871_v54, 0.0  ;;  %v4872_v16 = vmax.f32 %v4818_v63, 0.0  ;;  %v4873_v4 = vmax.f32 %v4819_v25, 0.0  ;;  %v4820_v2 = vadd.f32 %v12198_v32, %v4761_v33 }
 0x451   : > { %7510 = vmatmul.mubr.msk.bf16.gmra.mrb[96].mxu1 %vm10359_vm4, %v12291_v10  ;;  %v4965_v7 = vpack.c.bf16 %v4925_v50, %v4925_v50  ;;  %v5135_v26 = vrot.slane %v5133_v42, 1  ;;  %v4762_v9 = vmul.f32 %v12183_v19, %v4703_v38  ;;  %v4763_v24 = vmul.f32 %v12183_v19, %v4704_v40 }
 0x452   : > { %v4926_v0 = vsel %vm367_vm0, %v4872_v16, 0.0  ;;  %v12350_v30 = vpack.c.bf16 %v4873_v4, %v4872_v16  ;;  %v4874_v53 = vmax.f32 %v4820_v2, 0.0  ;;  %v4764_v54 = vmul.f32 %v12183_v19, %v4705_v52 }
 0x453   : > { %v5136_v63 = vor.u32 %v5135_v26, %v5131_v37  ;;  %v5138_v25 = vshll.u32 %v4965_v7, 16  ;;  %v5254_v33 = vrot.slane %v4965_v7, 1  ;;  %v4966_v5 = vpack.c.bf16 %v4873_v4, %v4926_v0  ;;  %v4706_v52 = vld [vmem:[#allocation2 + $0x180] sm:$0xff] }
 0x454   : > { %7561 = vmatprep.mubr.msk.bf16.mxu0 %vm10359_vm4, %v12350_v30  ;;  %v4928_v38 = vsel %vm378_vm1, %v4874_v53, 0.0  ;;  %v4821_v40 = vadd.f32 %v12198_v32, %v4762_v9  ;;  %v4822_v42 = vadd.f32 %v12198_v32, %v4763_v24  ;;  %v4823_v50 = vadd.f32 %v12198_v32, %v4764_v54 }
 0x455   : > { %v5140_v16 = vrot.slane %v5138_v25, 1  ;;  %v4967_v2 = vpack.c.bf16 %v4928_v38, %v4928_v38  ;;  %v12362_v37 = vsel %vm942_vm5, %v5253_v45, %v5254_v33  ;;  %v5145_v4 = vshll.u32 %v4966_v5, 16  ;;  %v4707_v9 = vld [vmem:[#allocation2 + $0x188] sm:$0xff] }
 0x456   : > { %v4875_v7 = vmax.f32 %v4821_v40, 0.0  ;;  %v4876_v26 = vmax.f32 %v4822_v42, 0.0  ;;  %v5143_v10 = vshrl.u32 %v4966_v5, 16  ;;  %v4877_v21 = vmax.f32 %v4823_v50, 0.0 }
 0x457   : > { %v12365_v0 = vsel %vm701_vm2, %v5136_v63, %v5140_v16  ;;  %v5150_v53 = vshll.u32 %v4967_v2, 16  ;;  %v5147_v24 = vrot.slane %v5145_v4, 1  ;;  %v4765_v25 = vmul.f32 %v12183_v19, %v4706_v52 }
 0x458   : > { %6029 = vmatprep.mubr.bf16.mxu1 %v12365_v0  ;;  %6191 = vmatmul.mubr.bf16.gmra.mrb[36].mxu0 %v12362_v37  ;;  %v4929_v54 = vsel %vm367_vm0, %v4875_v7, 0.0  ;;  %v12371_v45 = vpack.c.bf16 %v4876_v26, %v4875_v7  ;;  %v4931_v38 = vsel %vm378_vm1, %v4877_v21, 0.0  ;;  %v4766_v50 = vmul.f32 %v12183_v19, %v4707_v9 }
 0x459   : > { %7513 = vmatmul.mubr.msk.bf16.gmra.mrb[100].mxu1 %vm10359_vm4, %v12322_v3  ;;  %v5152_v63 = vrot.slane %v5150_v53, 1  ;;  %v4968_v33 = vpack.c.bf16 %v4876_v26, %v4929_v54  ;;  %v5148_v40 = vor.u32 %v5147_v24, %v5143_v10  ;;  %v4969_v42 = vpack.c.bf16 %v4931_v38, %v4931_v38 }
 0x45a   : > { %7564 = vmatprep.mubr.msk.bf16.mxu0 %vm10359_vm4, %v12371_v45  ;;  %v4824_v16 = vadd.f32 %v12198_v32, %v4765_v25  ;;  %v5256_v52 = vrot.slane %v4966_v5, 1  ;;  %v5257_v4 = vrot.slane %v4967_v2, 1  ;;  %v12386_v53 = vadd.f32 %v12314_v41, %v12312_v59 }
 0x45b   : > { %v5157_v7 = vshll.u32 %v4968_v33, 16  ;;  %v12389_v26 = vsel %vm701_vm2, %v5148_v40, %v5152_v63  ;;  %v5162_v21 = vshll.u32 %v4969_v42, 16  ;;  %v4825_v10 = vadd.f32 %v12198_v32, %v4766_v50 }
 0x45c   : > { %6037 = vmatprep.mubr.bf16.mxu1 %v12389_v26  ;;  %v5155_v24 = vshrl.u32 %v4968_v33, 16  ;;  %v4878_v9 = vmax.f32 %v4824_v16, 0.0  ;;  %v12395_v5 = vadd.f32 %v12327_v58, %v12320_v29  ;;  %v12398_v59 = vsel %vm942_vm5, %v5256_v52, %v5257_v4  ;;  %v9866_v16 = vld [vmem:[#allocation8 + $0x688] sm:$0xff]   ;;  %v9868_v52 = vld [vmem:[#allocation8 + $0x698] sm:$0xff]  }
 0x45d   : > { %v5159_v54 = vrot.slane %v5157_v7, 1  ;;  %v5164_v2 = vrot.slane %v5162_v21, 1  ;;  %v4879_v25 = vmax.f32 %v4825_v10, 0.0  ;;  %v5259_v51 = vrot.slane %v4968_v33, 1  ;;  %v9881_v33 = vld [vmem:[#allocation8 + $0x680] sm:$0xff]  }
 0x45e   : > { %v4932_v63 = vsel %vm367_vm0, %v4878_v9, 0.0  ;;  %v5260_v58 = vrot.slane %v4969_v42, 1  ;;  %v9867_v42 = vld [vmem:[#allocation8 + $0x690] sm:$0xff]  }
 0x45f   : > { %v5160_v41 = vor.u32 %v5159_v54, %v5155_v24  ;;  %v12403_v38 = vpack.c.bf16 %v4879_v25, %v4932_v63  ;;  %v12405_v40 = vpack.c.bf16 %v4879_v25, %v4878_v9 }
 0x460   : > { %6199 = vmatmul.mubr.bf16.gmra.mrb[40].mxu0 %v12398_v59  ;;  %v12418_v50 = vsel %vm942_vm5, %v5259_v51, %v5260_v58 }
 0x461   : > { %7516 = vmatmul.mubr.msk.bf16.gmra.mrb[104].mxu1 %vm10359_vm4, %v12350_v30  ;;  %v12411_v29 = vsel %vm701_vm2, %v5160_v41, %v5164_v2  ;;  %7567 = vmatprep.mubr.msk.bf16.mxu0 %vm10359_vm4, %v12405_v40 }
 0x462   : > { %6045 = vmatprep.mubr.bf16.mxu1 %v12411_v29 }
 0x468   : > { %6207 = vmatmul.mubr.bf16.gmra.mrb[44].mxu0 %v12418_v50 }
 0x469   : > { %7519 = vmatmul.mubr.msk.bf16.gmra.mrb[108].mxu1 %vm10359_vm4, %v12371_v45  ;;  %6408 = vmatprep.mubr.bf16.mxu0 %v12023_v17 }
 0x46a   : > { %6247 = vmatprep.mubr.bf16.mxu1 %v11977_v57  ;;  %v9869_v57 = vld [vmem:[#allocation8 + $0x6a0] sm:$0xff]  }
 0x470   : > { %7570 = vmatmul.mubr.msk.bf16.vlgmr.msra.gmra.mrb[48].mxu0 %vm10359_vm4, %v11986_v49  ;;  %v9871_v49 = vld [vmem:[#allocation8 + $0x6b0] sm:$0xff]  }
 0x471   : > { %6248 = vmatmul.mubr.bf16.vlgmr.msra.gmra.mrb[112].mxu1 %v11982_v36  ;;  %6416 = vmatprep.mubr.bf16.mxu0 %v12053_v46  ;;  %v9870_v36 = vld [vmem:[#allocation8 + $0x6a8] sm:$0xff]  }
 0x472   : > { %6255 = vmatprep.mubr.bf16.mxu1 %v12019_v15  ;;  %9133 = vmatpush3.bf16.msra.mxu0 %v9881_v33  ;;  %v5281_v33 = vshll.u32 %v12403_v38, 16 }
 0x473   : > { %9134 = vmatprep.subr.bf16.mxu0 %v9866_v16 }
 0x476   : > { %9135 = vmatpush3.bf16.msra.mxu0 %v9866_v16 }
 0x477   : > { %9136 = vmatprep.subr.bf16.mxu0 %v9867_v42 }
 0x478   : > { %7573 = vmatmul.mubr.msk.bf16.gmra.mrb[52].mxu0 %vm10359_vm4, %v12011_v11  ;;  %v9872_v11 = vld [vmem:[#allocation8 + $0x6b8] sm:$0xff]  }
 0x479   : > { %6256 = vmatmul.mubr.bf16.gmra.mrb[116].mxu1 %v12023_v17  ;;  %6424 = vmatprep.mubr.bf16.mxu0 %v12075_v28  ;;  %v13020_v17 = vld [vmem:[#allocation23_spill] sm:$0xff] }
 0x47a   : > { %6263 = vmatprep.mubr.bf16.mxu1 %v12045_v48  ;;  %9137 = vmatpush3.bf16.msra.mxu0 %v9867_v42 }
 0x47b   : > { %9138 = vmatprep.subr.bf16.mxu0 %v9868_v52 }
 0x47e   : > { %9139 = vmatpush3.bf16.msra.mxu0 %v9868_v52 }
 0x47f   : > { %9140 = vmatprep.subr.bf16.mxu0 %v9869_v57 }
 0x480   : > { %7576 = vmatmul.mubr.msk.bf16.gmra.mrb[56].mxu0 %vm10359_vm4, %v12047_v14  ;;  %v13021_v14 = vld [vmem:[#allocation17_spill] sm:$0xff] }
 0x481   : > { %6264 = vmatmul.mubr.bf16.gmra.mrb[120].mxu1 %v12053_v46  ;;  %6432 = vmatprep.mubr.bf16.mxu0 %v12107_v34  ;;  %v13022_v46 = vld [vmem:[#allocation25_spill] sm:$0xff] }
 0x482   : > { %6271 = vmatprep.mubr.bf16.mxu1 %v12068_v47  ;;  %9141 = vmatpush3.bf16.msra.mxu0 %v9869_v57 }
 0x483   : > { %9142 = vmatprep.subr.bf16.mxu0 %v9870_v36 }
 0x486   : > { %9143 = vmatpush3.bf16.msra.mxu0 %v9870_v36 }
 0x487   : > { %9144 = vmatprep.subr.bf16.mxu0 %v9871_v49 }
 0x488   : > { %7579 = vmatmul.mubr.msk.bf16.gmra.mrb[60].mxu0 %vm10359_vm4, %v12082_v39  ;;  %v4708_v39 = vld [vmem:[#allocation2 + $0x190] sm:$0x3] }
 0x489   : > { %6272 = vmatmul.mubr.bf16.gmra.mrb[124].mxu1 %v12075_v28  ;;  %6440 = vmatprep.mubr.bf16.mxu0 %v12138_v62 }
 0x48a   : > { %6279 = vmatprep.mubr.bf16.mxu1 %v12110_v1  ;;  %9145 = vmatpush3.bf16.msra.mxu0 %v9871_v49 }
 0x48b   : > { %9146 = vmatprep.subr.bf16.mxu0 %v9872_v11 }
 0x48e   : > { %9147 = vmatpush3.bf16.msra.mxu0 %v9872_v11 }
 0x490   : > { %7582 = vmatmul.mubr.msk.bf16.gmra.mrb[64].mxu0 %vm10359_vm4, %v12099_v13 }
 0x491   : > { %6280 = vmatmul.mubr.bf16.gmra.mrb[128].mxu1 %v12107_v34  ;;  %6448 = vmatprep.mubr.bf16.mxu0 %v12162_v6 }
 0x492   : > { %6287 = vmatprep.mubr.bf16.mxu1 %v12132_v20 }
 0x498   : > { %7585 = vmatmul.mubr.msk.bf16.gmra.mrb[68].mxu0 %vm10359_vm4, %v12129_v12 }
 0x499   : > { %6288 = vmatmul.mubr.bf16.gmra.mrb[132].mxu1 %v12138_v62  ;;  %6456 = vmatprep.mubr.bf16.mxu0 %v12215_v35 }
 0x49a   : > { %6295 = vmatprep.mubr.bf16.mxu1 %v12153_v18 }
 0x4a0   : > { %7588 = vmatmul.mubr.msk.bf16.gmra.mrb[72].mxu0 %vm10359_vm4, %v12167_v23 }
 0x4a1   : > { %6296 = vmatmul.mubr.bf16.gmra.mrb[136].mxu1 %v12162_v6  ;;  %6464 = vmatprep.mubr.bf16.mxu0 %v12238_v31  ;;  %v4767_v6 = vmul.f32 %v12183_v19, %v4708_v39  ;;  %v5283_v39 = vrot.slane %v5281_v33, 1 }
 0x4a2   : > { %6303 = vmatprep.mubr.bf16.mxu1 %v12209_v61 }
 0x4a8   : > { %7591 = vmatmul.mubr.msk.bf16.gmra.mrb[76].mxu0 %vm10359_vm4, %v12193_v60 }
 0x4a9   : > { %6304 = vmatmul.mubr.bf16.gmra.mrb[140].mxu1 %v12215_v35  ;;  %6472 = vmatprep.mubr.bf16.mxu0 %v12268_v8  ;;  %v13023_v35 = vld [vmem:[#allocation24_spill] sm:$0xff] }
 0x4aa   : > { %6311 = vmatprep.mubr.bf16.mxu1 %v13020_v17 }
 0x4b0   : > { %7594 = vmatmul.mubr.msk.bf16.gmra.mrb[112].mxu0 %vm10359_vm4, %v12233_v27 }
 0x4b1   : > { %6312 = vmatmul.mubr.bf16.gmra.mrb[144].mxu1 %v12238_v31  ;;  %6480 = vmatprep.mubr.bf16.mxu0 %v12294_v44  ;;  %v4826_v31 = vadd.f32 %v12198_v32, %v4767_v6 }
 0x4b2   : > { %6319 = vmatprep.mubr.bf16.mxu1 %v13021_v14 }
 0x4b3   : > { %v4880_v9 = vmax.f32 %v4826_v31, 0.0 }
 0x4b5   : > { %v4934_v41 = vsel %vm378_vm1, %v4880_v9, 0.0 }
 0x4b6   : > { %v4971_v16 = vpack.c.bf16 %v4934_v41, %v4934_v41 }
 0x4b8   : > { %7597 = vmatmul.mubr.msk.bf16.gmra.mrb[116].mxu0 %vm10359_vm4, %v12258_v22  ;;  %v13024_v22 = vld [vmem:[#allocation27_spill] sm:$0xff] }
 0x4b9   : > { %6320 = vmatmul.mubr.bf16.gmra.mrb[148].mxu1 %v12268_v8  ;;  %6488 = vmatprep.mubr.bf16.mxu0 %v12333_v56  ;;  %v8692_v28 = vpop.f32.mrb[240].mxu0 }
 0x4ba   : > { %6327 = vmatprep.mubr.bf16.mxu1 %v13022_v46  ;;  %v8693_v13 = vpop.f32.mrb[241].mxu0 }
 0x4bb   : > { %v8694_v34 = vadd.f32 %v8693_v13, %v8692_v28  ;;  %v8695_v12 = vpop.f32.mrb[242].mxu0  ;;  %v5286_v13 = vshll.u32 %v4971_v16, 16 }
 0x4bc   : > { %v8696_v62 = vpop.f32.mrb[243].mxu0 }
 0x4bd   : > { %v12488_v23 = vadd.f32 %v8694_v34, %v12386_v53  ;;  %v8697_v60 = vadd.f32 %v8696_v62, %v8695_v12  ;;  %v5279_v12 = vshrl.u32 %v12403_v38, 16  ;;  %v5288_v6 = vrot.slane %v5286_v13, 1 }
 0x4bf   : > { %v12494_v27 = vadd.f32 %v8697_v60, %v12395_v5  ;;  %v5284_v62 = vor.u32 %v5283_v39, %v5279_v12 }
 0x4c0   : > { %7600 = vmatmul.mubr.msk.bf16.gmra.mrb[120].mxu0 %vm10359_vm4, %v13023_v35 }
 0x4c1   : > { %6328 = vmatmul.mubr.bf16.gmra.mrb[152].mxu1 %v12294_v44  ;;  %6496 = vmatprep.mubr.bf16.mxu0 %v12365_v0 }
 0x4c2   : > { %6335 = vmatprep.mubr.bf16.mxu1 %v13024_v22  ;;  %v8586_v19 = vpop.f32.mrb[52].mxu1  ;;  %v8698_v4 = vpop.f32.mrb[244].mxu0 }
 0x4c3   : > { %v8587_v8 = vpop.f32.mrb[53].mxu1  ;;  %v8699_v21 = vpop.f32.mrb[245].mxu0 }
 0x4c4   : > { %v8588_v7 = vadd.f32 %v8587_v8, %v8586_v19  ;;  %v8589_v53 = vpop.f32.mrb[54].mxu1  ;;  %v8700_v10 = vadd.f32 %v8699_v21, %v8698_v4  ;;  %v8701_v54 = vpop.f32.mrb[246].mxu0 }
 0x4c5   : > { %v8590_v24 = vpop.f32.mrb[55].mxu1  ;;  %v8702_v2 = vpop.f32.mrb[247].mxu0 }
 0x4c6   : > { %v8591_v5 = vadd.f32 %v8590_v24, %v8589_v53  ;;  %v12500_v25 = vadd.f32 %v8700_v10, %v8588_v7  ;;  %v8703_v44 = vadd.f32 %v8702_v2, %v8701_v54  ;;  %v5294_v2 = vrot.slane %v4971_v16, 1  ;;  %v13025_v16 = vld [vmem:[#allocation13_spill] sm:$0xff] }
 0x4c8   : > { %7603 = vmatmul.mubr.msk.bf16.gmra.mrb[124].mxu0 %vm10359_vm4, %v12322_v3  ;;  %v12507_v32 = vadd.f32 %v8703_v44, %v8591_v5  ;;  %v5293_v5 = vrot.slane %v12403_v38, 1 }
 0x4c9   : > { %6336 = vmatmul.mubr.bf16.gmra.mrb[156].mxu1 %v12333_v56  ;;  %6504 = vmatprep.mubr.bf16.mxu0 %v12389_v26 }
 0x4ca   : > { %6343 = vmatprep.mubr.bf16.mxu1 %v12362_v37  ;;  %v8704_v63 = vpop.f32.mrb[248].mxu0  ;;  %v12540_v33 = vsel %vm942_vm5, %v5293_v5, %v5294_v2 }
 0x4cb   : > { %v8592_v51 = vpop.f32.mrb[56].mxu1  ;;  %v8705_v58 = vpop.f32.mrb[249].mxu0 }
 0x4cc   : > { %v8593_v42 = vpop.f32.mrb[57].mxu1  ;;  %v8706_v52 = vadd.f32 %v8705_v58, %v8704_v63  ;;  %v8707_v3 = vpop.f32.mrb[250].mxu0 }
 0x4cd   : > { %v8594_v57 = vadd.f32 %v8593_v42, %v8592_v51  ;;  %v8595_v56 = vpop.f32.mrb[58].mxu1  ;;  %v8708_v36 = vpop.f32.mrb[251].mxu0 }
 0x4ce   : > { %v8596_v49 = vpop.f32.mrb[59].mxu1  ;;  %v8709_v11 = vadd.f32 %v8708_v36, %v8707_v3 }
 0x4cf   : > { %v12516_v55 = vadd.f32 %v8706_v52, %v8594_v57  ;;  %v8597_v28 = vadd.f32 %v8596_v49, %v8595_v56 }
 0x4d0   : > { %7606 = vmatmul.mubr.msk.bf16.gmra.mrb[128].mxu0 %vm10359_vm4, %v12350_v30 }
 0x4d1   : > { %6344 = vmatmul.mubr.bf16.gmra.mrb[160].mxu1 %v12365_v0  ;;  %6512 = vmatprep.mubr.bf16.mxu0 %v12411_v29  ;;  %v12521_v34 = vadd.f32 %v8709_v11, %v8597_v28  ;;  %v5289_v0 = vsel %vm701_vm2, %v5284_v62, %v5288_v6 }
 0x4d2   : > { %6351 = vmatprep.mubr.bf16.mxu1 %v12398_v59 }
 0x4d4   : > { %v8710_v35 = vpop.f32.mrb[252].mxu0 }
 0x4d5   : > { %v8598_v60 = vpop.f32.mrb[60].mxu1  ;;  %v8711_v31 = vpop.f32.mrb[253].mxu0 }
 0x4d6   : > { %v8599_v30 = vpop.f32.mrb[61].mxu1  ;;  %v8712_v4 = vadd.f32 %v8711_v31, %v8710_v35  ;;  %v8713_v7 = vpop.f32.mrb[254].mxu0 }
 0x4d7   : > { %v8600_v19 = vadd.f32 %v8599_v30, %v8598_v60  ;;  %v8601_v8 = vpop.f32.mrb[62].mxu1  ;;  %v8714_v21 = vpop.f32.mrb[255].mxu0 }
 0x4d8   : > { %7609 = vmatmul.mubr.msk.bf16.gmra.mrb[132].mxu0 %vm10359_vm4, %v12371_v45  ;;  %v8602_v53 = vpop.f32.mrb[63].mxu1  ;;  %v8715_v54 = vadd.f32 %v8714_v21, %v8713_v7 }
 0x4d9   : > { %6352 = vmatmul.mubr.bf16.gmra.mrb[164].mxu1 %v12389_v26  ;;  %6520 = vmatprep.mubr.bf16.mxu0 %v5289_v0  ;;  %v12529_v10 = vadd.f32 %v8712_v4, %v8600_v19  ;;  %v8603_v24 = vadd.f32 %v8602_v53, %v8601_v8 }
 0x4da   : > { %6359 = vmatprep.mubr.bf16.mxu1 %v12418_v50 }
 0x4db   : > { %v12532_v9 = vadd.f32 %v8715_v54, %v8603_v24 }
 0x4dd   : > { %v8604_v44 = vpop.f32.mrb[64].mxu1 }
 0x4de   : > { %v8605_v45 = vpop.f32.mrb[65].mxu1  ;;  %v8716_v63 = vpop.f32.mrb[0].mxu0 }
 0x4df   : > { %v8606_v41 = vadd.f32 %v8605_v45, %v8604_v44  ;;  %v8607_v51 = vpop.f32.mrb[66].mxu1  ;;  %v8717_v26 = vpop.f32.mrb[1].mxu0 }
 0x4e0   : > { %7612 = vmatmul.mubr.msk.bf16.gmra.mrb[136].mxu0 %vm10359_vm4, %v12405_v40  ;;  %v8608_v58 = vpop.f32.mrb[67].mxu1  ;;  %v8718_v42 = vadd.f32 %v8717_v26, %v8716_v63  ;;  %v8719_v38 = vpop.f32.mrb[2].mxu0 }
 0x4e1   : > { %6360 = vmatmul.mubr.bf16.gmra.mrb[168].mxu1 %v12411_v29  ;;  %v8609_v52 = vadd.f32 %v8608_v58, %v8607_v51  ;;  %6528 = vmatprep.mubr.bf16.mxu0 %v13025_v16  ;;  %v8720_v3 = vpop.f32.mrb[3].mxu0  ;;  %v13026_v29 = vmov 0.0|0.0  }
 0x4e2   : > { %6367 = vmatprep.mubr.bf16.mxu1 %v12540_v33  ;;  %v12544_v57 = vadd.f32 %v8718_v42, %v8606_v41  ;;  %v8721_v56 = vadd.f32 %v8720_v3, %v8719_v38 }
 0x4e4   : > { %v12546_v43 = vadd.f32 %v8721_v56, %v8609_v52 }
 0x4e6   : > { %v8610_v40 = vpop.f32.mrb[68].mxu1  ;;  %v8722_v49 = vpop.f32.mrb[4].mxu0 }
 0x4e7   : > { %v8611_v36 = vpop.f32.mrb[69].mxu1  ;;  %v8723_v39 = vpop.f32.mrb[5].mxu0 }
 0x4e8   : > { %6529 = vmatmul.mubr.bf16.gmra.mrb[140].mxu0 %v13026_v29  ;;  %v8612_v11 = vadd.f32 %v8611_v36, %v8610_v40  ;;  %v8613_v28 = vpop.f32.mrb[70].mxu1  ;;  %v8724_v13 = vadd.f32 %v8723_v39, %v8722_v49  ;;  %v8725_v62 = vpop.f32.mrb[6].mxu0 }
 0x4e9   : > { %6368 = vmatmul.mubr.bf16.gmra.mrb[172].mxu1 %v5289_v0  ;;  %9148 = vmatprep.mubr.bf16.mxu0 %v12019_v15  ;;  %v8614_v12 = vpop.f32.mrb[71].mxu1  ;;  %v8726_v60 = vpop.f32.mrb[7].mxu0 }
 0x4ea   : > { %v8615_v6 = vadd.f32 %v8614_v12, %v8613_v28  ;;  %v12550_v35 = vadd.f32 %v8724_v13, %v8612_v11  ;;  %v8727_v30 = vadd.f32 %v8726_v60, %v8725_v62 }
 0x4ec   : > { %v12552_v31 = vadd.f32 %v8727_v30, %v8615_v6 }
 0x4ee   : > { %v8728_v19 = vpop.f32.mrb[8].mxu0 }
 0x4ef   : > { %v8616_v8 = vpop.f32.mrb[72].mxu1  ;;  %v8729_v4 = vpop.f32.mrb[9].mxu0 }
 0x4f0   : > { %9149 = vmatmul.mubr.bf16.vlgmr.msra.gmra.mrb[80].mxu0 %v12045_v48  ;;  %v8617_v7 = vpop.f32.mrb[73].mxu1  ;;  %v8730_v0 = vadd.f32 %v8729_v4, %v8728_v19  ;;  %v8731_v15 = vpop.f32.mrb[10].mxu0 }
 0x4f1   : > { %9152 = vmatprep.mubr.bf16.mxu0 %v12068_v47  ;;  %v8618_v53 = vadd.f32 %v8617_v7, %v8616_v8  ;;  %v8619_v21 = vpop.f32.mrb[74].mxu1  ;;  %v8732_v24 = vpop.f32.mrb[11].mxu0 }
 0x4f2   : > { %v8620_v54 = vpop.f32.mrb[75].mxu1  ;;  %v8733_v5 = vadd.f32 %v8732_v24, %v8731_v15 }
 0x4f3   : > { %v12556_v2 = vadd.f32 %v8730_v0, %v8618_v53  ;;  %v8621_v44 = vadd.f32 %v8620_v54, %v8619_v21 }
 0x4f5   : > { %v12558_v45 = vadd.f32 %v8733_v5, %v8621_v44 }
 0x4f7   : > { %v8622_v48 = vpop.f32.mrb[76].mxu1 }
 0x4f8   : > { %9153 = vmatmul.mubr.bf16.gmra.mrb[84].mxu0 %v12110_v1  ;;  %v8623_v41 = vpop.f32.mrb[77].mxu1  ;;  %v8734_v47 = vpop.f32.mrb[12].mxu0 }
 0x4f9   : > { %9156 = vmatprep.mubr.bf16.mxu0 %v12132_v20  ;;  %v8624_v63 = vadd.f32 %v8623_v41, %v8622_v48  ;;  %v8625_v51 = vpop.f32.mrb[78].mxu1  ;;  %v8735_v26 = vpop.f32.mrb[13].mxu0 }
 0x4fa   : > { %v8736_v58 = vadd.f32 %v8735_v26, %v8734_v47  ;;  %v8626_v42 = vpop.f32.mrb[79].mxu1  ;;  %v8737_v52 = vpop.f32.mrb[14].mxu0 }
 0x4fb   : > { %v8627_v38 = vadd.f32 %v8626_v42, %v8625_v51  ;;  %v8738_v16 = vpop.f32.mrb[15].mxu0 }
 0x4fc   : > { %v12562_v3 = vadd.f32 %v8736_v58, %v8624_v63  ;;  %v8739_v56 = vadd.f32 %v8738_v16, %v8737_v52 }
 0x4fe   : > { %v12564_v40 = vadd.f32 %v8739_v56, %v8627_v38 }
 0x500   : > { %9157 = vmatmul.mubr.bf16.gmra.mrb[88].mxu0 %v12153_v18  ;;  %v8740_v1 = vpop.f32.mrb[16].mxu0 }
 0x501   : > { %9160 = vmatprep.mubr.bf16.mxu0 %v12209_v61  ;;  %v8741_v20 = vpop.f32.mrb[17].mxu0 }
 0x502   : > { %v8628_v36 = vpop.f32.mrb[80].mxu1  ;;  %v8742_v49 = vadd.f32 %v8741_v20, %v8740_v1  ;;  %v8743_v29 = vpop.f32.mrb[18].mxu0 }
 0x503   : > { %v8629_v11 = vpop.f32.mrb[81].mxu1  ;;  %v8744_v28 = vpop.f32.mrb[19].mxu0 }
 0x504   : > { %v8630_v39 = vadd.f32 %v8629_v11, %v8628_v36  ;;  %v8631_v13 = vpop.f32.mrb[82].mxu1  ;;  %v8745_v12 = vadd.f32 %v8744_v28, %v8743_v29 }
 0x505   : > { %v8632_v62 = vpop.f32.mrb[83].mxu1 }
 0x506   : > { %v12568_v6 = vadd.f32 %v8742_v49, %v8630_v39  ;;  %v8633_v60 = vadd.f32 %v8632_v62, %v8631_v13 }
 0x508   : > { %9161 = vmatmul.mubr.bf16.gmra.mrb[92].mxu0 %v13020_v17  ;;  %v12571_v30 = vadd.f32 %v8745_v12, %v8633_v60 }
 0x509   : > { %9164 = vmatprep.mubr.bf16.mxu0 %v13021_v14  ;;  %v8746_v18 = vpop.f32.mrb[20].mxu0 }
 0x50a   : > { %v8747_v61 = vpop.f32.mrb[21].mxu0  ;;  %v8634_v19 = vpop.f32.mrb[84].mxu1 }
 0x50b   : > { %v8748_v8 = vadd.f32 %v8747_v61, %v8746_v18  ;;  %v8749_v4 = vpop.f32.mrb[22].mxu0  ;;  %v8635_v7 = vpop.f32.mrb[85].mxu1 }
 0x50c   : > { %v8750_v0 = vpop.f32.mrb[23].mxu0  ;;  %v8636_v15 = vadd.f32 %v8635_v7, %v8634_v19  ;;  %v8637_v53 = vpop.f32.mrb[86].mxu1 }
 0x50d   : > { %v8751_v21 = vadd.f32 %v8750_v0, %v8749_v4  ;;  %v8638_v24 = vpop.f32.mrb[87].mxu1 }
 0x50e   : > { %v12574_v54 = vadd.f32 %v8748_v8, %v8636_v15  ;;  %v8639_v5 = vadd.f32 %v8638_v24, %v8637_v53 }
 0x510   : > { %9165 = vmatmul.mubr.bf16.gmra.mrb[96].mxu0 %v13022_v46  ;;  %v12577_v17 = vadd.f32 %v8751_v21, %v8639_v5  ;;  %v13027_v5 = vld [vmem:[#allocation37_spill] sm:$0xff] }
 0x511   : > { %9168 = vmatprep.mubr.bf16.mxu0 %v13024_v22  ;;  %v8752_v14 = vpop.f32.mrb[24].mxu0 }
 0x512   : > { %v8753_v44 = vpop.f32.mrb[25].mxu0 }
 0x513   : > { %v8640_v48 = vpop.f32.mrb[88].mxu1  ;;  %v8754_v41 = vadd.f32 %v8753_v44, %v8752_v14  ;;  %v8755_v47 = vpop.f32.mrb[26].mxu0 }
 0x514   : > { %v8641_v63 = vpop.f32.mrb[89].mxu1  ;;  %v8756_v51 = vpop.f32.mrb[27].mxu0 }
 0x515   : > { %v8642_v26 = vadd.f32 %v8641_v63, %v8640_v48  ;;  %v8643_v58 = vpop.f32.mrb[90].mxu1  ;;  %v8757_v42 = vadd.f32 %v8756_v51, %v8755_v47 }
 0x516   : > { %v8644_v52 = vpop.f32.mrb[91].mxu1 }
 0x517   : > { %v12580_v38 = vadd.f32 %v8754_v41, %v8642_v26  ;;  %v8645_v16 = vadd.f32 %v8644_v52, %v8643_v58 }
 0x518   : > { %9169 = vmatmul.mubr.bf16.gmra.mrb[100].mxu0 %v12362_v37 }
 0x519   : > { %v12583_v46 = vadd.f32 %v8757_v42, %v8645_v16  ;;  %9172 = vmatprep.mubr.bf16.mxu0 %v12398_v59 }
 0x51b   : > { %v8646_v22 = vpop.f32.mrb[92].mxu1  ;;  %v8758_v56 = vpop.f32.mrb[28].mxu0 }
 0x51c   : > { %v8647_v1 = vpop.f32.mrb[93].mxu1  ;;  %v8759_v20 = vpop.f32.mrb[29].mxu0 }
 0x51d   : > { %v8648_v36 = vadd.f32 %v8647_v1, %v8646_v22  ;;  %v8649_v49 = vpop.f32.mrb[94].mxu1  ;;  %v8760_v29 = vadd.f32 %v8759_v20, %v8758_v56  ;;  %v8761_v11 = vpop.f32.mrb[30].mxu0 }
 0x51e   : > { %v8650_v28 = vpop.f32.mrb[95].mxu1  ;;  %v8762_v39 = vpop.f32.mrb[31].mxu0 }
 0x51f   : > { %v12586_v13 = vadd.f32 %v8760_v29, %v8648_v36  ;;  %v8651_v12 = vadd.f32 %v8650_v28, %v8649_v49  ;;  %v8763_v62 = vadd.f32 %v8762_v39, %v8761_v11 }
 0x520   : > { %9173 = vmatmul.mubr.bf16.gmra.mrb[104].mxu0 %v12418_v50 }
 0x521   : > { %v12589_v37 = vadd.f32 %v8763_v62, %v8651_v12  ;;  %9176 = vmatprep.mubr.bf16.mxu0 %v12540_v33 }
 0x523   : > { %v8764_v59 = vpop.f32.mrb[32].mxu0 }
 0x524   : > { %v8652_v60 = vpop.f32.mrb[96].mxu1  ;;  %v8765_v18 = vpop.f32.mrb[33].mxu0 }
 0x525   : > { %v8653_v61 = vpop.f32.mrb[97].mxu1  ;;  %v8766_v19 = vadd.f32 %v8765_v18, %v8764_v59  ;;  %v8767_v8 = vpop.f32.mrb[34].mxu0 }
 0x526   : > { %v8654_v4 = vadd.f32 %v8653_v61, %v8652_v60  ;;  %v8655_v7 = vpop.f32.mrb[98].mxu1  ;;  %v8768_v0 = vpop.f32.mrb[35].mxu0 }
 0x527   : > { %v8656_v15 = vpop.f32.mrb[99].mxu1  ;;  %v8769_v53 = vadd.f32 %v8768_v0, %v8767_v8 }
 0x528   : > { %v12592_v21 = vadd.f32 %v8766_v19, %v8654_v4  ;;  %v8657_v24 = vadd.f32 %v8656_v15, %v8655_v7  ;;  %9177 = vmatmul.mubr.bf16.gmra.mrb[108].mxu0 %v13027_v5 }
 0x52a   : > { %v12595_v50 = vadd.f32 %v8769_v53, %v8657_v24 }
 0x52b   : > { %v8770_v14 = vpop.f32.mrb[36].mxu0 }
 0x52c   : > { %v8658_v33 = vpop.f32.mrb[100].mxu1  ;;  %v8771_v44 = vpop.f32.mrb[37].mxu0 }
 0x52d   : > { %v8659_v48 = vpop.f32.mrb[101].mxu1  ;;  %v8772_v41 = vadd.f32 %v8771_v44, %v8770_v14  ;;  %v8773_v47 = vpop.f32.mrb[38].mxu0 }
 0x52e   : > { %v8660_v63 = vadd.f32 %v8659_v48, %v8658_v33  ;;  %v8661_v51 = vpop.f32.mrb[102].mxu1  ;;  %v8774_v26 = vpop.f32.mrb[39].mxu0 }
 0x52f   : > { %v8662_v58 = vpop.f32.mrb[103].mxu1  ;;  %v8775_v42 = vadd.f32 %v8774_v26, %v8773_v47 }
 0x530   : > { %v12597_v52 = vadd.f32 %v8772_v41, %v8660_v63  ;;  %v8663_v16 = vadd.f32 %v8662_v58, %v8661_v51 }
 0x532   : > { %v12599_v22 = vadd.f32 %v8775_v42, %v8663_v16 }
 0x533   : > { %v8776_v56 = vpop.f32.mrb[40].mxu0 }
 0x534   : > { %v8664_v1 = vpop.f32.mrb[104].mxu1  ;;  %v8777_v20 = vpop.f32.mrb[41].mxu0 }
 0x535   : > { %v8665_v36 = vpop.f32.mrb[105].mxu1  ;;  %v8778_v49 = vadd.f32 %v8777_v20, %v8776_v56  ;;  %v8779_v29 = vpop.f32.mrb[42].mxu0 }
 0x536   : > { %v8666_v11 = vadd.f32 %v8665_v36, %v8664_v1  ;;  %v8667_v28 = vpop.f32.mrb[106].mxu1  ;;  %v8780_v39 = vpop.f32.mrb[43].mxu0 }
 0x537   : > { %v8668_v12 = vpop.f32.mrb[107].mxu1  ;;  %v8781_v62 = vadd.f32 %v8780_v39, %v8779_v29 }
 0x538   : > { %v12601_v59 = vadd.f32 %v8778_v49, %v8666_v11  ;;  %v8669_v60 = vadd.f32 %v8668_v12, %v8667_v28 }
 0x53a   : > { %v12603_v18 = vadd.f32 %v8781_v62, %v8669_v60 }
 0x53b   : > { %v8782_v61 = vpop.f32.mrb[44].mxu0 }
 0x53c   : > { %v8670_v19 = vpop.f32.mrb[108].mxu1  ;;  %v8783_v8 = vpop.f32.mrb[45].mxu0 }
 0x53d   : > { %v8671_v4 = vpop.f32.mrb[109].mxu1  ;;  %v8784_v7 = vadd.f32 %v8783_v8, %v8782_v61  ;;  %v8785_v0 = vpop.f32.mrb[46].mxu0 }
 0x53e   : > { %v8672_v15 = vadd.f32 %v8671_v4, %v8670_v19  ;;  %v8673_v53 = vpop.f32.mrb[110].mxu1  ;;  %v8786_v24 = vpop.f32.mrb[47].mxu0 }
 0x53f   : > { %v8674_v5 = vpop.f32.mrb[111].mxu1  ;;  %v8787_v14 = vadd.f32 %v8786_v24, %v8785_v0 }
 0x540   : > { %v12605_v33 = vadd.f32 %v8784_v7, %v8672_v15  ;;  %v8675_v44 = vadd.f32 %v8674_v5, %v8673_v53 }
 0x542   : > { %v12607_v48 = vadd.f32 %v8787_v14, %v8675_v44 }
 0x543   : > { %v8916_v41 = vpop.f32.mrb[48].mxu0 }
 0x544   : > { %v8804_v47 = vpop.f32.mrb[112].mxu1  ;;  %v8917_v63 = vpop.f32.mrb[49].mxu0 }
 0x545   : > { %v8805_v51 = vpop.f32.mrb[113].mxu1  ;;  %v8918_v26 = vadd.f32 %v8917_v63, %v8916_v41  ;;  %v8919_v58 = vpop.f32.mrb[50].mxu0 }
 0x546   : > { %v8806_v42 = vadd.f32 %v8805_v51, %v8804_v47  ;;  %v8807_v16 = vpop.f32.mrb[114].mxu1  ;;  %v8920_v56 = vpop.f32.mrb[51].mxu0 }
 0x547   : > { %v8808_v1 = vpop.f32.mrb[115].mxu1  ;;  %v8921_v20 = vadd.f32 %v8920_v56, %v8919_v58 }
 0x548   : > { %v6250_v36 = vadd.f32 %v8806_v42, %v12488_v23  ;;  %v8809_v49 = vadd.f32 %v8808_v1, %v8807_v16 }
 0x54a   : > { %v12610_v29 = vadd.f32 %v8918_v26, %v6250_v36  ;;  %v6253_v11 = vadd.f32 %v8809_v49, %v12494_v27 }
 0x54b   : > { %v8922_v28 = vpop.f32.mrb[52].mxu0 }
 0x54c   : > { %v12613_v39 = vadd.f32 %v8921_v20, %v6253_v11  ;;  %v8810_v12 = vpop.f32.mrb[116].mxu1  ;;  %v8923_v62 = vpop.f32.mrb[53].mxu0 }
 0x54d   : > { %v8811_v60 = vpop.f32.mrb[117].mxu1  ;;  %v8924_v61 = vadd.f32 %v8923_v62, %v8922_v28  ;;  %v8925_v19 = vpop.f32.mrb[54].mxu0 }
 0x54e   : > { %v8812_v8 = vadd.f32 %v8811_v60, %v8810_v12  ;;  %v8813_v4 = vpop.f32.mrb[118].mxu1  ;;  %v8926_v7 = vpop.f32.mrb[55].mxu0 }
 0x54f   : > { %v8814_v0 = vpop.f32.mrb[119].mxu1  ;;  %v8927_v15 = vadd.f32 %v8926_v7, %v8925_v19 }
 0x550   : > { %v6258_v23 = vadd.f32 %v8812_v8, %v12500_v25  ;;  %v8815_v53 = vadd.f32 %v8814_v0, %v8813_v4 }
 0x552   : > { %v12616_v24 = vadd.f32 %v8924_v61, %v6258_v23  ;;  %v6261_v27 = vadd.f32 %v8815_v53, %v12507_v32 }
 0x553   : > { %v8928_v5 = vpop.f32.mrb[56].mxu0 }
 0x554   : > { %v12619_v14 = vadd.f32 %v8927_v15, %v6261_v27  ;;  %v8816_v44 = vpop.f32.mrb[120].mxu1  ;;  %v8929_v41 = vpop.f32.mrb[57].mxu0 }
 0x555   : > { %v8817_v47 = vpop.f32.mrb[121].mxu1  ;;  %v8930_v63 = vadd.f32 %v8929_v41, %v8928_v5  ;;  %v8931_v51 = vpop.f32.mrb[58].mxu0 }
 0x556   : > { %v8818_v26 = vadd.f32 %v8817_v47, %v8816_v44  ;;  %v8819_v58 = vpop.f32.mrb[122].mxu1  ;;  %v8932_v42 = vpop.f32.mrb[59].mxu0 }
 0x557   : > { %v8820_v16 = vpop.f32.mrb[123].mxu1  ;;  %v8933_v56 = vadd.f32 %v8932_v42, %v8931_v51 }
 0x558   : > { %v6266_v25 = vadd.f32 %v8818_v26, %v12516_v55  ;;  %v8821_v1 = vadd.f32 %v8820_v16, %v8819_v58 }
 0x55a   : > { %v12622_v20 = vadd.f32 %v8930_v63, %v6266_v25  ;;  %v6269_v32 = vadd.f32 %v8821_v1, %v12521_v34 }
 0x55b   : > { %v8934_v36 = vpop.f32.mrb[60].mxu0 }
 0x55c   : > { %v12625_v49 = vadd.f32 %v8933_v56, %v6269_v32  ;;  %v8822_v11 = vpop.f32.mrb[124].mxu1  ;;  %v8935_v28 = vpop.f32.mrb[61].mxu0 }
 0x55d   : > { %v8823_v12 = vpop.f32.mrb[125].mxu1  ;;  %v8936_v62 = vadd.f32 %v8935_v28, %v8934_v36  ;;  %v8937_v60 = vpop.f32.mrb[62].mxu0 }
 0x55e   : > { %v8824_v61 = vadd.f32 %v8823_v12, %v8822_v11  ;;  %v8825_v19 = vpop.f32.mrb[126].mxu1  ;;  %v8938_v8 = vpop.f32.mrb[63].mxu0 }
 0x55f   : > { %v8826_v4 = vpop.f32.mrb[127].mxu1  ;;  %v8939_v7 = vadd.f32 %v8938_v8, %v8937_v60 }
 0x560   : > { %v6274_v55 = vadd.f32 %v8824_v61, %v12529_v10  ;;  %v8827_v0 = vadd.f32 %v8826_v4, %v8825_v19 }
 0x562   : > { %v12628_v15 = vadd.f32 %v8936_v62, %v6274_v55  ;;  %v6277_v34 = vadd.f32 %v8827_v0, %v12532_v9 }
 0x563   : > { %v8940_v23 = vpop.f32.mrb[64].mxu0 }
 0x564   : > { %v12631_v53 = vadd.f32 %v8939_v7, %v6277_v34  ;;  %v8828_v27 = vpop.f32.mrb[128].mxu1  ;;  %v8941_v5 = vpop.f32.mrb[65].mxu0 }
 0x565   : > { %v8829_v44 = vpop.f32.mrb[129].mxu1  ;;  %v8942_v41 = vadd.f32 %v8941_v5, %v8940_v23  ;;  %v8943_v47 = vpop.f32.mrb[66].mxu0 }
 0x566   : > { %v8830_v63 = vadd.f32 %v8829_v44, %v8828_v27  ;;  %v8831_v51 = vpop.f32.mrb[130].mxu1  ;;  %v8944_v26 = vpop.f32.mrb[67].mxu0 }
 0x567   : > { %v8832_v58 = vpop.f32.mrb[131].mxu1  ;;  %v8945_v42 = vadd.f32 %v8944_v26, %v8943_v47 }
 0x568   : > { %v6282_v10 = vadd.f32 %v8830_v63, %v12544_v57  ;;  %v8833_v16 = vadd.f32 %v8832_v58, %v8831_v51 }
 0x56a   : > { %v12634_v56 = vadd.f32 %v8942_v41, %v6282_v10  ;;  %v6285_v9 = vadd.f32 %v8833_v16, %v12546_v43 }
 0x56b   : > { %v8946_v25 = vpop.f32.mrb[68].mxu0 }
 0x56c   : > { %v12637_v1 = vadd.f32 %v8945_v42, %v6285_v9  ;;  %v8834_v32 = vpop.f32.mrb[132].mxu1  ;;  %v8947_v36 = vpop.f32.mrb[69].mxu0 }
 0x56d   : > { %v8835_v11 = vpop.f32.mrb[133].mxu1  ;;  %v8948_v28 = vadd.f32 %v8947_v36, %v8946_v25  ;;  %v8949_v12 = vpop.f32.mrb[70].mxu0 }
 0x56e   : > { %v8836_v62 = vadd.f32 %v8835_v11, %v8834_v32  ;;  %v8837_v60 = vpop.f32.mrb[134].mxu1  ;;  %v8950_v61 = vpop.f32.mrb[71].mxu0 }
 0x56f   : > { %v8838_v19 = vpop.f32.mrb[135].mxu1  ;;  %v8951_v8 = vadd.f32 %v8950_v61, %v8949_v12 }
 0x570   : > { %v6290_v57 = vadd.f32 %v8836_v62, %v12550_v35  ;;  %v8839_v4 = vadd.f32 %v8838_v19, %v8837_v60 }
 0x572   : > { %v12640_v7 = vadd.f32 %v8948_v28, %v6290_v57  ;;  %v6293_v43 = vadd.f32 %v8839_v4, %v12552_v31 }
 0x573   : > { %v8952_v55 = vpop.f32.mrb[72].mxu0 }
 0x574   : > { %v12643_v0 = vadd.f32 %v8951_v8, %v6293_v43  ;;  %v8840_v34 = vpop.f32.mrb[136].mxu1  ;;  %v8953_v23 = vpop.f32.mrb[73].mxu0 }
 0x575   : > { %v8841_v27 = vpop.f32.mrb[137].mxu1  ;;  %v8954_v5 = vadd.f32 %v8953_v23, %v8952_v55  ;;  %v8955_v44 = vpop.f32.mrb[74].mxu0 }
 0x576   : > { %v8842_v41 = vadd.f32 %v8841_v27, %v8840_v34  ;;  %v8843_v47 = vpop.f32.mrb[138].mxu1  ;;  %v8956_v63 = vpop.f32.mrb[75].mxu0 }
 0x577   : > { %v8844_v51 = vpop.f32.mrb[139].mxu1  ;;  %v8957_v26 = vadd.f32 %v8956_v63, %v8955_v44 }
 0x578   : > { %v6298_v35 = vadd.f32 %v8842_v41, %v12556_v2  ;;  %v8845_v58 = vadd.f32 %v8844_v51, %v8843_v47 }
 0x57a   : > { %v12646_v42 = vadd.f32 %v8954_v5, %v6298_v35  ;;  %v6301_v31 = vadd.f32 %v8845_v58, %v12558_v45 }
 0x57b   : > { %v8958_v10 = vpop.f32.mrb[76].mxu0 }
 0x57c   : > { %v12649_v16 = vadd.f32 %v8957_v26, %v6301_v31  ;;  %v8846_v9 = vpop.f32.mrb[140].mxu1  ;;  %v8959_v25 = vpop.f32.mrb[77].mxu0 }
 0x57d   : > { %v8847_v32 = vpop.f32.mrb[141].mxu1  ;;  %v8960_v36 = vadd.f32 %v8959_v25, %v8958_v10  ;;  %v8961_v11 = vpop.f32.mrb[78].mxu0 }
 0x57e   : > { %v8848_v28 = vadd.f32 %v8847_v32, %v8846_v9  ;;  %v8849_v12 = vpop.f32.mrb[142].mxu1  ;;  %v8962_v62 = vpop.f32.mrb[79].mxu0 }
 0x57f   : > { %v8850_v60 = vpop.f32.mrb[143].mxu1  ;;  %v8963_v61 = vadd.f32 %v8962_v62, %v8961_v11 }
 0x580   : > { %v6306_v2 = vadd.f32 %v8848_v28, %v12562_v3  ;;  %v8851_v19 = vadd.f32 %v8850_v60, %v8849_v12 }
 0x582   : > { %v12652_v8 = vadd.f32 %v8960_v36, %v6306_v2  ;;  %v6309_v45 = vadd.f32 %v8851_v19, %v12564_v40 }
 0x583   : > { %v8964_v57 = vpop.f32.mrb[112].mxu0 }
 0x584   : > { %v12655_v4 = vadd.f32 %v8963_v61, %v6309_v45  ;;  %v8852_v43 = vpop.f32.mrb[144].mxu1  ;;  %v8965_v55 = vpop.f32.mrb[113].mxu0 }
 0x585   : > { %v8853_v34 = vpop.f32.mrb[145].mxu1  ;;  %v8966_v23 = vadd.f32 %v8965_v55, %v8964_v57  ;;  %v8967_v27 = vpop.f32.mrb[114].mxu0 }
 0x586   : > { %v8854_v5 = vadd.f32 %v8853_v34, %v8852_v43  ;;  %v8855_v44 = vpop.f32.mrb[146].mxu1  ;;  %v8968_v41 = vpop.f32.mrb[115].mxu0 }
 0x587   : > { %v8856_v47 = vpop.f32.mrb[147].mxu1  ;;  %v8969_v63 = vadd.f32 %v8968_v41, %v8967_v27 }
 0x588   : > { %v6314_v3 = vadd.f32 %v8854_v5, %v12568_v6  ;;  %v8857_v51 = vadd.f32 %v8856_v47, %v8855_v44 }
 0x58a   : > { %v12658_v26 = vadd.f32 %v8966_v23, %v6314_v3  ;;  %v6317_v40 = vadd.f32 %v8857_v51, %v12571_v30 }
 0x58b   : > { %v8970_v35 = vpop.f32.mrb[116].mxu0 }
 0x58c   : > { %v12661_v58 = vadd.f32 %v8969_v63, %v6317_v40  ;;  %v8858_v31 = vpop.f32.mrb[148].mxu1  ;;  %v8971_v10 = vpop.f32.mrb[117].mxu0 }
 0x58d   : > { %v8859_v9 = vpop.f32.mrb[149].mxu1  ;;  %v8972_v25 = vadd.f32 %v8971_v10, %v8970_v35  ;;  %v8973_v32 = vpop.f32.mrb[118].mxu0 }
 0x58e   : > { %v8860_v36 = vadd.f32 %v8859_v9, %v8858_v31  ;;  %v8861_v11 = vpop.f32.mrb[150].mxu1  ;;  %v8974_v28 = vpop.f32.mrb[119].mxu0 }
 0x58f   : > { %v8862_v12 = vpop.f32.mrb[151].mxu1  ;;  %v8975_v62 = vadd.f32 %v8974_v28, %v8973_v32 }
 0x590   : > { %v6322_v6 = vadd.f32 %v8860_v36, %v12574_v54  ;;  %v8863_v60 = vadd.f32 %v8862_v12, %v8861_v11 }
 0x592   : > { %v12664_v61 = vadd.f32 %v8972_v25, %v6322_v6  ;;  %v6325_v30 = vadd.f32 %v8863_v60, %v12577_v17 }
 0x593   : > { %v8976_v2 = vpop.f32.mrb[120].mxu0 }
 0x594   : > { %v12667_v19 = vadd.f32 %v8975_v62, %v6325_v30  ;;  %v8864_v45 = vpop.f32.mrb[152].mxu1  ;;  %v8977_v57 = vpop.f32.mrb[121].mxu0 }
 0x595   : > { %v8865_v43 = vpop.f32.mrb[153].mxu1  ;;  %v8978_v55 = vadd.f32 %v8977_v57, %v8976_v2  ;;  %v8979_v34 = vpop.f32.mrb[122].mxu0 }
 0x596   : > { %v8866_v23 = vadd.f32 %v8865_v43, %v8864_v45  ;;  %v8867_v27 = vpop.f32.mrb[154].mxu1  ;;  %v8980_v5 = vpop.f32.mrb[123].mxu0 }
 0x597   : > { %v8868_v44 = vpop.f32.mrb[155].mxu1  ;;  %v8981_v41 = vadd.f32 %v8980_v5, %v8979_v34 }
 0x598   : > { %v6330_v54 = vadd.f32 %v8866_v23, %v12580_v38  ;;  %v8869_v47 = vadd.f32 %v8868_v44, %v8867_v27 }
 0x59a   : > { %v12670_v63 = vadd.f32 %v8978_v55, %v6330_v54  ;;  %v6333_v17 = vadd.f32 %v8869_v47, %v12583_v46 }
 0x59b   : > { %v8982_v3 = vpop.f32.mrb[124].mxu0 }
 0x59c   : > { %v12673_v51 = vadd.f32 %v8981_v41, %v6333_v17  ;;  %v8870_v40 = vpop.f32.mrb[156].mxu1  ;;  %v8983_v35 = vpop.f32.mrb[125].mxu0 }
 0x59d   : > { %v8871_v31 = vpop.f32.mrb[157].mxu1  ;;  %v8984_v10 = vadd.f32 %v8983_v35, %v8982_v3  ;;  %v8985_v9 = vpop.f32.mrb[126].mxu0 }
 0x59e   : > { %v8872_v25 = vadd.f32 %v8871_v31, %v8870_v40  ;;  %v8873_v32 = vpop.f32.mrb[158].mxu1  ;;  %v8986_v36 = vpop.f32.mrb[127].mxu0 }
 0x59f   : > { %v8874_v11 = vpop.f32.mrb[159].mxu1  ;;  %v8987_v28 = vadd.f32 %v8986_v36, %v8985_v9 }
 0x5a0   : > { %v6338_v38 = vadd.f32 %v8872_v25, %v12586_v13  ;;  %v8875_v12 = vadd.f32 %v8874_v11, %v8873_v32 }
 0x5a2   : > { %v12676_v62 = vadd.f32 %v8984_v10, %v6338_v38  ;;  %v6341_v46 = vadd.f32 %v8875_v12, %v12589_v37 }
 0x5a3   : > { %v8988_v6 = vpop.f32.mrb[128].mxu0 }
 0x5a4   : > { %v12679_v60 = vadd.f32 %v8987_v28, %v6341_v46  ;;  %v8876_v30 = vpop.f32.mrb[160].mxu1  ;;  %v8989_v2 = vpop.f32.mrb[129].mxu0 }
 0x5a5   : > { %v8877_v45 = vpop.f32.mrb[161].mxu1  ;;  %v8990_v57 = vadd.f32 %v8989_v2, %v8988_v6  ;;  %v8991_v43 = vpop.f32.mrb[130].mxu0 }
 0x5a6   : > { %v8878_v55 = vadd.f32 %v8877_v45, %v8876_v30  ;;  %v8879_v34 = vpop.f32.mrb[162].mxu1  ;;  %v8992_v23 = vpop.f32.mrb[131].mxu0 }
 0x5a7   : > { %v8880_v27 = vpop.f32.mrb[163].mxu1  ;;  %v8993_v5 = vadd.f32 %v8992_v23, %v8991_v43 }
 0x5a8   : > { %v6346_v13 = vadd.f32 %v8878_v55, %v12592_v21  ;;  %v8881_v44 = vadd.f32 %v8880_v27, %v8879_v34 }
 0x5aa   : > { %v12682_v41 = vadd.f32 %v8990_v57, %v6346_v13  ;;  %v6349_v37 = vadd.f32 %v8881_v44, %v12595_v50 }
 0x5ab   : > { %v8994_v54 = vpop.f32.mrb[132].mxu0 }
 0x5ac   : > { %v12685_v47 = vadd.f32 %v8993_v5, %v6349_v37  ;;  %v8882_v17 = vpop.f32.mrb[164].mxu1  ;;  %v8995_v3 = vpop.f32.mrb[133].mxu0 }
 0x5ad   : > { %v8883_v40 = vpop.f32.mrb[165].mxu1  ;;  %v8996_v35 = vadd.f32 %v8995_v3, %v8994_v54  ;;  %v8997_v31 = vpop.f32.mrb[134].mxu0 }
 0x5ae   : > { %v8884_v10 = vadd.f32 %v8883_v40, %v8882_v17  ;;  %v8885_v9 = vpop.f32.mrb[166].mxu1  ;;  %v8998_v25 = vpop.f32.mrb[135].mxu0 }
 0x5af   : > { %v8886_v32 = vpop.f32.mrb[167].mxu1  ;;  %v8999_v36 = vadd.f32 %v8998_v25, %v8997_v31 }
 0x5b0   : > { %v6354_v21 = vadd.f32 %v8884_v10, %v12597_v52  ;;  %v8887_v11 = vadd.f32 %v8886_v32, %v8885_v9 }
 0x5b2   : > { %v12688_v28 = vadd.f32 %v8996_v35, %v6354_v21  ;;  %v6357_v50 = vadd.f32 %v8887_v11, %v12599_v22  ;;  %v9211_v21 = vld [vmem:[#allocation2 + $0x19] sm:$0xff] }
 0x5b3   : > { %v9000_v38 = vpop.f32.mrb[136].mxu0 }
 0x5b4   : > { %v12691_v12 = vadd.f32 %v8999_v36, %v6357_v50  ;;  %v8888_v46 = vpop.f32.mrb[168].mxu1  ;;  %v9001_v6 = vpop.f32.mrb[137].mxu0  ;;  %v9201_v36 = vld [vmem:[#allocation2 + $0x31] sm:$0xff] }
 0x5b5   : > { %v8889_v30 = vpop.f32.mrb[169].mxu1  ;;  %v9002_v2 = vadd.f32 %v9001_v6, %v9000_v38  ;;  %v9003_v45 = vpop.f32.mrb[138].mxu0  ;;  %v9212_v38 = vadd.f32 %v9211_v21, %v12610_v29 }
 0x5b6   : > { %v8890_v57 = vadd.f32 %v8889_v30, %v8888_v46  ;;  %v8891_v43 = vpop.f32.mrb[170].mxu1  ;;  %v9004_v55 = vpop.f32.mrb[139].mxu0  ;;  %v9221_v46 = vld [vmem:[#allocation2 + $0x39] sm:$0xff]  ;;  %v9231_v30 = vld [vmem:[#allocation2 + $0x21] sm:$0xff] }
 0x5b7   : > { %v8892_v34 = vpop.f32.mrb[171].mxu1  ;;  %v9005_v23 = vadd.f32 %v9004_v55, %v9003_v45 }
 0x5b8   : > { %v6362_v52 = vadd.f32 %v8890_v57, %v12601_v59  ;;  %v8893_v27 = vadd.f32 %v8892_v34, %v8891_v43  ;;  %v9232_v43 = vadd.f32 %v9231_v30, %v12613_v39  ;;  %v9251_v39 = vld [vmem:[#allocation2 + $0x49] sm:$0xff]  ;;  %v9321_v30 = vld [vmem:[#allocation2 + $0xc1] sm:$0xff] }
 0x5ba   : > { %v12694_v5 = vadd.f32 %v9002_v2, %v6362_v52  ;;  %v6365_v22 = vadd.f32 %v8893_v27, %v12603_v18  ;;  %v9202_v18 = vadd.f32 %v9201_v36, %v12616_v24  ;;  %v9222_v2 = vadd.f32 %v9221_v46, %v12619_v14  ;;  %v9241_v14 = vld [vmem:[#allocation2 + $0x61] sm:$0xff]  ;;  %v9261_v27 = vld [vmem:[#allocation2 + $0x69] sm:$0xff] }
 0x5bb   : > { %v9006_v13 = vpop.f32.mrb[140].mxu0  ;;  %v9252_v52 = vadd.f32 %v9251_v39, %v12622_v20 }
 0x5bc   : > { %v12697_v44 = vadd.f32 %v9005_v23, %v6365_v22  ;;  %v8894_v37 = vpop.f32.mrb[172].mxu1  ;;  %v9007_v54 = vpop.f32.mrb[141].mxu0  ;;  %v9242_v23 = vadd.f32 %v9241_v14, %v12628_v15 }
 0x5bd   : > { %v8895_v17 = vpop.f32.mrb[173].mxu1  ;;  %v9008_v3 = vadd.f32 %v9007_v54, %v9006_v13  ;;  %v9009_v40 = vpop.f32.mrb[142].mxu0  ;;  %v9271_v13 = vld [vmem:[#allocation2 + $0x51] sm:$0xff] }
 0x5be   : > { %v8896_v35 = vadd.f32 %v8895_v17, %v8894_v37  ;;  %v8897_v31 = vpop.f32.mrb[174].mxu1  ;;  %v9010_v10 = vpop.f32.mrb[143].mxu0  ;;  %v9262_v37 = vadd.f32 %v9261_v27, %v12631_v53  ;;  %v9291_v53 = vld [vmem:[#allocation2 + $0x79] sm:$0xff] }
 0x5bf   : > { %v8898_v9 = vpop.f32.mrb[175].mxu1  ;;  %v9011_v25 = vadd.f32 %v9010_v10, %v9009_v40  ;;  %v9281_v10 = vld [vmem:[#allocation2 + $0x91] sm:$0xff]  ;;  %v9381_v27 = vld [vmem:[#allocation2 + $0xf9] sm:$0xff] }
 0x5c0   : > { %v6370_v59 = vadd.f32 %v8896_v35, %v12605_v33  ;;  %v8899_v32 = vadd.f32 %v8898_v9, %v8897_v31  ;;  %v9282_v9 = vadd.f32 %v9281_v10, %v12640_v7  ;;  %v9421_v10 = vld [vmem:[#allocation2 + $0x129] sm:$0xff] }
 0x5c2   : > { %v12701_v11 = vadd.f32 %v9008_v3, %v6370_v59  ;;  %v6373_v50 = vadd.f32 %v8899_v32, %v12607_v48  ;;  %v9272_v3 = vadd.f32 %v9271_v13, %v12625_v49  ;;  %v9292_v49 = vadd.f32 %v9291_v53, %v12634_v56  ;;  %v9311_v32 = vld [vmem:[#allocation2 + $0x81] sm:$0xff] }
 0x5c3   : > { %v9150_v6 = vpop.f32.mrb[80].mxu0  ;;  %v9391_v13 = vld [vmem:[#allocation2 + $0xe1] sm:$0xff] }
 0x5c4   : > { %v12706_v45 = vadd.f32 %v9011_v25, %v6373_v50  ;;  %v9205_v33 = vadd.f32 %v9202_v18, %v9150_v6  ;;  %v6571_v57 = vpop.f32.mrb[81].mxu0  ;;  %v9301_v25 = vld [vmem:[#allocation2 + $0x99] sm:$0xff]  ;;  %v9312_v50 = vadd.f32 %v9311_v32, %v12637_v1 }
 0x5c5   : > { %v9215_v55 = vadd.f32 %v9212_v38, %v6571_v57  ;;  %v9151_v34 = vpop.f32.mrb[82].mxu0  ;;  %v9302_v36 = vadd.f32 %v9301_v25, %v12643_v0  ;;  %v9331_v0 = vld [vmem:[#allocation2 + $0xa9] sm:$0xff] }
 0x5c6   : > { %6764 = vst [vmem:[#allocation2 + $0x31] sm:$0xff] %v9205_v33  ;;  %6828 = vst [vmem:[%s12711_s23 + $0x10] sm:$0xff] %v9205_v33  ;;  %v9225_v48 = vadd.f32 %v9222_v2, %v9151_v34  ;;  %v6574_v29 = vpop.f32.mrb[83].mxu0  ;;  %v9322_v2 = vadd.f32 %v9321_v30, %v12652_v8  ;;  %v9332_v1 = vadd.f32 %v9331_v0, %v12646_v42  ;;  %v9341_v33 = vld [vmem:[#allocation2 + $0xc9] sm:$0xff] }
 0x5c7   : > { %6762 = vst [vmem:[#allocation2 + $0x19] sm:$0xff] %v9215_v55  ;;  %6826 = vst [vmem:[%s12711_s23] sm:$0xff] %v9215_v55  ;;  %v9235_v24 = vadd.f32 %v9232_v43, %v6574_v29  ;;  %v9351_v43 = vld [vmem:[#allocation2 + $0xb1] sm:$0xff]  ;;  %v9342_v55 = vadd.f32 %v9341_v33, %v12655_v4  ;;  %v9371_v4 = vld [vmem:[#allocation2 + $0xd9] sm:$0xff] }
 0x5c8   : > { %6765 = vst [vmem:[#allocation2 + $0x39] sm:$0xff] %v9225_v48  ;;  %6829 = vst [vmem:[%s12711_s23 + $0x18] sm:$0xff] %v9225_v48  ;;  %v9352_v29 = vadd.f32 %v9351_v43, %v12649_v16  ;;  %v9372_v16 = vadd.f32 %v9371_v4, %v12658_v26  ;;  %v9481_v43 = vld [vmem:[#allocation2 + $0x181] sm:$0xff] }
 0x5c9   : > { %6763 = vst [vmem:[#allocation2 + $0x21] sm:$0xff] %v9235_v24  ;;  %6827 = vst [vmem:[%s12711_s23 + $0x8] sm:$0xff] %v9235_v24 }
 0x5cb   : > { %v9154_v22 = vpop.f32.mrb[84].mxu0 }
 0x5cc   : > { %v9245_v54 = vadd.f32 %v9242_v23, %v9154_v22  ;;  %v6587_v17 = vpop.f32.mrb[85].mxu0  ;;  %v9361_v23 = vld [vmem:[#allocation2 + $0xf1] sm:$0xff] }
 0x5cd   : > { %v9255_v40 = vadd.f32 %v9252_v52, %v6587_v17  ;;  %v9155_v35 = vpop.f32.mrb[86].mxu0  ;;  %v9362_v52 = vadd.f32 %v9361_v23, %v12664_v61 }
 0x5ce   : > { %6768 = vst [vmem:[#allocation2 + $0x61] sm:$0xff] %v9245_v54  ;;  %6832 = vst [vmem:[%s12711_s23 + $0x30] sm:$0xff] %v9245_v54  ;;  %v9265_v31 = vadd.f32 %v9262_v37, %v9155_v35  ;;  %v6590_v15 = vpop.f32.mrb[87].mxu0  ;;  %v9382_v37 = vadd.f32 %v9381_v27, %v12667_v19  ;;  %v9411_v19 = vld [vmem:[#allocation2 + $0x109] sm:$0xff] }
 0x5cf   : > { %6766 = vst [vmem:[#allocation2 + $0x49] sm:$0xff] %v9255_v40  ;;  %6830 = vst [vmem:[%s12711_s23 + $0x20] sm:$0xff] %v9255_v40  ;;  %v9275_v20 = vadd.f32 %v9272_v3, %v6590_v15  ;;  %v9392_v3 = vadd.f32 %v9391_v13, %v12661_v58  ;;  %v9401_v15 = vld [vmem:[#allocation2 + $0x121] sm:$0xff]  ;;  %v9412_v58 = vadd.f32 %v9411_v19, %v12670_v63 }
 0x5d0   : > { %6769 = vst [vmem:[#allocation2 + $0x69] sm:$0xff] %v9265_v31  ;;  %6833 = vst [vmem:[%s12711_s23 + $0x38] sm:$0xff] %v9265_v31 }
 0x5d1   : > { %6767 = vst [vmem:[#allocation2 + $0x51] sm:$0xff] %v9275_v20  ;;  %6831 = vst [vmem:[%s12711_s23 + $0x28] sm:$0xff] %v9275_v20  ;;  %v9402_v20 = vadd.f32 %v9401_v15, %v12676_v62 }
 0x5d3   : > { %v9158_v59 = vpop.f32.mrb[88].mxu0 }
 0x5d4   : > { %v9285_v21 = vadd.f32 %v9282_v9, %v9158_v59  ;;  %v6603_v18 = vpop.f32.mrb[89].mxu0  ;;  %v9431_v9 = vld [vmem:[#allocation2 + $0x111] sm:$0xff] }
 0x5d5   : > { %v9295_v38 = vadd.f32 %v9292_v49, %v6603_v18  ;;  %v9159_v46 = vpop.f32.mrb[90].mxu0  ;;  %v9422_v49 = vadd.f32 %v9421_v10, %v12679_v60  ;;  %v9432_v32 = vadd.f32 %v9431_v9, %v12673_v51  ;;  %v9451_v60 = vld [vmem:[#allocation2 + $0x139] sm:$0xff] }
 0x5d6   : > { %6772 = vst [vmem:[#allocation2 + $0x91] sm:$0xff] %v9285_v21  ;;  %6836 = vst [vmem:[%s12711_s23 + $0x50] sm:$0xff] %v9285_v21  ;;  %v9305_v6 = vadd.f32 %v9302_v36, %v9159_v46  ;;  %v6606_v7 = vpop.f32.mrb[91].mxu0  ;;  %v9452_v51 = vadd.f32 %v9451_v60, %v12682_v41  ;;  %v9461_v46 = vld [vmem:[#allocation2 + $0x159] sm:$0xff] }
 0x5d7   : > { %6770 = vst [vmem:[#allocation2 + $0x79] sm:$0xff] %v9295_v38  ;;  %6834 = vst [vmem:[%s12711_s23 + $0x40] sm:$0xff] %v9295_v38  ;;  %v9315_v56 = vadd.f32 %v9312_v50, %v6606_v7  ;;  %v9441_v50 = vld [vmem:[#allocation2 + $0x151] sm:$0xff]  ;;  %v9471_v7 = vld [vmem:[#allocation2 + $0x141] sm:$0xff] }
 0x5d8   : > { %6773 = vst [vmem:[#allocation2 + $0x99] sm:$0xff] %v9305_v6  ;;  %6837 = vst [vmem:[%s12711_s23 + $0x58] sm:$0xff] %v9305_v6  ;;  %v9442_v38 = vadd.f32 %v9441_v50, %v12688_v28 }
 0x5d9   : > { %6771 = vst [vmem:[#allocation2 + $0x81] sm:$0xff] %v9315_v56  ;;  %6835 = vst [vmem:[%s12711_s23 + $0x48] sm:$0xff] %v9315_v56  ;;  %v9462_v56 = vadd.f32 %v9461_v46, %v12691_v12  ;;  %v9491_v12 = vld [vmem:[#allocation2 + $0x169] sm:$0xff] }
 0x5db   : > { %v9162_v57 = vpop.f32.mrb[92].mxu0 }
 0x5dc   : > { %v9325_v34 = vadd.f32 %v9322_v2, %v9162_v57  ;;  %v6619_v48 = vpop.f32.mrb[93].mxu0  ;;  %v9472_v2 = vadd.f32 %v9471_v7, %v12685_v47  ;;  %v9482_v47 = vadd.f32 %v9481_v43, %v12701_v11 }
 0x5dd   : > { %v9335_v24 = vadd.f32 %v9332_v1, %v6619_v48  ;;  %v9163_v14 = vpop.f32.mrb[94].mxu0 }
 0x5de   : > { %6776 = vst [vmem:[#allocation2 + $0xc1] sm:$0xff] %v9325_v34  ;;  %6840 = vst [vmem:[%s12711_s23 + $0x70] sm:$0xff] %v9325_v34  ;;  %v9345_v39 = vadd.f32 %v9342_v55, %v9163_v14  ;;  %v6622_v8 = vpop.f32.mrb[95].mxu0  ;;  %v9492_v55 = vadd.f32 %v9491_v12, %v12694_v5  ;;  %v9501_v34 = vld [vmem:[#allocation2 + $0x189] sm:$0xff] }
 0x5df   : > { %6774 = vst [vmem:[#allocation2 + $0xa9] sm:$0xff] %v9335_v24  ;;  %6838 = vst [vmem:[%s12711_s23 + $0x60] sm:$0xff] %v9335_v24  ;;  %v9355_v42 = vadd.f32 %v9352_v29, %v6622_v8  ;;  %v9511_v29 = vld [vmem:[#allocation2 + $0x171] sm:$0xff]  ;;  %v9502_v24 = vadd.f32 %v9501_v34, %v12706_v45 }
 0x5e0   : > { %6777 = vst [vmem:[#allocation2 + $0xc9] sm:$0xff] %v9345_v39  ;;  %6841 = vst [vmem:[%s12711_s23 + $0x78] sm:$0xff] %v9345_v39  ;;  %v9512_v8 = vadd.f32 %v9511_v29, %v12697_v44 }
 0x5e1   : > { %6775 = vst [vmem:[#allocation2 + $0xb1] sm:$0xff] %v9355_v42  ;;  %6839 = vst [vmem:[%s12711_s23 + $0x68] sm:$0xff] %v9355_v42 }
 0x5e3   : > { %v9166_v22 = vpop.f32.mrb[96].mxu0 }
 0x5e4   : > { %v9365_v54 = vadd.f32 %v9362_v52, %v9166_v22  ;;  %v6635_v17 = vpop.f32.mrb[97].mxu0 }
 0x5e5   : > { %v9375_v40 = vadd.f32 %v9372_v16, %v6635_v17  ;;  %v9167_v35 = vpop.f32.mrb[98].mxu0 }
 0x5e6   : > { %6780 = vst [vmem:[#allocation2 + $0xf1] sm:$0xff] %v9365_v54  ;;  %6844 = vst [vmem:[%s12711_s23 + $0x90] sm:$0xff] %v9365_v54  ;;  %v9385_v31 = vadd.f32 %v9382_v37, %v9167_v35  ;;  %v6638_v61 = vpop.f32.mrb[99].mxu0 }
 0x5e7   : > { %6778 = vst [vmem:[#allocation2 + $0xd9] sm:$0xff] %v9375_v40  ;;  %6842 = vst [vmem:[%s12711_s23 + $0x80] sm:$0xff] %v9375_v40  ;;  %v9395_v26 = vadd.f32 %v9392_v3, %v6638_v61 }
 0x5e8   : > { %6781 = vst [vmem:[#allocation2 + $0xf9] sm:$0xff] %v9385_v31  ;;  %6845 = vst [vmem:[%s12711_s23 + $0x98] sm:$0xff] %v9385_v31 }
 0x5e9   : > { %6779 = vst [vmem:[#allocation2 + $0xe1] sm:$0xff] %v9395_v26  ;;  %6843 = vst [vmem:[%s12711_s23 + $0x88] sm:$0xff] %v9395_v26 }
 0x5eb   : > { %v9170_v53 = vpop.f32.mrb[100].mxu0 }
 0x5ec   : > { %v9405_v25 = vadd.f32 %v9402_v20, %v9170_v53  ;;  %v6651_v59 = vpop.f32.mrb[101].mxu0 }
 0x5ed   : > { %v9415_v36 = vadd.f32 %v9412_v58, %v6651_v59  ;;  %v9171_v21 = vpop.f32.mrb[102].mxu0 }
 0x5ee   : > { %6784 = vst [vmem:[#allocation2 + $0x121] sm:$0xff] %v9405_v25  ;;  %6848 = vst [vmem:[%s12711_s23 + $0xb0] sm:$0xff] %v9405_v25  ;;  %v9425_v18 = vadd.f32 %v9422_v49, %v9171_v21  ;;  %v6654_v62 = vpop.f32.mrb[103].mxu0 }
 0x5ef   : > { %6782 = vst [vmem:[#allocation2 + $0x109] sm:$0xff] %v9415_v36  ;;  %6846 = vst [vmem:[%s12711_s23 + $0xa0] sm:$0xff] %v9415_v36  ;;  %v9435_v63 = vadd.f32 %v9432_v32, %v6654_v62 }
 0x5f0   : > { %6785 = vst [vmem:[#allocation2 + $0x129] sm:$0xff] %v9425_v18  ;;  %6849 = vst [vmem:[%s12711_s23 + $0xb8] sm:$0xff] %v9425_v18 }
 0x5f1   : > { %6783 = vst [vmem:[#allocation2 + $0x111] sm:$0xff] %v9435_v63  ;;  %6847 = vst [vmem:[%s12711_s23 + $0xa8] sm:$0xff] %v9435_v63 }
 0x5f3   : > { %v9174_v6 = vpop.f32.mrb[104].mxu0 }
 0x5f4   : > { %v9445_v30 = vadd.f32 %v9442_v38, %v9174_v6  ;;  %v6667_v0 = vpop.f32.mrb[105].mxu0 }
 0x5f5   : > { %v9455_v1 = vadd.f32 %v9452_v51, %v6667_v0  ;;  %v9175_v33 = vpop.f32.mrb[106].mxu0 }
 0x5f6   : > { %6788 = vst [vmem:[#allocation2 + $0x151] sm:$0xff] %v9445_v30  ;;  %6852 = vst [vmem:[%s12711_s23 + $0xd0] sm:$0xff] %v9445_v30  ;;  %v9465_v28 = vadd.f32 %v9462_v56, %v9175_v33  ;;  %v6670_v57 = vpop.f32.mrb[107].mxu0 }
 0x5f7   : > { %6786 = vst [vmem:[#allocation2 + $0x139] sm:$0xff] %v9455_v1  ;;  %6850 = vst [vmem:[%s12711_s23 + $0xc0] sm:$0xff] %v9455_v1  ;;  %v9475_v41 = vadd.f32 %v9472_v2, %v6670_v57 }
 0x5f8   : > { %6789 = vst [vmem:[#allocation2 + $0x159] sm:$0xff] %v9465_v28  ;;  %6853 = vst [vmem:[%s12711_s23 + $0xd8] sm:$0xff] %v9465_v28 }
 0x5f9   : > { %6787 = vst [vmem:[#allocation2 + $0x141] sm:$0xff] %v9475_v41  ;;  %6851 = vst [vmem:[%s12711_s23 + $0xc8] sm:$0xff] %v9475_v41 }
 0x5fb   : > { %v9178_v48 = vpop.f32.mrb[108].mxu0 }
 0x5fc   : > { %v9485_v14 = vadd.f32 %v9482_v47, %v9178_v48  ;;  %v6683_v39 = vpop.f32.mrb[109].mxu0 }
 0x5fd   : > { %v9495_v42 = vadd.f32 %v9492_v55, %v6683_v39  ;;  %v9179_v23 = vpop.f32.mrb[110].mxu0 }
 0x5fe   : > { %6792 = vst [vmem:[#allocation2 + $0x181] sm:$0xff] %v9485_v14  ;;  %6856 = vst [vmem:[%s12711_s23 + $0xf0] sm:$0xff] %v9485_v14  ;;  %v9505_v5 = vadd.f32 %v9502_v24, %v9179_v23  ;;  %v6686_v11 = vpop.f32.mrb[111].mxu0 }
 0x5ff   : > { %6790 = vst [vmem:[#allocation2 + $0x169] sm:$0xff] %v9495_v42  ;;  %6854 = vst [vmem:[%s12711_s23 + $0xe0] sm:$0xff] %v9495_v42  ;;  %v9515_v44 = vadd.f32 %v9512_v8, %v6686_v11 }
 0x600   : > { %6793 = vst [vmem:[#allocation2 + $0x189] sm:$0xff] %v9505_v5  ;;  %6857 = vst [vmem:[%s12711_s23 + $0xf8] sm:$0xff] %v9505_v5 }
 0x601   : > { %6791 = vst [vmem:[#allocation2 + $0x171] sm:$0xff] %v9515_v44  ;;  %6855 = vst [vmem:[%s12711_s23 + $0xe8] sm:$0xff] %v9515_v44 }
 0x602   : > { %9981 = shalt.err (!%p9978_p6)
}
 0x603   : > { %s9982_s10 = scalar_lea.hbm %s12775_s29, 4096  ;;  %s9986_s12 = scalar_lea.hbm %s12828_s4, 8192 }
 0x604   : > { %p9983_p12 = scmp.ne.s32.totalorder %s12775_s29, %s9982_s10  ;;  %p9987_p11 = scmp.lt.u32.totalorder %s12775_s29, %s12828_s4 }
 0x605   : > { %p9988_p7 = scmp.lt.u32.totalorder %s9986_s12, %s9982_s10  ;;  %p9990_p8 = scmp.lt.u32.totalorder %s9982_s10, %s12775_s29 }
 0x606   : > { %p9984_p13 = pnand %p9983_p12, %p13028_p4 }
 0x607   : > { %p9989_p3 = por %p9988_p7, %p9987_p11 }
 0x608   : > { %p9985_p1 = pneg %p9984_p13 }
 0x609   : > { %p9991_p5 = por %p9990_p8, %p9989_p3 }
 0x60b   : > { %p9992_p10 = pnand %p9991_p5, %p9985_p1 }
 0x60d   : > { %9995 = shalt.err (!%p9992_p10)
}
 0x60e   : > { %s10052_s14 = smov 128   ;;  %s10053_s23 = smov 8  }
 0x60f   : > { %9590 = dma.vmem_to_hbm [thread:$0]  (%p13028_p4), %s12777_s25, 4096, %s12775_s29, %s6859_s7, %s10052_s14, %s10052_s14, %s10053_s23  }
 0x610 PF: > { %s6887_s9 = sand.u32 1, %s10026_s15   ;;  %p13029_p2 = scmp.ne.s32.totalorder %s12917_s28, 0 }
 0x611   : > { %p13030_p0 = scmp.ge.s32.totalorder %s10038_s18, 2  ;;  %s6888_s19 = scalar_lea.sflag [#allocation5], %s6887_s9 }
 0x613   : > { %p9604_p9 = pnand %p13030_p0, %p13029_p2 }
 0x615   : > { %10021 = dma.done.wait (!%p9604_p9), %s6888_s19, 4096  }
 0x616   : > { %10023 = vsyncadd (!%p9604_p9), %s6888_s19, 4294963200  ;;  %p18_p6 = scmp.ge.s32.totalorder %s10104_s21, 4   ;;  %s13031_s15 = smov %s10030_s16 }
 0x617   : > { %s13032_s16 = smov %s10034_s17  ;;  %s13033_s17 = smov %s10116_s24 }
 0x618   : > { %s13034_s18 = smov %s10104_s21  ;;  %20 = sbr.rel (!%p18_p6) target bundleno = 8 (0x8), region = 92 }
 0x61f   :  { %6893 = vsyncpa [#allocation4], 1 }
 0x620   :  { %6895 = vsyncpa [#allocation4 + $0x1], 1 }
 0x621   :  { %6896 = vsyncpa [#allocation7], 1 }
 0x622   :  { %6897 = vsyncpa [#allocation5], 1 }
 0x623   :  { %6899 = vsyncpa [#allocation5 + $0x1], 1 }

</bundles_post_ra>
